<compile_context>
chip_gen: v6e
topology: v6e:2x2x1
jax: 0.10.0
libtpu: 0.0.40
codegen_flags: <defaults>
</compile_context>

<pallas_src>
import functools

import jax
import jax.numpy as jnp
from jax.experimental import pallas as pl
from jax.experimental.pallas import tpu as pltpu

LANE = 128                                    # all channel dims padded to this
_DIMSEM3 = ("parallel", "parallel", "arbitrary")


def _round_up(x, m):
    return (x + m - 1) // m * m


# ----------------------------------------------------------------------------
# Pallas kernels
# ----------------------------------------------------------------------------

def _gemm_kernel(x_ref, w_ref, b_ref, o_ref, acc_ref, *, relu):
    """out = maybe_relu(x @ w + bias); accumulation over grid axis 2 (K)."""
    @pl.when(pl.program_id(2) == 0)
    def _init():
        acc_ref[...] = jnp.zeros_like(acc_ref)

    acc_ref[...] += jnp.dot(x_ref[...], w_ref[...],
                            preferred_element_type=jnp.float32)

    @pl.when(pl.program_id(2) == pl.num_programs(2) - 1)
    def _finalize():
        out = acc_ref[...] + b_ref[...]
        if relu:
            out = jnp.maximum(out, 0.0)
        o_ref[...] = out.astype(o_ref.dtype)


def _gemm_res_kernel(x_ref, w_ref, b_ref, r_ref, o_ref, acc_ref, *, relu):
    """out = maybe_relu(x @ w + bias + residual); residual fused in epilogue."""
    @pl.when(pl.program_id(2) == 0)
    def _init():
        acc_ref[...] = jnp.zeros_like(acc_ref)

    acc_ref[...] += jnp.dot(x_ref[...], w_ref[...],
                            preferred_element_type=jnp.float32)

    @pl.when(pl.program_id(2) == pl.num_programs(2) - 1)
    def _finalize():
        out = acc_ref[...] + b_ref[...] + r_ref[...].astype(jnp.float32)
        if relu:
            out = jnp.maximum(out, 0.0)
        o_ref[...] = out.astype(o_ref.dtype)


def _conv3x3_kernel(x_ref, w_ref, b_ref, o_ref, acc_ref, *, n_rows, wp, relu):
    """3x3 / stride-1 / pad-1 conv as 9 shifted-window matmuls (no HBM im2col).

    x_ref : (Lp, tk)  bf16  spatially padded image, flattened row-major.
    w_ref : (9, tk, tn) bf16 per-tap (dy, dx) weights, BN scale folded in.
    o_ref : (n_rows, tn)    outputs on the padded grid (wrapper keeps the
                            valid columns x < W of each row).
    """
    @pl.when(pl.program_id(2) == 0)
    def _init():
        acc_ref[...] = jnp.zeros_like(acc_ref)

    for dy in range(3):
        for dx in range(3):
            off = dy * wp + dx                       # static tap offset
            tap = x_ref[off:off + n_rows, :]         # shifted window (VMEM)
            acc_ref[...] += jnp.dot(tap, w_ref[dy * 3 + dx],
                                    preferred_element_type=jnp.float32)

    @pl.when(pl.program_id(2) == pl.num_programs(2) - 1)
    def _finalize():
        out = acc_ref[...] + b_ref[...]
        if relu:
            out = jnp.maximum(out, 0.0)
        o_ref[...] = out.astype(o_ref.dtype)


def _gap_kernel(x_ref, o_ref):
    """Global average pool over the spatial axis: (B, HW, tc) -> (B, tc)."""
    o_ref[...] = jnp.mean(x_ref[...].astype(jnp.float32),
                          axis=1).astype(o_ref.dtype)


# ----------------------------------------------------------------------------
# Pallas call wrappers
# ----------------------------------------------------------------------------

def fused_gemm(x, w, bias, residual=None, relu=True, out_dtype=jnp.bfloat16):
    """maybe_relu(x @ w + bias [+ residual]) with a tiled (M, N, K) grid.

    x: (M, K) bf16; w: (K, N) bf16 (BN scale pre-folded); bias: (1, N) f32;
    residual: (M, N).  K and N must be multiples of 128 (lane-dense tiles).
    """
    M, K = x.shape
    K2, N = w.shape
    assert K == K2 and K % LANE == 0 and N % LANE == 0

    tm = min(256, _round_up(M, 16))
    mp = _round_up(M, tm)
    tn = 256 if N % 256 == 0 else LANE
    tk = 256 if K % 256 == 0 else LANE

    x = x.astype(jnp.bfloat16)
    if mp != M:
        x = jnp.pad(x, ((0, mp - M), (0, 0)))

    x_spec = pl.BlockSpec((tm, tk), lambda i, j, k: (i, k))
    w_spec = pl.BlockSpec((tk, tn), lambda i, j, k: (k, j))
    b_spec = pl.BlockSpec((1, tn), lambda i, j, k: (0, j))
    o_spec = pl.BlockSpec((tm, tn), lambda i, j, k: (i, j))

    if residual is None:
        kern = functools.partial(_gemm_kernel, relu=relu)
        in_specs = [x_spec, w_spec, b_spec]
        args = (x, w, bias)
        aliases = {}
    else:
        residual = residual.astype(out_dtype)
        if mp != M:
            residual = jnp.pad(residual, ((0, mp - M), (0, 0)))
        kern = functools.partial(_gemm_res_kernel, relu=relu)
        in_specs = [x_spec, w_spec, b_spec,
                    pl.BlockSpec((tm, tn), lambda i, j, k: (i, j))]
        args = (x, w, bias, residual)
        aliases = {3: 0}        # reuse the residual buffer for the output

    out = pl.pallas_call(
        kern,
        out_shape=jax.ShapeDtypeStruct((mp, N), out_dtype),
        grid_spec=pltpu.PrefetchScalarGridSpec(
            num_scalar_prefetch=0,
            grid=(mp // tm, N // tn, K // tk),
            in_specs=in_specs,
            out_specs=o_spec,
            scratch_shapes=[pltpu.VMEM((tm, tn), jnp.float32)],
        ),
        compiler_params=pltpu.CompilerParams(dimension_semantics=_DIMSEM3),
        input_output_aliases=aliases,
    )(*args)
    return out[:M] if mp != M else out


def conv3x3_bn(x4, w9, bias, relu=True):
    """3x3 conv (stride 1, pad 1) + folded BN (+ReLU) as one fused pallas_call.

    x4: (B, H, W, K) bf16 channel-padded; w9: (9, K, N) bf16; bias: (1, N) f32.
    Grouped convs are handled by block-diagonal w9 (built at prep time).
    """
    B, H, W, K = x4.shape
    N = w9.shape[-1]
    hp, wp = H + 2, W + 2
    n_rows = H * wp                       # outputs computed on the padded grid

    # Spatial zero-pad once (~1.3x, not 9x im2col), flatten; +2 tail rows keep
    # the last tap windows in-bounds (they only feed discarded positions).
    xp = jnp.pad(x4, ((0, 0), (1, 1), (1, 1), (0, 0)))
    xpf = jnp.pad(xp.reshape(B, hp * wp, K), ((0, 0), (0, 2), (0, 0)))
    lp = hp * wp + 2

    tn = 256 if N % 256 == 0 else LANE
    tk = 256 if K % 256 == 0 else LANE
    # TODO(synk): for large images, additionally tile the row (M) axis with a
    # halo instead of holding one full image per grid step.
    out = pl.pallas_call(
        functools.partial(_conv3x3_kernel, n_rows=n_rows, wp=wp, relu=relu),
        out_shape=jax.ShapeDtypeStruct((B, n_rows, N), jnp.bfloat16),
        grid_spec=pltpu.PrefetchScalarGridSpec(
            num_scalar_prefetch=0,
            grid=(B, N // tn, K // tk),
            in_specs=[
                pl.BlockSpec((None, lp, tk), lambda b, j, k: (b, 0, k)),
                pl.BlockSpec((9, tk, tn), lambda b, j, k: (0, k, j)),
                pl.BlockSpec((1, tn), lambda b, j, k: (0, j)),
            ],
            out_specs=pl.BlockSpec((None, n_rows, tn), lambda b, j, k: (b, 0, j)),
            scratch_shapes=[pltpu.VMEM((n_rows, tn), jnp.float32)],
        ),
        compiler_params=pltpu.CompilerParams(dimension_semantics=_DIMSEM3),
    )(xpf, w9, bias)
    # Valid outputs live at flattened position y*wp + x with x < W.
    return out.reshape(B, H, wp, N)[:, :, :W, :]


def conv1x1_bn(x4, w, bias, relu=True, residual=None):
    """1x1 conv + folded BN (+residual) (+ReLU) as a fused GEMM."""
    B, H, W, K = x4.shape
    N = w.shape[1]
    x2 = x4.reshape(B * H * W, K)
    r2 = None if residual is None else residual.reshape(B * H * W, N)
    y = fused_gemm(x2, w, bias, residual=r2, relu=relu)
    return y.reshape(B, H, W, N)


def global_avg_pool(x4):
    """AdaptiveAvgPool2d(1): (B, H, W, C) -> (B, C), gridded over channel tiles."""
    B, H, W, C = x4.shape
    xf = x4.reshape(B, H * W, C)
    tc = LANE
    return pl.pallas_call(
        _gap_kernel,
        out_shape=jax.ShapeDtypeStruct((B, C), jnp.bfloat16),
        grid=(C // tc,),
        in_specs=[pl.BlockSpec((B, H * W, tc), lambda j: (0, 0, j))],
        out_specs=pl.BlockSpec((B, tc), lambda j: (0, j)),
        compiler_params=pltpu.CompilerParams(dimension_semantics=("parallel",)),
    )(xf)


# ----------------------------------------------------------------------------
# Parameter initialisation (matches the PyTorch module's init) and prep
# ----------------------------------------------------------------------------

def _kaiming_conv(key, cout, cin, kh, kw):
    # kaiming_normal_, mode='fan_out', nonlinearity='relu'
    fan_out = cout * kh * kw
    std = (2.0 / fan_out) ** 0.5
    return std * jax.random.normal(key, (cout, cin, kh, kw), jnp.float32)


def _bn_params(c):
    # gamma=1, beta=0 (weights_init); running_mean=0, running_var=1; eps=1e-5.
    # NOTE: BatchNorm evaluated in inference mode (folded running statistics).
    return (jnp.ones((c,), jnp.float32), jnp.zeros((c,), jnp.float32),
            jnp.zeros((c,), jnp.float32), jnp.ones((c,), jnp.float32), 1e-5)


def init_resnext(key, n_blocks, cfg, n_classes, stem_in=3):
    card, width = cfg
    keys = iter(jax.random.split(key, 256))
    params = {}

    # first_block is a constructor argument of the PyTorch ResNeXt; a standard
    # CIFAR-style stem is used here: conv3x3(stem_in -> 64, stride 1)+BN+ReLU.
    # TODO(synk): first_block is externally supplied in the PyTorch module.
    params['stem_w'] = _kaiming_conv(next(keys), 64, stem_in, 3, 3)
    params['stem_bn'] = _bn_params(64)

    in_ch = 64
    layers = []
    for li, nb in enumerate(n_blocks):
        reduce = (li != 0)
        layer = []
        for _ in range(nb):
            mid = card * width
            out_ch = mid * 2
            blk = {
                'reduce': reduce,
                'groups': card,
                'w1': _kaiming_conv(next(keys), mid, in_ch, 1, 1),
                'bn1': _bn_params(mid),
                'w2': _kaiming_conv(next(keys), mid, mid // card, 3, 3),
                'bn2': _bn_params(mid),
                'w3': _kaiming_conv(next(keys), out_ch, mid, 1, 1),
                'bn3': _bn_params(out_ch),
            }
            if reduce or in_ch != out_ch:
                blk['shortcut'] = {
                    'w': _kaiming_conv(next(keys), out_ch, in_ch, 1, 1),
                    'bn': _bn_params(out_ch),
                }
            else:
                blk['shortcut'] = None
            in_ch = out_ch
            reduce = False
            layer.append(blk)
        layers.append(layer)
        width *= 2
    params['layers'] = layers

    # fc = nn.Linear(cardinality * width, n_classes) (== final channel count)
    fc_in = in_ch
    k = 1.0 / (fc_in ** 0.5)
    params['fc_w'] = jax.random.uniform(next(keys), (n_classes, fc_in),
                                        jnp.float32, -k, k)
    params['fc_b'] = jax.random.uniform(next(keys), (n_classes,),
                                        jnp.float32, -k, k)
    return params


def _bn_fold(bn):
    gamma, beta, mean, var, eps = bn
    scale = gamma / jnp.sqrt(var + eps)
    bias = beta - mean * scale
    return scale, bias


def _pad2(a, rows, cols):
    r, c = a.shape
    return jnp.pad(a, ((0, rows - r), (0, cols - c)))


def _prep_conv1x1(w, bn):
    """(Cout, Cin, 1, 1) conv + BN -> (K_pad, N_pad) bf16 weight, (1, N_pad) f32 bias."""
    cout, cin = w.shape[:2]
    scale, bias = _bn_fold(bn)
    wm = w.reshape(cout, cin).T * scale[None, :]          # BN scale folded in
    kp, np_ = _round_up(cin, LANE), _round_up(cout, LANE)
    wm = _pad2(wm, kp, np_).astype(jnp.bfloat16)
    b = jnp.pad(bias, (0, np_ - cout)).reshape(1, np_).astype(jnp.float32)
    return wm, b


def _prep_conv3x3(w, bn, groups):
    """(Cout, Cin/g, 3, 3) grouped conv + BN -> block-diagonal dense per-tap
    weight (9, K_pad, N_pad) bf16 and (1, N_pad) f32 bias."""
    cout, cin_g = w.shape[:2]
    cin = cin_g * groups
    cout_g = cout // groups
    scale, bias = _bn_fold(bn)
    wt = jnp.transpose(w, (2, 3, 1, 0)).reshape(9, cin_g, cout)  # tap-major (dy, dx)
    dense = jnp.zeros((9, cin, cout), jnp.float32)
    for g in range(groups):
        dense = dense.at[:, g * cin_g:(g + 1) * cin_g,
                         g * cout_g:(g + 1) * cout_g].set(
            wt[:, :, g * cout_g:(g + 1) * cout_g])
    dense = dense * scale[None, None, :]                  # BN scale folded in
    kp, np_ = _round_up(cin, LANE), _round_up(cout, LANE)
    dense = jnp.pad(dense, ((0, 0), (0, kp - cin),
                            (0, np_ - cout))).astype(jnp.bfloat16)
    b = jnp.pad(bias, (0, np_ - cout)).reshape(1, np_).astype(jnp.float32)
    return dense, b


def prepare_params(params, n_classes):
    """Fold BN, build block-diagonal grouped weights, pad to lane-dense shapes."""
    prep = {'n_classes': n_classes}
    prep['stem_w'], prep['stem_b'] = _prep_conv3x3(
        params['stem_w'], params['stem_bn'], groups=1)
    layers = []
    for layer in params['layers']:
        blks = []
        for blk in layer:
            b = {'reduce': blk['reduce']}
            b['w1'], b['b1'] = _prep_conv1x1(blk['w1'], blk['bn1'])
            b['w2'], b['b2'] = _prep_conv3x3(blk['w2'], blk['bn2'], blk['groups'])
            b['w3'], b['b3'] = _prep_conv1x1(blk['w3'], blk['bn3'])
            if blk['shortcut'] is not None:
                b['sc_w'], b['sc_b'] = _prep_conv1x1(blk['shortcut']['w'],
                                                     blk['shortcut']['bn'])
            else:
                b['sc_w'], b['sc_b'] = None, None
            blks.append(b)
        layers.append(blks)
    prep['layers'] = layers

    fc_w, fc_b = params['fc_w'], params['fc_b']          # (n_cls, fc_in), (n_cls,)
    n_cls, fc_in = fc_w.shape
    kp, np_ = _round_up(fc_in, LANE), _round_up(n_cls, LANE)
    prep['fc_w'] = _pad2(fc_w.T, kp, np_).astype(jnp.bfloat16)
    prep['fc_b'] = jnp.pad(fc_b, (0, np_ - n_cls)).reshape(1, np_).astype(jnp.float32)
    return prep


# ----------------------------------------------------------------------------
# Forward pass
# ----------------------------------------------------------------------------

def bottleneck_forward(x, p):
    # TODO(synk): stride-2 sampling is a wrapper slice (done once, reused by
    # conv1 and the shortcut); it could be folded into the GEMM index_map.
    xs = x[:, ::2, ::2, :] if p['reduce'] else x
    out = conv1x1_bn(xs, p['w1'], p['b1'], relu=True)
    out = conv3x3_bn(out, p['w2'], p['b2'], relu=True)
    if p['sc_w'] is not None:
        sc = conv1x1_bn(xs, p['sc_w'], p['sc_b'], relu=False)
    else:
        sc = xs
    # relu(bn3(conv3(out)) + shortcut(x)): residual + relu fused in the epilogue.
    return conv1x1_bn(out, p['w3'], p['b3'], relu=True, residual=sc)


def resnext_forward(x_nchw, prep):
    x = jnp.transpose(x_nchw, (0, 2, 3, 1)).astype(jnp.bfloat16)   # NCHW -> NHWC
    cin = x.shape[-1]
    x = jnp.pad(x, ((0, 0), (0, 0), (0, 0), (0, _round_up(cin, LANE) - cin)))
    # first_block: conv3x3 + BN + ReLU
    x = conv3x3_bn(x, prep['stem_w'], prep['stem_b'], relu=True)
    for layer in prep['layers']:
        for blk in layer:
            x = bottleneck_forward(x, blk)
    pooled = global_avg_pool(x)                                    # (B, C_pad)
    logits = fused_gemm(pooled, prep['fc_w'], prep['fc_b'],
                        relu=False, out_dtype=jnp.float32)
    return logits[:, :prep['n_classes']]


if __name__ == "__main__":
    key = jax.random.PRNGKey(0)
    kp, kx = jax.random.split(key)

    # Small ResNeXt: n_blocks=[1,1,1], cfg=(cardinality=2, width=4), 10 classes.
    params = init_resnext(kp, n_blocks=[1, 1, 1], cfg=(2, 4), n_classes=10)
    prep = prepare_params(params, n_classes=10)

    x = jax.random.normal(kx, (2, 3, 16, 16), jnp.float32)   # NCHW like PyTorch
    fwd = jax.jit(lambda xx: resnext_forward(xx, prep))
    y = fwd(x)
    jax.block_until_ready(y)

    assert y.shape == (2, 10), y.shape
    assert bool(jnp.all(jnp.isfinite(y)))
    print("KERNEL_OK")
</pallas_src>

<mosaic_0001>
module attributes {stable_mosaic.version = 11 : i64} {
  func.func @_conv3x3_kernel(%arg0: i32, %arg1: i32, %arg2: i32, %arg3: memref<1x326x128xbf16, #tpu.memory_space<vmem>>, %arg4: memref<9x128x128xbf16, #tpu.memory_space<vmem>>, %arg5: memref<1x128xf32, #tpu.memory_space<vmem>>, %arg6: memref<1x288x128xbf16, #tpu.memory_space<vmem>>, %arg7: memref<288x128xf32, #tpu.memory_space<vmem>>) attributes {dimension_semantics = [#tpu.dimension_semantics<parallel>, #tpu.dimension_semantics<parallel>, #tpu.dimension_semantics<arbitrary>], iteration_bounds = array<i64: 2, 1, 1>, scalar_prefetch = 0 : i64, scratch_operands = 1 : i64, tpu.core_type = #tpu.core_type<tc>, window_params = [{transform_indices = @transform_0, window_bounds = array<i64: 1, 326, 128>}, {transform_indices = @transform_1, window_bounds = array<i64: 9, 128, 128>}, {transform_indices = @transform_2, window_bounds = array<i64: 1, 128>}, {transform_indices = @transform_3, window_bounds = array<i64: 1, 288, 128>}]} {
    %c0_i32 = arith.constant 0 : i32
    %0 = arith.cmpi eq, %arg2, %c0_i32 : i32
    %1 = arith.extui %0 : i1 to i32
    %c0_i32_0 = arith.constant 0 : i32
    %2 = arith.cmpi ne, %1, %c0_i32_0 : i32
    scf.if %2 {
      %cst_86 = arith.constant 0.000000e+00 : f32
      %78 = vector.broadcast %cst_86 : f32 to vector<288x128xf32>
      %c0_87 = arith.constant 0 : index
      %c0_88 = arith.constant 0 : index
      %79 = vector.load %arg7[%c0_87, %c0_88] : memref<288x128xf32, #tpu.memory_space<vmem>>, vector<288x128xf32>
      tpu.vector_store %arg7[%c0_87, %c0_88], %78 {strides = array<i32>} : memref<288x128xf32, #tpu.memory_space<vmem>>, vector<288x128xf32>,
    } else {
    }
    %c0 = arith.constant 0 : index
    %c0_1 = arith.constant 0 : index
    %c0_2 = arith.constant 0 : index
    %3 = vector.load %arg3[%c0, %c0_1, %c0_2] : memref<1x326x128xbf16, #tpu.memory_space<vmem>>, vector<1x288x128xbf16>
    %4 = vector.shape_cast %3 : vector<1x288x128xbf16> to vector<288x128xbf16>
    %c0_3 = arith.constant 0 : index
    %c0_4 = arith.constant 0 : index
    %5 = vector.load %arg7[%c0_3, %c0_4] : memref<288x128xf32, #tpu.memory_space<vmem>>, vector<288x128xf32>
    %c0_5 = arith.constant 0 : index
    %c0_6 = arith.constant 0 : index
    %c0_7 = arith.constant 0 : index
    %6 = vector.load %arg4[%c0_5, %c0_6, %c0_7] : memref<9x128x128xbf16, #tpu.memory_space<vmem>>, vector<1x128x128xbf16>
    %7 = vector.shape_cast %6 : vector<1x128x128xbf16> to vector<128x128xbf16>
    %cst = arith.constant dense<0.000000e+00> : vector<288x128xf32>
    %8 = tpu.matmul %4, %7, %cst {dimension_numbers = #tpu.dot_dimension_numbers<[1], [0], [0], [1], [0, 0, 1, 1], [], []>} : vector<288x128xbf16>, vector<128x128xbf16>, vector<288x128xf32> -> vector<288x128xf32>
    %9 = arith.addf %5, %8 : vector<288x128xf32>
    %c0_8 = arith.constant 0 : index
    %c0_9 = arith.constant 0 : index
    %10 = vector.load %arg7[%c0_8, %c0_9] : memref<288x128xf32, #tpu.memory_space<vmem>>, vector<288x128xf32>
    tpu.vector_store %arg7[%c0_8, %c0_9], %9 {strides = array<i32>} : memref<288x128xf32, #tpu.memory_space<vmem>>, vector<288x128xf32>,
    %c0_10 = arith.constant 0 : index
    %c1 = arith.constant 1 : index
    %c0_11 = arith.constant 0 : index
    %11 = vector.load %arg3[%c0_10, %c1, %c0_11] : memref<1x326x128xbf16, #tpu.memory_space<vmem>>, vector<1x288x128xbf16>
    %12 = vector.shape_cast %11 : vector<1x288x128xbf16> to vector<288x128xbf16>
    %c0_12 = arith.constant 0 : index
    %c0_13 = arith.constant 0 : index
    %13 = vector.load %arg7[%c0_12, %c0_13] : memref<288x128xf32, #tpu.memory_space<vmem>>, vector<288x128xf32>
    %c1_14 = arith.constant 1 : index
    %c0_15 = arith.constant 0 : index
    %c0_16 = arith.constant 0 : index
    %14 = vector.load %arg4[%c1_14, %c0_15, %c0_16] : memref<9x128x128xbf16, #tpu.memory_space<vmem>>, vector<1x128x128xbf16>
    %15 = vector.shape_cast %14 : vector<1x128x128xbf16> to vector<128x128xbf16>
    %cst_17 = arith.constant dense<0.000000e+00> : vector<288x128xf32>
    %16 = tpu.matmul %12, %15, %cst_17 {dimension_numbers = #tpu.dot_dimension_numbers<[1], [0], [0], [1], [0, 0, 1, 1], [], []>} : vector<288x128xbf16>, vector<128x128xbf16>, vector<288x128xf32> -> vector<288x128xf32>
    %17 = arith.addf %13, %16 : vector<288x128xf32>
    %c0_18 = arith.constant 0 : index
    %c0_19 = arith.constant 0 : index
    %18 = vector.load %arg7[%c0_18, %c0_19] : memref<288x128xf32, #tpu.memory_space<vmem>>, vector<288x128xf32>
    tpu.vector_store %arg7[%c0_18, %c0_19], %17 {strides = array<i32>} : memref<288x128xf32, #tpu.memory_space<vmem>>, vector<288x128xf32>,
    %c0_20 = arith.constant 0 : index
    %c2 = arith.constant 2 : index
    %c0_21 = arith.constant 0 : index
    %19 = vector.load %arg3[%c0_20, %c2, %c0_21] : memref<1x326x128xbf16, #tpu.memory_space<vmem>>, vector<1x288x128xbf16>
    %20 = vector.shape_cast %19 : vector<1x288x128xbf16> to vector<288x128xbf16>
    %c0_22 = arith.constant 0 : index
    %c0_23 = arith.constant 0 : index
    %21 = vector.load %arg7[%c0_22, %c0_23] : memref<288x128xf32, #tpu.memory_space<vmem>>, vector<288x128xf32>
    %c2_24 = arith.constant 2 : index
    %c0_25 = arith.constant 0 : index
    %c0_26 = arith.constant 0 : index
    %22 = vector.load %arg4[%c2_24, %c0_25, %c0_26] : memref<9x128x128xbf16, #tpu.memory_space<vmem>>, vector<1x128x128xbf16>
    %23 = vector.shape_cast %22 : vector<1x128x128xbf16> to vector<128x128xbf16>
    %cst_27 = arith.constant dense<0.000000e+00> : vector<288x128xf32>
    %24 = tpu.matmul %20, %23, %cst_27 {dimension_numbers = #tpu.dot_dimension_numbers<[1], [0], [0], [1], [0, 0, 1, 1], [], []>} : vector<288x128xbf16>, vector<128x128xbf16>, vector<288x128xf32> -> vector<288x128xf32>
    %25 = arith.addf %21, %24 : vector<288x128xf32>
    %c0_28 = arith.constant 0 : index
    %c0_29 = arith.constant 0 : index
    %26 = vector.load %arg7[%c0_28, %c0_29] : memref<288x128xf32, #tpu.memory_space<vmem>>, vector<288x128xf32>
    tpu.vector_store %arg7[%c0_28, %c0_29], %25 {strides = array<i32>} : memref<288x128xf32, #tpu.memory_space<vmem>>, vector<288x128xf32>,
    %c0_30 = arith.constant 0 : index
    %c18 = arith.constant 18 : index
    %c0_31 = arith.constant 0 : index
    %27 = vector.load %arg3[%c0_30, %c18, %c0_31] : memref<1x326x128xbf16, #tpu.memory_space<vmem>>, vector<1x288x128xbf16>
    %28 = vector.shape_cast %27 : vector<1x288x128xbf16> to vector<288x128xbf16>
    %c0_32 = arith.constant 0 : index
    %c0_33 = arith.constant 0 : index
    %29 = vector.load %arg7[%c0_32, %c0_33] : memref<288x128xf32, #tpu.memory_space<vmem>>, vector<288x128xf32>
    %c3 = arith.constant 3 : index
    %c0_34 = arith.constant 0 : index
    %c0_35 = arith.constant 0 : index
    %30 = vector.load %arg4[%c3, %c0_34, %c0_35] : memref<9x128x128xbf16, #tpu.memory_space<vmem>>, vector<1x128x128xbf16>
    %31 = vector.shape_cast %30 : vector<1x128x128xbf16> to vector<128x128xbf16>
    %cst_36 = arith.constant dense<0.000000e+00> : vector<288x128xf32>
    %32 = tpu.matmul %28, %31, %cst_36 {dimension_numbers = #tpu.dot_dimension_numbers<[1], [0], [0], [1], [0, 0, 1, 1], [], []>} : vector<288x128xbf16>, vector<128x128xbf16>, vector<288x128xf32> -> vector<288x128xf32>
    %33 = arith.addf %29, %32 : vector<288x128xf32>
    %c0_37 = arith.constant 0 : index
    %c0_38 = arith.constant 0 : index
    %34 = vector.load %arg7[%c0_37, %c0_38] : memref<288x128xf32, #tpu.memory_space<vmem>>, vector<288x128xf32>
    tpu.vector_store %arg7[%c0_37, %c0_38], %33 {strides = array<i32>} : memref<288x128xf32, #tpu.memory_space<vmem>>, vector<288x128xf32>,
    %c0_39 = arith.constant 0 : index
    %c19 = arith.constant 19 : index
    %c0_40 = arith.constant 0 : index
    %35 = vector.load %arg3[%c0_39, %c19, %c0_40] : memref<1x326x128xbf16, #tpu.memory_space<vmem>>, vector<1x288x128xbf16>
    %36 = vector.shape_cast %35 : vector<1x288x128xbf16> to vector<288x128xbf16>
    %c0_41 = arith.constant 0 : index
    %c0_42 = arith.constant 0 : index
    %37 = vector.load %arg7[%c0_41, %c0_42] : memref<288x128xf32, #tpu.memory_space<vmem>>, vector<288x128xf32>
    %c4 = arith.constant 4 : index
    %c0_43 = arith.constant 0 : index
    %c0_44 = arith.constant 0 : index
    %38 = vector.load %arg4[%c4, %c0_43, %c0_44] : memref<9x128x128xbf16, #tpu.memory_space<vmem>>, vector<1x128x128xbf16>
    %39 = vector.shape_cast %38 : vector<1x128x128xbf16> to vector<128x128xbf16>
    %cst_45 = arith.constant dense<0.000000e+00> : vector<288x128xf32>
    %40 = tpu.matmul %36, %39, %cst_45 {dimension_numbers = #tpu.dot_dimension_numbers<[1], [0], [0], [1], [0, 0, 1, 1], [], []>} : vector<288x128xbf16>, vector<128x128xbf16>, vector<288x128xf32> -> vector<288x128xf32>
    %41 = arith.addf %37, %40 : vector<288x128xf32>
    %c0_46 = arith.constant 0 : index
    %c0_47 = arith.constant 0 : index
    %42 = vector.load %arg7[%c0_46, %c0_47] : memref<288x128xf32, #tpu.memory_space<vmem>>, vector<288x128xf32>
    tpu.vector_store %arg7[%c0_46, %c0_47], %41 {strides = array<i32>} : memref<288x128xf32, #tpu.memory_space<vmem>>, vector<288x128xf32>,
    %c0_48 = arith.constant 0 : index
    %c20 = arith.constant 20 : index
    %c0_49 = arith.constant 0 : index
    %43 = vector.load %arg3[%c0_48, %c20, %c0_49] : memref<1x326x128xbf16, #tpu.memory_space<vmem>>, vector<1x288x128xbf16>
    %44 = vector.shape_cast %43 : vector<1x288x128xbf16> to vector<288x128xbf16>
    %c0_50 = arith.constant 0 : index
    %c0_51 = arith.constant 0 : index
    %45 = vector.load %arg7[%c0_50, %c0_51] : memref<288x128xf32, #tpu.memory_space<vmem>>, vector<288x128xf32>
    %c5 = arith.constant 5 : index
    %c0_52 = arith.constant 0 : index
    %c0_53 = arith.constant 0 : index
    %46 = vector.load %arg4[%c5, %c0_52, %c0_53] : memref<9x128x128xbf16, #tpu.memory_space<vmem>>, vector<1x128x128xbf16>
    %47 = vector.shape_cast %46 : vector<1x128x128xbf16> to vector<128x128xbf16>
    %cst_54 = arith.constant dense<0.000000e+00> : vector<288x128xf32>
    %48 = tpu.matmul %44, %47, %cst_54 {dimension_numbers = #tpu.dot_dimension_numbers<[1], [0], [0], [1], [0, 0, 1, 1], [], []>} : vector<288x128xbf16>, vector<128x128xbf16>, vector<288x128xf32> -> vector<288x128xf32>
    %49 = arith.addf %45, %48 : vector<288x128xf32>
    %c0_55 = arith.constant 0 : index
    %c0_56 = arith.constant 0 : index
    %50 = vector.load %arg7[%c0_55, %c0_56] : memref<288x128xf32, #tpu.memory_space<vmem>>, vector<288x128xf32>
    tpu.vector_store %arg7[%c0_55, %c0_56], %49 {strides = array<i32>} : memref<288x128xf32, #tpu.memory_space<vmem>>, vector<288x128xf32>,
    %c0_57 = arith.constant 0 : index
    %c36 = arith.constant 36 : index
    %c0_58 = arith.constant 0 : index
    %51 = vector.load %arg3[%c0_57, %c36, %c0_58] : memref<1x326x128xbf16, #tpu.memory_space<vmem>>, vector<1x288x128xbf16>
    %52 = vector.shape_cast %51 : vector<1x288x128xbf16> to vector<288x128xbf16>
    %c0_59 = arith.constant 0 : index
    %c0_60 = arith.constant 0 : index
    %53 = vector.load %arg7[%c0_59, %c0_60] : memref<288x128xf32, #tpu.memory_space<vmem>>, vector<288x128xf32>
    %c6 = arith.constant 6 : index
    %c0_61 = arith.constant 0 : index
    %c0_62 = arith.constant 0 : index
    %54 = vector.load %arg4[%c6, %c0_61, %c0_62] : memref<9x128x128xbf16, #tpu.memory_space<vmem>>, vector<1x128x128xbf16>
    %55 = vector.shape_cast %54 : vector<1x128x128xbf16> to vector<128x128xbf16>
    %cst_63 = arith.constant dense<0.000000e+00> : vector<288x128xf32>
    %56 = tpu.matmul %52, %55, %cst_63 {dimension_numbers = #tpu.dot_dimension_numbers<[1], [0], [0], [1], [0, 0, 1, 1], [], []>} : vector<288x128xbf16>, vector<128x128xbf16>, vector<288x128xf32> -> vector<288x128xf32>
    %57 = arith.addf %53, %56 : vector<288x128xf32>
    %c0_64 = arith.constant 0 : index
    %c0_65 = arith.constant 0 : index
    %58 = vector.load %arg7[%c0_64, %c0_65] : memref<288x128xf32, #tpu.memory_space<vmem>>, vector<288x128xf32>
    tpu.vector_store %arg7[%c0_64, %c0_65], %57 {strides = array<i32>} : memref<288x128xf32, #tpu.memory_space<vmem>>, vector<288x128xf32>,
    %c0_66 = arith.constant 0 : index
    %c37 = arith.constant 37 : index
    %c0_67 = arith.constant 0 : index
    %59 = vector.load %arg3[%c0_66, %c37, %c0_67] : memref<1x326x128xbf16, #tpu.memory_space<vmem>>, vector<1x288x128xbf16>
    %60 = vector.shape_cast %59 : vector<1x288x128xbf16> to vector<288x128xbf16>
    %c0_68 = arith.constant 0 : index
    %c0_69 = arith.constant 0 : index
    %61 = vector.load %arg7[%c0_68, %c0_69] : memref<288x128xf32, #tpu.memory_space<vmem>>, vector<288x128xf32>
    %c7 = arith.constant 7 : index
    %c0_70 = arith.constant 0 : index
    %c0_71 = arith.constant 0 : index
    %62 = vector.load %arg4[%c7, %c0_70, %c0_71] : memref<9x128x128xbf16, #tpu.memory_space<vmem>>, vector<1x128x128xbf16>
    %63 = vector.shape_cast %62 : vector<1x128x128xbf16> to vector<128x128xbf16>
    %cst_72 = arith.constant dense<0.000000e+00> : vector<288x128xf32>
    %64 = tpu.matmul %60, %63, %cst_72 {dimension_numbers = #tpu.dot_dimension_numbers<[1], [0], [0], [1], [0, 0, 1, 1], [], []>} : vector<288x128xbf16>, vector<128x128xbf16>, vector<288x128xf32> -> vector<288x128xf32>
    %65 = arith.addf %61, %64 : vector<288x128xf32>
    %c0_73 = arith.constant 0 : index
    %c0_74 = arith.constant 0 : index
    %66 = vector.load %arg7[%c0_73, %c0_74] : memref<288x128xf32, #tpu.memory_space<vmem>>, vector<288x128xf32>
    tpu.vector_store %arg7[%c0_73, %c0_74], %65 {strides = array<i32>} : memref<288x128xf32, #tpu.memory_space<vmem>>, vector<288x128xf32>,
    %c0_75 = arith.constant 0 : index
    %c38 = arith.constant 38 : index
    %c0_76 = arith.constant 0 : index
    %67 = vector.load %arg3[%c0_75, %c38, %c0_76] : memref<1x326x128xbf16, #tpu.memory_space<vmem>>, vector<1x288x128xbf16>
    %68 = vector.shape_cast %67 : vector<1x288x128xbf16> to vector<288x128xbf16>
    %c0_77 = arith.constant 0 : index
    %c0_78 = arith.constant 0 : index
    %69 = vector.load %arg7[%c0_77, %c0_78] : memref<288x128xf32, #tpu.memory_space<vmem>>, vector<288x128xf32>
    %c8 = arith.constant 8 : index
    %c0_79 = arith.constant 0 : index
    %c0_80 = arith.constant 0 : index
    %70 = vector.load %arg4[%c8, %c0_79, %c0_80] : memref<9x128x128xbf16, #tpu.memory_space<vmem>>, vector<1x128x128xbf16>
    %71 = vector.shape_cast %70 : vector<1x128x128xbf16> to vector<128x128xbf16>
    %cst_81 = arith.constant dense<0.000000e+00> : vector<288x128xf32>
    %72 = tpu.matmul %68, %71, %cst_81 {dimension_numbers = #tpu.dot_dimension_numbers<[1], [0], [0], [1], [0, 0, 1, 1], [], []>} : vector<288x128xbf16>, vector<128x128xbf16>, vector<288x128xf32> -> vector<288x128xf32>
    %73 = arith.addf %69, %72 : vector<288x128xf32>
    %c0_82 = arith.constant 0 : index
    %c0_83 = arith.constant 0 : index
    %74 = vector.load %arg7[%c0_82, %c0_83] : memref<288x128xf32, #tpu.memory_space<vmem>>, vector<288x128xf32>
    tpu.vector_store %arg7[%c0_82, %c0_83], %73 {strides = array<i32>} : memref<288x128xf32, #tpu.memory_space<vmem>>, vector<288x128xf32>,
    %c0_i32_84 = arith.constant 0 : i32
    %75 = arith.cmpi eq, %arg2, %c0_i32_84 : i32
    %76 = arith.extui %75 : i1 to i32
    %c0_i32_85 = arith.constant 0 : i32
    %77 = arith.cmpi ne, %76, %c0_i32_85 : i32
    scf.if %77 {
      %c0_86 = arith.constant 0 : index
      %c0_87 = arith.constant 0 : index
      %78 = vector.load %arg7[%c0_86, %c0_87] : memref<288x128xf32, #tpu.memory_space<vmem>>, vector<288x128xf32>
      %c0_88 = arith.constant 0 : index
      %c0_89 = arith.constant 0 : index
      %79 = vector.load %arg5[%c0_88, %c0_89] : memref<1x128xf32, #tpu.memory_space<vmem>>, vector<1x128xf32>
      %80 = vector.broadcast %79 : vector<1x128xf32> to vector<288x128xf32>
      %81 = arith.addf %78, %80 : vector<288x128xf32>
      %cst_90 = arith.constant 0.000000e+00 : f32
      %82 = vector.broadcast %cst_90 : f32 to vector<288x128xf32>
      %83 = arith.maximumf %81, %82 : vector<288x128xf32>
      %84 = arith.truncf %83 : vector<288x128xf32> to vector<288x128xbf16>
      %c0_91 = arith.constant 0 : index
      %c0_92 = arith.constant 0 : index
      %c0_93 = arith.constant 0 : index
      %85 = vector.load %arg6[%c0_91, %c0_92, %c0_93] : memref<1x288x128xbf16, #tpu.memory_space<vmem>>, vector<1x288x128xbf16>
      %86 = vector.shape_cast %85 : vector<1x288x128xbf16> to vector<288x128xbf16>
      %87 = vector.shape_cast %84 : vector<288x128xbf16> to vector<1x288x128xbf16>
      tpu.vector_store %arg6[%c0_91, %c0_92, %c0_93], %87 {strides = array<i32>} : memref<1x288x128xbf16, #tpu.memory_space<vmem>>, vector<1x288x128xbf16>,
    } else {
    }
    return
  }
  func.func @transform_0(%arg0: i32, %arg1: i32, %arg2: i32) -> (i32, i32, i32) {
    %c0_i32 = arith.constant 0 : i32
    %c0_i32_0 = arith.constant 0 : i32
    return %arg0, %c0_i32, %arg2 : i32, i32, i32
  }
  func.func @transform_1(%arg0: i32, %arg1: i32, %arg2: i32) -> (i32, i32, i32) {
    %c0_i32 = arith.constant 0 : i32
    %c0_i32_0 = arith.constant 0 : i32
    return %c0_i32, %arg2, %arg1 : i32, i32, i32
  }
  func.func @transform_2(%arg0: i32, %arg1: i32, %arg2: i32) -> (i32, i32) {
    %c0_i32 = arith.constant 0 : i32
    %c0_i32_0 = arith.constant 0 : i32
    return %c0_i32, %arg1 : i32, i32
  }
  func.func @transform_3(%arg0: i32, %arg1: i32, %arg2: i32) -> (i32, i32, i32) {
    %c0_i32 = arith.constant 0 : i32
    %c0_i32_0 = arith.constant 0 : i32
    return %arg0, %c0_i32, %arg1 : i32, i32, i32
  }
}

module attributes {stable_mosaic.version = 11 : i64} {
  func.func @_gemm_kernel(%arg0: i32, %arg1: i32, %arg2: i32, %arg3: memref<256x128xbf16, #tpu.memory_space<vmem>>, %arg4: memref<128x128xbf16, #tpu.memory_space<vmem>>, %arg5: memref<1x128xf32, #tpu.memory_space<vmem>>, %arg6: memref<256x128xbf16, #tpu.memory_space<vmem>>, %arg7: memref<256x128xf32, #tpu.memory_space<vmem>>) attributes {dimension_semantics = [#tpu.dimension_semantics<parallel>, #tpu.dimension_semantics<parallel>, #tpu.dimension_semantics<arbitrary>], iteration_bounds = array<i64: 2, 1, 1>, scalar_prefetch = 0 : i64, scratch_operands = 1 : i64, tpu.core_type = #tpu.core_type<tc>, window_params = [{transform_indices = @transform_0, window_bounds = array<i64: 256, 128>}, {transform_indices = @transform_1, window_bounds = array<i64: 128, 128>}, {transform_indices = @transform_2, window_bounds = array<i64: 1, 128>}, {transform_indices = @transform_3, window_bounds = array<i64: 256, 128>}]} {
    %c0_i32 = arith.constant 0 : i32
    %0 = arith.cmpi eq, %arg2, %c0_i32 : i32
    %1 = arith.extui %0 : i1 to i32
    %c0_i32_0 = arith.constant 0 : i32
    %2 = arith.cmpi ne, %1, %c0_i32_0 : i32
    scf.if %2 {
      %cst_10 = arith.constant 0.000000e+00 : f32
      %12 = vector.broadcast %cst_10 : f32 to vector<256x128xf32>
      %c0_11 = arith.constant 0 : index
      %c0_12 = arith.constant 0 : index
      %13 = vector.load %arg7[%c0_11, %c0_12] : memref<256x128xf32, #tpu.memory_space<vmem>>, vector<256x128xf32>
      tpu.vector_store %arg7[%c0_11, %c0_12], %12 {strides = array<i32>} : memref<256x128xf32, #tpu.memory_space<vmem>>, vector<256x128xf32>,
    } else {
    }
    %c0 = arith.constant 0 : index
    %c0_1 = arith.constant 0 : index
    %3 = vector.load %arg7[%c0, %c0_1] : memref<256x128xf32, #tpu.memory_space<vmem>>, vector<256x128xf32>
    %c0_2 = arith.constant 0 : index
    %c0_3 = arith.constant 0 : index
    %4 = vector.load %arg3[%c0_2, %c0_3] : memref<256x128xbf16, #tpu.memory_space<vmem>>, vector<256x128xbf16>
    %c0_4 = arith.constant 0 : index
    %c0_5 = arith.constant 0 : index
    %5 = vector.load %arg4[%c0_4, %c0_5] : memref<128x128xbf16, #tpu.memory_space<vmem>>, vector<128x128xbf16>
    %cst = arith.constant dense<0.000000e+00> : vector<256x128xf32>
    %6 = tpu.matmul %4, %5, %cst {dimension_numbers = #tpu.dot_dimension_numbers<[1], [0], [0], [1], [0, 0, 1, 1], [], []>} : vector<256x128xbf16>, vector<128x128xbf16>, vector<256x128xf32> -> vector<256x128xf32>
    %7 = arith.addf %3, %6 : vector<256x128xf32>
    %c0_6 = arith.constant 0 : index
    %c0_7 = arith.constant 0 : index
    %8 = vector.load %arg7[%c0_6, %c0_7] : memref<256x128xf32, #tpu.memory_space<vmem>>, vector<256x128xf32>
    tpu.vector_store %arg7[%c0_6, %c0_7], %7 {strides = array<i32>} : memref<256x128xf32, #tpu.memory_space<vmem>>, vector<256x128xf32>,
    %c0_i32_8 = arith.constant 0 : i32
    %9 = arith.cmpi eq, %arg2, %c0_i32_8 : i32
    %10 = arith.extui %9 : i1 to i32
    %c0_i32_9 = arith.constant 0 : i32
    %11 = arith.cmpi ne, %10, %c0_i32_9 : i32
    scf.if %11 {
      %c0_10 = arith.constant 0 : index
      %c0_11 = arith.constant 0 : index
      %12 = vector.load %arg7[%c0_10, %c0_11] : memref<256x128xf32, #tpu.memory_space<vmem>>, vector<256x128xf32>
      %c0_12 = arith.constant 0 : index
      %c0_13 = arith.constant 0 : index
      %13 = vector.load %arg5[%c0_12, %c0_13] : memref<1x128xf32, #tpu.memory_space<vmem>>, vector<1x128xf32>
      %14 = vector.broadcast %13 : vector<1x128xf32> to vector<256x128xf32>
      %15 = arith.addf %12, %14 : vector<256x128xf32>
      %16 = arith.truncf %15 : vector<256x128xf32> to vector<256x128xbf16>
      %c0_14 = arith.constant 0 : index
      %c0_15 = arith.constant 0 : index
      %17 = vector.load %arg6[%c0_14, %c0_15] : memref<256x128xbf16, #tpu.memory_space<vmem>>, vector<256x128xbf16>
      tpu.vector_store %arg6[%c0_14, %c0_15], %16 {strides = array<i32>} : memref<256x128xbf16, #tpu.memory_space<vmem>>, vector<256x128xbf16>,
    } else {
    }
    return
  }
  func.func @transform_0(%arg0: i32, %arg1: i32, %arg2: i32) -> (i32, i32) {
    %c0_i32 = arith.constant 0 : i32
    return %arg0, %arg2 : i32, i32
  }
  func.func @transform_1(%arg0: i32, %arg1: i32, %arg2: i32) -> (i32, i32) {
    %c0_i32 = arith.constant 0 : i32
    return %arg2, %arg1 : i32, i32
  }
  func.func @transform_2(%arg0: i32, %arg1: i32, %arg2: i32) -> (i32, i32) {
    %c0_i32 = arith.constant 0 : i32
    %c0_i32_0 = arith.constant 0 : i32
    return %c0_i32, %arg1 : i32, i32
  }
  func.func @transform_3(%arg0: i32, %arg1: i32, %arg2: i32) -> (i32, i32) {
    %c0_i32 = arith.constant 0 : i32
    return %arg0, %arg1 : i32, i32
  }
}

module attributes {stable_mosaic.version = 11 : i64} {
  func.func @_gemm_kernel(%arg0: i32, %arg1: i32, %arg2: i32, %arg3: memref<256x128xbf16, #tpu.memory_space<vmem>>, %arg4: memref<128x128xbf16, #tpu.memory_space<vmem>>, %arg5: memref<1x128xf32, #tpu.memory_space<vmem>>, %arg6: memref<256x128xbf16, #tpu.memory_space<vmem>>, %arg7: memref<256x128xf32, #tpu.memory_space<vmem>>) attributes {dimension_semantics = [#tpu.dimension_semantics<parallel>, #tpu.dimension_semantics<parallel>, #tpu.dimension_semantics<arbitrary>], iteration_bounds = array<i64: 2, 1, 1>, scalar_prefetch = 0 : i64, scratch_operands = 1 : i64, tpu.core_type = #tpu.core_type<tc>, window_params = [{transform_indices = @transform_0, window_bounds = array<i64: 256, 128>}, {transform_indices = @transform_1, window_bounds = array<i64: 128, 128>}, {transform_indices = @transform_2, window_bounds = array<i64: 1, 128>}, {transform_indices = @transform_3, window_bounds = array<i64: 256, 128>}]} {
    %c0_i32 = arith.constant 0 : i32
    %0 = arith.cmpi eq, %arg2, %c0_i32 : i32
    %1 = arith.extui %0 : i1 to i32
    %c0_i32_0 = arith.constant 0 : i32
    %2 = arith.cmpi ne, %1, %c0_i32_0 : i32
    scf.if %2 {
      %cst_10 = arith.constant 0.000000e+00 : f32
      %12 = vector.broadcast %cst_10 : f32 to vector<256x128xf32>
      %c0_11 = arith.constant 0 : index
      %c0_12 = arith.constant 0 : index
      %13 = vector.load %arg7[%c0_11, %c0_12] : memref<256x128xf32, #tpu.memory_space<vmem>>, vector<256x128xf32>
      tpu.vector_store %arg7[%c0_11, %c0_12], %12 {strides = array<i32>} : memref<256x128xf32, #tpu.memory_space<vmem>>, vector<256x128xf32>,
    } else {
    }
    %c0 = arith.constant 0 : index
    %c0_1 = arith.constant 0 : index
    %3 = vector.load %arg7[%c0, %c0_1] : memref<256x128xf32, #tpu.memory_space<vmem>>, vector<256x128xf32>
    %c0_2 = arith.constant 0 : index
    %c0_3 = arith.constant 0 : index
    %4 = vector.load %arg3[%c0_2, %c0_3] : memref<256x128xbf16, #tpu.memory_space<vmem>>, vector<256x128xbf16>
    %c0_4 = arith.constant 0 : index
    %c0_5 = arith.constant 0 : index
    %5 = vector.load %arg4[%c0_4, %c0_5] : memref<128x128xbf16, #tpu.memory_space<vmem>>, vector<128x128xbf16>
    %cst = arith.constant dense<0.000000e+00> : vector<256x128xf32>
    %6 = tpu.matmul %4, %5, %cst {dimension_numbers = #tpu.dot_dimension_numbers<[1], [0], [0], [1], [0, 0, 1, 1], [], []>} : vector<256x128xbf16>, vector<128x128xbf16>, vector<256x128xf32> -> vector<256x128xf32>
    %7 = arith.addf %3, %6 : vector<256x128xf32>
    %c0_6 = arith.constant 0 : index
    %c0_7 = arith.constant 0 : index
    %8 = vector.load %arg7[%c0_6, %c0_7] : memref<256x128xf32, #tpu.memory_space<vmem>>, vector<256x128xf32>
    tpu.vector_store %arg7[%c0_6, %c0_7], %7 {strides = array<i32>} : memref<256x128xf32, #tpu.memory_space<vmem>>, vector<256x128xf32>,
    %c0_i32_8 = arith.constant 0 : i32
    %9 = arith.cmpi eq, %arg2, %c0_i32_8 : i32
    %10 = arith.extui %9 : i1 to i32
    %c0_i32_9 = arith.constant 0 : i32
    %11 = arith.cmpi ne, %10, %c0_i32_9 : i32
    scf.if %11 {
      %c0_10 = arith.constant 0 : index
      %c0_11 = arith.constant 0 : index
      %12 = vector.load %arg7[%c0_10, %c0_11] : memref<256x128xf32, #tpu.memory_space<vmem>>, vector<256x128xf32>
      %c0_12 = arith.constant 0 : index
      %c0_13 = arith.constant 0 : index
      %13 = vector.load %arg5[%c0_12, %c0_13] : memref<1x128xf32, #tpu.memory_space<vmem>>, vector<1x128xf32>
      %14 = vector.broadcast %13 : vector<1x128xf32> to vector<256x128xf32>
      %15 = arith.addf %12, %14 : vector<256x128xf32>
      %cst_14 = arith.constant 0.000000e+00 : f32
      %16 = vector.broadcast %cst_14 : f32 to vector<256x128xf32>
      %17 = arith.maximumf %15, %16 : vector<256x128xf32>
      %18 = arith.truncf %17 : vector<256x128xf32> to vector<256x128xbf16>
      %c0_15 = arith.constant 0 : index
      %c0_16 = arith.constant 0 : index
      %19 = vector.load %arg6[%c0_15, %c0_16] : memref<256x128xbf16, #tpu.memory_space<vmem>>, vector<256x128xbf16>
      tpu.vector_store %arg6[%c0_15, %c0_16], %18 {strides = array<i32>} : memref<256x128xbf16, #tpu.memory_space<vmem>>, vector<256x128xbf16>,
    } else {
    }
    return
  }
  func.func @transform_0(%arg0: i32, %arg1: i32, %arg2: i32) -> (i32, i32) {
    %c0_i32 = arith.constant 0 : i32
    return %arg0, %arg2 : i32, i32
  }
  func.func @transform_1(%arg0: i32, %arg1: i32, %arg2: i32) -> (i32, i32) {
    %c0_i32 = arith.constant 0 : i32
    return %arg2, %arg1 : i32, i32
  }
  func.func @transform_2(%arg0: i32, %arg1: i32, %arg2: i32) -> (i32, i32) {
    %c0_i32 = arith.constant 0 : i32
    %c0_i32_0 = arith.constant 0 : i32
    return %c0_i32, %arg1 : i32, i32
  }
  func.func @transform_3(%arg0: i32, %arg1: i32, %arg2: i32) -> (i32, i32) {
    %c0_i32 = arith.constant 0 : i32
    return %arg0, %arg1 : i32, i32
  }
}

module attributes {stable_mosaic.version = 11 : i64} {
  func.func @_gemm_res_kernel(%arg0: i32, %arg1: i32, %arg2: i32, %arg3: memref<256x128xbf16, #tpu.memory_space<vmem>>, %arg4: memref<128x128xbf16, #tpu.memory_space<vmem>>, %arg5: memref<1x128xf32, #tpu.memory_space<vmem>>, %arg6: memref<256x128xbf16, #tpu.memory_space<vmem>>, %arg7: memref<256x128xbf16, #tpu.memory_space<vmem>>, %arg8: memref<256x128xf32, #tpu.memory_space<vmem>>) attributes {dimension_semantics = [#tpu.dimension_semantics<parallel>, #tpu.dimension_semantics<parallel>, #tpu.dimension_semantics<arbitrary>], iteration_bounds = array<i64: 2, 1, 1>, scalar_prefetch = 0 : i64, scratch_operands = 1 : i64, tpu.core_type = #tpu.core_type<tc>, window_params = [{transform_indices = @transform_0, window_bounds = array<i64: 256, 128>}, {transform_indices = @transform_1, window_bounds = array<i64: 128, 128>}, {transform_indices = @transform_2, window_bounds = array<i64: 1, 128>}, {transform_indices = @transform_3, window_bounds = array<i64: 256, 128>}, {transform_indices = @transform_4, window_bounds = array<i64: 256, 128>}]} {
    %c0_i32 = arith.constant 0 : i32
    %0 = arith.cmpi eq, %arg2, %c0_i32 : i32
    %1 = arith.extui %0 : i1 to i32
    %c0_i32_0 = arith.constant 0 : i32
    %2 = arith.cmpi ne, %1, %c0_i32_0 : i32
    scf.if %2 {
      %cst_10 = arith.constant 0.000000e+00 : f32
      %12 = vector.broadcast %cst_10 : f32 to vector<256x128xf32>
      %c0_11 = arith.constant 0 : index
      %c0_12 = arith.constant 0 : index
      %13 = vector.load %arg8[%c0_11, %c0_12] : memref<256x128xf32, #tpu.memory_space<vmem>>, vector<256x128xf32>
      tpu.vector_store %arg8[%c0_11, %c0_12], %12 {strides = array<i32>} : memref<256x128xf32, #tpu.memory_space<vmem>>, vector<256x128xf32>,
    } else {
    }
    %c0 = arith.constant 0 : index
    %c0_1 = arith.constant 0 : index
    %3 = vector.load %arg8[%c0, %c0_1] : memref<256x128xf32, #tpu.memory_space<vmem>>, vector<256x128xf32>
    %c0_2 = arith.constant 0 : index
    %c0_3 = arith.constant 0 : index
    %4 = vector.load %arg3[%c0_2, %c0_3] : memref<256x128xbf16, #tpu.memory_space<vmem>>, vector<256x128xbf16>
    %c0_4 = arith.constant 0 : index
    %c0_5 = arith.constant 0 : index
    %5 = vector.load %arg4[%c0_4, %c0_5] : memref<128x128xbf16, #tpu.memory_space<vmem>>, vector<128x128xbf16>
    %cst = arith.constant dense<0.000000e+00> : vector<256x128xf32>
    %6 = tpu.matmul %4, %5, %cst {dimension_numbers = #tpu.dot_dimension_numbers<[1], [0], [0], [1], [0, 0, 1, 1], [], []>} : vector<256x128xbf16>, vector<128x128xbf16>, vector<256x128xf32> -> vector<256x128xf32>
    %7 = arith.addf %3, %6 : vector<256x128xf32>
    %c0_6 = arith.constant 0 : index
    %c0_7 = arith.constant 0 : index
    %8 = vector.load %arg8[%c0_6, %c0_7] : memref<256x128xf32, #tpu.memory_space<vmem>>, vector<256x128xf32>
    tpu.vector_store %arg8[%c0_6, %c0_7], %7 {strides = array<i32>} : memref<256x128xf32, #tpu.memory_space<vmem>>, vector<256x128xf32>,
    %c0_i32_8 = arith.constant 0 : i32
    %9 = arith.cmpi eq, %arg2, %c0_i32_8 : i32
    %10 = arith.extui %9 : i1 to i32
    %c0_i32_9 = arith.constant 0 : i32
    %11 = arith.cmpi ne, %10, %c0_i32_9 : i32
    scf.if %11 {
      %c0_10 = arith.constant 0 : index
      %c0_11 = arith.constant 0 : index
      %12 = vector.load %arg8[%c0_10, %c0_11] : memref<256x128xf32, #tpu.memory_space<vmem>>, vector<256x128xf32>
      %c0_12 = arith.constant 0 : index
      %c0_13 = arith.constant 0 : index
      %13 = vector.load %arg5[%c0_12, %c0_13] : memref<1x128xf32, #tpu.memory_space<vmem>>, vector<1x128xf32>
      %14 = vector.broadcast %13 : vector<1x128xf32> to vector<256x128xf32>
      %15 = arith.addf %12, %14 : vector<256x128xf32>
      %c0_14 = arith.constant 0 : index
      %c0_15 = arith.constant 0 : index
      %16 = vector.load %arg6[%c0_14, %c0_15] : memref<256x128xbf16, #tpu.memory_space<vmem>>, vector<256x128xbf16>
      %17 = arith.extf %16 : vector<256x128xbf16> to vector<256x128xf32>
      %18 = arith.addf %15, %17 : vector<256x128xf32>
      %cst_16 = arith.constant 0.000000e+00 : f32
      %19 = vector.broadcast %cst_16 : f32 to vector<256x128xf32>
      %20 = arith.maximumf %18, %19 : vector<256x128xf32>
      %21 = arith.truncf %20 : vector<256x128xf32> to vector<256x128xbf16>
      %c0_17 = arith.constant 0 : index
      %c0_18 = arith.constant 0 : index
      %22 = vector.load %arg7[%c0_17, %c0_18] : memref<256x128xbf16, #tpu.memory_space<vmem>>, vector<256x128xbf16>
      tpu.vector_store %arg7[%c0_17, %c0_18], %21 {strides = array<i32>} : memref<256x128xbf16, #tpu.memory_space<vmem>>, vector<256x128xbf16>,
    } else {
    }
    return
  }
  func.func @transform_0(%arg0: i32, %arg1: i32, %arg2: i32) -> (i32, i32) {
    %c0_i32 = arith.constant 0 : i32
    return %arg0, %arg2 : i32, i32
  }
  func.func @transform_1(%arg0: i32, %arg1: i32, %arg2: i32) -> (i32, i32) {
    %c0_i32 = arith.constant 0 : i32
    return %arg2, %arg1 : i32, i32
  }
  func.func @transform_2(%arg0: i32, %arg1: i32, %arg2: i32) -> (i32, i32) {
    %c0_i32 = arith.constant 0 : i32
    %c0_i32_0 = arith.constant 0 : i32
    return %c0_i32, %arg1 : i32, i32
  }
  func.func @transform_3(%arg0: i32, %arg1: i32, %arg2: i32) -> (i32, i32) {
    %c0_i32 = arith.constant 0 : i32
    return %arg0, %arg1 : i32, i32
  }
  func.func @transform_4(%arg0: i32, %arg1: i32, %arg2: i32) -> (i32, i32) {
    %c0_i32 = arith.constant 0 : i32
    return %arg0, %arg1 : i32, i32
  }
}

module attributes {stable_mosaic.version = 11 : i64} {
  func.func @_gemm_kernel(%arg0: i32, %arg1: i32, %arg2: i32, %arg3: memref<128x128xbf16, #tpu.memory_space<vmem>>, %arg4: memref<128x128xbf16, #tpu.memory_space<vmem>>, %arg5: memref<1x128xf32, #tpu.memory_space<vmem>>, %arg6: memref<128x128xbf16, #tpu.memory_space<vmem>>, %arg7: memref<128x128xf32, #tpu.memory_space<vmem>>) attributes {dimension_semantics = [#tpu.dimension_semantics<parallel>, #tpu.dimension_semantics<parallel>, #tpu.dimension_semantics<arbitrary>], iteration_bounds = array<i64: 1, 1, 1>, scalar_prefetch = 0 : i64, scratch_operands = 1 : i64, tpu.core_type = #tpu.core_type<tc>, window_params = [{transform_indices = @transform_0, window_bounds = array<i64: 128, 128>}, {transform_indices = @transform_1, window_bounds = array<i64: 128, 128>}, {transform_indices = @transform_2, window_bounds = array<i64: 1, 128>}, {transform_indices = @transform_3, window_bounds = array<i64: 128, 128>}]} {
    %c0_i32 = arith.constant 0 : i32
    %0 = arith.cmpi eq, %arg2, %c0_i32 : i32
    %1 = arith.extui %0 : i1 to i32
    %c0_i32_0 = arith.constant 0 : i32
    %2 = arith.cmpi ne, %1, %c0_i32_0 : i32
    scf.if %2 {
      %cst_10 = arith.constant 0.000000e+00 : f32
      %12 = vector.broadcast %cst_10 : f32 to vector<128x128xf32>
      %c0_11 = arith.constant 0 : index
      %c0_12 = arith.constant 0 : index
      %13 = vector.load %arg7[%c0_11, %c0_12] : memref<128x128xf32, #tpu.memory_space<vmem>>, vector<128x128xf32>
      tpu.vector_store %arg7[%c0_11, %c0_12], %12 {strides = array<i32>} : memref<128x128xf32, #tpu.memory_space<vmem>>, vector<128x128xf32>,
    } else {
    }
    %c0 = arith.constant 0 : index
    %c0_1 = arith.constant 0 : index
    %3 = vector.load %arg7[%c0, %c0_1] : memref<128x128xf32, #tpu.memory_space<vmem>>, vector<128x128xf32>
    %c0_2 = arith.constant 0 : index
    %c0_3 = arith.constant 0 : index
    %4 = vector.load %arg3[%c0_2, %c0_3] : memref<128x128xbf16, #tpu.memory_space<vmem>>, vector<128x128xbf16>
    %c0_4 = arith.constant 0 : index
    %c0_5 = arith.constant 0 : index
    %5 = vector.load %arg4[%c0_4, %c0_5] : memref<128x128xbf16, #tpu.memory_space<vmem>>, vector<128x128xbf16>
    %cst = arith.constant dense<0.000000e+00> : vector<128x128xf32>
    %6 = tpu.matmul %4, %5, %cst {dimension_numbers = #tpu.dot_dimension_numbers<[1], [0], [0], [1], [0, 0, 1, 1], [], []>} : vector<128x128xbf16>, vector<128x128xbf16>, vector<128x128xf32> -> vector<128x128xf32>
    %7 = arith.addf %3, %6 : vector<128x128xf32>
    %c0_6 = arith.constant 0 : index
    %c0_7 = arith.constant 0 : index
    %8 = vector.load %arg7[%c0_6, %c0_7] : memref<128x128xf32, #tpu.memory_space<vmem>>, vector<128x128xf32>
    tpu.vector_store %arg7[%c0_6, %c0_7], %7 {strides = array<i32>} : memref<128x128xf32, #tpu.memory_space<vmem>>, vector<128x128xf32>,
    %c0_i32_8 = arith.constant 0 : i32
    %9 = arith.cmpi eq, %arg2, %c0_i32_8 : i32
    %10 = arith.extui %9 : i1 to i32
    %c0_i32_9 = arith.constant 0 : i32
    %11 = arith.cmpi ne, %10, %c0_i32_9 : i32
    scf.if %11 {
      %c0_10 = arith.constant 0 : index
      %c0_11 = arith.constant 0 : index
      %12 = vector.load %arg7[%c0_10, %c0_11] : memref<128x128xf32, #tpu.memory_space<vmem>>, vector<128x128xf32>
      %c0_12 = arith.constant 0 : index
      %c0_13 = arith.constant 0 : index
      %13 = vector.load %arg5[%c0_12, %c0_13] : memref<1x128xf32, #tpu.memory_space<vmem>>, vector<1x128xf32>
      %14 = vector.broadcast %13 : vector<1x128xf32> to vector<128x128xf32>
      %15 = arith.addf %12, %14 : vector<128x128xf32>
      %16 = arith.truncf %15 : vector<128x128xf32> to vector<128x128xbf16>
      %c0_14 = arith.constant 0 : index
      %c0_15 = arith.constant 0 : index
      %17 = vector.load %arg6[%c0_14, %c0_15] : memref<128x128xbf16, #tpu.memory_space<vmem>>, vector<128x128xbf16>
      tpu.vector_store %arg6[%c0_14, %c0_15], %16 {strides = array<i32>} : memref<128x128xbf16, #tpu.memory_space<vmem>>, vector<128x128xbf16>,
    } else {
    }
    return
  }
  func.func @transform_0(%arg0: i32, %arg1: i32, %arg2: i32) -> (i32, i32) {
    %c0_i32 = arith.constant 0 : i32
    return %arg0, %arg2 : i32, i32
  }
  func.func @transform_1(%arg0: i32, %arg1: i32, %arg2: i32) -> (i32, i32) {
    %c0_i32 = arith.constant 0 : i32
    return %arg2, %arg1 : i32, i32
  }
  func.func @transform_2(%arg0: i32, %arg1: i32, %arg2: i32) -> (i32, i32) {
    %c0_i32 = arith.constant 0 : i32
    %c0_i32_0 = arith.constant 0 : i32
    return %c0_i32, %arg1 : i32, i32
  }
  func.func @transform_3(%arg0: i32, %arg1: i32, %arg2: i32) -> (i32, i32) {
    %c0_i32 = arith.constant 0 : i32
    return %arg0, %arg1 : i32, i32
  }
}

module attributes {stable_mosaic.version = 11 : i64} {
  func.func @_gemm_kernel(%arg0: i32, %arg1: i32, %arg2: i32, %arg3: memref<128x128xbf16, #tpu.memory_space<vmem>>, %arg4: memref<128x128xbf16, #tpu.memory_space<vmem>>, %arg5: memref<1x128xf32, #tpu.memory_space<vmem>>, %arg6: memref<128x128xbf16, #tpu.memory_space<vmem>>, %arg7: memref<128x128xf32, #tpu.memory_space<vmem>>) attributes {dimension_semantics = [#tpu.dimension_semantics<parallel>, #tpu.dimension_semantics<parallel>, #tpu.dimension_semantics<arbitrary>], iteration_bounds = array<i64: 1, 1, 1>, scalar_prefetch = 0 : i64, scratch_operands = 1 : i64, tpu.core_type = #tpu.core_type<tc>, window_params = [{transform_indices = @transform_0, window_bounds = array<i64: 128, 128>}, {transform_indices = @transform_1, window_bounds = array<i64: 128, 128>}, {transform_indices = @transform_2, window_bounds = array<i64: 1, 128>}, {transform_indices = @transform_3, window_bounds = array<i64: 128, 128>}]} {
    %c0_i32 = arith.constant 0 : i32
    %0 = arith.cmpi eq, %arg2, %c0_i32 : i32
    %1 = arith.extui %0 : i1 to i32
    %c0_i32_0 = arith.constant 0 : i32
    %2 = arith.cmpi ne, %1, %c0_i32_0 : i32
    scf.if %2 {
      %cst_10 = arith.constant 0.000000e+00 : f32
      %12 = vector.broadcast %cst_10 : f32 to vector<128x128xf32>
      %c0_11 = arith.constant 0 : index
      %c0_12 = arith.constant 0 : index
      %13 = vector.load %arg7[%c0_11, %c0_12] : memref<128x128xf32, #tpu.memory_space<vmem>>, vector<128x128xf32>
      tpu.vector_store %arg7[%c0_11, %c0_12], %12 {strides = array<i32>} : memref<128x128xf32, #tpu.memory_space<vmem>>, vector<128x128xf32>,
    } else {
    }
    %c0 = arith.constant 0 : index
    %c0_1 = arith.constant 0 : index
    %3 = vector.load %arg7[%c0, %c0_1] : memref<128x128xf32, #tpu.memory_space<vmem>>, vector<128x128xf32>
    %c0_2 = arith.constant 0 : index
    %c0_3 = arith.constant 0 : index
    %4 = vector.load %arg3[%c0_2, %c0_3] : memref<128x128xbf16, #tpu.memory_space<vmem>>, vector<128x128xbf16>
    %c0_4 = arith.constant 0 : index
    %c0_5 = arith.constant 0 : index
    %5 = vector.load %arg4[%c0_4, %c0_5] : memref<128x128xbf16, #tpu.memory_space<vmem>>, vector<128x128xbf16>
    %cst = arith.constant dense<0.000000e+00> : vector<128x128xf32>
    %6 = tpu.matmul %4, %5, %cst {dimension_numbers = #tpu.dot_dimension_numbers<[1], [0], [0], [1], [0, 0, 1, 1], [], []>} : vector<128x128xbf16>, vector<128x128xbf16>, vector<128x128xf32> -> vector<128x128xf32>
    %7 = arith.addf %3, %6 : vector<128x128xf32>
    %c0_6 = arith.constant 0 : index
    %c0_7 = arith.constant 0 : index
    %8 = vector.load %arg7[%c0_6, %c0_7] : memref<128x128xf32, #tpu.memory_space<vmem>>, vector<128x128xf32>
    tpu.vector_store %arg7[%c0_6, %c0_7], %7 {strides = array<i32>} : memref<128x128xf32, #tpu.memory_space<vmem>>, vector<128x128xf32>,
    %c0_i32_8 = arith.constant 0 : i32
    %9 = arith.cmpi eq, %arg2, %c0_i32_8 : i32
    %10 = arith.extui %9 : i1 to i32
    %c0_i32_9 = arith.constant 0 : i32
    %11 = arith.cmpi ne, %10, %c0_i32_9 : i32
    scf.if %11 {
      %c0_10 = arith.constant 0 : index
      %c0_11 = arith.constant 0 : index
      %12 = vector.load %arg7[%c0_10, %c0_11] : memref<128x128xf32, #tpu.memory_space<vmem>>, vector<128x128xf32>
      %c0_12 = arith.constant 0 : index
      %c0_13 = arith.constant 0 : index
      %13 = vector.load %arg5[%c0_12, %c0_13] : memref<1x128xf32, #tpu.memory_space<vmem>>, vector<1x128xf32>
      %14 = vector.broadcast %13 : vector<1x128xf32> to vector<128x128xf32>
      %15 = arith.addf %12, %14 : vector<128x128xf32>
      %cst_14 = arith.constant 0.000000e+00 : f32
      %16 = vector.broadcast %cst_14 : f32 to vector<128x128xf32>
      %17 = arith.maximumf %15, %16 : vector<128x128xf32>
      %18 = arith.truncf %17 : vector<128x128xf32> to vector<128x128xbf16>
      %c0_15 = arith.constant 0 : index
      %c0_16 = arith.constant 0 : index
      %19 = vector.load %arg6[%c0_15, %c0_16] : memref<128x128xbf16, #tpu.memory_space<vmem>>, vector<128x128xbf16>
      tpu.vector_store %arg6[%c0_15, %c0_16], %18 {strides = array<i32>} : memref<128x128xbf16, #tpu.memory_space<vmem>>, vector<128x128xbf16>,
    } else {
    }
    return
  }
  func.func @transform_0(%arg0: i32, %arg1: i32, %arg2: i32) -> (i32, i32) {
    %c0_i32 = arith.constant 0 : i32
    return %arg0, %arg2 : i32, i32
  }
  func.func @transform_1(%arg0: i32, %arg1: i32, %arg2: i32) -> (i32, i32) {
    %c0_i32 = arith.constant 0 : i32
    return %arg2, %arg1 : i32, i32
  }
  func.func @transform_2(%arg0: i32, %arg1: i32, %arg2: i32) -> (i32, i32) {
    %c0_i32 = arith.constant 0 : i32
    %c0_i32_0 = arith.constant 0 : i32
    return %c0_i32, %arg1 : i32, i32
  }
  func.func @transform_3(%arg0: i32, %arg1: i32, %arg2: i32) -> (i32, i32) {
    %c0_i32 = arith.constant 0 : i32
    return %arg0, %arg1 : i32, i32
  }
}

module attributes {stable_mosaic.version = 11 : i64} {
  func.func @_conv3x3_kernel(%arg0: i32, %arg1: i32, %arg2: i32, %arg3: memref<1x102x128xbf16, #tpu.memory_space<vmem>>, %arg4: memref<9x128x128xbf16, #tpu.memory_space<vmem>>, %arg5: memref<1x128xf32, #tpu.memory_space<vmem>>, %arg6: memref<1x80x128xbf16, #tpu.memory_space<vmem>>, %arg7: memref<80x128xf32, #tpu.memory_space<vmem>>) attributes {dimension_semantics = [#tpu.dimension_semantics<parallel>, #tpu.dimension_semantics<parallel>, #tpu.dimension_semantics<arbitrary>], iteration_bounds = array<i64: 2, 1, 1>, scalar_prefetch = 0 : i64, scratch_operands = 1 : i64, tpu.core_type = #tpu.core_type<tc>, window_params = [{transform_indices = @transform_0, window_bounds = array<i64: 1, 102, 128>}, {transform_indices = @transform_1, window_bounds = array<i64: 9, 128, 128>}, {transform_indices = @transform_2, window_bounds = array<i64: 1, 128>}, {transform_indices = @transform_3, window_bounds = array<i64: 1, 80, 128>}]} {
    %c0_i32 = arith.constant 0 : i32
    %0 = arith.cmpi eq, %arg2, %c0_i32 : i32
    %1 = arith.extui %0 : i1 to i32
    %c0_i32_0 = arith.constant 0 : i32
    %2 = arith.cmpi ne, %1, %c0_i32_0 : i32
    scf.if %2 {
      %cst_86 = arith.constant 0.000000e+00 : f32
      %78 = vector.broadcast %cst_86 : f32 to vector<80x128xf32>
      %c0_87 = arith.constant 0 : index
      %c0_88 = arith.constant 0 : index
      %79 = vector.load %arg7[%c0_87, %c0_88] : memref<80x128xf32, #tpu.memory_space<vmem>>, vector<80x128xf32>
      tpu.vector_store %arg7[%c0_87, %c0_88], %78 {strides = array<i32>} : memref<80x128xf32, #tpu.memory_space<vmem>>, vector<80x128xf32>,
    } else {
    }
    %c0 = arith.constant 0 : index
    %c0_1 = arith.constant 0 : index
    %c0_2 = arith.constant 0 : index
    %3 = vector.load %arg3[%c0, %c0_1, %c0_2] : memref<1x102x128xbf16, #tpu.memory_space<vmem>>, vector<1x80x128xbf16>
    %4 = vector.shape_cast %3 : vector<1x80x128xbf16> to vector<80x128xbf16>
    %c0_3 = arith.constant 0 : index
    %c0_4 = arith.constant 0 : index
    %5 = vector.load %arg7[%c0_3, %c0_4] : memref<80x128xf32, #tpu.memory_space<vmem>>, vector<80x128xf32>
    %c0_5 = arith.constant 0 : index
    %c0_6 = arith.constant 0 : index
    %c0_7 = arith.constant 0 : index
    %6 = vector.load %arg4[%c0_5, %c0_6, %c0_7] : memref<9x128x128xbf16, #tpu.memory_space<vmem>>, vector<1x128x128xbf16>
    %7 = vector.shape_cast %6 : vector<1x128x128xbf16> to vector<128x128xbf16>
    %cst = arith.constant dense<0.000000e+00> : vector<80x128xf32>
    %8 = tpu.matmul %4, %7, %cst {dimension_numbers = #tpu.dot_dimension_numbers<[1], [0], [0], [1], [0, 0, 1, 1], [], []>} : vector<80x128xbf16>, vector<128x128xbf16>, vector<80x128xf32> -> vector<80x128xf32>
    %9 = arith.addf %5, %8 : vector<80x128xf32>
    %c0_8 = arith.constant 0 : index
    %c0_9 = arith.constant 0 : index
    %10 = vector.load %arg7[%c0_8, %c0_9] : memref<80x128xf32, #tpu.memory_space<vmem>>, vector<80x128xf32>
    tpu.vector_store %arg7[%c0_8, %c0_9], %9 {strides = array<i32>} : memref<80x128xf32, #tpu.memory_space<vmem>>, vector<80x128xf32>,
    %c0_10 = arith.constant 0 : index
    %c1 = arith.constant 1 : index
    %c0_11 = arith.constant 0 : index
    %11 = vector.load %arg3[%c0_10, %c1, %c0_11] : memref<1x102x128xbf16, #tpu.memory_space<vmem>>, vector<1x80x128xbf16>
    %12 = vector.shape_cast %11 : vector<1x80x128xbf16> to vector<80x128xbf16>
    %c0_12 = arith.constant 0 : index
    %c0_13 = arith.constant 0 : index
    %13 = vector.load %arg7[%c0_12, %c0_13] : memref<80x128xf32, #tpu.memory_space<vmem>>, vector<80x128xf32>
    %c1_14 = arith.constant 1 : index
    %c0_15 = arith.constant 0 : index
    %c0_16 = arith.constant 0 : index
    %14 = vector.load %arg4[%c1_14, %c0_15, %c0_16] : memref<9x128x128xbf16, #tpu.memory_space<vmem>>, vector<1x128x128xbf16>
    %15 = vector.shape_cast %14 : vector<1x128x128xbf16> to vector<128x128xbf16>
    %cst_17 = arith.constant dense<0.000000e+00> : vector<80x128xf32>
    %16 = tpu.matmul %12, %15, %cst_17 {dimension_numbers = #tpu.dot_dimension_numbers<[1], [0], [0], [1], [0, 0, 1, 1], [], []>} : vector<80x128xbf16>, vector<128x128xbf16>, vector<80x128xf32> -> vector<80x128xf32>
    %17 = arith.addf %13, %16 : vector<80x128xf32>
    %c0_18 = arith.constant 0 : index
    %c0_19 = arith.constant 0 : index
    %18 = vector.load %arg7[%c0_18, %c0_19] : memref<80x128xf32, #tpu.memory_space<vmem>>, vector<80x128xf32>
    tpu.vector_store %arg7[%c0_18, %c0_19], %17 {strides = array<i32>} : memref<80x128xf32, #tpu.memory_space<vmem>>, vector<80x128xf32>,
    %c0_20 = arith.constant 0 : index
    %c2 = arith.constant 2 : index
    %c0_21 = arith.constant 0 : index
    %19 = vector.load %arg3[%c0_20, %c2, %c0_21] : memref<1x102x128xbf16, #tpu.memory_space<vmem>>, vector<1x80x128xbf16>
    %20 = vector.shape_cast %19 : vector<1x80x128xbf16> to vector<80x128xbf16>
    %c0_22 = arith.constant 0 : index
    %c0_23 = arith.constant 0 : index
    %21 = vector.load %arg7[%c0_22, %c0_23] : memref<80x128xf32, #tpu.memory_space<vmem>>, vector<80x128xf32>
    %c2_24 = arith.constant 2 : index
    %c0_25 = arith.constant 0 : index
    %c0_26 = arith.constant 0 : index
    %22 = vector.load %arg4[%c2_24, %c0_25, %c0_26] : memref<9x128x128xbf16, #tpu.memory_space<vmem>>, vector<1x128x128xbf16>
    %23 = vector.shape_cast %22 : vector<1x128x128xbf16> to vector<128x128xbf16>
    %cst_27 = arith.constant dense<0.000000e+00> : vector<80x128xf32>
    %24 = tpu.matmul %20, %23, %cst_27 {dimension_numbers = #tpu.dot_dimension_numbers<[1], [0], [0], [1], [0, 0, 1, 1], [], []>} : vector<80x128xbf16>, vector<128x128xbf16>, vector<80x128xf32> -> vector<80x128xf32>
    %25 = arith.addf %21, %24 : vector<80x128xf32>
    %c0_28 = arith.constant 0 : index
    %c0_29 = arith.constant 0 : index
    %26 = vector.load %arg7[%c0_28, %c0_29] : memref<80x128xf32, #tpu.memory_space<vmem>>, vector<80x128xf32>
    tpu.vector_store %arg7[%c0_28, %c0_29], %25 {strides = array<i32>} : memref<80x128xf32, #tpu.memory_space<vmem>>, vector<80x128xf32>,
    %c0_30 = arith.constant 0 : index
    %c10 = arith.constant 10 : index
    %c0_31 = arith.constant 0 : index
    %27 = vector.load %arg3[%c0_30, %c10, %c0_31] : memref<1x102x128xbf16, #tpu.memory_space<vmem>>, vector<1x80x128xbf16>
    %28 = vector.shape_cast %27 : vector<1x80x128xbf16> to vector<80x128xbf16>
    %c0_32 = arith.constant 0 : index
    %c0_33 = arith.constant 0 : index
    %29 = vector.load %arg7[%c0_32, %c0_33] : memref<80x128xf32, #tpu.memory_space<vmem>>, vector<80x128xf32>
    %c3 = arith.constant 3 : index
    %c0_34 = arith.constant 0 : index
    %c0_35 = arith.constant 0 : index
    %30 = vector.load %arg4[%c3, %c0_34, %c0_35] : memref<9x128x128xbf16, #tpu.memory_space<vmem>>, vector<1x128x128xbf16>
    %31 = vector.shape_cast %30 : vector<1x128x128xbf16> to vector<128x128xbf16>
    %cst_36 = arith.constant dense<0.000000e+00> : vector<80x128xf32>
    %32 = tpu.matmul %28, %31, %cst_36 {dimension_numbers = #tpu.dot_dimension_numbers<[1], [0], [0], [1], [0, 0, 1, 1], [], []>} : vector<80x128xbf16>, vector<128x128xbf16>, vector<80x128xf32> -> vector<80x128xf32>
    %33 = arith.addf %29, %32 : vector<80x128xf32>
    %c0_37 = arith.constant 0 : index
    %c0_38 = arith.constant 0 : index
    %34 = vector.load %arg7[%c0_37, %c0_38] : memref<80x128xf32, #tpu.memory_space<vmem>>, vector<80x128xf32>
    tpu.vector_store %arg7[%c0_37, %c0_38], %33 {strides = array<i32>} : memref<80x128xf32, #tpu.memory_space<vmem>>, vector<80x128xf32>,
    %c0_39 = arith.constant 0 : index
    %c11 = arith.constant 11 : index
    %c0_40 = arith.constant 0 : index
    %35 = vector.load %arg3[%c0_39, %c11, %c0_40] : memref<1x102x128xbf16, #tpu.memory_space<vmem>>, vector<1x80x128xbf16>
    %36 = vector.shape_cast %35 : vector<1x80x128xbf16> to vector<80x128xbf16>
    %c0_41 = arith.constant 0 : index
    %c0_42 = arith.constant 0 : index
    %37 = vector.load %arg7[%c0_41, %c0_42] : memref<80x128xf32, #tpu.memory_space<vmem>>, vector<80x128xf32>
    %c4 = arith.constant 4 : index
    %c0_43 = arith.constant 0 : index
    %c0_44 = arith.constant 0 : index
    %38 = vector.load %arg4[%c4, %c0_43, %c0_44] : memref<9x128x128xbf16, #tpu.memory_space<vmem>>, vector<1x128x128xbf16>
    %39 = vector.shape_cast %38 : vector<1x128x128xbf16> to vector<128x128xbf16>
    %cst_45 = arith.constant dense<0.000000e+00> : vector<80x128xf32>
    %40 = tpu.matmul %36, %39, %cst_45 {dimension_numbers = #tpu.dot_dimension_numbers<[1], [0], [0], [1], [0, 0, 1, 1], [], []>} : vector<80x128xbf16>, vector<128x128xbf16>, vector<80x128xf32> -> vector<80x128xf32>
    %41 = arith.addf %37, %40 : vector<80x128xf32>
    %c0_46 = arith.constant 0 : index
    %c0_47 = arith.constant 0 : index
    %42 = vector.load %arg7[%c0_46, %c0_47] : memref<80x128xf32, #tpu.memory_space<vmem>>, vector<80x128xf32>
    tpu.vector_store %arg7[%c0_46, %c0_47], %41 {strides = array<i32>} : memref<80x128xf32, #tpu.memory_space<vmem>>, vector<80x128xf32>,
    %c0_48 = arith.constant 0 : index
    %c12 = arith.constant 12 : index
    %c0_49 = arith.constant 0 : index
    %43 = vector.load %arg3[%c0_48, %c12, %c0_49] : memref<1x102x128xbf16, #tpu.memory_space<vmem>>, vector<1x80x128xbf16>
    %44 = vector.shape_cast %43 : vector<1x80x128xbf16> to vector<80x128xbf16>
    %c0_50 = arith.constant 0 : index
    %c0_51 = arith.constant 0 : index
    %45 = vector.load %arg7[%c0_50, %c0_51] : memref<80x128xf32, #tpu.memory_space<vmem>>, vector<80x128xf32>
    %c5 = arith.constant 5 : index
    %c0_52 = arith.constant 0 : index
    %c0_53 = arith.constant 0 : index
    %46 = vector.load %arg4[%c5, %c0_52, %c0_53] : memref<9x128x128xbf16, #tpu.memory_space<vmem>>, vector<1x128x128xbf16>
    %47 = vector.shape_cast %46 : vector<1x128x128xbf16> to vector<128x128xbf16>
    %cst_54 = arith.constant dense<0.000000e+00> : vector<80x128xf32>
    %48 = tpu.matmul %44, %47, %cst_54 {dimension_numbers = #tpu.dot_dimension_numbers<[1], [0], [0], [1], [0, 0, 1, 1], [], []>} : vector<80x128xbf16>, vector<128x128xbf16>, vector<80x128xf32> -> vector<80x128xf32>
    %49 = arith.addf %45, %48 : vector<80x128xf32>
    %c0_55 = arith.constant 0 : index
    %c0_56 = arith.constant 0 : index
    %50 = vector.load %arg7[%c0_55, %c0_56] : memref<80x128xf32, #tpu.memory_space<vmem>>, vector<80x128xf32>
    tpu.vector_store %arg7[%c0_55, %c0_56], %49 {strides = array<i32>} : memref<80x128xf32, #tpu.memory_space<vmem>>, vector<80x128xf32>,
    %c0_57 = arith.constant 0 : index
    %c20 = arith.constant 20 : index
    %c0_58 = arith.constant 0 : index
    %51 = vector.load %arg3[%c0_57, %c20, %c0_58] : memref<1x102x128xbf16, #tpu.memory_space<vmem>>, vector<1x80x128xbf16>
    %52 = vector.shape_cast %51 : vector<1x80x128xbf16> to vector<80x128xbf16>
    %c0_59 = arith.constant 0 : index
    %c0_60 = arith.constant 0 : index
    %53 = vector.load %arg7[%c0_59, %c0_60] : memref<80x128xf32, #tpu.memory_space<vmem>>, vector<80x128xf32>
    %c6 = arith.constant 6 : index
    %c0_61 = arith.constant 0 : index
    %c0_62 = arith.constant 0 : index
    %54 = vector.load %arg4[%c6, %c0_61, %c0_62] : memref<9x128x128xbf16, #tpu.memory_space<vmem>>, vector<1x128x128xbf16>
    %55 = vector.shape_cast %54 : vector<1x128x128xbf16> to vector<128x128xbf16>
    %cst_63 = arith.constant dense<0.000000e+00> : vector<80x128xf32>
    %56 = tpu.matmul %52, %55, %cst_63 {dimension_numbers = #tpu.dot_dimension_numbers<[1], [0], [0], [1], [0, 0, 1, 1], [], []>} : vector<80x128xbf16>, vector<128x128xbf16>, vector<80x128xf32> -> vector<80x128xf32>
    %57 = arith.addf %53, %56 : vector<80x128xf32>
    %c0_64 = arith.constant 0 : index
    %c0_65 = arith.constant 0 : index
    %58 = vector.load %arg7[%c0_64, %c0_65] : memref<80x128xf32, #tpu.memory_space<vmem>>, vector<80x128xf32>
    tpu.vector_store %arg7[%c0_64, %c0_65], %57 {strides = array<i32>} : memref<80x128xf32, #tpu.memory_space<vmem>>, vector<80x128xf32>,
    %c0_66 = arith.constant 0 : index
    %c21 = arith.constant 21 : index
    %c0_67 = arith.constant 0 : index
    %59 = vector.load %arg3[%c0_66, %c21, %c0_67] : memref<1x102x128xbf16, #tpu.memory_space<vmem>>, vector<1x80x128xbf16>
    %60 = vector.shape_cast %59 : vector<1x80x128xbf16> to vector<80x128xbf16>
    %c0_68 = arith.constant 0 : index
    %c0_69 = arith.constant 0 : index
    %61 = vector.load %arg7[%c0_68, %c0_69] : memref<80x128xf32, #tpu.memory_space<vmem>>, vector<80x128xf32>
    %c7 = arith.constant 7 : index
    %c0_70 = arith.constant 0 : index
    %c0_71 = arith.constant 0 : index
    %62 = vector.load %arg4[%c7, %c0_70, %c0_71] : memref<9x128x128xbf16, #tpu.memory_space<vmem>>, vector<1x128x128xbf16>
    %63 = vector.shape_cast %62 : vector<1x128x128xbf16> to vector<128x128xbf16>
    %cst_72 = arith.constant dense<0.000000e+00> : vector<80x128xf32>
    %64 = tpu.matmul %60, %63, %cst_72 {dimension_numbers = #tpu.dot_dimension_numbers<[1], [0], [0], [1], [0, 0, 1, 1], [], []>} : vector<80x128xbf16>, vector<128x128xbf16>, vector<80x128xf32> -> vector<80x128xf32>
    %65 = arith.addf %61, %64 : vector<80x128xf32>
    %c0_73 = arith.constant 0 : index
    %c0_74 = arith.constant 0 : index
    %66 = vector.load %arg7[%c0_73, %c0_74] : memref<80x128xf32, #tpu.memory_space<vmem>>, vector<80x128xf32>
    tpu.vector_store %arg7[%c0_73, %c0_74], %65 {strides = array<i32>} : memref<80x128xf32, #tpu.memory_space<vmem>>, vector<80x128xf32>,
    %c0_75 = arith.constant 0 : index
    %c22 = arith.constant 22 : index
    %c0_76 = arith.constant 0 : index
    %67 = vector.load %arg3[%c0_75, %c22, %c0_76] : memref<1x102x128xbf16, #tpu.memory_space<vmem>>, vector<1x80x128xbf16>
    %68 = vector.shape_cast %67 : vector<1x80x128xbf16> to vector<80x128xbf16>
    %c0_77 = arith.constant 0 : index
    %c0_78 = arith.constant 0 : index
    %69 = vector.load %arg7[%c0_77, %c0_78] : memref<80x128xf32, #tpu.memory_space<vmem>>, vector<80x128xf32>
    %c8 = arith.constant 8 : index
    %c0_79 = arith.constant 0 : index
    %c0_80 = arith.constant 0 : index
    %70 = vector.load %arg4[%c8, %c0_79, %c0_80] : memref<9x128x128xbf16, #tpu.memory_space<vmem>>, vector<1x128x128xbf16>
    %71 = vector.shape_cast %70 : vector<1x128x128xbf16> to vector<128x128xbf16>
    %cst_81 = arith.constant dense<0.000000e+00> : vector<80x128xf32>
    %72 = tpu.matmul %68, %71, %cst_81 {dimension_numbers = #tpu.dot_dimension_numbers<[1], [0], [0], [1], [0, 0, 1, 1], [], []>} : vector<80x128xbf16>, vector<128x128xbf16>, vector<80x128xf32> -> vector<80x128xf32>
    %73 = arith.addf %69, %72 : vector<80x128xf32>
    %c0_82 = arith.constant 0 : index
    %c0_83 = arith.constant 0 : index
    %74 = vector.load %arg7[%c0_82, %c0_83] : memref<80x128xf32, #tpu.memory_space<vmem>>, vector<80x128xf32>
    tpu.vector_store %arg7[%c0_82, %c0_83], %73 {strides = array<i32>} : memref<80x128xf32, #tpu.memory_space<vmem>>, vector<80x128xf32>,
    %c0_i32_84 = arith.constant 0 : i32
    %75 = arith.cmpi eq, %arg2, %c0_i32_84 : i32
    %76 = arith.extui %75 : i1 to i32
    %c0_i32_85 = arith.constant 0 : i32
    %77 = arith.cmpi ne, %76, %c0_i32_85 : i32
    scf.if %77 {
      %c0_86 = arith.constant 0 : index
      %c0_87 = arith.constant 0 : index
      %78 = vector.load %arg7[%c0_86, %c0_87] : memref<80x128xf32, #tpu.memory_space<vmem>>, vector<80x128xf32>
      %c0_88 = arith.constant 0 : index
      %c0_89 = arith.constant 0 : index
      %79 = vector.load %arg5[%c0_88, %c0_89] : memref<1x128xf32, #tpu.memory_space<vmem>>, vector<1x128xf32>
      %80 = vector.broadcast %79 : vector<1x128xf32> to vector<80x128xf32>
      %81 = arith.addf %78, %80 : vector<80x128xf32>
      %cst_90 = arith.constant 0.000000e+00 : f32
      %82 = vector.broadcast %cst_90 : f32 to vector<80x128xf32>
      %83 = arith.maximumf %81, %82 : vector<80x128xf32>
      %84 = arith.truncf %83 : vector<80x128xf32> to vector<80x128xbf16>
      %c0_91 = arith.constant 0 : index
      %c0_92 = arith.constant 0 : index
      %c0_93 = arith.constant 0 : index
      %85 = vector.load %arg6[%c0_91, %c0_92, %c0_93] : memref<1x80x128xbf16, #tpu.memory_space<vmem>>, vector<1x80x128xbf16>
      %86 = vector.shape_cast %85 : vector<1x80x128xbf16> to vector<80x128xbf16>
      %87 = vector.shape_cast %84 : vector<80x128xbf16> to vector<1x80x128xbf16>
      tpu.vector_store %arg6[%c0_91, %c0_92, %c0_93], %87 {strides = array<i32>} : memref<1x80x128xbf16, #tpu.memory_space<vmem>>, vector<1x80x128xbf16>,
    } else {
    }
    return
  }
  func.func @transform_0(%arg0: i32, %arg1: i32, %arg2: i32) -> (i32, i32, i32) {
    %c0_i32 = arith.constant 0 : i32
    %c0_i32_0 = arith.constant 0 : i32
    return %arg0, %c0_i32, %arg2 : i32, i32, i32
  }
  func.func @transform_1(%arg0: i32, %arg1: i32, %arg2: i32) -> (i32, i32, i32) {
    %c0_i32 = arith.constant 0 : i32
    %c0_i32_0 = arith.constant 0 : i32
    return %c0_i32, %arg2, %arg1 : i32, i32, i32
  }
  func.func @transform_2(%arg0: i32, %arg1: i32, %arg2: i32) -> (i32, i32) {
    %c0_i32 = arith.constant 0 : i32
    %c0_i32_0 = arith.constant 0 : i32
    return %c0_i32, %arg1 : i32, i32
  }
  func.func @transform_3(%arg0: i32, %arg1: i32, %arg2: i32) -> (i32, i32, i32) {
    %c0_i32 = arith.constant 0 : i32
    %c0_i32_0 = arith.constant 0 : i32
    return %arg0, %c0_i32, %arg1 : i32, i32, i32
  }
}

module attributes {stable_mosaic.version = 11 : i64} {
  func.func @_gemm_res_kernel(%arg0: i32, %arg1: i32, %arg2: i32, %arg3: memref<128x128xbf16, #tpu.memory_space<vmem>>, %arg4: memref<128x128xbf16, #tpu.memory_space<vmem>>, %arg5: memref<1x128xf32, #tpu.memory_space<vmem>>, %arg6: memref<128x128xbf16, #tpu.memory_space<vmem>>, %arg7: memref<128x128xbf16, #tpu.memory_space<vmem>>, %arg8: memref<128x128xf32, #tpu.memory_space<vmem>>) attributes {dimension_semantics = [#tpu.dimension_semantics<parallel>, #tpu.dimension_semantics<parallel>, #tpu.dimension_semantics<arbitrary>], iteration_bounds = array<i64: 1, 1, 1>, scalar_prefetch = 0 : i64, scratch_operands = 1 : i64, tpu.core_type = #tpu.core_type<tc>, window_params = [{transform_indices = @transform_0, window_bounds = array<i64: 128, 128>}, {transform_indices = @transform_1, window_bounds = array<i64: 128, 128>}, {transform_indices = @transform_2, window_bounds = array<i64: 1, 128>}, {transform_indices = @transform_3, window_bounds = array<i64: 128, 128>}, {transform_indices = @transform_4, window_bounds = array<i64: 128, 128>}]} {
    %c0_i32 = arith.constant 0 : i32
    %0 = arith.cmpi eq, %arg2, %c0_i32 : i32
    %1 = arith.extui %0 : i1 to i32
    %c0_i32_0 = arith.constant 0 : i32
    %2 = arith.cmpi ne, %1, %c0_i32_0 : i32
    scf.if %2 {
      %cst_10 = arith.constant 0.000000e+00 : f32
      %12 = vector.broadcast %cst_10 : f32 to vector<128x128xf32>
      %c0_11 = arith.constant 0 : index
      %c0_12 = arith.constant 0 : index
      %13 = vector.load %arg8[%c0_11, %c0_12] : memref<128x128xf32, #tpu.memory_space<vmem>>, vector<128x128xf32>
      tpu.vector_store %arg8[%c0_11, %c0_12], %12 {strides = array<i32>} : memref<128x128xf32, #tpu.memory_space<vmem>>, vector<128x128xf32>,
    } else {
    }
    %c0 = arith.constant 0 : index
    %c0_1 = arith.constant 0 : index
    %3 = vector.load %arg8[%c0, %c0_1] : memref<128x128xf32, #tpu.memory_space<vmem>>, vector<128x128xf32>
    %c0_2 = arith.constant 0 : index
    %c0_3 = arith.constant 0 : index
    %4 = vector.load %arg3[%c0_2, %c0_3] : memref<128x128xbf16, #tpu.memory_space<vmem>>, vector<128x128xbf16>
    %c0_4 = arith.constant 0 : index
    %c0_5 = arith.constant 0 : index
    %5 = vector.load %arg4[%c0_4, %c0_5] : memref<128x128xbf16, #tpu.memory_space<vmem>>, vector<128x128xbf16>
    %cst = arith.constant dense<0.000000e+00> : vector<128x128xf32>
    %6 = tpu.matmul %4, %5, %cst {dimension_numbers = #tpu.dot_dimension_numbers<[1], [0], [0], [1], [0, 0, 1, 1], [], []>} : vector<128x128xbf16>, vector<128x128xbf16>, vector<128x128xf32> -> vector<128x128xf32>
    %7 = arith.addf %3, %6 : vector<128x128xf32>
    %c0_6 = arith.constant 0 : index
    %c0_7 = arith.constant 0 : index
    %8 = vector.load %arg8[%c0_6, %c0_7] : memref<128x128xf32, #tpu.memory_space<vmem>>, vector<128x128xf32>
    tpu.vector_store %arg8[%c0_6, %c0_7], %7 {strides = array<i32>} : memref<128x128xf32, #tpu.memory_space<vmem>>, vector<128x128xf32>,
    %c0_i32_8 = arith.constant 0 : i32
    %9 = arith.cmpi eq, %arg2, %c0_i32_8 : i32
    %10 = arith.extui %9 : i1 to i32
    %c0_i32_9 = arith.constant 0 : i32
    %11 = arith.cmpi ne, %10, %c0_i32_9 : i32
    scf.if %11 {
      %c0_10 = arith.constant 0 : index
      %c0_11 = arith.constant 0 : index
      %12 = vector.load %arg8[%c0_10, %c0_11] : memref<128x128xf32, #tpu.memory_space<vmem>>, vector<128x128xf32>
      %c0_12 = arith.constant 0 : index
      %c0_13 = arith.constant 0 : index
      %13 = vector.load %arg5[%c0_12, %c0_13] : memref<1x128xf32, #tpu.memory_space<vmem>>, vector<1x128xf32>
      %14 = vector.broadcast %13 : vector<1x128xf32> to vector<128x128xf32>
      %15 = arith.addf %12, %14 : vector<128x128xf32>
      %c0_14 = arith.constant 0 : index
      %c0_15 = arith.constant 0 : index
      %16 = vector.load %arg6[%c0_14, %c0_15] : memref<128x128xbf16, #tpu.memory_space<vmem>>, vector<128x128xbf16>
      %17 = arith.extf %16 : vector<128x128xbf16> to vector<128x128xf32>
      %18 = arith.addf %15, %17 : vector<128x128xf32>
      %cst_16 = arith.constant 0.000000e+00 : f32
      %19 = vector.broadcast %cst_16 : f32 to vector<128x128xf32>
      %20 = arith.maximumf %18, %19 : vector<128x128xf32>
      %21 = arith.truncf %20 : vector<128x128xf32> to vector<128x128xbf16>
      %c0_17 = arith.constant 0 : index
      %c0_18 = arith.constant 0 : index
      %22 = vector.load %arg7[%c0_17, %c0_18] : memref<128x128xbf16, #tpu.memory_space<vmem>>, vector<128x128xbf16>
      tpu.vector_store %arg7[%c0_17, %c0_18], %21 {strides = array<i32>} : memref<128x128xbf16, #tpu.memory_space<vmem>>, vector<128x128xbf16>,
    } else {
    }
    return
  }
  func.func @transform_0(%arg0: i32, %arg1: i32, %arg2: i32) -> (i32, i32) {
    %c0_i32 = arith.constant 0 : i32
    return %arg0, %arg2 : i32, i32
  }
  func.func @transform_1(%arg0: i32, %arg1: i32, %arg2: i32) -> (i32, i32) {
    %c0_i32 = arith.constant 0 : i32
    return %arg2, %arg1 : i32, i32
  }
  func.func @transform_2(%arg0: i32, %arg1: i32, %arg2: i32) -> (i32, i32) {
    %c0_i32 = arith.constant 0 : i32
    %c0_i32_0 = arith.constant 0 : i32
    return %c0_i32, %arg1 : i32, i32
  }
  func.func @transform_3(%arg0: i32, %arg1: i32, %arg2: i32) -> (i32, i32) {
    %c0_i32 = arith.constant 0 : i32
    return %arg0, %arg1 : i32, i32
  }
  func.func @transform_4(%arg0: i32, %arg1: i32, %arg2: i32) -> (i32, i32) {
    %c0_i32 = arith.constant 0 : i32
    return %arg0, %arg1 : i32, i32
  }
}

module attributes {stable_mosaic.version = 11 : i64} {
  func.func @_gemm_kernel(%arg0: i32, %arg1: i32, %arg2: i32, %arg3: memref<32x128xbf16, #tpu.memory_space<vmem>>, %arg4: memref<128x128xbf16, #tpu.memory_space<vmem>>, %arg5: memref<1x128xf32, #tpu.memory_space<vmem>>, %arg6: memref<32x128xbf16, #tpu.memory_space<vmem>>, %arg7: memref<32x128xf32, #tpu.memory_space<vmem>>) attributes {dimension_semantics = [#tpu.dimension_semantics<parallel>, #tpu.dimension_semantics<parallel>, #tpu.dimension_semantics<arbitrary>], iteration_bounds = array<i64: 1, 1, 1>, scalar_prefetch = 0 : i64, scratch_operands = 1 : i64, tpu.core_type = #tpu.core_type<tc>, window_params = [{transform_indices = @transform_0, window_bounds = array<i64: 32, 128>}, {transform_indices = @transform_1, window_bounds = array<i64: 128, 128>}, {transform_indices = @transform_2, window_bounds = array<i64: 1, 128>}, {transform_indices = @transform_3, window_bounds = array<i64: 32, 128>}]} {
    %c0_i32 = arith.constant 0 : i32
    %0 = arith.cmpi eq, %arg2, %c0_i32 : i32
    %1 = arith.extui %0 : i1 to i32
    %c0_i32_0 = arith.constant 0 : i32
    %2 = arith.cmpi ne, %1, %c0_i32_0 : i32
    scf.if %2 {
      %cst_10 = arith.constant 0.000000e+00 : f32
      %12 = vector.broadcast %cst_10 : f32 to vector<32x128xf32>
      %c0_11 = arith.constant 0 : index
      %c0_12 = arith.constant 0 : index
      %13 = vector.load %arg7[%c0_11, %c0_12] : memref<32x128xf32, #tpu.memory_space<vmem>>, vector<32x128xf32>
      tpu.vector_store %arg7[%c0_11, %c0_12], %12 {strides = array<i32>} : memref<32x128xf32, #tpu.memory_space<vmem>>, vector<32x128xf32>,
    } else {
    }
    %c0 = arith.constant 0 : index
    %c0_1 = arith.constant 0 : index
    %3 = vector.load %arg7[%c0, %c0_1] : memref<32x128xf32, #tpu.memory_space<vmem>>, vector<32x128xf32>
    %c0_2 = arith.constant 0 : index
    %c0_3 = arith.constant 0 : index
    %4 = vector.load %arg3[%c0_2, %c0_3] : memref<32x128xbf16, #tpu.memory_space<vmem>>, vector<32x128xbf16>
    %c0_4 = arith.constant 0 : index
    %c0_5 = arith.constant 0 : index
    %5 = vector.load %arg4[%c0_4, %c0_5] : memref<128x128xbf16, #tpu.memory_space<vmem>>, vector<128x128xbf16>
    %cst = arith.constant dense<0.000000e+00> : vector<32x128xf32>
    %6 = tpu.matmul %4, %5, %cst {dimension_numbers = #tpu.dot_dimension_numbers<[1], [0], [0], [1], [0, 0, 1, 1], [], []>} : vector<32x128xbf16>, vector<128x128xbf16>, vector<32x128xf32> -> vector<32x128xf32>
    %7 = arith.addf %3, %6 : vector<32x128xf32>
    %c0_6 = arith.constant 0 : index
    %c0_7 = arith.constant 0 : index
    %8 = vector.load %arg7[%c0_6, %c0_7] : memref<32x128xf32, #tpu.memory_space<vmem>>, vector<32x128xf32>
    tpu.vector_store %arg7[%c0_6, %c0_7], %7 {strides = array<i32>} : memref<32x128xf32, #tpu.memory_space<vmem>>, vector<32x128xf32>,
    %c0_i32_8 = arith.constant 0 : i32
    %9 = arith.cmpi eq, %arg2, %c0_i32_8 : i32
    %10 = arith.extui %9 : i1 to i32
    %c0_i32_9 = arith.constant 0 : i32
    %11 = arith.cmpi ne, %10, %c0_i32_9 : i32
    scf.if %11 {
      %c0_10 = arith.constant 0 : index
      %c0_11 = arith.constant 0 : index
      %12 = vector.load %arg7[%c0_10, %c0_11] : memref<32x128xf32, #tpu.memory_space<vmem>>, vector<32x128xf32>
      %c0_12 = arith.constant 0 : index
      %c0_13 = arith.constant 0 : index
      %13 = vector.load %arg5[%c0_12, %c0_13] : memref<1x128xf32, #tpu.memory_space<vmem>>, vector<1x128xf32>
      %14 = vector.broadcast %13 : vector<1x128xf32> to vector<32x128xf32>
      %15 = arith.addf %12, %14 : vector<32x128xf32>
      %16 = arith.truncf %15 : vector<32x128xf32> to vector<32x128xbf16>
      %c0_14 = arith.constant 0 : index
      %c0_15 = arith.constant 0 : index
      %17 = vector.load %arg6[%c0_14, %c0_15] : memref<32x128xbf16, #tpu.memory_space<vmem>>, vector<32x128xbf16>
      tpu.vector_store %arg6[%c0_14, %c0_15], %16 {strides = array<i32>} : memref<32x128xbf16, #tpu.memory_space<vmem>>, vector<32x128xbf16>,
    } else {
    }
    return
  }
  func.func @transform_0(%arg0: i32, %arg1: i32, %arg2: i32) -> (i32, i32) {
    %c0_i32 = arith.constant 0 : i32
    return %arg0, %arg2 : i32, i32
  }
  func.func @transform_1(%arg0: i32, %arg1: i32, %arg2: i32) -> (i32, i32) {
    %c0_i32 = arith.constant 0 : i32
    return %arg2, %arg1 : i32, i32
  }
  func.func @transform_2(%arg0: i32, %arg1: i32, %arg2: i32) -> (i32, i32) {
    %c0_i32 = arith.constant 0 : i32
    %c0_i32_0 = arith.constant 0 : i32
    return %c0_i32, %arg1 : i32, i32
  }
  func.func @transform_3(%arg0: i32, %arg1: i32, %arg2: i32) -> (i32, i32) {
    %c0_i32 = arith.constant 0 : i32
    return %arg0, %arg1 : i32, i32
  }
}

module attributes {stable_mosaic.version = 11 : i64} {
  func.func @_gemm_kernel(%arg0: i32, %arg1: i32, %arg2: i32, %arg3: memref<32x128xbf16, #tpu.memory_space<vmem>>, %arg4: memref<128x128xbf16, #tpu.memory_space<vmem>>, %arg5: memref<1x128xf32, #tpu.memory_space<vmem>>, %arg6: memref<32x128xbf16, #tpu.memory_space<vmem>>, %arg7: memref<32x128xf32, #tpu.memory_space<vmem>>) attributes {dimension_semantics = [#tpu.dimension_semantics<parallel>, #tpu.dimension_semantics<parallel>, #tpu.dimension_semantics<arbitrary>], iteration_bounds = array<i64: 1, 1, 1>, scalar_prefetch = 0 : i64, scratch_operands = 1 : i64, tpu.core_type = #tpu.core_type<tc>, window_params = [{transform_indices = @transform_0, window_bounds = array<i64: 32, 128>}, {transform_indices = @transform_1, window_bounds = array<i64: 128, 128>}, {transform_indices = @transform_2, window_bounds = array<i64: 1, 128>}, {transform_indices = @transform_3, window_bounds = array<i64: 32, 128>}]} {
    %c0_i32 = arith.constant 0 : i32
    %0 = arith.cmpi eq, %arg2, %c0_i32 : i32
    %1 = arith.extui %0 : i1 to i32
    %c0_i32_0 = arith.constant 0 : i32
    %2 = arith.cmpi ne, %1, %c0_i32_0 : i32
    scf.if %2 {
      %cst_10 = arith.constant 0.000000e+00 : f32
      %12 = vector.broadcast %cst_10 : f32 to vector<32x128xf32>
      %c0_11 = arith.constant 0 : index
      %c0_12 = arith.constant 0 : index
      %13 = vector.load %arg7[%c0_11, %c0_12] : memref<32x128xf32, #tpu.memory_space<vmem>>, vector<32x128xf32>
      tpu.vector_store %arg7[%c0_11, %c0_12], %12 {strides = array<i32>} : memref<32x128xf32, #tpu.memory_space<vmem>>, vector<32x128xf32>,
    } else {
    }
    %c0 = arith.constant 0 : index
    %c0_1 = arith.constant 0 : index
    %3 = vector.load %arg7[%c0, %c0_1] : memref<32x128xf32, #tpu.memory_space<vmem>>, vector<32x128xf32>
    %c0_2 = arith.constant 0 : index
    %c0_3 = arith.constant 0 : index
    %4 = vector.load %arg3[%c0_2, %c0_3] : memref<32x128xbf16, #tpu.memory_space<vmem>>, vector<32x128xbf16>
    %c0_4 = arith.constant 0 : index
    %c0_5 = arith.constant 0 : index
    %5 = vector.load %arg4[%c0_4, %c0_5] : memref<128x128xbf16, #tpu.memory_space<vmem>>, vector<128x128xbf16>
    %cst = arith.constant dense<0.000000e+00> : vector<32x128xf32>
    %6 = tpu.matmul %4, %5, %cst {dimension_numbers = #tpu.dot_dimension_numbers<[1], [0], [0], [1], [0, 0, 1, 1], [], []>} : vector<32x128xbf16>, vector<128x128xbf16>, vector<32x128xf32> -> vector<32x128xf32>
    %7 = arith.addf %3, %6 : vector<32x128xf32>
    %c0_6 = arith.constant 0 : index
    %c0_7 = arith.constant 0 : index
    %8 = vector.load %arg7[%c0_6, %c0_7] : memref<32x128xf32, #tpu.memory_space<vmem>>, vector<32x128xf32>
    tpu.vector_store %arg7[%c0_6, %c0_7], %7 {strides = array<i32>} : memref<32x128xf32, #tpu.memory_space<vmem>>, vector<32x128xf32>,
    %c0_i32_8 = arith.constant 0 : i32
    %9 = arith.cmpi eq, %arg2, %c0_i32_8 : i32
    %10 = arith.extui %9 : i1 to i32
    %c0_i32_9 = arith.constant 0 : i32
    %11 = arith.cmpi ne, %10, %c0_i32_9 : i32
    scf.if %11 {
      %c0_10 = arith.constant 0 : index
      %c0_11 = arith.constant 0 : index
      %12 = vector.load %arg7[%c0_10, %c0_11] : memref<32x128xf32, #tpu.memory_space<vmem>>, vector<32x128xf32>
      %c0_12 = arith.constant 0 : index
      %c0_13 = arith.constant 0 : index
      %13 = vector.load %arg5[%c0_12, %c0_13] : memref<1x128xf32, #tpu.memory_space<vmem>>, vector<1x128xf32>
      %14 = vector.broadcast %13 : vector<1x128xf32> to vector<32x128xf32>
      %15 = arith.addf %12, %14 : vector<32x128xf32>
      %cst_14 = arith.constant 0.000000e+00 : f32
      %16 = vector.broadcast %cst_14 : f32 to vector<32x128xf32>
      %17 = arith.maximumf %15, %16 : vector<32x128xf32>
      %18 = arith.truncf %17 : vector<32x128xf32> to vector<32x128xbf16>
      %c0_15 = arith.constant 0 : index
      %c0_16 = arith.constant 0 : index
      %19 = vector.load %arg6[%c0_15, %c0_16] : memref<32x128xbf16, #tpu.memory_space<vmem>>, vector<32x128xbf16>
      tpu.vector_store %arg6[%c0_15, %c0_16], %18 {strides = array<i32>} : memref<32x128xbf16, #tpu.memory_space<vmem>>, vector<32x128xbf16>,
    } else {
    }
    return
  }
  func.func @transform_0(%arg0: i32, %arg1: i32, %arg2: i32) -> (i32, i32) {
    %c0_i32 = arith.constant 0 : i32
    return %arg0, %arg2 : i32, i32
  }
  func.func @transform_1(%arg0: i32, %arg1: i32, %arg2: i32) -> (i32, i32) {
    %c0_i32 = arith.constant 0 : i32
    return %arg2, %arg1 : i32, i32
  }
  func.func @transform_2(%arg0: i32, %arg1: i32, %arg2: i32) -> (i32, i32) {
    %c0_i32 = arith.constant 0 : i32
    %c0_i32_0 = arith.constant 0 : i32
    return %c0_i32, %arg1 : i32, i32
  }
  func.func @transform_3(%arg0: i32, %arg1: i32, %arg2: i32) -> (i32, i32) {
    %c0_i32 = arith.constant 0 : i32
    return %arg0, %arg1 : i32, i32
  }
}

module attributes {stable_mosaic.version = 11 : i64} {
  func.func @_conv3x3_kernel(%arg0: i32, %arg1: i32, %arg2: i32, %arg3: memref<1x38x128xbf16, #tpu.memory_space<vmem>>, %arg4: memref<9x128x128xbf16, #tpu.memory_space<vmem>>, %arg5: memref<1x128xf32, #tpu.memory_space<vmem>>, %arg6: memref<1x24x128xbf16, #tpu.memory_space<vmem>>, %arg7: memref<24x128xf32, #tpu.memory_space<vmem>>) attributes {dimension_semantics = [#tpu.dimension_semantics<parallel>, #tpu.dimension_semantics<parallel>, #tpu.dimension_semantics<arbitrary>], iteration_bounds = array<i64: 2, 1, 1>, scalar_prefetch = 0 : i64, scratch_operands = 1 : i64, tpu.core_type = #tpu.core_type<tc>, window_params = [{transform_indices = @transform_0, window_bounds = array<i64: 1, 38, 128>}, {transform_indices = @transform_1, window_bounds = array<i64: 9, 128, 128>}, {transform_indices = @transform_2, window_bounds = array<i64: 1, 128>}, {transform_indices = @transform_3, window_bounds = array<i64: 1, 24, 128>}]} {
    %c0_i32 = arith.constant 0 : i32
    %0 = arith.cmpi eq, %arg2, %c0_i32 : i32
    %1 = arith.extui %0 : i1 to i32
    %c0_i32_0 = arith.constant 0 : i32
    %2 = arith.cmpi ne, %1, %c0_i32_0 : i32
    scf.if %2 {
      %cst_89 = arith.constant 0.000000e+00 : f32
      %78 = vector.broadcast %cst_89 : f32 to vector<24x128xf32>
      %c0_90 = arith.constant 0 : index
      %c0_91 = arith.constant 0 : index
      %79 = vector.load %arg7[%c0_90, %c0_91] : memref<24x128xf32, #tpu.memory_space<vmem>>, vector<24x128xf32>
      tpu.vector_store %arg7[%c0_90, %c0_91], %78 {strides = array<i32>} : memref<24x128xf32, #tpu.memory_space<vmem>>, vector<24x128xf32>,
    } else {
    }
    %c0 = arith.constant 0 : index
    %c0_1 = arith.constant 0 : index
    %c0_2 = arith.constant 0 : index
    %3 = vector.load %arg3[%c0, %c0_1, %c0_2] : memref<1x38x128xbf16, #tpu.memory_space<vmem>>, vector<1x24x128xbf16>
    %4 = vector.shape_cast %3 : vector<1x24x128xbf16> to vector<24x128xbf16>
    %c0_3 = arith.constant 0 : index
    %c0_4 = arith.constant 0 : index
    %5 = vector.load %arg7[%c0_3, %c0_4] : memref<24x128xf32, #tpu.memory_space<vmem>>, vector<24x128xf32>
    %c0_5 = arith.constant 0 : index
    %c0_6 = arith.constant 0 : index
    %c0_7 = arith.constant 0 : index
    %6 = vector.load %arg4[%c0_5, %c0_6, %c0_7] : memref<9x128x128xbf16, #tpu.memory_space<vmem>>, vector<1x128x128xbf16>
    %7 = vector.shape_cast %6 : vector<1x128x128xbf16> to vector<128x128xbf16>
    %cst = arith.constant dense<0.000000e+00> : vector<24x128xf32>
    %8 = tpu.matmul %4, %7, %cst {dimension_numbers = #tpu.dot_dimension_numbers<[1], [0], [0], [1], [0, 0, 1, 1], [], []>} : vector<24x128xbf16>, vector<128x128xbf16>, vector<24x128xf32> -> vector<24x128xf32>
    %9 = arith.addf %5, %8 : vector<24x128xf32>
    %c0_8 = arith.constant 0 : index
    %c0_9 = arith.constant 0 : index
    %10 = vector.load %arg7[%c0_8, %c0_9] : memref<24x128xf32, #tpu.memory_space<vmem>>, vector<24x128xf32>
    tpu.vector_store %arg7[%c0_8, %c0_9], %9 {strides = array<i32>} : memref<24x128xf32, #tpu.memory_space<vmem>>, vector<24x128xf32>,
    %c0_10 = arith.constant 0 : index
    %c1 = arith.constant 1 : index
    %c0_11 = arith.constant 0 : index
    %11 = vector.load %arg3[%c0_10, %c1, %c0_11] : memref<1x38x128xbf16, #tpu.memory_space<vmem>>, vector<1x24x128xbf16>
    %12 = vector.shape_cast %11 : vector<1x24x128xbf16> to vector<24x128xbf16>
    %c0_12 = arith.constant 0 : index
    %c0_13 = arith.constant 0 : index
    %13 = vector.load %arg7[%c0_12, %c0_13] : memref<24x128xf32, #tpu.memory_space<vmem>>, vector<24x128xf32>
    %c1_14 = arith.constant 1 : index
    %c0_15 = arith.constant 0 : index
    %c0_16 = arith.constant 0 : index
    %14 = vector.load %arg4[%c1_14, %c0_15, %c0_16] : memref<9x128x128xbf16, #tpu.memory_space<vmem>>, vector<1x128x128xbf16>
    %15 = vector.shape_cast %14 : vector<1x128x128xbf16> to vector<128x128xbf16>
    %cst_17 = arith.constant dense<0.000000e+00> : vector<24x128xf32>
    %16 = tpu.matmul %12, %15, %cst_17 {dimension_numbers = #tpu.dot_dimension_numbers<[1], [0], [0], [1], [0, 0, 1, 1], [], []>} : vector<24x128xbf16>, vector<128x128xbf16>, vector<24x128xf32> -> vector<24x128xf32>
    %17 = arith.addf %13, %16 : vector<24x128xf32>
    %c0_18 = arith.constant 0 : index
    %c0_19 = arith.constant 0 : index
    %18 = vector.load %arg7[%c0_18, %c0_19] : memref<24x128xf32, #tpu.memory_space<vmem>>, vector<24x128xf32>
    tpu.vector_store %arg7[%c0_18, %c0_19], %17 {strides = array<i32>} : memref<24x128xf32, #tpu.memory_space<vmem>>, vector<24x128xf32>,
    %c0_20 = arith.constant 0 : index
    %c2 = arith.constant 2 : index
    %c0_21 = arith.constant 0 : index
    %19 = vector.load %arg3[%c0_20, %c2, %c0_21] : memref<1x38x128xbf16, #tpu.memory_space<vmem>>, vector<1x24x128xbf16>
    %20 = vector.shape_cast %19 : vector<1x24x128xbf16> to vector<24x128xbf16>
    %c0_22 = arith.constant 0 : index
    %c0_23 = arith.constant 0 : index
    %21 = vector.load %arg7[%c0_22, %c0_23] : memref<24x128xf32, #tpu.memory_space<vmem>>, vector<24x128xf32>
    %c2_24 = arith.constant 2 : index
    %c0_25 = arith.constant 0 : index
    %c0_26 = arith.constant 0 : index
    %22 = vector.load %arg4[%c2_24, %c0_25, %c0_26] : memref<9x128x128xbf16, #tpu.memory_space<vmem>>, vector<1x128x128xbf16>
    %23 = vector.shape_cast %22 : vector<1x128x128xbf16> to vector<128x128xbf16>
    %cst_27 = arith.constant dense<0.000000e+00> : vector<24x128xf32>
    %24 = tpu.matmul %20, %23, %cst_27 {dimension_numbers = #tpu.dot_dimension_numbers<[1], [0], [0], [1], [0, 0, 1, 1], [], []>} : vector<24x128xbf16>, vector<128x128xbf16>, vector<24x128xf32> -> vector<24x128xf32>
    %25 = arith.addf %21, %24 : vector<24x128xf32>
    %c0_28 = arith.constant 0 : index
    %c0_29 = arith.constant 0 : index
    %26 = vector.load %arg7[%c0_28, %c0_29] : memref<24x128xf32, #tpu.memory_space<vmem>>, vector<24x128xf32>
    tpu.vector_store %arg7[%c0_28, %c0_29], %25 {strides = array<i32>} : memref<24x128xf32, #tpu.memory_space<vmem>>, vector<24x128xf32>,
    %c0_30 = arith.constant 0 : index
    %c6 = arith.constant 6 : index
    %c0_31 = arith.constant 0 : index
    %27 = vector.load %arg3[%c0_30, %c6, %c0_31] : memref<1x38x128xbf16, #tpu.memory_space<vmem>>, vector<1x24x128xbf16>
    %28 = vector.shape_cast %27 : vector<1x24x128xbf16> to vector<24x128xbf16>
    %c0_32 = arith.constant 0 : index
    %c0_33 = arith.constant 0 : index
    %29 = vector.load %arg7[%c0_32, %c0_33] : memref<24x128xf32, #tpu.memory_space<vmem>>, vector<24x128xf32>
    %c3 = arith.constant 3 : index
    %c0_34 = arith.constant 0 : index
    %c0_35 = arith.constant 0 : index
    %30 = vector.load %arg4[%c3, %c0_34, %c0_35] : memref<9x128x128xbf16, #tpu.memory_space<vmem>>, vector<1x128x128xbf16>
    %31 = vector.shape_cast %30 : vector<1x128x128xbf16> to vector<128x128xbf16>
    %cst_36 = arith.constant dense<0.000000e+00> : vector<24x128xf32>
    %32 = tpu.matmul %28, %31, %cst_36 {dimension_numbers = #tpu.dot_dimension_numbers<[1], [0], [0], [1], [0, 0, 1, 1], [], []>} : vector<24x128xbf16>, vector<128x128xbf16>, vector<24x128xf32> -> vector<24x128xf32>
    %33 = arith.addf %29, %32 : vector<24x128xf32>
    %c0_37 = arith.constant 0 : index
    %c0_38 = arith.constant 0 : index
    %34 = vector.load %arg7[%c0_37, %c0_38] : memref<24x128xf32, #tpu.memory_space<vmem>>, vector<24x128xf32>
    tpu.vector_store %arg7[%c0_37, %c0_38], %33 {strides = array<i32>} : memref<24x128xf32, #tpu.memory_space<vmem>>, vector<24x128xf32>,
    %c0_39 = arith.constant 0 : index
    %c7 = arith.constant 7 : index
    %c0_40 = arith.constant 0 : index
    %35 = vector.load %arg3[%c0_39, %c7, %c0_40] : memref<1x38x128xbf16, #tpu.memory_space<vmem>>, vector<1x24x128xbf16>
    %36 = vector.shape_cast %35 : vector<1x24x128xbf16> to vector<24x128xbf16>
    %c0_41 = arith.constant 0 : index
    %c0_42 = arith.constant 0 : index
    %37 = vector.load %arg7[%c0_41, %c0_42] : memref<24x128xf32, #tpu.memory_space<vmem>>, vector<24x128xf32>
    %c4 = arith.constant 4 : index
    %c0_43 = arith.constant 0 : index
    %c0_44 = arith.constant 0 : index
    %38 = vector.load %arg4[%c4, %c0_43, %c0_44] : memref<9x128x128xbf16, #tpu.memory_space<vmem>>, vector<1x128x128xbf16>
    %39 = vector.shape_cast %38 : vector<1x128x128xbf16> to vector<128x128xbf16>
    %cst_45 = arith.constant dense<0.000000e+00> : vector<24x128xf32>
    %40 = tpu.matmul %36, %39, %cst_45 {dimension_numbers = #tpu.dot_dimension_numbers<[1], [0], [0], [1], [0, 0, 1, 1], [], []>} : vector<24x128xbf16>, vector<128x128xbf16>, vector<24x128xf32> -> vector<24x128xf32>
    %41 = arith.addf %37, %40 : vector<24x128xf32>
    %c0_46 = arith.constant 0 : index
    %c0_47 = arith.constant 0 : index
    %42 = vector.load %arg7[%c0_46, %c0_47] : memref<24x128xf32, #tpu.memory_space<vmem>>, vector<24x128xf32>
    tpu.vector_store %arg7[%c0_46, %c0_47], %41 {strides = array<i32>} : memref<24x128xf32, #tpu.memory_space<vmem>>, vector<24x128xf32>,
    %c0_48 = arith.constant 0 : index
    %c8 = arith.constant 8 : index
    %c0_49 = arith.constant 0 : index
    %43 = vector.load %arg3[%c0_48, %c8, %c0_49] : memref<1x38x128xbf16, #tpu.memory_space<vmem>>, vector<1x24x128xbf16>
    %44 = vector.shape_cast %43 : vector<1x24x128xbf16> to vector<24x128xbf16>
    %c0_50 = arith.constant 0 : index
    %c0_51 = arith.constant 0 : index
    %45 = vector.load %arg7[%c0_50, %c0_51] : memref<24x128xf32, #tpu.memory_space<vmem>>, vector<24x128xf32>
    %c5 = arith.constant 5 : index
    %c0_52 = arith.constant 0 : index
    %c0_53 = arith.constant 0 : index
    %46 = vector.load %arg4[%c5, %c0_52, %c0_53] : memref<9x128x128xbf16, #tpu.memory_space<vmem>>, vector<1x128x128xbf16>
    %47 = vector.shape_cast %46 : vector<1x128x128xbf16> to vector<128x128xbf16>
    %cst_54 = arith.constant dense<0.000000e+00> : vector<24x128xf32>
    %48 = tpu.matmul %44, %47, %cst_54 {dimension_numbers = #tpu.dot_dimension_numbers<[1], [0], [0], [1], [0, 0, 1, 1], [], []>} : vector<24x128xbf16>, vector<128x128xbf16>, vector<24x128xf32> -> vector<24x128xf32>
    %49 = arith.addf %45, %48 : vector<24x128xf32>
    %c0_55 = arith.constant 0 : index
    %c0_56 = arith.constant 0 : index
    %50 = vector.load %arg7[%c0_55, %c0_56] : memref<24x128xf32, #tpu.memory_space<vmem>>, vector<24x128xf32>
    tpu.vector_store %arg7[%c0_55, %c0_56], %49 {strides = array<i32>} : memref<24x128xf32, #tpu.memory_space<vmem>>, vector<24x128xf32>,
    %c0_57 = arith.constant 0 : index
    %c12 = arith.constant 12 : index
    %c0_58 = arith.constant 0 : index
    %51 = vector.load %arg3[%c0_57, %c12, %c0_58] : memref<1x38x128xbf16, #tpu.memory_space<vmem>>, vector<1x24x128xbf16>
    %52 = vector.shape_cast %51 : vector<1x24x128xbf16> to vector<24x128xbf16>
    %c0_59 = arith.constant 0 : index
    %c0_60 = arith.constant 0 : index
    %53 = vector.load %arg7[%c0_59, %c0_60] : memref<24x128xf32, #tpu.memory_space<vmem>>, vector<24x128xf32>
    %c6_61 = arith.constant 6 : index
    %c0_62 = arith.constant 0 : index
    %c0_63 = arith.constant 0 : index
    %54 = vector.load %arg4[%c6_61, %c0_62, %c0_63] : memref<9x128x128xbf16, #tpu.memory_space<vmem>>, vector<1x128x128xbf16>
    %55 = vector.shape_cast %54 : vector<1x128x128xbf16> to vector<128x128xbf16>
    %cst_64 = arith.constant dense<0.000000e+00> : vector<24x128xf32>
    %56 = tpu.matmul %52, %55, %cst_64 {dimension_numbers = #tpu.dot_dimension_numbers<[1], [0], [0], [1], [0, 0, 1, 1], [], []>} : vector<24x128xbf16>, vector<128x128xbf16>, vector<24x128xf32> -> vector<24x128xf32>
    %57 = arith.addf %53, %56 : vector<24x128xf32>
    %c0_65 = arith.constant 0 : index
    %c0_66 = arith.constant 0 : index
    %58 = vector.load %arg7[%c0_65, %c0_66] : memref<24x128xf32, #tpu.memory_space<vmem>>, vector<24x128xf32>
    tpu.vector_store %arg7[%c0_65, %c0_66], %57 {strides = array<i32>} : memref<24x128xf32, #tpu.memory_space<vmem>>, vector<24x128xf32>,
    %c0_67 = arith.constant 0 : index
    %c13 = arith.constant 13 : index
    %c0_68 = arith.constant 0 : index
    %59 = vector.load %arg3[%c0_67, %c13, %c0_68] : memref<1x38x128xbf16, #tpu.memory_space<vmem>>, vector<1x24x128xbf16>
    %60 = vector.shape_cast %59 : vector<1x24x128xbf16> to vector<24x128xbf16>
    %c0_69 = arith.constant 0 : index
    %c0_70 = arith.constant 0 : index
    %61 = vector.load %arg7[%c0_69, %c0_70] : memref<24x128xf32, #tpu.memory_space<vmem>>, vector<24x128xf32>
    %c7_71 = arith.constant 7 : index
    %c0_72 = arith.constant 0 : index
    %c0_73 = arith.constant 0 : index
    %62 = vector.load %arg4[%c7_71, %c0_72, %c0_73] : memref<9x128x128xbf16, #tpu.memory_space<vmem>>, vector<1x128x128xbf16>
    %63 = vector.shape_cast %62 : vector<1x128x128xbf16> to vector<128x128xbf16>
    %cst_74 = arith.constant dense<0.000000e+00> : vector<24x128xf32>
    %64 = tpu.matmul %60, %63, %cst_74 {dimension_numbers = #tpu.dot_dimension_numbers<[1], [0], [0], [1], [0, 0, 1, 1], [], []>} : vector<24x128xbf16>, vector<128x128xbf16>, vector<24x128xf32> -> vector<24x128xf32>
    %65 = arith.addf %61, %64 : vector<24x128xf32>
    %c0_75 = arith.constant 0 : index
    %c0_76 = arith.constant 0 : index
    %66 = vector.load %arg7[%c0_75, %c0_76] : memref<24x128xf32, #tpu.memory_space<vmem>>, vector<24x128xf32>
    tpu.vector_store %arg7[%c0_75, %c0_76], %65 {strides = array<i32>} : memref<24x128xf32, #tpu.memory_space<vmem>>, vector<24x128xf32>,
    %c0_77 = arith.constant 0 : index
    %c14 = arith.constant 14 : index
    %c0_78 = arith.constant 0 : index
    %67 = vector.load %arg3[%c0_77, %c14, %c0_78] : memref<1x38x128xbf16, #tpu.memory_space<vmem>>, vector<1x24x128xbf16>
    %68 = vector.shape_cast %67 : vector<1x24x128xbf16> to vector<24x128xbf16>
    %c0_79 = arith.constant 0 : index
    %c0_80 = arith.constant 0 : index
    %69 = vector.load %arg7[%c0_79, %c0_80] : memref<24x128xf32, #tpu.memory_space<vmem>>, vector<24x128xf32>
    %c8_81 = arith.constant 8 : index
    %c0_82 = arith.constant 0 : index
    %c0_83 = arith.constant 0 : index
    %70 = vector.load %arg4[%c8_81, %c0_82, %c0_83] : memref<9x128x128xbf16, #tpu.memory_space<vmem>>, vector<1x128x128xbf16>
    %71 = vector.shape_cast %70 : vector<1x128x128xbf16> to vector<128x128xbf16>
    %cst_84 = arith.constant dense<0.000000e+00> : vector<24x128xf32>
    %72 = tpu.matmul %68, %71, %cst_84 {dimension_numbers = #tpu.dot_dimension_numbers<[1], [0], [0], [1], [0, 0, 1, 1], [], []>} : vector<24x128xbf16>, vector<128x128xbf16>, vector<24x128xf32> -> vector<24x128xf32>
    %73 = arith.addf %69, %72 : vector<24x128xf32>
    %c0_85 = arith.constant 0 : index
    %c0_86 = arith.constant 0 : index
    %74 = vector.load %arg7[%c0_85, %c0_86] : memref<24x128xf32, #tpu.memory_space<vmem>>, vector<24x128xf32>
    tpu.vector_store %arg7[%c0_85, %c0_86], %73 {strides = array<i32>} : memref<24x128xf32, #tpu.memory_space<vmem>>, vector<24x128xf32>,
    %c0_i32_87 = arith.constant 0 : i32
    %75 = arith.cmpi eq, %arg2, %c0_i32_87 : i32
    %76 = arith.extui %75 : i1 to i32
    %c0_i32_88 = arith.constant 0 : i32
    %77 = arith.cmpi ne, %76, %c0_i32_88 : i32
    scf.if %77 {
      %c0_89 = arith.constant 0 : index
      %c0_90 = arith.constant 0 : index
      %78 = vector.load %arg7[%c0_89, %c0_90] : memref<24x128xf32, #tpu.memory_space<vmem>>, vector<24x128xf32>
      %c0_91 = arith.constant 0 : index
      %c0_92 = arith.constant 0 : index
      %79 = vector.load %arg5[%c0_91, %c0_92] : memref<1x128xf32, #tpu.memory_space<vmem>>, vector<1x128xf32>
      %80 = vector.broadcast %79 : vector<1x128xf32> to vector<24x128xf32>
      %81 = arith.addf %78, %80 : vector<24x128xf32>
      %cst_93 = arith.constant 0.000000e+00 : f32
      %82 = vector.broadcast %cst_93 : f32 to vector<24x128xf32>
      %83 = arith.maximumf %81, %82 : vector<24x128xf32>
      %84 = arith.truncf %83 : vector<24x128xf32> to vector<24x128xbf16>
      %c0_94 = arith.constant 0 : index
      %c0_95 = arith.constant 0 : index
      %c0_96 = arith.constant 0 : index
      %85 = vector.load %arg6[%c0_94, %c0_95, %c0_96] : memref<1x24x128xbf16, #tpu.memory_space<vmem>>, vector<1x24x128xbf16>
      %86 = vector.shape_cast %85 : vector<1x24x128xbf16> to vector<24x128xbf16>
      %87 = vector.shape_cast %84 : vector<24x128xbf16> to vector<1x24x128xbf16>
      tpu.vector_store %arg6[%c0_94, %c0_95, %c0_96], %87 {strides = array<i32>} : memref<1x24x128xbf16, #tpu.memory_space<vmem>>, vector<1x24x128xbf16>,
    } else {
    }
    return
  }
  func.func @transform_0(%arg0: i32, %arg1: i32, %arg2: i32) -> (i32, i32, i32) {
    %c0_i32 = arith.constant 0 : i32
    %c0_i32_0 = arith.constant 0 : i32
    return %arg0, %c0_i32, %arg2 : i32, i32, i32
  }
  func.func @transform_1(%arg0: i32, %arg1: i32, %arg2: i32) -> (i32, i32, i32) {
    %c0_i32 = arith.constant 0 : i32
    %c0_i32_0 = arith.constant 0 : i32
    return %c0_i32, %arg2, %arg1 : i32, i32, i32
  }
  func.func @transform_2(%arg0: i32, %arg1: i32, %arg2: i32) -> (i32, i32) {
    %c0_i32 = arith.constant 0 : i32
    %c0_i32_0 = arith.constant 0 : i32
    return %c0_i32, %arg1 : i32, i32
  }
  func.func @transform_3(%arg0: i32, %arg1: i32, %arg2: i32) -> (i32, i32, i32) {
    %c0_i32 = arith.constant 0 : i32
    %c0_i32_0 = arith.constant 0 : i32
    return %arg0, %c0_i32, %arg1 : i32, i32, i32
  }
}

module attributes {stable_mosaic.version = 11 : i64} {
  func.func @_gemm_res_kernel(%arg0: i32, %arg1: i32, %arg2: i32, %arg3: memref<32x128xbf16, #tpu.memory_space<vmem>>, %arg4: memref<128x128xbf16, #tpu.memory_space<vmem>>, %arg5: memref<1x128xf32, #tpu.memory_space<vmem>>, %arg6: memref<32x128xbf16, #tpu.memory_space<vmem>>, %arg7: memref<32x128xbf16, #tpu.memory_space<vmem>>, %arg8: memref<32x128xf32, #tpu.memory_space<vmem>>) attributes {dimension_semantics = [#tpu.dimension_semantics<parallel>, #tpu.dimension_semantics<parallel>, #tpu.dimension_semantics<arbitrary>], iteration_bounds = array<i64: 1, 1, 1>, scalar_prefetch = 0 : i64, scratch_operands = 1 : i64, tpu.core_type = #tpu.core_type<tc>, window_params = [{transform_indices = @transform_0, window_bounds = array<i64: 32, 128>}, {transform_indices = @transform_1, window_bounds = array<i64: 128, 128>}, {transform_indices = @transform_2, window_bounds = array<i64: 1, 128>}, {transform_indices = @transform_3, window_bounds = array<i64: 32, 128>}, {transform_indices = @transform_4, window_bounds = array<i64: 32, 128>}]} {
    %c0_i32 = arith.constant 0 : i32
    %0 = arith.cmpi eq, %arg2, %c0_i32 : i32
    %1 = arith.extui %0 : i1 to i32
    %c0_i32_0 = arith.constant 0 : i32
    %2 = arith.cmpi ne, %1, %c0_i32_0 : i32
    scf.if %2 {
      %cst_10 = arith.constant 0.000000e+00 : f32
      %12 = vector.broadcast %cst_10 : f32 to vector<32x128xf32>
      %c0_11 = arith.constant 0 : index
      %c0_12 = arith.constant 0 : index
      %13 = vector.load %arg8[%c0_11, %c0_12] : memref<32x128xf32, #tpu.memory_space<vmem>>, vector<32x128xf32>
      tpu.vector_store %arg8[%c0_11, %c0_12], %12 {strides = array<i32>} : memref<32x128xf32, #tpu.memory_space<vmem>>, vector<32x128xf32>,
    } else {
    }
    %c0 = arith.constant 0 : index
    %c0_1 = arith.constant 0 : index
    %3 = vector.load %arg8[%c0, %c0_1] : memref<32x128xf32, #tpu.memory_space<vmem>>, vector<32x128xf32>
    %c0_2 = arith.constant 0 : index
    %c0_3 = arith.constant 0 : index
    %4 = vector.load %arg3[%c0_2, %c0_3] : memref<32x128xbf16, #tpu.memory_space<vmem>>, vector<32x128xbf16>
    %c0_4 = arith.constant 0 : index
    %c0_5 = arith.constant 0 : index
    %5 = vector.load %arg4[%c0_4, %c0_5] : memref<128x128xbf16, #tpu.memory_space<vmem>>, vector<128x128xbf16>
    %cst = arith.constant dense<0.000000e+00> : vector<32x128xf32>
    %6 = tpu.matmul %4, %5, %cst {dimension_numbers = #tpu.dot_dimension_numbers<[1], [0], [0], [1], [0, 0, 1, 1], [], []>} : vector<32x128xbf16>, vector<128x128xbf16>, vector<32x128xf32> -> vector<32x128xf32>
    %7 = arith.addf %3, %6 : vector<32x128xf32>
    %c0_6 = arith.constant 0 : index
    %c0_7 = arith.constant 0 : index
    %8 = vector.load %arg8[%c0_6, %c0_7] : memref<32x128xf32, #tpu.memory_space<vmem>>, vector<32x128xf32>
    tpu.vector_store %arg8[%c0_6, %c0_7], %7 {strides = array<i32>} : memref<32x128xf32, #tpu.memory_space<vmem>>, vector<32x128xf32>,
    %c0_i32_8 = arith.constant 0 : i32
    %9 = arith.cmpi eq, %arg2, %c0_i32_8 : i32
    %10 = arith.extui %9 : i1 to i32
    %c0_i32_9 = arith.constant 0 : i32
    %11 = arith.cmpi ne, %10, %c0_i32_9 : i32
    scf.if %11 {
      %c0_10 = arith.constant 0 : index
      %c0_11 = arith.constant 0 : index
      %12 = vector.load %arg8[%c0_10, %c0_11] : memref<32x128xf32, #tpu.memory_space<vmem>>, vector<32x128xf32>
      %c0_12 = arith.constant 0 : index
      %c0_13 = arith.constant 0 : index
      %13 = vector.load %arg5[%c0_12, %c0_13] : memref<1x128xf32, #tpu.memory_space<vmem>>, vector<1x128xf32>
      %14 = vector.broadcast %13 : vector<1x128xf32> to vector<32x128xf32>
      %15 = arith.addf %12, %14 : vector<32x128xf32>
      %c0_14 = arith.constant 0 : index
      %c0_15 = arith.constant 0 : index
      %16 = vector.load %arg6[%c0_14, %c0_15] : memref<32x128xbf16, #tpu.memory_space<vmem>>, vector<32x128xbf16>
      %17 = arith.extf %16 : vector<32x128xbf16> to vector<32x128xf32>
      %18 = arith.addf %15, %17 : vector<32x128xf32>
      %cst_16 = arith.constant 0.000000e+00 : f32
      %19 = vector.broadcast %cst_16 : f32 to vector<32x128xf32>
      %20 = arith.maximumf %18, %19 : vector<32x128xf32>
      %21 = arith.truncf %20 : vector<32x128xf32> to vector<32x128xbf16>
      %c0_17 = arith.constant 0 : index
      %c0_18 = arith.constant 0 : index
      %22 = vector.load %arg7[%c0_17, %c0_18] : memref<32x128xbf16, #tpu.memory_space<vmem>>, vector<32x128xbf16>
      tpu.vector_store %arg7[%c0_17, %c0_18], %21 {strides = array<i32>} : memref<32x128xbf16, #tpu.memory_space<vmem>>, vector<32x128xbf16>,
    } else {
    }
    return
  }
  func.func @transform_0(%arg0: i32, %arg1: i32, %arg2: i32) -> (i32, i32) {
    %c0_i32 = arith.constant 0 : i32
    return %arg0, %arg2 : i32, i32
  }
  func.func @transform_1(%arg0: i32, %arg1: i32, %arg2: i32) -> (i32, i32) {
    %c0_i32 = arith.constant 0 : i32
    return %arg2, %arg1 : i32, i32
  }
  func.func @transform_2(%arg0: i32, %arg1: i32, %arg2: i32) -> (i32, i32) {
    %c0_i32 = arith.constant 0 : i32
    %c0_i32_0 = arith.constant 0 : i32
    return %c0_i32, %arg1 : i32, i32
  }
  func.func @transform_3(%arg0: i32, %arg1: i32, %arg2: i32) -> (i32, i32) {
    %c0_i32 = arith.constant 0 : i32
    return %arg0, %arg1 : i32, i32
  }
  func.func @transform_4(%arg0: i32, %arg1: i32, %arg2: i32) -> (i32, i32) {
    %c0_i32 = arith.constant 0 : i32
    return %arg0, %arg1 : i32, i32
  }
}

module attributes {stable_mosaic.version = 11 : i64} {
  func.func @_gap_kernel(%arg0: i32, %arg1: memref<2x16x128xbf16, #tpu.memory_space<vmem>>, %arg2: memref<2x128xbf16, #tpu.memory_space<vmem>>) attributes {dimension_semantics = [#tpu.dimension_semantics<parallel>], iteration_bounds = array<i64: 1>, scalar_prefetch = 0 : i64, scratch_operands = 0 : i64, tpu.core_type = #tpu.core_type<tc>, window_params = [{transform_indices = @transform_0, window_bounds = array<i64: 2, 16, 128>}, {transform_indices = @transform_1, window_bounds = array<i64: 2, 128>}]} {
    %c0 = arith.constant 0 : index
    %c0_0 = arith.constant 0 : index
    %c0_1 = arith.constant 0 : index
    %0 = vector.load %arg1[%c0, %c0_0, %c0_1] : memref<2x16x128xbf16, #tpu.memory_space<vmem>>, vector<2x16x128xbf16>
    %1 = arith.extf %0 : vector<2x16x128xbf16> to vector<2x16x128xf32>
    %cst = arith.constant dense<0.000000e+00> : vector<2x128xf32>
    %2 = vector.multi_reduction <add>, %1, %cst [1] : vector<2x16x128xf32> to vector<2x128xf32>
    %cst_2 = arith.constant 1.600000e+01 : f32
    %3 = vector.broadcast %cst_2 : f32 to vector<2x128xf32>
    %4 = arith.divf %2, %3 : vector<2x128xf32>
    %5 = arith.truncf %4 : vector<2x128xf32> to vector<2x128xbf16>
    %c0_3 = arith.constant 0 : index
    %c0_4 = arith.constant 0 : index
    %6 = vector.load %arg2[%c0_3, %c0_4] : memref<2x128xbf16, #tpu.memory_space<vmem>>, vector<2x128xbf16>
    tpu.vector_store %arg2[%c0_3, %c0_4], %5 {strides = array<i32>} : memref<2x128xbf16, #tpu.memory_space<vmem>>, vector<2x128xbf16>,
    return
  }
  func.func @transform_0(%arg0: i32) -> (i32, i32, i32) {
    %c0_i32 = arith.constant 0 : i32
    %c0_i32_0 = arith.constant 0 : i32
    %c0_i32_1 = arith.constant 0 : i32
    return %c0_i32, %c0_i32_0, %arg0 : i32, i32, i32
  }
  func.func @transform_1(%arg0: i32) -> (i32, i32) {
    %c0_i32 = arith.constant 0 : i32
    %c0_i32_0 = arith.constant 0 : i32
    return %c0_i32, %arg0 : i32, i32
  }
}

module attributes {stable_mosaic.version = 11 : i64} {
  func.func @_gemm_kernel(%arg0: i32, %arg1: i32, %arg2: i32, %arg3: memref<16x128xbf16, #tpu.memory_space<vmem>>, %arg4: memref<128x128xbf16, #tpu.memory_space<vmem>>, %arg5: memref<1x128xf32, #tpu.memory_space<vmem>>, %arg6: memref<16x128xf32, #tpu.memory_space<vmem>>, %arg7: memref<16x128xf32, #tpu.memory_space<vmem>>) attributes {dimension_semantics = [#tpu.dimension_semantics<parallel>, #tpu.dimension_semantics<parallel>, #tpu.dimension_semantics<arbitrary>], iteration_bounds = array<i64: 1, 1, 1>, scalar_prefetch = 0 : i64, scratch_operands = 1 : i64, tpu.core_type = #tpu.core_type<tc>, window_params = [{transform_indices = @transform_0, window_bounds = array<i64: 16, 128>}, {transform_indices = @transform_1, window_bounds = array<i64: 128, 128>}, {transform_indices = @transform_2, window_bounds = array<i64: 1, 128>}, {transform_indices = @transform_3, window_bounds = array<i64: 16, 128>}]} {
    %c0_i32 = arith.constant 0 : i32
    %0 = arith.cmpi eq, %arg2, %c0_i32 : i32
    %1 = arith.extui %0 : i1 to i32
    %c0_i32_0 = arith.constant 0 : i32
    %2 = arith.cmpi ne, %1, %c0_i32_0 : i32
    scf.if %2 {
      %cst_10 = arith.constant 0.000000e+00 : f32
      %12 = vector.broadcast %cst_10 : f32 to vector<16x128xf32>
      %c0_11 = arith.constant 0 : index
      %c0_12 = arith.constant 0 : index
      %13 = vector.load %arg7[%c0_11, %c0_12] : memref<16x128xf32, #tpu.memory_space<vmem>>, vector<16x128xf32>
      tpu.vector_store %arg7[%c0_11, %c0_12], %12 {strides = array<i32>} : memref<16x128xf32, #tpu.memory_space<vmem>>, vector<16x128xf32>,
    } else {
    }
    %c0 = arith.constant 0 : index
    %c0_1 = arith.constant 0 : index
    %3 = vector.load %arg7[%c0, %c0_1] : memref<16x128xf32, #tpu.memory_space<vmem>>, vector<16x128xf32>
    %c0_2 = arith.constant 0 : index
    %c0_3 = arith.constant 0 : index
    %4 = vector.load %arg3[%c0_2, %c0_3] : memref<16x128xbf16, #tpu.memory_space<vmem>>, vector<16x128xbf16>
    %c0_4 = arith.constant 0 : index
    %c0_5 = arith.constant 0 : index
    %5 = vector.load %arg4[%c0_4, %c0_5] : memref<128x128xbf16, #tpu.memory_space<vmem>>, vector<128x128xbf16>
    %cst = arith.constant dense<0.000000e+00> : vector<16x128xf32>
    %6 = tpu.matmul %4, %5, %cst {dimension_numbers = #tpu.dot_dimension_numbers<[1], [0], [0], [1], [0, 0, 1, 1], [], []>} : vector<16x128xbf16>, vector<128x128xbf16>, vector<16x128xf32> -> vector<16x128xf32>
    %7 = arith.addf %3, %6 : vector<16x128xf32>
    %c0_6 = arith.constant 0 : index
    %c0_7 = arith.constant 0 : index
    %8 = vector.load %arg7[%c0_6, %c0_7] : memref<16x128xf32, #tpu.memory_space<vmem>>, vector<16x128xf32>
    tpu.vector_store %arg7[%c0_6, %c0_7], %7 {strides = array<i32>} : memref<16x128xf32, #tpu.memory_space<vmem>>, vector<16x128xf32>,
    %c0_i32_8 = arith.constant 0 : i32
    %9 = arith.cmpi eq, %arg2, %c0_i32_8 : i32
    %10 = arith.extui %9 : i1 to i32
    %c0_i32_9 = arith.constant 0 : i32
    %11 = arith.cmpi ne, %10, %c0_i32_9 : i32
    scf.if %11 {
      %c0_10 = arith.constant 0 : index
      %c0_11 = arith.constant 0 : index
      %12 = vector.load %arg7[%c0_10, %c0_11] : memref<16x128xf32, #tpu.memory_space<vmem>>, vector<16x128xf32>
      %c0_12 = arith.constant 0 : index
      %c0_13 = arith.constant 0 : index
      %13 = vector.load %arg5[%c0_12, %c0_13] : memref<1x128xf32, #tpu.memory_space<vmem>>, vector<1x128xf32>
      %14 = vector.broadcast %13 : vector<1x128xf32> to vector<16x128xf32>
      %15 = arith.addf %12, %14 : vector<16x128xf32>
      %c0_14 = arith.constant 0 : index
      %c0_15 = arith.constant 0 : index
      %16 = vector.load %arg6[%c0_14, %c0_15] : memref<16x128xf32, #tpu.memory_space<vmem>>, vector<16x128xf32>
      tpu.vector_store %arg6[%c0_14, %c0_15], %15 {strides = array<i32>} : memref<16x128xf32, #tpu.memory_space<vmem>>, vector<16x128xf32>,
    } else {
    }
    return
  }
  func.func @transform_0(%arg0: i32, %arg1: i32, %arg2: i32) -> (i32, i32) {
    %c0_i32 = arith.constant 0 : i32
    return %arg0, %arg2 : i32, i32
  }
  func.func @transform_1(%arg0: i32, %arg1: i32, %arg2: i32) -> (i32, i32) {
    %c0_i32 = arith.constant 0 : i32
    return %arg2, %arg1 : i32, i32
  }
  func.func @transform_2(%arg0: i32, %arg1: i32, %arg2: i32) -> (i32, i32) {
    %c0_i32 = arith.constant 0 : i32
    %c0_i32_0 = arith.constant 0 : i32
    return %c0_i32, %arg1 : i32, i32
  }
  func.func @transform_3(%arg0: i32, %arg1: i32, %arg2: i32) -> (i32, i32) {
    %c0_i32 = arith.constant 0 : i32
    return %arg0, %arg1 : i32, i32
  }
}

</mosaic_0001>

<bundles_post_ra>
// kernel: _lambda_.16
= control target key start
LH: loop header
LB: loop body
LE: loop exit
PB: predicated region body
PF: predicated region fallthrough
CT: control target
= control target key end

     0   :  { %s1499_s12 = smov 0   ;;  %s1501_s13 = smov 0   ;;  %s1636_s0 = inlined_call_operand.vmem [shape: bf16[512,128], index: 0, kind: input, shape index: {}]   ;;  %s1637_s1 = inlined_call_operand.vmem [shape: bf16[128,128], index: 1, kind: input, shape index: {}]   ;;  %s1638_s2 = inlined_call_operand.vmem [shape: f32[1,128], index: 2, kind: input, shape index: {}]   ;;  %s1639_s3 = inlined_call_operand.vmem [shape: bf16[512,128], index: 3, kind: output, shape index: {}]  }
   0x1   :  { %s1503_s14 = smov 0  }
   0x2 LB: > { %s32_s15 = sadd.s32 1, %s1473_s13  ;;  %p1128_p0 = scmp.ge.s32.totalorder %s1477_s14, 1  ;;  %s1477_s14 = sphi %s1503_s14, %s13_s14   ;;  %s1473_s13 = sphi %s1501_s13, %s1641_s13   ;;  %s1469_s12 = sphi %s1499_s12, %s1640_s12  }
   0x3   : > { %p34_p1 = scmp.ge.s32.totalorder %s32_s15, 2  ;;  %p188_p2 = scmp.lt.s32.totalorder %s1477_s14, 3 }
   0x5   : > { %s1643_s15 = smov (%p34_p1, %s32_s15), 0  ;;  %p189_p3 = pnand %p1128_p0, %p188_p2 }
   0x6   : > { %s1129_s18 = sshll.u32 (!%p189_p3), %s1469_s12, 5 }
   0x7   : > { %192 = sbr.rel (%p189_p3) target bundleno = 275 (0x113), region = 32  ;;  %p230_p4 = scmp.lt.s32.totalorder (!%p189_p3), %s1129_s18, 63 }
   0xc   : > { %v1431_v0 = vld [vmem:[%s1637_s1 + $0x38] sm:$0xff]   ;;  %v1432_v1 = vld [vmem:[%s1637_s1 + $0x30] sm:$0xff]   ;;  %s1645_s18 = smov (!%p230_p4, %s1129_s18), 63  ;;  %v1433_v2 = vld [vmem:[%s1637_s1 + $0x28] sm:$0xff]  }
   0xd   : > { %1343 = vmatprep.subr.bf16.mxu0 %v1431_v0  ;;  %1391 = vmatprep.subr.bf16.mxu1 %v1431_v0  ;;  %s1130_s23 = sshll.u32 %s1645_s18, 2  ;;  %v1434_v3 = vld [vmem:[%s1637_s1 + $0x20] sm:$0xff]   ;;  %v1435_v6 = vld [vmem:[%s1637_s1 + $0x18] sm:$0xff]   ;;  %v1436_v7 = vld [vmem:[%s1637_s1 + $0x10] sm:$0xff]  }
   0xe   : > { %1344 = vmatpush3.bf16.msra.mxu0 %v1431_v0  ;;  %1399 = vmatpush3.bf16.msra.mxu1 %v1431_v0  ;;  %s1534_s26 = scalar_lea.vmem %s1636_s0, %s1130_s23  ;;  %v1437_v8 = vld [vmem:[%s1637_s1 + $0x8] sm:$0xff]   ;;  %v1438_v9 = vld [vmem:[%s1637_s1] sm:$0xff]   ;;  %s1585_s17 = scalar_lea.vmem %s1639_s3, %s1130_s23 }
   0xf   : > { %1345 = vmatprep.subr.bf16.mxu0 %v1432_v1  ;;  %1392 = vmatprep.subr.bf16.mxu1 %v1432_v1  ;;  %v1439_v4 = vld [vmem:[%s1534_s26] sm:$0xff]   ;;  %v1441_v10 = vld [vmem:[%s1534_s26 + $0x8] sm:$0xff]   ;;  %v1443_v12 = vld [vmem:[%s1534_s26 + $0x10] sm:$0xff]  }
  0x10   : > { %v1440_v5 = vld [vmem:[%s1534_s26 + $0x40] sm:$0xff]   ;;  %1359 = vmatprep.mubr.bf16.mxu0 %v1439_v4  ;;  %v1442_v11 = vld [vmem:[%s1534_s26 + $0x48] sm:$0xff]   ;;  %v1444_v13 = vld [vmem:[%s1534_s26 + $0x50] sm:$0xff]  }
  0x11   : > { %1375 = vmatprep.mubr.bf16.mxu1 %v1440_v5  ;;  %v1445_v14 = vld [vmem:[%s1534_s26 + $0x18] sm:$0xff]   ;;  %v1447_v16 = vld [vmem:[%s1534_s26 + $0x20] sm:$0xff]   ;;  %v1449_v18 = vld [vmem:[%s1534_s26 + $0x28] sm:$0xff]  }
  0x12   : > { %1346 = vmatpush3.bf16.msra.mxu0 %v1432_v1  ;;  %1400 = vmatpush3.bf16.msra.mxu1 %v1432_v1  ;;  %v1446_v15 = vld [vmem:[%s1534_s26 + $0x58] sm:$0xff]   ;;  %v1448_v17 = vld [vmem:[%s1534_s26 + $0x60] sm:$0xff]   ;;  %v1450_v19 = vld [vmem:[%s1534_s26 + $0x68] sm:$0xff]  }
  0x13   : > { %1347 = vmatprep.subr.bf16.mxu0 %v1433_v2  ;;  %1393 = vmatprep.subr.bf16.mxu1 %v1433_v2  ;;  %v1451_v20 = vld [vmem:[%s1534_s26 + $0x30] sm:$0xff]   ;;  %v1453_v22 = vld [vmem:[%s1534_s26 + $0x38] sm:$0xff]   ;;  %v1570_v24 = vld [vmem:[%s1638_s2] ss:$0 sm:$0xff] }
  0x14   : > { %v1452_v21 = vld [vmem:[%s1534_s26 + $0x70] sm:$0xff]   ;;  %v1454_v23 = vld [vmem:[%s1534_s26 + $0x78] sm:$0xff]  }
  0x16   : > { %1348 = vmatpush3.bf16.msra.mxu0 %v1433_v2  ;;  %1401 = vmatpush3.bf16.msra.mxu1 %v1433_v2 }
  0x17   : > { %1349 = vmatprep.subr.bf16.mxu0 %v1434_v3  ;;  %1394 = vmatprep.subr.bf16.mxu1 %v1434_v3 }
  0x1a   : > { %1350 = vmatpush3.bf16.msra.mxu0 %v1434_v3  ;;  %1402 = vmatpush3.bf16.msra.mxu1 %v1434_v3 }
  0x1b   : > { %1351 = vmatprep.subr.bf16.mxu0 %v1435_v6  ;;  %1395 = vmatprep.subr.bf16.mxu1 %v1435_v6 }
  0x1e   : > { %1352 = vmatpush3.bf16.msra.mxu0 %v1435_v6  ;;  %1403 = vmatpush3.bf16.msra.mxu1 %v1435_v6 }
  0x1f   : > { %1353 = vmatprep.subr.bf16.mxu0 %v1436_v7  ;;  %1396 = vmatprep.subr.bf16.mxu1 %v1436_v7 }
  0x22   : > { %1354 = vmatpush3.bf16.msra.mxu0 %v1436_v7  ;;  %1404 = vmatpush3.bf16.msra.mxu1 %v1436_v7 }
  0x23   : > { %1355 = vmatprep.subr.bf16.mxu0 %v1437_v8  ;;  %1397 = vmatprep.subr.bf16.mxu1 %v1437_v8 }
  0x26   : > { %1356 = vmatpush3.bf16.msra.mxu0 %v1437_v8  ;;  %1405 = vmatpush3.bf16.msra.mxu1 %v1437_v8 }
  0x27   : > { %1357 = vmatprep.subr.bf16.mxu0 %v1438_v9  ;;  %1398 = vmatprep.subr.bf16.mxu1 %v1438_v9 }
  0x2a   : > { %1358 = vmatpush3.bf16.msra.mxu0 %v1438_v9  ;;  %1406 = vmatpush3.bf16.msra.mxu1 %v1438_v9 }
  0x2d   : > { %1360 = vmatmul.mubr.bf16.vlgmr.msra.gmra.mxu0 %v1441_v10  ;;  %1376 = vmatmul.mubr.bf16.vlgmr.msra.gmra.mxu1 %v1442_v11 }
  0x2e   : > { %1363 = vmatprep.mubr.bf16.mxu0 %v1443_v12  ;;  %1379 = vmatprep.mubr.bf16.mxu1 %v1444_v13 }
  0x35   : > { %1364 = vmatmul.mubr.bf16.gmra.mxu0 %v1445_v14  ;;  %1380 = vmatmul.mubr.bf16.gmra.mxu1 %v1446_v15 }
  0x36   : > { %1367 = vmatprep.mubr.bf16.mxu0 %v1447_v16  ;;  %1383 = vmatprep.mubr.bf16.mxu1 %v1448_v17 }
  0x3d   : > { %1368 = vmatmul.mubr.bf16.gmra.mxu0 %v1449_v18  ;;  %1384 = vmatmul.mubr.bf16.gmra.mxu1 %v1450_v19 }
  0x3e   : > { %1371 = vmatprep.mubr.bf16.mxu0 %v1451_v20  ;;  %1387 = vmatprep.mubr.bf16.mxu1 %v1452_v21 }
  0x45   : > { %1372 = vmatmul.mubr.bf16.gmra.mxu0 %v1453_v22  ;;  %1388 = vmatmul.mubr.bf16.gmra.mxu1 %v1454_v23 }
  0xed   : > { %v1361_v25 = vpop.f32.mrf.mxu0  ;;  %v1377_v26 = vpop.f32.mrf.mxu1 }
  0xee   : > { %v789_v27 = vadd.f32 %v1361_v25, %v1570_v24  ;;  %v805_v28 = vadd.f32 %v1377_v26, %v1570_v24 }
  0xef   : > { %v554_v29 = vpop.f32.mrf.mxu0  ;;  %v618_v30 = vpop.f32.mrf.mxu1 }
  0xf0   : > { %v787_v31 = vadd.f32 %v1570_v24, %v554_v29  ;;  %v803_v32 = vadd.f32 %v1570_v24, %v618_v30  ;;  %v821_v37 = vmax.f32 %v789_v27, 0.0  ;;  %v837_v38 = vmax.f32 %v805_v28, 0.0 }
  0xf1   : > { %v1362_v33 = vpop.f32.mrf.mxu0  ;;  %v1378_v34 = vpop.f32.mrf.mxu1 }
  0xf2   : > { %v790_v35 = vadd.f32 %v1362_v33, %v1570_v24  ;;  %v806_v36 = vadd.f32 %v1378_v34, %v1570_v24  ;;  %v819_v45 = vmax.f32 %v787_v31, 0.0  ;;  %v835_v46 = vmax.f32 %v803_v32, 0.0 }
  0xf3   : > { %v557_v39 = vpop.f32.mrf.mxu0  ;;  %v621_v40 = vpop.f32.mrf.mxu1 }
  0xf4   : > { %v822_v41 = vmax.f32 %v790_v35, 0.0  ;;  %v838_v42 = vmax.f32 %v806_v36, 0.0  ;;  %v788_v43 = vadd.f32 %v1570_v24, %v557_v39  ;;  %v804_v44 = vadd.f32 %v1570_v24, %v621_v40 }
  0xf5   : > { %v1365_v47 = vpop.f32.mrf.mxu0  ;;  %v1381_v48 = vpop.f32.mrf.mxu1 }
  0xf6   : > { %v1232_v49 = vpack.c.bf16 %v822_v41, %v821_v37  ;;  %v1272_v50 = vpack.c.bf16 %v838_v42, %v837_v38  ;;  %v820_v51 = vmax.f32 %v788_v43, 0.0  ;;  %v836_v52 = vmax.f32 %v804_v44, 0.0 }
  0xf7   : > { %v793_v53 = vadd.f32 %v1365_v47, %v1570_v24  ;;  %v809_v54 = vadd.f32 %v1381_v48, %v1570_v24  ;;  %v570_v55 = vpop.f32.mrf.mxu0  ;;  %v634_v56 = vpop.f32.mrf.mxu1 }
  0xf8   : > { %1304 = vst [vmem:[%s1585_s17 + $0x8] sm:$0xff] %v1232_v49   ;;  %1312 = vst [vmem:[%s1585_s17 + $0x48] sm:$0xff] %v1272_v50   ;;  %v1227_v57 = vpack.c.bf16 %v820_v51, %v819_v45  ;;  %v1267_v58 = vpack.c.bf16 %v836_v52, %v835_v46  ;;  %v791_v59 = vadd.f32 %v1570_v24, %v570_v55 }
  0xf9   : > { %v807_v60 = vadd.f32 %v1570_v24, %v634_v56  ;;  %v1366_v61 = vpop.f32.mrf.mxu0  ;;  %v1382_v62 = vpop.f32.mrf.mxu1  ;;  %v825_v1 = vmax.f32 %v793_v53, 0.0  ;;  %v841_v2 = vmax.f32 %v809_v54, 0.0 }
  0xfa   : > { %1228 = vst [vmem:[%s1585_s17] sm:$0xff] %v1227_v57   ;;  %1311 = vst [vmem:[%s1585_s17 + $0x40] sm:$0xff] %v1267_v58   ;;  %v794_v63 = vadd.f32 %v1366_v61, %v1570_v24  ;;  %v810_v0 = vadd.f32 %v1382_v62, %v1570_v24  ;;  %v823_v9 = vmax.f32 %v791_v59, 0.0 }
  0xfb   : > { %v573_v3 = vpop.f32.mrf.mxu0  ;;  %v637_v4 = vpop.f32.mrf.mxu1  ;;  %v839_v10 = vmax.f32 %v807_v60, 0.0 }
  0xfc   : > { %v826_v5 = vmax.f32 %v794_v63, 0.0  ;;  %v842_v6 = vmax.f32 %v810_v0, 0.0  ;;  %v792_v7 = vadd.f32 %v1570_v24, %v573_v3  ;;  %v808_v8 = vadd.f32 %v1570_v24, %v637_v4 }
  0xfd   : > { %v1369_v11 = vpop.f32.mrf.mxu0  ;;  %v1385_v12 = vpop.f32.mrf.mxu1 }
  0xfe   : > { %v1242_v13 = vpack.c.bf16 %v826_v5, %v825_v1  ;;  %v1282_v14 = vpack.c.bf16 %v842_v6, %v841_v2  ;;  %v824_v15 = vmax.f32 %v792_v7, 0.0  ;;  %v840_v16 = vmax.f32 %v808_v8, 0.0 }
  0xff   : > { %v797_v17 = vadd.f32 %v1369_v11, %v1570_v24  ;;  %v813_v18 = vadd.f32 %v1385_v12, %v1570_v24  ;;  %v586_v19 = vpop.f32.mrf.mxu0  ;;  %v650_v20 = vpop.f32.mrf.mxu1 }
 0x100   : > { %1306 = vst [vmem:[%s1585_s17 + $0x18] sm:$0xff] %v1242_v13   ;;  %1314 = vst [vmem:[%s1585_s17 + $0x58] sm:$0xff] %v1282_v14   ;;  %v1237_v21 = vpack.c.bf16 %v824_v15, %v823_v9  ;;  %v1277_v22 = vpack.c.bf16 %v840_v16, %v839_v10  ;;  %v795_v23 = vadd.f32 %v1570_v24, %v586_v19 }
 0x101   : > { %v811_v25 = vadd.f32 %v1570_v24, %v650_v20  ;;  %v1370_v26 = vpop.f32.mrf.mxu0  ;;  %v1386_v27 = vpop.f32.mrf.mxu1  ;;  %v829_v30 = vmax.f32 %v797_v17, 0.0  ;;  %v845_v31 = vmax.f32 %v813_v18, 0.0 }
 0x102   : > { %1305 = vst [vmem:[%s1585_s17 + $0x10] sm:$0xff] %v1237_v21   ;;  %1313 = vst [vmem:[%s1585_s17 + $0x50] sm:$0xff] %v1277_v22   ;;  %v798_v28 = vadd.f32 %v1370_v26, %v1570_v24  ;;  %v814_v29 = vadd.f32 %v1386_v27, %v1570_v24  ;;  %v827_v38 = vmax.f32 %v795_v23, 0.0 }
 0x103   : > { %v589_v32 = vpop.f32.mrf.mxu0  ;;  %v653_v33 = vpop.f32.mrf.mxu1  ;;  %v843_v39 = vmax.f32 %v811_v25, 0.0 }
 0x104   : > { %v830_v34 = vmax.f32 %v798_v28, 0.0  ;;  %v846_v35 = vmax.f32 %v814_v29, 0.0  ;;  %v796_v36 = vadd.f32 %v1570_v24, %v589_v32  ;;  %v812_v37 = vadd.f32 %v1570_v24, %v653_v33 }
 0x105   : > { %v1373_v40 = vpop.f32.mrf.mxu0  ;;  %v1389_v41 = vpop.f32.mrf.mxu1 }
 0x106   : > { %v1252_v42 = vpack.c.bf16 %v830_v34, %v829_v30  ;;  %v1292_v43 = vpack.c.bf16 %v846_v35, %v845_v31  ;;  %v828_v44 = vmax.f32 %v796_v36, 0.0  ;;  %v844_v45 = vmax.f32 %v812_v37, 0.0 }
 0x107   : > { %v801_v46 = vadd.f32 %v1373_v40, %v1570_v24  ;;  %v817_v47 = vadd.f32 %v1389_v41, %v1570_v24  ;;  %v602_v48 = vpop.f32.mrf.mxu0  ;;  %v666_v49 = vpop.f32.mrf.mxu1 }
 0x108   : > { %1308 = vst [vmem:[%s1585_s17 + $0x28] sm:$0xff] %v1252_v42   ;;  %1316 = vst [vmem:[%s1585_s17 + $0x68] sm:$0xff] %v1292_v43   ;;  %v1247_v50 = vpack.c.bf16 %v828_v44, %v827_v38  ;;  %v1287_v51 = vpack.c.bf16 %v844_v45, %v843_v39  ;;  %v799_v52 = vadd.f32 %v1570_v24, %v602_v48 }
 0x109   : > { %v815_v53 = vadd.f32 %v1570_v24, %v666_v49  ;;  %v1374_v54 = vpop.f32.mrf.mxu0  ;;  %v1390_v55 = vpop.f32.mrf.mxu1  ;;  %v833_v58 = vmax.f32 %v801_v46, 0.0  ;;  %v849_v59 = vmax.f32 %v817_v47, 0.0 }
 0x10a   : > { %1307 = vst [vmem:[%s1585_s17 + $0x20] sm:$0xff] %v1247_v50   ;;  %1315 = vst [vmem:[%s1585_s17 + $0x60] sm:$0xff] %v1287_v51   ;;  %v802_v56 = vadd.f32 %v1374_v54, %v1570_v24  ;;  %v818_v57 = vadd.f32 %v1390_v55, %v1570_v24  ;;  %v831_v2 = vmax.f32 %v799_v52, 0.0 }
 0x10b   : > { %v605_v60 = vpop.f32.mrf.mxu0  ;;  %v669_v61 = vpop.f32.mrf.mxu1  ;;  %v847_v3 = vmax.f32 %v815_v53, 0.0 }
 0x10c   : > { %v834_v62 = vmax.f32 %v802_v56, 0.0  ;;  %v850_v63 = vmax.f32 %v818_v57, 0.0  ;;  %v800_v0 = vadd.f32 %v1570_v24, %v605_v60  ;;  %v816_v1 = vadd.f32 %v1570_v24, %v669_v61 }
 0x10e   : > { %v1262_v4 = vpack.c.bf16 %v834_v62, %v833_v58  ;;  %v1302_v5 = vpack.c.bf16 %v850_v63, %v849_v59  ;;  %v832_v6 = vmax.f32 %v800_v0, 0.0  ;;  %v848_v7 = vmax.f32 %v816_v1, 0.0 }
 0x110   : > { %1310 = vst [vmem:[%s1585_s17 + $0x38] sm:$0xff] %v1262_v4   ;;  %1318 = vst [vmem:[%s1585_s17 + $0x78] sm:$0xff] %v1302_v5   ;;  %v1257_v8 = vpack.c.bf16 %v832_v6, %v831_v2  ;;  %v1297_v9 = vpack.c.bf16 %v848_v7, %v847_v3 }
 0x112   : > { %1309 = vst [vmem:[%s1585_s17 + $0x30] sm:$0xff] %v1257_v8   ;;  %1317 = vst [vmem:[%s1585_s17 + $0x70] sm:$0xff] %v1297_v9  }
 0x113 PF: > { %s13_s14 = sadd.s32 1, %s1477_s14   ;;  %s1640_s12 = smov %s1473_s13 }
 0x114   : > { %p10_p5 = scmp.ge.s32.totalorder %s13_s14, 4   ;;  %s1641_s13 = smov %s1643_s15 }
 0x116   :  { %12 = sbr.rel (!%p10_p5) target bundleno = 2 (0x2), region = 76 }

// kernel: _lambda_.18
= control target key start
LH: loop header
LB: loop body
LE: loop exit
PB: predicated region body
PF: predicated region fallthrough
CT: control target
= control target key end

     0   :  { %s1467_s12 = smov 0   ;;  %s1469_s13 = smov 0   ;;  %s1604_s0 = inlined_call_operand.vmem [shape: bf16[512,128], index: 0, kind: input, shape index: {}]   ;;  %s1605_s1 = inlined_call_operand.vmem [shape: bf16[128,128], index: 1, kind: input, shape index: {}]   ;;  %s1606_s2 = inlined_call_operand.vmem [shape: f32[1,128], index: 2, kind: input, shape index: {}]   ;;  %s1607_s3 = inlined_call_operand.vmem [shape: bf16[512,128], index: 3, kind: output, shape index: {}]  }
   0x1   :  { %s1471_s14 = smov 0  }
   0x2 LB: > { %s32_s15 = sadd.s32 1, %s1441_s13  ;;  %p1096_p0 = scmp.ge.s32.totalorder %s1445_s14, 1  ;;  %s1445_s14 = sphi %s1471_s14, %s13_s14   ;;  %s1441_s13 = sphi %s1469_s13, %s1609_s13   ;;  %s1437_s12 = sphi %s1467_s12, %s1608_s12  }
   0x3   : > { %p34_p1 = scmp.ge.s32.totalorder %s32_s15, 2  ;;  %p188_p2 = scmp.lt.s32.totalorder %s1445_s14, 3 }
   0x5   : > { %s1611_s15 = smov (%p34_p1, %s32_s15), 0  ;;  %p189_p3 = pnand %p1096_p0, %p188_p2 }
   0x6   : > { %s1097_s18 = sshll.u32 (!%p189_p3), %s1437_s12, 5 }
   0x7   : > { %192 = sbr.rel (%p189_p3) target bundleno = 273 (0x111), region = 32  ;;  %p230_p4 = scmp.lt.s32.totalorder (!%p189_p3), %s1097_s18, 63 }
   0xc   : > { %v1399_v0 = vld [vmem:[%s1605_s1 + $0x38] sm:$0xff]   ;;  %v1400_v1 = vld [vmem:[%s1605_s1 + $0x30] sm:$0xff]   ;;  %s1613_s18 = smov (!%p230_p4, %s1097_s18), 63  ;;  %v1401_v2 = vld [vmem:[%s1605_s1 + $0x28] sm:$0xff]  }
   0xd   : > { %1311 = vmatprep.subr.bf16.mxu0 %v1399_v0  ;;  %1359 = vmatprep.subr.bf16.mxu1 %v1399_v0  ;;  %s1098_s23 = sshll.u32 %s1613_s18, 2  ;;  %v1402_v3 = vld [vmem:[%s1605_s1 + $0x20] sm:$0xff]   ;;  %v1403_v6 = vld [vmem:[%s1605_s1 + $0x18] sm:$0xff]   ;;  %v1404_v7 = vld [vmem:[%s1605_s1 + $0x10] sm:$0xff]  }
   0xe   : > { %1312 = vmatpush3.bf16.msra.mxu0 %v1399_v0  ;;  %1367 = vmatpush3.bf16.msra.mxu1 %v1399_v0  ;;  %s1502_s26 = scalar_lea.vmem %s1604_s0, %s1098_s23  ;;  %v1405_v8 = vld [vmem:[%s1605_s1 + $0x8] sm:$0xff]   ;;  %v1406_v9 = vld [vmem:[%s1605_s1] sm:$0xff]   ;;  %s1551_s17 = scalar_lea.vmem %s1607_s3, %s1098_s23 }
   0xf   : > { %1313 = vmatprep.subr.bf16.mxu0 %v1400_v1  ;;  %1360 = vmatprep.subr.bf16.mxu1 %v1400_v1  ;;  %v1407_v4 = vld [vmem:[%s1502_s26] sm:$0xff]   ;;  %v1409_v10 = vld [vmem:[%s1502_s26 + $0x8] sm:$0xff]   ;;  %v1411_v12 = vld [vmem:[%s1502_s26 + $0x10] sm:$0xff]  }
  0x10   : > { %v1408_v5 = vld [vmem:[%s1502_s26 + $0x40] sm:$0xff]   ;;  %1327 = vmatprep.mubr.bf16.mxu0 %v1407_v4  ;;  %v1410_v11 = vld [vmem:[%s1502_s26 + $0x48] sm:$0xff]   ;;  %v1412_v13 = vld [vmem:[%s1502_s26 + $0x50] sm:$0xff]  }
  0x11   : > { %1343 = vmatprep.mubr.bf16.mxu1 %v1408_v5  ;;  %v1413_v14 = vld [vmem:[%s1502_s26 + $0x18] sm:$0xff]   ;;  %v1415_v16 = vld [vmem:[%s1502_s26 + $0x20] sm:$0xff]   ;;  %v1417_v18 = vld [vmem:[%s1502_s26 + $0x28] sm:$0xff]  }
  0x12   : > { %1314 = vmatpush3.bf16.msra.mxu0 %v1400_v1  ;;  %1368 = vmatpush3.bf16.msra.mxu1 %v1400_v1  ;;  %v1414_v15 = vld [vmem:[%s1502_s26 + $0x58] sm:$0xff]   ;;  %v1416_v17 = vld [vmem:[%s1502_s26 + $0x60] sm:$0xff]   ;;  %v1418_v19 = vld [vmem:[%s1502_s26 + $0x68] sm:$0xff]  }
  0x13   : > { %1315 = vmatprep.subr.bf16.mxu0 %v1401_v2  ;;  %1361 = vmatprep.subr.bf16.mxu1 %v1401_v2  ;;  %v1419_v20 = vld [vmem:[%s1502_s26 + $0x30] sm:$0xff]   ;;  %v1421_v22 = vld [vmem:[%s1502_s26 + $0x38] sm:$0xff]   ;;  %v1538_v26 = vld [vmem:[%s1606_s2] ss:$0 sm:$0xff] }
  0x14   : > { %v1420_v21 = vld [vmem:[%s1502_s26 + $0x70] sm:$0xff]   ;;  %v1422_v23 = vld [vmem:[%s1502_s26 + $0x78] sm:$0xff]  }
  0x16   : > { %1316 = vmatpush3.bf16.msra.mxu0 %v1401_v2  ;;  %1369 = vmatpush3.bf16.msra.mxu1 %v1401_v2 }
  0x17   : > { %1317 = vmatprep.subr.bf16.mxu0 %v1402_v3  ;;  %1362 = vmatprep.subr.bf16.mxu1 %v1402_v3 }
  0x1a   : > { %1318 = vmatpush3.bf16.msra.mxu0 %v1402_v3  ;;  %1370 = vmatpush3.bf16.msra.mxu1 %v1402_v3 }
  0x1b   : > { %1319 = vmatprep.subr.bf16.mxu0 %v1403_v6  ;;  %1363 = vmatprep.subr.bf16.mxu1 %v1403_v6 }
  0x1e   : > { %1320 = vmatpush3.bf16.msra.mxu0 %v1403_v6  ;;  %1371 = vmatpush3.bf16.msra.mxu1 %v1403_v6 }
  0x1f   : > { %1321 = vmatprep.subr.bf16.mxu0 %v1404_v7  ;;  %1364 = vmatprep.subr.bf16.mxu1 %v1404_v7 }
  0x22   : > { %1322 = vmatpush3.bf16.msra.mxu0 %v1404_v7  ;;  %1372 = vmatpush3.bf16.msra.mxu1 %v1404_v7 }
  0x23   : > { %1323 = vmatprep.subr.bf16.mxu0 %v1405_v8  ;;  %1365 = vmatprep.subr.bf16.mxu1 %v1405_v8 }
  0x26   : > { %1324 = vmatpush3.bf16.msra.mxu0 %v1405_v8  ;;  %1373 = vmatpush3.bf16.msra.mxu1 %v1405_v8 }
  0x27   : > { %1325 = vmatprep.subr.bf16.mxu0 %v1406_v9  ;;  %1366 = vmatprep.subr.bf16.mxu1 %v1406_v9 }
  0x2a   : > { %1326 = vmatpush3.bf16.msra.mxu0 %v1406_v9  ;;  %1374 = vmatpush3.bf16.msra.mxu1 %v1406_v9 }
  0x2d   : > { %1328 = vmatmul.mubr.bf16.vlgmr.msra.gmra.mxu0 %v1409_v10  ;;  %1344 = vmatmul.mubr.bf16.vlgmr.msra.gmra.mxu1 %v1410_v11 }
  0x2e   : > { %1331 = vmatprep.mubr.bf16.mxu0 %v1411_v12  ;;  %1347 = vmatprep.mubr.bf16.mxu1 %v1412_v13 }
  0x35   : > { %1332 = vmatmul.mubr.bf16.gmra.mxu0 %v1413_v14  ;;  %1348 = vmatmul.mubr.bf16.gmra.mxu1 %v1414_v15 }
  0x36   : > { %1335 = vmatprep.mubr.bf16.mxu0 %v1415_v16  ;;  %1351 = vmatprep.mubr.bf16.mxu1 %v1416_v17 }
  0x3d   : > { %1336 = vmatmul.mubr.bf16.gmra.mxu0 %v1417_v18  ;;  %1352 = vmatmul.mubr.bf16.gmra.mxu1 %v1418_v19 }
  0x3e   : > { %1339 = vmatprep.mubr.bf16.mxu0 %v1419_v20  ;;  %1355 = vmatprep.mubr.bf16.mxu1 %v1420_v21 }
  0x45   : > { %1340 = vmatmul.mubr.bf16.gmra.mxu0 %v1421_v22  ;;  %1356 = vmatmul.mubr.bf16.gmra.mxu1 %v1422_v23 }
  0xed   : > { %v1329_v24 = vpop.f32.mrf.mxu0  ;;  %v1345_v25 = vpop.f32.mrf.mxu1 }
  0xee   : > { %v789_v31 = vadd.f32 %v1329_v24, %v1538_v26  ;;  %v805_v32 = vadd.f32 %v1345_v25, %v1538_v26 }
  0xef   : > { %v554_v27 = vpop.f32.mrf.mxu0  ;;  %v618_v28 = vpop.f32.mrf.mxu1 }
  0xf0   : > { %v787_v35 = vadd.f32 %v1538_v26, %v554_v27  ;;  %v803_v36 = vadd.f32 %v1538_v26, %v618_v28 }
  0xf1   : > { %v1330_v29 = vpop.f32.mrf.mxu0  ;;  %v1346_v30 = vpop.f32.mrf.mxu1 }
  0xf2   : > { %v790_v33 = vadd.f32 %v1330_v29, %v1538_v26  ;;  %v806_v34 = vadd.f32 %v1346_v30, %v1538_v26 }
  0xf3   : > { %v557_v37 = vpop.f32.mrf.mxu0  ;;  %v621_v38 = vpop.f32.mrf.mxu1 }
  0xf4   : > { %v1200_v39 = vpack.c.bf16 %v790_v33, %v789_v31  ;;  %v1240_v40 = vpack.c.bf16 %v806_v34, %v805_v32  ;;  %v788_v41 = vadd.f32 %v1538_v26, %v557_v37  ;;  %v804_v42 = vadd.f32 %v1538_v26, %v621_v38 }
  0xf5   : > { %v1333_v43 = vpop.f32.mrf.mxu0  ;;  %v1349_v44 = vpop.f32.mrf.mxu1 }
  0xf6   : > { %1272 = vst [vmem:[%s1551_s17 + $0x8] sm:$0xff] %v1200_v39   ;;  %1280 = vst [vmem:[%s1551_s17 + $0x48] sm:$0xff] %v1240_v40   ;;  %v1195_v45 = vpack.c.bf16 %v788_v41, %v787_v35  ;;  %v1235_v46 = vpack.c.bf16 %v804_v42, %v803_v36  ;;  %v793_v51 = vadd.f32 %v1333_v43, %v1538_v26 }
  0xf7   : > { %v570_v47 = vpop.f32.mrf.mxu0  ;;  %v634_v48 = vpop.f32.mrf.mxu1  ;;  %v809_v52 = vadd.f32 %v1349_v44, %v1538_v26 }
  0xf8   : > { %1196 = vst [vmem:[%s1551_s17] sm:$0xff] %v1195_v45   ;;  %1279 = vst [vmem:[%s1551_s17 + $0x40] sm:$0xff] %v1235_v46   ;;  %v791_v55 = vadd.f32 %v1538_v26, %v570_v47  ;;  %v807_v56 = vadd.f32 %v1538_v26, %v634_v48 }
  0xf9   : > { %v1334_v49 = vpop.f32.mrf.mxu0  ;;  %v1350_v50 = vpop.f32.mrf.mxu1 }
  0xfa   : > { %v794_v53 = vadd.f32 %v1334_v49, %v1538_v26  ;;  %v810_v54 = vadd.f32 %v1350_v50, %v1538_v26 }
  0xfb   : > { %v573_v57 = vpop.f32.mrf.mxu0  ;;  %v637_v58 = vpop.f32.mrf.mxu1 }
  0xfc   : > { %v1210_v59 = vpack.c.bf16 %v794_v53, %v793_v51  ;;  %v1250_v60 = vpack.c.bf16 %v810_v54, %v809_v52  ;;  %v792_v61 = vadd.f32 %v1538_v26, %v573_v57  ;;  %v808_v62 = vadd.f32 %v1538_v26, %v637_v58 }
  0xfd   : > { %v1337_v63 = vpop.f32.mrf.mxu0  ;;  %v1353_v0 = vpop.f32.mrf.mxu1 }
  0xfe   : > { %1274 = vst [vmem:[%s1551_s17 + $0x18] sm:$0xff] %v1210_v59   ;;  %1282 = vst [vmem:[%s1551_s17 + $0x58] sm:$0xff] %v1250_v60   ;;  %v1205_v1 = vpack.c.bf16 %v792_v61, %v791_v55  ;;  %v1245_v2 = vpack.c.bf16 %v808_v62, %v807_v56  ;;  %v797_v7 = vadd.f32 %v1337_v63, %v1538_v26 }
  0xff   : > { %v586_v3 = vpop.f32.mrf.mxu0  ;;  %v650_v4 = vpop.f32.mrf.mxu1  ;;  %v813_v8 = vadd.f32 %v1353_v0, %v1538_v26 }
 0x100   : > { %1273 = vst [vmem:[%s1551_s17 + $0x10] sm:$0xff] %v1205_v1   ;;  %1281 = vst [vmem:[%s1551_s17 + $0x50] sm:$0xff] %v1245_v2   ;;  %v795_v11 = vadd.f32 %v1538_v26, %v586_v3  ;;  %v811_v12 = vadd.f32 %v1538_v26, %v650_v4 }
 0x101   : > { %v1338_v5 = vpop.f32.mrf.mxu0  ;;  %v1354_v6 = vpop.f32.mrf.mxu1 }
 0x102   : > { %v798_v9 = vadd.f32 %v1338_v5, %v1538_v26  ;;  %v814_v10 = vadd.f32 %v1354_v6, %v1538_v26 }
 0x103   : > { %v589_v13 = vpop.f32.mrf.mxu0  ;;  %v653_v14 = vpop.f32.mrf.mxu1 }
 0x104   : > { %v1220_v15 = vpack.c.bf16 %v798_v9, %v797_v7  ;;  %v1260_v16 = vpack.c.bf16 %v814_v10, %v813_v8  ;;  %v796_v17 = vadd.f32 %v1538_v26, %v589_v13  ;;  %v812_v18 = vadd.f32 %v1538_v26, %v653_v14 }
 0x105   : > { %v1341_v19 = vpop.f32.mrf.mxu0  ;;  %v1357_v20 = vpop.f32.mrf.mxu1 }
 0x106   : > { %1276 = vst [vmem:[%s1551_s17 + $0x28] sm:$0xff] %v1220_v15   ;;  %1284 = vst [vmem:[%s1551_s17 + $0x68] sm:$0xff] %v1260_v16   ;;  %v1215_v21 = vpack.c.bf16 %v796_v17, %v795_v11  ;;  %v1255_v22 = vpack.c.bf16 %v812_v18, %v811_v12  ;;  %v801_v28 = vadd.f32 %v1341_v19, %v1538_v26 }
 0x107   : > { %v602_v23 = vpop.f32.mrf.mxu0  ;;  %v666_v24 = vpop.f32.mrf.mxu1  ;;  %v817_v29 = vadd.f32 %v1357_v20, %v1538_v26 }
 0x108   : > { %1275 = vst [vmem:[%s1551_s17 + $0x20] sm:$0xff] %v1215_v21   ;;  %1283 = vst [vmem:[%s1551_s17 + $0x60] sm:$0xff] %v1255_v22   ;;  %v799_v32 = vadd.f32 %v1538_v26, %v602_v23  ;;  %v815_v33 = vadd.f32 %v1538_v26, %v666_v24 }
 0x109   : > { %v1342_v25 = vpop.f32.mrf.mxu0  ;;  %v1358_v27 = vpop.f32.mrf.mxu1 }
 0x10a   : > { %v802_v30 = vadd.f32 %v1342_v25, %v1538_v26  ;;  %v818_v31 = vadd.f32 %v1358_v27, %v1538_v26 }
 0x10b   : > { %v605_v34 = vpop.f32.mrf.mxu0  ;;  %v669_v35 = vpop.f32.mrf.mxu1 }
 0x10c   : > { %v1230_v36 = vpack.c.bf16 %v802_v30, %v801_v28  ;;  %v1270_v37 = vpack.c.bf16 %v818_v31, %v817_v29  ;;  %v800_v38 = vadd.f32 %v1538_v26, %v605_v34  ;;  %v816_v39 = vadd.f32 %v1538_v26, %v669_v35 }
 0x10e   : > { %1278 = vst [vmem:[%s1551_s17 + $0x38] sm:$0xff] %v1230_v36   ;;  %1286 = vst [vmem:[%s1551_s17 + $0x78] sm:$0xff] %v1270_v37   ;;  %v1225_v40 = vpack.c.bf16 %v800_v38, %v799_v32  ;;  %v1265_v41 = vpack.c.bf16 %v816_v39, %v815_v33 }
 0x110   : > { %1277 = vst [vmem:[%s1551_s17 + $0x30] sm:$0xff] %v1225_v40   ;;  %1285 = vst [vmem:[%s1551_s17 + $0x70] sm:$0xff] %v1265_v41  }
 0x111 PF: > { %s13_s14 = sadd.s32 1, %s1445_s14   ;;  %s1608_s12 = smov %s1441_s13 }
 0x112   : > { %p10_p5 = scmp.ge.s32.totalorder %s13_s14, 4   ;;  %s1609_s13 = smov %s1611_s15 }
 0x114   :  { %12 = sbr.rel (!%p10_p5) target bundleno = 2 (0x2), region = 76 }

// kernel: _lambda_.19
= control target key start
LH: loop header
LB: loop body
LE: loop exit
PB: predicated region body
PF: predicated region fallthrough
CT: control target
= control target key end

     0   :  { %s1756_s15 = smov 0   ;;  %s1758_s16 = smov 0   ;;  %s1996_s0 = inlined_call_operand.vmem [shape: bf16[512,128], index: 0, kind: input, shape index: {}]   ;;  %s1997_s1 = inlined_call_operand.vmem [shape: bf16[128,128], index: 1, kind: input, shape index: {}]   ;;  %s1998_s2 = inlined_call_operand.vmem [shape: f32[1,128], index: 2, kind: input, shape index: {}]   ;;  %s1999_s3 = inlined_call_operand.vmem [shape: bf16[512,128], index: 3, kind: input, shape index: {}, may-alias: {3,4}]   ;;  %s2000_s4 = inlined_call_operand.vmem [shape: bf16[512,128], index: 4, kind: output, shape index: {}, may-alias: {3,4}]  }
   0x1   :  { %s1760_s17 = smov 0  }
   0x2 LB: > { %s33_s18 = sadd.s32 1, %s1725_s16  ;;  %p1299_p0 = scmp.ge.s32.totalorder %s1729_s17, 1  ;;  %s1729_s17 = sphi %s1760_s17, %s14_s17   ;;  %s1725_s16 = sphi %s1758_s16, %s2002_s16   ;;  %s1721_s15 = sphi %s1756_s15, %s2001_s15  }
   0x3   : > { %p35_p1 = scmp.ge.s32.totalorder %s33_s18, 2  ;;  %p229_p2 = scmp.lt.s32.totalorder %s1729_s17, 3 }
   0x5   : > { %s2004_s18 = smov (%p35_p1, %s33_s18), 0  ;;  %p230_p3 = pnand %p1299_p0, %p229_p2 }
   0x6   : > { %s1300_s21 = sshll.u32 (!%p230_p3), %s1721_s15, 5 }
   0x7   : > { %233 = sbr.rel (%p230_p3) target bundleno = 277 (0x115), region = 36  ;;  %p281_p4 = scmp.lt.s32.totalorder (!%p230_p3), %s1300_s21, 63 }
   0xc   : > { %v1683_v0 = vld [vmem:[%s1997_s1 + $0x38] sm:$0xff]   ;;  %v1684_v1 = vld [vmem:[%s1997_s1 + $0x30] sm:$0xff]   ;;  %s2006_s21 = smov (!%p281_p4, %s1300_s21), 63  ;;  %v1685_v2 = vld [vmem:[%s1997_s1 + $0x28] sm:$0xff]  }
   0xd   : > { %1595 = vmatprep.subr.bf16.mxu0 %v1683_v0  ;;  %1643 = vmatprep.subr.bf16.mxu1 %v1683_v0  ;;  %s1783_s26 = sshll.u32 %s2006_s21, 2  ;;  %v1686_v3 = vld [vmem:[%s1997_s1 + $0x20] sm:$0xff]   ;;  %v1687_v6 = vld [vmem:[%s1997_s1 + $0x18] sm:$0xff]   ;;  %v1688_v7 = vld [vmem:[%s1997_s1 + $0x10] sm:$0xff]  }
   0xe   : > { %1596 = vmatpush3.bf16.msra.mxu0 %v1683_v0  ;;  %1651 = vmatpush3.bf16.msra.mxu1 %v1683_v0  ;;  %s1789_s29 = scalar_lea.vmem %s1996_s0, %s1783_s26  ;;  %v1689_v8 = vld [vmem:[%s1997_s1 + $0x8] sm:$0xff]   ;;  %v1690_v9 = vld [vmem:[%s1997_s1] sm:$0xff]   ;;  %s1826_s19 = scalar_lea.vmem %s1999_s3, %s1783_s26 }
   0xf   : > { %1597 = vmatprep.subr.bf16.mxu0 %v1684_v1  ;;  %1644 = vmatprep.subr.bf16.mxu1 %v1684_v1  ;;  %v1691_v4 = vld [vmem:[%s1789_s29] sm:$0xff]   ;;  %v1693_v10 = vld [vmem:[%s1789_s29 + $0x8] sm:$0xff]   ;;  %v1695_v12 = vld [vmem:[%s1789_s29 + $0x10] sm:$0xff]   ;;  %s1898_s24 = scalar_lea.vmem %s2000_s4, %s1783_s26 }
  0x10   : > { %v1692_v5 = vld [vmem:[%s1789_s29 + $0x40] sm:$0xff]   ;;  %1611 = vmatprep.mubr.bf16.mxu0 %v1691_v4  ;;  %v1694_v11 = vld [vmem:[%s1789_s29 + $0x48] sm:$0xff]   ;;  %v1696_v13 = vld [vmem:[%s1789_s29 + $0x50] sm:$0xff]  }
  0x11   : > { %1627 = vmatprep.mubr.bf16.mxu1 %v1692_v5  ;;  %v1697_v14 = vld [vmem:[%s1789_s29 + $0x18] sm:$0xff]   ;;  %v1699_v16 = vld [vmem:[%s1789_s29 + $0x20] sm:$0xff]   ;;  %v1701_v18 = vld [vmem:[%s1789_s29 + $0x28] sm:$0xff]  }
  0x12   : > { %1598 = vmatpush3.bf16.msra.mxu0 %v1684_v1  ;;  %1652 = vmatpush3.bf16.msra.mxu1 %v1684_v1  ;;  %v1698_v15 = vld [vmem:[%s1789_s29 + $0x58] sm:$0xff]   ;;  %v1700_v17 = vld [vmem:[%s1789_s29 + $0x60] sm:$0xff]   ;;  %v1702_v19 = vld [vmem:[%s1789_s29 + $0x68] sm:$0xff]  }
  0x13   : > { %1599 = vmatprep.subr.bf16.mxu0 %v1685_v2  ;;  %1645 = vmatprep.subr.bf16.mxu1 %v1685_v2  ;;  %v1703_v20 = vld [vmem:[%s1789_s29 + $0x30] sm:$0xff]   ;;  %v1705_v22 = vld [vmem:[%s1789_s29 + $0x38] sm:$0xff]   ;;  %v1541_v24 = vld [vmem:[%s1826_s19 + $0x8] sm:$0xff]  }
  0x14   : > { %v1704_v21 = vld [vmem:[%s1789_s29 + $0x70] sm:$0xff]   ;;  %v1706_v23 = vld [vmem:[%s1789_s29 + $0x78] sm:$0xff]   ;;  %v1549_v25 = vld [vmem:[%s1826_s19 + $0x48] sm:$0xff]   ;;  %v1403_v32 = vunpack.c.l.bf16 %v1541_v24  ;;  %v1404_v41 = vunpack.c.h.bf16 %v1541_v24 }
  0x15   : > { %v1398_v26 = vld [vmem:[%s1826_s19] sm:$0xff]   ;;  %v1838_v29 = vld [vmem:[%s1826_s19 + $0x18] sm:$0xff]   ;;  %v1435_v34 = vunpack.c.l.bf16 %v1549_v25  ;;  %v1844_v37 = vld [vmem:[%s1826_s19 + $0x10] sm:$0xff]   ;;  %v1436_v42 = vunpack.c.h.bf16 %v1549_v25 }
  0x16   : > { %1600 = vmatpush3.bf16.msra.mxu0 %v1685_v2  ;;  %1653 = vmatpush3.bf16.msra.mxu1 %v1685_v2  ;;  %v1548_v27 = vld [vmem:[%s1826_s19 + $0x40] sm:$0xff]   ;;  %v1841_v30 = vld [vmem:[%s1826_s19 + $0x58] sm:$0xff]   ;;  %v1399_v35 = vunpack.c.l.bf16 %v1398_v26  ;;  %v1847_v38 = vld [vmem:[%s1826_s19 + $0x50] sm:$0xff]   ;;  %v1400_v45 = vunpack.c.h.bf16 %v1398_v26  ;;  %v1411_v47 = vunpack.c.l.bf16 %v1838_v29  ;;  %v1407_v51 = vunpack.c.l.bf16 %v1844_v37 }
  0x17   : > { %1601 = vmatprep.subr.bf16.mxu0 %v1686_v3  ;;  %1646 = vmatprep.subr.bf16.mxu1 %v1686_v3  ;;  %v1835_v28 = vld [vmem:[%s1998_s2] ss:$0 sm:$0xff]  ;;  %v1431_v36 = vunpack.c.l.bf16 %v1548_v27  ;;  %v1432_v46 = vunpack.c.h.bf16 %v1548_v27  ;;  %v1443_v48 = vunpack.c.l.bf16 %v1841_v30  ;;  %v1439_v52 = vunpack.c.l.bf16 %v1847_v38  ;;  %v1862_v59 = vld [vmem:[%s1826_s19 + $0x28] sm:$0xff]  }
  0x18   : > { %v1412_v55 = vunpack.c.h.bf16 %v1838_v29  ;;  %v1444_v56 = vunpack.c.h.bf16 %v1841_v30  ;;  %v1408_v57 = vunpack.c.h.bf16 %v1844_v37  ;;  %v1440_v58 = vunpack.c.h.bf16 %v1847_v38  ;;  %v1865_v60 = vld [vmem:[%s1826_s19 + $0x68] sm:$0xff]   ;;  %v1870_v1 = vld [vmem:[%s1826_s19 + $0x20] sm:$0xff]  }
  0x19   : > { %v1419_v63 = vunpack.c.l.bf16 %v1862_v59  ;;  %v1451_v0 = vunpack.c.l.bf16 %v1865_v60  ;;  %v1873_v2 = vld [vmem:[%s1826_s19 + $0x60] sm:$0xff]  }
  0x1a   : > { %1602 = vmatpush3.bf16.msra.mxu0 %v1686_v3  ;;  %1654 = vmatpush3.bf16.msra.mxu1 %v1686_v3 }
  0x1b   : > { %1603 = vmatprep.subr.bf16.mxu0 %v1687_v6  ;;  %1647 = vmatprep.subr.bf16.mxu1 %v1687_v6 }
  0x1e   : > { %1604 = vmatpush3.bf16.msra.mxu0 %v1687_v6  ;;  %1655 = vmatpush3.bf16.msra.mxu1 %v1687_v6 }
  0x1f   : > { %1605 = vmatprep.subr.bf16.mxu0 %v1688_v7  ;;  %1648 = vmatprep.subr.bf16.mxu1 %v1688_v7 }
  0x22   : > { %1606 = vmatpush3.bf16.msra.mxu0 %v1688_v7  ;;  %1656 = vmatpush3.bf16.msra.mxu1 %v1688_v7  ;;  %v1415_v7 = vunpack.c.l.bf16 %v1870_v1 }
  0x23   : > { %1607 = vmatprep.subr.bf16.mxu0 %v1689_v8  ;;  %1649 = vmatprep.subr.bf16.mxu1 %v1689_v8 }
  0x26   : > { %1608 = vmatpush3.bf16.msra.mxu0 %v1689_v8  ;;  %1657 = vmatpush3.bf16.msra.mxu1 %v1689_v8  ;;  %v1447_v8 = vunpack.c.l.bf16 %v1873_v2 }
  0x27   : > { %1609 = vmatprep.subr.bf16.mxu0 %v1690_v9  ;;  %1650 = vmatprep.subr.bf16.mxu1 %v1690_v9 }
  0x2a   : > { %1610 = vmatpush3.bf16.msra.mxu0 %v1690_v9  ;;  %1658 = vmatpush3.bf16.msra.mxu1 %v1690_v9 }
  0x2d   : > { %1612 = vmatmul.mubr.bf16.vlgmr.msra.gmra.mxu0 %v1693_v10  ;;  %1628 = vmatmul.mubr.bf16.vlgmr.msra.gmra.mxu1 %v1694_v11 }
  0x2e   : > { %1615 = vmatprep.mubr.bf16.mxu0 %v1695_v12  ;;  %1631 = vmatprep.mubr.bf16.mxu1 %v1696_v13 }
  0x35   : > { %1616 = vmatmul.mubr.bf16.gmra.mxu0 %v1697_v14  ;;  %1632 = vmatmul.mubr.bf16.gmra.mxu1 %v1698_v15 }
  0x36   : > { %1619 = vmatprep.mubr.bf16.mxu0 %v1699_v16  ;;  %1635 = vmatprep.mubr.bf16.mxu1 %v1700_v17  ;;  %v1420_v17 = vunpack.c.h.bf16 %v1862_v59 }
  0x3d   : > { %1620 = vmatmul.mubr.bf16.gmra.mxu0 %v1701_v18  ;;  %1636 = vmatmul.mubr.bf16.gmra.mxu1 %v1702_v19  ;;  %v1452_v18 = vunpack.c.h.bf16 %v1865_v60 }
  0x3e   : > { %1623 = vmatprep.mubr.bf16.mxu0 %v1703_v20  ;;  %1639 = vmatprep.mubr.bf16.mxu1 %v1704_v21 }
  0x45   : > { %1624 = vmatmul.mubr.bf16.gmra.mxu0 %v1705_v22  ;;  %1640 = vmatmul.mubr.bf16.gmra.mxu1 %v1706_v23 }
  0xed   : > { %v1613_v31 = vpop.f32.mrf.mxu0  ;;  %v1629_v33 = vpop.f32.mrf.mxu1 }
  0xee   : > { %v849_v39 = vadd.f32 %v1613_v31, %v1835_v28  ;;  %v865_v40 = vadd.f32 %v1629_v33, %v1835_v28  ;;  %v1889_v33 = vld [vmem:[%s1826_s19 + $0x78] sm:$0xff]  }
  0xef   : > { %v614_v43 = vpop.f32.mrf.mxu0  ;;  %v678_v44 = vpop.f32.mrf.mxu1 }
  0xf0   : > { %v847_v49 = vadd.f32 %v1835_v28, %v614_v43  ;;  %v863_v50 = vadd.f32 %v1835_v28, %v678_v44  ;;  %v945_v61 = vadd.f32 %v1403_v32, %v849_v39  ;;  %v961_v62 = vadd.f32 %v1435_v34, %v865_v40  ;;  %v1886_v32 = vld [vmem:[%s1826_s19 + $0x38] sm:$0xff]   ;;  %v1892_v40 = vld [vmem:[%s1826_s19 + $0x30] sm:$0xff]  }
  0xf1   : > { %v1614_v53 = vpop.f32.mrf.mxu0  ;;  %v1630_v54 = vpop.f32.mrf.mxu1 }
  0xf2   : > { %v850_v3 = vadd.f32 %v1614_v53, %v1835_v28  ;;  %v866_v4 = vadd.f32 %v1630_v54, %v1835_v28  ;;  %v943_v9 = vadd.f32 %v1399_v35, %v847_v49  ;;  %v959_v10 = vadd.f32 %v1431_v36, %v863_v50 }
  0xf3   : > { %v617_v5 = vpop.f32.mrf.mxu0  ;;  %v681_v6 = vpop.f32.mrf.mxu1  ;;  %v977_v19 = vmax.f32 %v945_v61, 0.0  ;;  %v993_v20 = vmax.f32 %v961_v62, 0.0  ;;  %v1416_v54 = vunpack.c.h.bf16 %v1870_v1  ;;  %v1448_v61 = vunpack.c.h.bf16 %v1873_v2 }
  0xf4   : > { %v848_v11 = vadd.f32 %v1835_v28, %v617_v5  ;;  %v864_v12 = vadd.f32 %v1835_v28, %v681_v6  ;;  %v946_v13 = vadd.f32 %v1404_v41, %v850_v3  ;;  %v962_v14 = vadd.f32 %v1436_v42, %v866_v4  ;;  %v1901_v41 = vld [vmem:[%s1826_s19 + $0x70] sm:$0xff]  }
  0xf5   : > { %v1617_v15 = vpop.f32.mrf.mxu0  ;;  %v1633_v16 = vpop.f32.mrf.mxu1  ;;  %v975_v34 = vmax.f32 %v943_v9, 0.0  ;;  %v991_v35 = vmax.f32 %v959_v10, 0.0 }
  0xf6   : > { %v944_v21 = vadd.f32 %v1400_v45, %v848_v11  ;;  %v960_v22 = vadd.f32 %v1432_v46, %v864_v12  ;;  %v978_v23 = vmax.f32 %v946_v13, 0.0  ;;  %v994_v24 = vmax.f32 %v962_v14, 0.0 }
  0xf7   : > { %v853_v25 = vadd.f32 %v1617_v15, %v1835_v28  ;;  %v869_v26 = vadd.f32 %v1633_v16, %v1835_v28  ;;  %v630_v27 = vpop.f32.mrf.mxu0  ;;  %v694_v31 = vpop.f32.mrf.mxu1  ;;  %v1427_v16 = vunpack.c.l.bf16 %v1886_v32 }
  0xf8   : > { %v976_v36 = vmax.f32 %v944_v21, 0.0  ;;  %v992_v39 = vmax.f32 %v960_v22, 0.0  ;;  %v1469_v42 = vpack.c.bf16 %v978_v23, %v977_v19  ;;  %v1509_v43 = vpack.c.bf16 %v994_v24, %v993_v20 }
  0xf9   : > { %v851_v44 = vadd.f32 %v1835_v28, %v630_v27  ;;  %v867_v45 = vadd.f32 %v1835_v28, %v694_v31  ;;  %v1618_v46 = vpop.f32.mrf.mxu0  ;;  %v1634_v49 = vpop.f32.mrf.mxu1  ;;  %v949_v62 = vadd.f32 %v1411_v47, %v853_v25  ;;  %v965_v3 = vadd.f32 %v1443_v48, %v869_v26 }
  0xfa   : > { %v1464_v50 = vpack.c.bf16 %v976_v36, %v975_v34  ;;  %v1504_v53 = vpack.c.bf16 %v992_v39, %v991_v35  ;;  %v854_v4 = vadd.f32 %v1618_v46, %v1835_v28  ;;  %v870_v5 = vadd.f32 %v1634_v49, %v1835_v28  ;;  %1556 = vst [vmem:[%s1898_s24 + $0x8] sm:$0xff] %v1469_v42  }
  0xfb   : > { %v633_v6 = vpop.f32.mrf.mxu0  ;;  %v697_v9 = vpop.f32.mrf.mxu1  ;;  %1564 = vst [vmem:[%s1898_s24 + $0x48] sm:$0xff] %v1509_v43   ;;  %v947_v10 = vadd.f32 %v1407_v51, %v851_v44  ;;  %v963_v11 = vadd.f32 %v1439_v52, %v867_v45  ;;  %v1459_v51 = vunpack.c.l.bf16 %v1889_v33  ;;  %v997_v21 = vmax.f32 %v965_v3, 0.0 }
  0xfc   : > { %v852_v12 = vadd.f32 %v1835_v28, %v633_v6  ;;  %v868_v47 = vadd.f32 %v1835_v28, %v697_v9  ;;  %1465 = vst [vmem:[%s1898_s24] sm:$0xff] %v1464_v50   ;;  %1563 = vst [vmem:[%s1898_s24 + $0x40] sm:$0xff] %v1504_v53   ;;  %v950_v48 = vadd.f32 %v1412_v55, %v854_v4  ;;  %v981_v55 = vmax.f32 %v949_v62, 0.0 }
  0xfd   : > { %v966_v13 = vadd.f32 %v1444_v56, %v870_v5  ;;  %v1621_v14 = vpop.f32.mrf.mxu0  ;;  %v1637_v15 = vpop.f32.mrf.mxu1  ;;  %v979_v24 = vmax.f32 %v947_v10, 0.0  ;;  %v995_v25 = vmax.f32 %v963_v11, 0.0  ;;  %v1423_v49 = vunpack.c.l.bf16 %v1892_v40 }
  0xfe   : > { %v948_v52 = vadd.f32 %v1408_v57, %v852_v12  ;;  %v964_v19 = vadd.f32 %v1440_v58, %v868_v47  ;;  %v857_v20 = vadd.f32 %v1621_v14, %v1835_v28  ;;  %v873_v29 = vadd.f32 %v1637_v15, %v1835_v28 }
  0xff   : > { %v982_v30 = vmax.f32 %v950_v48, 0.0  ;;  %v998_v56 = vmax.f32 %v966_v13, 0.0  ;;  %v646_v22 = vpop.f32.mrf.mxu0  ;;  %v710_v23 = vpop.f32.mrf.mxu1  ;;  %v1455_v50 = vunpack.c.l.bf16 %v1901_v41  ;;  %v1428_v9 = vunpack.c.h.bf16 %v1886_v32 }
 0x100   : > { %v980_v26 = vmax.f32 %v948_v52, 0.0  ;;  %v996_v27 = vmax.f32 %v964_v19, 0.0  ;;  %v855_v38 = vadd.f32 %v1835_v28, %v646_v22  ;;  %v871_v57 = vadd.f32 %v1835_v28, %v710_v23 }
 0x101   : > { %v1479_v31 = vpack.c.bf16 %v982_v30, %v981_v55  ;;  %v1519_v37 = vpack.c.bf16 %v998_v56, %v997_v21  ;;  %v1622_v58 = vpop.f32.mrf.mxu0  ;;  %v1638_v34 = vpop.f32.mrf.mxu1  ;;  %v953_v39 = vadd.f32 %v1419_v63, %v857_v20  ;;  %v969_v42 = vadd.f32 %v1451_v0, %v873_v29 }
 0x102   : > { %v1474_v35 = vpack.c.bf16 %v980_v26, %v979_v24  ;;  %v1514_v36 = vpack.c.bf16 %v996_v27, %v995_v25  ;;  %v858_v43 = vadd.f32 %v1622_v58, %v1835_v28  ;;  %v874_v44 = vadd.f32 %v1638_v34, %v1835_v28 }
 0x103   : > { %v649_v45 = vpop.f32.mrf.mxu0  ;;  %v713_v46 = vpop.f32.mrf.mxu1  ;;  %1558 = vst [vmem:[%s1898_s24 + $0x18] sm:$0xff] %v1479_v31   ;;  %1566 = vst [vmem:[%s1898_s24 + $0x58] sm:$0xff] %v1519_v37   ;;  %v951_v53 = vadd.f32 %v1415_v7, %v855_v38  ;;  %v967_v63 = vadd.f32 %v1447_v8, %v871_v57  ;;  %v1460_v7 = vunpack.c.h.bf16 %v1889_v33  ;;  %v985_v10 = vmax.f32 %v953_v39, 0.0 }
 0x104   : > { %v856_v0 = vadd.f32 %v1835_v28, %v649_v45  ;;  %v872_v62 = vadd.f32 %v1835_v28, %v713_v46  ;;  %1557 = vst [vmem:[%s1898_s24 + $0x10] sm:$0xff] %v1474_v35   ;;  %1565 = vst [vmem:[%s1898_s24 + $0x50] sm:$0xff] %v1514_v36   ;;  %v954_v3 = vadd.f32 %v1420_v17, %v858_v43  ;;  %v1001_v8 = vmax.f32 %v969_v42, 0.0 }
 0x105   : > { %v970_v4 = vadd.f32 %v1452_v18, %v874_v44  ;;  %v1625_v5 = vpop.f32.mrf.mxu0  ;;  %v1641_v6 = vpop.f32.mrf.mxu1  ;;  %v983_v13 = vmax.f32 %v951_v53, 0.0  ;;  %v999_v14 = vmax.f32 %v967_v63, 0.0  ;;  %v1424_v21 = vunpack.c.h.bf16 %v1892_v40 }
 0x106   : > { %v952_v11 = vadd.f32 %v1416_v54, %v856_v0  ;;  %v968_v12 = vadd.f32 %v1448_v61, %v872_v62  ;;  %v986_v47 = vmax.f32 %v954_v3, 0.0  ;;  %v861_v17 = vadd.f32 %v1625_v5, %v1835_v28 }
 0x107   : > { %v1002_v59 = vmax.f32 %v970_v4, 0.0  ;;  %v877_v60 = vadd.f32 %v1641_v6, %v1835_v28  ;;  %v662_v18 = vpop.f32.mrf.mxu0  ;;  %v726_v48 = vpop.f32.mrf.mxu1  ;;  %v1456_v30 = vunpack.c.h.bf16 %v1901_v41 }
 0x108   : > { %v984_v15 = vmax.f32 %v952_v11, 0.0  ;;  %v1000_v52 = vmax.f32 %v968_v12, 0.0  ;;  %v1489_v19 = vpack.c.bf16 %v986_v47, %v985_v10  ;;  %v859_v54 = vadd.f32 %v1835_v28, %v662_v18 }
 0x109   : > { %v1529_v1 = vpack.c.bf16 %v1002_v59, %v1001_v8  ;;  %v875_v2 = vadd.f32 %v1835_v28, %v726_v48  ;;  %v1626_v61 = vpop.f32.mrf.mxu0  ;;  %v1642_v20 = vpop.f32.mrf.mxu1  ;;  %v957_v56 = vadd.f32 %v1427_v16, %v861_v17  ;;  %v973_v22 = vadd.f32 %v1459_v51, %v877_v60 }
 0x10a   : > { %v1484_v29 = vpack.c.bf16 %v984_v15, %v983_v13  ;;  %v1524_v55 = vpack.c.bf16 %v1000_v52, %v999_v14  ;;  %1560 = vst [vmem:[%s1898_s24 + $0x28] sm:$0xff] %v1489_v19   ;;  %v862_v23 = vadd.f32 %v1626_v61, %v1835_v28  ;;  %v878_v24 = vadd.f32 %v1642_v20, %v1835_v28 }
 0x10b   : > { %1568 = vst [vmem:[%s1898_s24 + $0x68] sm:$0xff] %v1529_v1   ;;  %v665_v25 = vpop.f32.mrf.mxu0  ;;  %v729_v26 = vpop.f32.mrf.mxu1  ;;  %v955_v27 = vadd.f32 %v1423_v49, %v859_v54  ;;  %v971_v31 = vadd.f32 %v1455_v50, %v875_v2  ;;  %v989_v37 = vmax.f32 %v957_v56, 0.0  ;;  %v1005_v38 = vmax.f32 %v973_v22, 0.0 }
 0x10c   : > { %1559 = vst [vmem:[%s1898_s24 + $0x20] sm:$0xff] %v1484_v29   ;;  %1567 = vst [vmem:[%s1898_s24 + $0x60] sm:$0xff] %v1524_v55   ;;  %v860_v40 = vadd.f32 %v1835_v28, %v665_v25  ;;  %v876_v32 = vadd.f32 %v1835_v28, %v729_v26  ;;  %v958_v41 = vadd.f32 %v1428_v9, %v862_v23 }
 0x10d   : > { %v974_v33 = vadd.f32 %v1460_v7, %v878_v24  ;;  %v987_v34 = vmax.f32 %v955_v27, 0.0  ;;  %v1003_v35 = vmax.f32 %v971_v31, 0.0 }
 0x10e   : > { %v956_v16 = vadd.f32 %v1424_v21, %v860_v40  ;;  %v972_v51 = vadd.f32 %v1456_v30, %v876_v32  ;;  %v990_v57 = vmax.f32 %v958_v41, 0.0 }
 0x10f   : > { %v1006_v58 = vmax.f32 %v974_v33, 0.0 }
 0x110   : > { %v988_v36 = vmax.f32 %v956_v16, 0.0  ;;  %v1004_v39 = vmax.f32 %v972_v51, 0.0  ;;  %v1499_v42 = vpack.c.bf16 %v990_v57, %v989_v37 }
 0x111   : > { %v1539_v43 = vpack.c.bf16 %v1006_v58, %v1005_v38 }
 0x112   : > { %v1494_v44 = vpack.c.bf16 %v988_v36, %v987_v34  ;;  %v1534_v28 = vpack.c.bf16 %v1004_v39, %v1003_v35  ;;  %1562 = vst [vmem:[%s1898_s24 + $0x38] sm:$0xff] %v1499_v42  }
 0x113   : > { %1570 = vst [vmem:[%s1898_s24 + $0x78] sm:$0xff] %v1539_v43  }
 0x114   : > { %1561 = vst [vmem:[%s1898_s24 + $0x30] sm:$0xff] %v1494_v44   ;;  %1569 = vst [vmem:[%s1898_s24 + $0x70] sm:$0xff] %v1534_v28  }
 0x115 PF: > { %s14_s17 = sadd.s32 1, %s1729_s17   ;;  %s2001_s15 = smov %s1725_s16 }
 0x116   : > { %p11_p5 = scmp.ge.s32.totalorder %s14_s17, 4   ;;  %s2002_s16 = smov %s2004_s18 }
 0x118   :  { %13 = sbr.rel (!%p11_p5) target bundleno = 2 (0x2), region = 83 }

// kernel: _lambda_.22
= control target key start
LH: loop header
LB: loop body
LE: loop exit
PB: predicated region body
PF: predicated region fallthrough
CT: control target
= control target key end

     0   :  { %s705_s1 = inlined_call_operand.vmem [shape: bf16[128,128], index: 1, kind: input, shape index: {}]   ;;  %s706_s0 = inlined_call_operand.vmem [shape: bf16[128,128], index: 0, kind: input, shape index: {}]   ;;  %s707_s2 = inlined_call_operand.vmem [shape: f32[1,128], index: 2, kind: input, shape index: {}]   ;;  %s708_s3 = inlined_call_operand.vmem [shape: bf16[128,128], index: 3, kind: output, shape index: {}]  }
   0x1   :  { %v594_v0 = vld [vmem:[%s705_s1 + $0x38] sm:$0xff]   ;;  %v595_v1 = vld [vmem:[%s705_s1 + $0x30] sm:$0xff]   ;;  %v596_v2 = vld [vmem:[%s705_s1 + $0x28] sm:$0xff]  }
   0x2   :  { %546 = vmatprep.subr.bf16.mxu0 %v594_v0  ;;  %578 = vmatprep.subr.bf16.mxu1 %v594_v0  ;;  %v597_v3 = vld [vmem:[%s705_s1 + $0x20] sm:$0xff]   ;;  %v598_v6 = vld [vmem:[%s705_s1 + $0x18] sm:$0xff]   ;;  %v599_v7 = vld [vmem:[%s705_s1 + $0x10] sm:$0xff]  }
   0x3   :  { %547 = vmatpush3.bf16.msra.mxu0 %v594_v0  ;;  %586 = vmatpush3.bf16.msra.mxu1 %v594_v0  ;;  %v602_v4 = vld [vmem:[%s706_s0] sm:$0xff]   ;;  %v600_v8 = vld [vmem:[%s705_s1 + $0x8] sm:$0xff]   ;;  %v606_v12 = vld [vmem:[%s706_s0 + $0x10] sm:$0xff]  }
   0x4   :  { %548 = vmatprep.subr.bf16.mxu0 %v595_v1  ;;  %579 = vmatprep.subr.bf16.mxu1 %v595_v1  ;;  %v603_v5 = vld [vmem:[%s706_s0 + $0x20] sm:$0xff]   ;;  %v604_v10 = vld [vmem:[%s706_s0 + $0x8] sm:$0xff]   ;;  %v607_v13 = vld [vmem:[%s706_s0 + $0x30] sm:$0xff]  }
   0x5   :  { %562 = vmatprep.mubr.bf16.mxu0 %v602_v4  ;;  %570 = vmatprep.mubr.bf16.mxu1 %v603_v5  ;;  %v601_v9 = vld [vmem:[%s705_s1] sm:$0xff]   ;;  %v605_v11 = vld [vmem:[%s706_s0 + $0x28] sm:$0xff]   ;;  %v608_v14 = vld [vmem:[%s706_s0 + $0x18] sm:$0xff]  }
   0x6   :  { %v609_v15 = vld [vmem:[%s706_s0 + $0x38] sm:$0xff]   ;;  %v450_v18 = vld [vmem:[%s707_s2] ss:$0 sm:$0xff] }
   0x7   :  { %549 = vmatpush3.bf16.msra.mxu0 %v595_v1  ;;  %587 = vmatpush3.bf16.msra.mxu1 %v595_v1 }
   0x8   :  { %550 = vmatprep.subr.bf16.mxu0 %v596_v2  ;;  %580 = vmatprep.subr.bf16.mxu1 %v596_v2 }
   0xb   :  { %551 = vmatpush3.bf16.msra.mxu0 %v596_v2  ;;  %588 = vmatpush3.bf16.msra.mxu1 %v596_v2 }
   0xc   :  { %552 = vmatprep.subr.bf16.mxu0 %v597_v3  ;;  %581 = vmatprep.subr.bf16.mxu1 %v597_v3 }
   0xf   :  { %553 = vmatpush3.bf16.msra.mxu0 %v597_v3  ;;  %589 = vmatpush3.bf16.msra.mxu1 %v597_v3 }
  0x10   :  { %554 = vmatprep.subr.bf16.mxu0 %v598_v6  ;;  %582 = vmatprep.subr.bf16.mxu1 %v598_v6 }
  0x13   :  { %555 = vmatpush3.bf16.msra.mxu0 %v598_v6  ;;  %590 = vmatpush3.bf16.msra.mxu1 %v598_v6 }
  0x14   :  { %556 = vmatprep.subr.bf16.mxu0 %v599_v7  ;;  %583 = vmatprep.subr.bf16.mxu1 %v599_v7 }
  0x17   :  { %557 = vmatpush3.bf16.msra.mxu0 %v599_v7  ;;  %591 = vmatpush3.bf16.msra.mxu1 %v599_v7 }
  0x18   :  { %558 = vmatprep.subr.bf16.mxu0 %v600_v8  ;;  %584 = vmatprep.subr.bf16.mxu1 %v600_v8 }
  0x1b   :  { %559 = vmatpush3.bf16.msra.mxu0 %v600_v8  ;;  %592 = vmatpush3.bf16.msra.mxu1 %v600_v8 }
  0x1c   :  { %560 = vmatprep.subr.bf16.mxu0 %v601_v9  ;;  %585 = vmatprep.subr.bf16.mxu1 %v601_v9 }
  0x1f   :  { %561 = vmatpush3.bf16.msra.mxu0 %v601_v9  ;;  %593 = vmatpush3.bf16.msra.mxu1 %v601_v9 }
  0x22   :  { %563 = vmatmul.mubr.bf16.vlgmr.msra.gmra.mxu0 %v604_v10  ;;  %571 = vmatmul.mubr.bf16.vlgmr.msra.gmra.mxu1 %v605_v11 }
  0x23   :  { %566 = vmatprep.mubr.bf16.mxu0 %v606_v12  ;;  %574 = vmatprep.mubr.bf16.mxu1 %v607_v13 }
  0x2a   :  { %567 = vmatmul.mubr.bf16.gmra.mxu0 %v608_v14  ;;  %575 = vmatmul.mubr.bf16.gmra.mxu1 %v609_v15 }
  0xe2   :  { %v564_v16 = vpop.f32.mrf.mxu0  ;;  %v572_v17 = vpop.f32.mrf.mxu1 }
  0xe3   :  { %v336_v23 = vadd.f32 %v564_v16, %v450_v18  ;;  %v344_v24 = vadd.f32 %v572_v17, %v450_v18 }
  0xe4   :  { %v213_v19 = vpop.f32.mrf.mxu0  ;;  %v245_v20 = vpop.f32.mrf.mxu1 }
  0xe5   :  { %v334_v27 = vadd.f32 %v450_v18, %v213_v19  ;;  %v342_v28 = vadd.f32 %v450_v18, %v245_v20 }
  0xe6   :  { %v565_v21 = vpop.f32.mrf.mxu0  ;;  %v573_v22 = vpop.f32.mrf.mxu1 }
  0xe7   :  { %v337_v25 = vadd.f32 %v565_v21, %v450_v18  ;;  %v345_v26 = vadd.f32 %v573_v22, %v450_v18 }
  0xe8   :  { %v216_v29 = vpop.f32.mrf.mxu0  ;;  %v248_v30 = vpop.f32.mrf.mxu1 }
  0xe9   :  { %v491_v31 = vpack.c.bf16 %v337_v25, %v336_v23  ;;  %v511_v32 = vpack.c.bf16 %v345_v26, %v344_v24  ;;  %v335_v33 = vadd.f32 %v450_v18, %v216_v29  ;;  %v343_v34 = vadd.f32 %v450_v18, %v248_v30 }
  0xea   :  { %v568_v35 = vpop.f32.mrf.mxu0  ;;  %v576_v36 = vpop.f32.mrf.mxu1 }
  0xeb   :  { %523 = vst [vmem:[%s708_s3 + $0x8] sm:$0xff] %v491_v31   ;;  %527 = vst [vmem:[%s708_s3 + $0x28] sm:$0xff] %v511_v32   ;;  %v486_v37 = vpack.c.bf16 %v335_v33, %v334_v27  ;;  %v506_v38 = vpack.c.bf16 %v343_v34, %v342_v28  ;;  %v340_v43 = vadd.f32 %v568_v35, %v450_v18 }
  0xec   :  { %v229_v39 = vpop.f32.mrf.mxu0  ;;  %v261_v40 = vpop.f32.mrf.mxu1  ;;  %v348_v44 = vadd.f32 %v576_v36, %v450_v18 }
  0xed   :  { %487 = vst [vmem:[%s708_s3] sm:$0xff] %v486_v37   ;;  %526 = vst [vmem:[%s708_s3 + $0x20] sm:$0xff] %v506_v38   ;;  %v338_v47 = vadd.f32 %v450_v18, %v229_v39  ;;  %v346_v48 = vadd.f32 %v450_v18, %v261_v40 }
  0xee   :  { %v569_v41 = vpop.f32.mrf.mxu0  ;;  %v577_v42 = vpop.f32.mrf.mxu1 }
  0xef   :  { %v341_v45 = vadd.f32 %v569_v41, %v450_v18  ;;  %v349_v46 = vadd.f32 %v577_v42, %v450_v18 }
  0xf0   :  { %v232_v49 = vpop.f32.mrf.mxu0  ;;  %v264_v50 = vpop.f32.mrf.mxu1 }
  0xf1   :  { %v501_v51 = vpack.c.bf16 %v341_v45, %v340_v43  ;;  %v521_v52 = vpack.c.bf16 %v349_v46, %v348_v44  ;;  %v339_v53 = vadd.f32 %v450_v18, %v232_v49  ;;  %v347_v54 = vadd.f32 %v450_v18, %v264_v50 }
  0xf3   :  { %525 = vst [vmem:[%s708_s3 + $0x18] sm:$0xff] %v501_v51   ;;  %529 = vst [vmem:[%s708_s3 + $0x38] sm:$0xff] %v521_v52   ;;  %v496_v55 = vpack.c.bf16 %v339_v53, %v338_v47  ;;  %v516_v56 = vpack.c.bf16 %v347_v54, %v346_v48 }
  0xf5   :  { %524 = vst [vmem:[%s708_s3 + $0x10] sm:$0xff] %v496_v55   ;;  %528 = vst [vmem:[%s708_s3 + $0x30] sm:$0xff] %v516_v56  }

// kernel: _lambda_.20
= control target key start
LH: loop header
LB: loop body
LE: loop exit
PB: predicated region body
PF: predicated region fallthrough
CT: control target
= control target key end

     0   :  { %s721_s1 = inlined_call_operand.vmem [shape: bf16[128,128], index: 1, kind: input, shape index: {}]   ;;  %s722_s0 = inlined_call_operand.vmem [shape: bf16[128,128], index: 0, kind: input, shape index: {}]   ;;  %s723_s2 = inlined_call_operand.vmem [shape: f32[1,128], index: 2, kind: input, shape index: {}]   ;;  %s724_s3 = inlined_call_operand.vmem [shape: bf16[128,128], index: 3, kind: output, shape index: {}]  }
   0x1   :  { %v610_v0 = vld [vmem:[%s721_s1 + $0x38] sm:$0xff]   ;;  %v611_v1 = vld [vmem:[%s721_s1 + $0x30] sm:$0xff]   ;;  %v612_v2 = vld [vmem:[%s721_s1 + $0x28] sm:$0xff]  }
   0x2   :  { %562 = vmatprep.subr.bf16.mxu0 %v610_v0  ;;  %594 = vmatprep.subr.bf16.mxu1 %v610_v0  ;;  %v613_v3 = vld [vmem:[%s721_s1 + $0x20] sm:$0xff]   ;;  %v614_v6 = vld [vmem:[%s721_s1 + $0x18] sm:$0xff]   ;;  %v615_v7 = vld [vmem:[%s721_s1 + $0x10] sm:$0xff]  }
   0x3   :  { %563 = vmatpush3.bf16.msra.mxu0 %v610_v0  ;;  %602 = vmatpush3.bf16.msra.mxu1 %v610_v0  ;;  %v618_v4 = vld [vmem:[%s722_s0] sm:$0xff]   ;;  %v616_v8 = vld [vmem:[%s721_s1 + $0x8] sm:$0xff]   ;;  %v622_v12 = vld [vmem:[%s722_s0 + $0x10] sm:$0xff]  }
   0x4   :  { %564 = vmatprep.subr.bf16.mxu0 %v611_v1  ;;  %595 = vmatprep.subr.bf16.mxu1 %v611_v1  ;;  %v619_v5 = vld [vmem:[%s722_s0 + $0x20] sm:$0xff]   ;;  %v620_v10 = vld [vmem:[%s722_s0 + $0x8] sm:$0xff]   ;;  %v623_v13 = vld [vmem:[%s722_s0 + $0x30] sm:$0xff]  }
   0x5   :  { %578 = vmatprep.mubr.bf16.mxu0 %v618_v4  ;;  %586 = vmatprep.mubr.bf16.mxu1 %v619_v5  ;;  %v617_v9 = vld [vmem:[%s721_s1] sm:$0xff]   ;;  %v621_v11 = vld [vmem:[%s722_s0 + $0x28] sm:$0xff]   ;;  %v624_v14 = vld [vmem:[%s722_s0 + $0x18] sm:$0xff]  }
   0x6   :  { %v625_v15 = vld [vmem:[%s722_s0 + $0x38] sm:$0xff]   ;;  %v466_v16 = vld [vmem:[%s723_s2] ss:$0 sm:$0xff] }
   0x7   :  { %565 = vmatpush3.bf16.msra.mxu0 %v611_v1  ;;  %603 = vmatpush3.bf16.msra.mxu1 %v611_v1 }
   0x8   :  { %566 = vmatprep.subr.bf16.mxu0 %v612_v2  ;;  %596 = vmatprep.subr.bf16.mxu1 %v612_v2 }
   0xb   :  { %567 = vmatpush3.bf16.msra.mxu0 %v612_v2  ;;  %604 = vmatpush3.bf16.msra.mxu1 %v612_v2 }
   0xc   :  { %568 = vmatprep.subr.bf16.mxu0 %v613_v3  ;;  %597 = vmatprep.subr.bf16.mxu1 %v613_v3 }
   0xf   :  { %569 = vmatpush3.bf16.msra.mxu0 %v613_v3  ;;  %605 = vmatpush3.bf16.msra.mxu1 %v613_v3 }
  0x10   :  { %570 = vmatprep.subr.bf16.mxu0 %v614_v6  ;;  %598 = vmatprep.subr.bf16.mxu1 %v614_v6 }
  0x13   :  { %571 = vmatpush3.bf16.msra.mxu0 %v614_v6  ;;  %606 = vmatpush3.bf16.msra.mxu1 %v614_v6 }
  0x14   :  { %572 = vmatprep.subr.bf16.mxu0 %v615_v7  ;;  %599 = vmatprep.subr.bf16.mxu1 %v615_v7 }
  0x17   :  { %573 = vmatpush3.bf16.msra.mxu0 %v615_v7  ;;  %607 = vmatpush3.bf16.msra.mxu1 %v615_v7 }
  0x18   :  { %574 = vmatprep.subr.bf16.mxu0 %v616_v8  ;;  %600 = vmatprep.subr.bf16.mxu1 %v616_v8 }
  0x1b   :  { %575 = vmatpush3.bf16.msra.mxu0 %v616_v8  ;;  %608 = vmatpush3.bf16.msra.mxu1 %v616_v8 }
  0x1c   :  { %576 = vmatprep.subr.bf16.mxu0 %v617_v9  ;;  %601 = vmatprep.subr.bf16.mxu1 %v617_v9 }
  0x1f   :  { %577 = vmatpush3.bf16.msra.mxu0 %v617_v9  ;;  %609 = vmatpush3.bf16.msra.mxu1 %v617_v9 }
  0x22   :  { %579 = vmatmul.mubr.bf16.vlgmr.msra.gmra.mxu0 %v620_v10  ;;  %587 = vmatmul.mubr.bf16.vlgmr.msra.gmra.mxu1 %v621_v11 }
  0x23   :  { %582 = vmatprep.mubr.bf16.mxu0 %v622_v12  ;;  %590 = vmatprep.mubr.bf16.mxu1 %v623_v13 }
  0x2a   :  { %583 = vmatmul.mubr.bf16.gmra.mxu0 %v624_v14  ;;  %591 = vmatmul.mubr.bf16.gmra.mxu1 %v625_v15 }
  0xe2   :  { %v580_v17 = vpop.f32.mrf.mxu0  ;;  %v588_v18 = vpop.f32.mrf.mxu1 }
  0xe3   :  { %v336_v19 = vadd.f32 %v580_v17, %v466_v16  ;;  %v344_v20 = vadd.f32 %v588_v18, %v466_v16 }
  0xe4   :  { %v213_v21 = vpop.f32.mrf.mxu0  ;;  %v245_v22 = vpop.f32.mrf.mxu1 }
  0xe5   :  { %v334_v23 = vadd.f32 %v466_v16, %v213_v21  ;;  %v342_v24 = vadd.f32 %v466_v16, %v245_v22  ;;  %v352_v29 = vmax.f32 %v336_v19, 0.0  ;;  %v360_v30 = vmax.f32 %v344_v20, 0.0 }
  0xe6   :  { %v581_v25 = vpop.f32.mrf.mxu0  ;;  %v589_v26 = vpop.f32.mrf.mxu1 }
  0xe7   :  { %v337_v27 = vadd.f32 %v581_v25, %v466_v16  ;;  %v345_v28 = vadd.f32 %v589_v26, %v466_v16  ;;  %v350_v37 = vmax.f32 %v334_v23, 0.0  ;;  %v358_v38 = vmax.f32 %v342_v24, 0.0 }
  0xe8   :  { %v216_v31 = vpop.f32.mrf.mxu0  ;;  %v248_v32 = vpop.f32.mrf.mxu1 }
  0xe9   :  { %v353_v33 = vmax.f32 %v337_v27, 0.0  ;;  %v361_v34 = vmax.f32 %v345_v28, 0.0  ;;  %v335_v35 = vadd.f32 %v466_v16, %v216_v31  ;;  %v343_v36 = vadd.f32 %v466_v16, %v248_v32 }
  0xea   :  { %v584_v39 = vpop.f32.mrf.mxu0  ;;  %v592_v40 = vpop.f32.mrf.mxu1 }
  0xeb   :  { %v507_v41 = vpack.c.bf16 %v353_v33, %v352_v29  ;;  %v527_v42 = vpack.c.bf16 %v361_v34, %v360_v30  ;;  %v351_v43 = vmax.f32 %v335_v35, 0.0  ;;  %v359_v44 = vmax.f32 %v343_v36, 0.0 }
  0xec   :  { %v340_v45 = vadd.f32 %v584_v39, %v466_v16  ;;  %v348_v46 = vadd.f32 %v592_v40, %v466_v16  ;;  %v229_v47 = vpop.f32.mrf.mxu0  ;;  %v261_v48 = vpop.f32.mrf.mxu1 }
  0xed   :  { %539 = vst [vmem:[%s724_s3 + $0x8] sm:$0xff] %v507_v41   ;;  %543 = vst [vmem:[%s724_s3 + $0x28] sm:$0xff] %v527_v42   ;;  %v502_v49 = vpack.c.bf16 %v351_v43, %v350_v37  ;;  %v522_v50 = vpack.c.bf16 %v359_v44, %v358_v38  ;;  %v338_v51 = vadd.f32 %v466_v16, %v229_v47 }
  0xee   :  { %v346_v52 = vadd.f32 %v466_v16, %v261_v48  ;;  %v585_v53 = vpop.f32.mrf.mxu0  ;;  %v593_v54 = vpop.f32.mrf.mxu1  ;;  %v356_v57 = vmax.f32 %v340_v45, 0.0  ;;  %v364_v58 = vmax.f32 %v348_v46, 0.0 }
  0xef   :  { %503 = vst [vmem:[%s724_s3] sm:$0xff] %v502_v49   ;;  %542 = vst [vmem:[%s724_s3 + $0x20] sm:$0xff] %v522_v50   ;;  %v341_v55 = vadd.f32 %v585_v53, %v466_v16  ;;  %v349_v56 = vadd.f32 %v593_v54, %v466_v16  ;;  %v354_v1 = vmax.f32 %v338_v51, 0.0 }
  0xf0   :  { %v232_v59 = vpop.f32.mrf.mxu0  ;;  %v264_v60 = vpop.f32.mrf.mxu1  ;;  %v362_v2 = vmax.f32 %v346_v52, 0.0 }
  0xf1   :  { %v357_v61 = vmax.f32 %v341_v55, 0.0  ;;  %v365_v62 = vmax.f32 %v349_v56, 0.0  ;;  %v339_v63 = vadd.f32 %v466_v16, %v232_v59  ;;  %v347_v0 = vadd.f32 %v466_v16, %v264_v60 }
  0xf3   :  { %v517_v3 = vpack.c.bf16 %v357_v61, %v356_v57  ;;  %v537_v4 = vpack.c.bf16 %v365_v62, %v364_v58  ;;  %v355_v5 = vmax.f32 %v339_v63, 0.0  ;;  %v363_v6 = vmax.f32 %v347_v0, 0.0 }
  0xf5   :  { %541 = vst [vmem:[%s724_s3 + $0x18] sm:$0xff] %v517_v3   ;;  %545 = vst [vmem:[%s724_s3 + $0x38] sm:$0xff] %v537_v4   ;;  %v512_v7 = vpack.c.bf16 %v355_v5, %v354_v1  ;;  %v532_v8 = vpack.c.bf16 %v363_v6, %v362_v2 }
  0xf7   :  { %540 = vst [vmem:[%s724_s3 + $0x10] sm:$0xff] %v512_v7   ;;  %544 = vst [vmem:[%s724_s3 + $0x30] sm:$0xff] %v532_v8  }

// kernel: _lambda_.26
= control target key start
LH: loop header
LB: loop body
LE: loop exit
PB: predicated region body
PF: predicated region fallthrough
CT: control target
= control target key end

     0   :  { %s335_s1 = inlined_call_operand.vmem [shape: bf16[128,128], index: 1, kind: input, shape index: {}]   ;;  %s336_s0 = inlined_call_operand.vmem [shape: bf16[32,128], index: 0, kind: input, shape index: {}]   ;;  %s337_s2 = inlined_call_operand.vmem [shape: f32[1,128], index: 2, kind: input, shape index: {}]   ;;  %s338_s3 = inlined_call_operand.vmem [shape: bf16[32,128], index: 3, kind: output, shape index: {}]  }
   0x1   :  { %v266_v0 = vld [vmem:[%s335_s1 + $0x38] sm:$0xff]   ;;  %v267_v1 = vld [vmem:[%s335_s1 + $0x30] sm:$0xff]   ;;  %v268_v2 = vld [vmem:[%s335_s1 + $0x28] sm:$0xff]  }
   0x2   :  { %246 = vmatprep.subr.bf16.mxu0 %v266_v0  ;;  %v269_v3 = vld [vmem:[%s335_s1 + $0x20] sm:$0xff]   ;;  %v270_v5 = vld [vmem:[%s335_s1 + $0x18] sm:$0xff]   ;;  %v271_v6 = vld [vmem:[%s335_s1 + $0x10] sm:$0xff]  }
   0x3   :  { %247 = vmatpush3.bf16.msra.mxu0 %v266_v0  ;;  %v274_v4 = vld [vmem:[%s336_s0] sm:$0xff]   ;;  %v272_v7 = vld [vmem:[%s335_s1 + $0x8] sm:$0xff]  }
   0x4   :  { %248 = vmatprep.subr.bf16.mxu0 %v267_v1  ;;  %262 = vmatprep.mubr.bf16.mxu0 %v274_v4  ;;  %v273_v8 = vld [vmem:[%s335_s1] sm:$0xff]   ;;  %v275_v9 = vld [vmem:[%s336_s0 + $0x8] sm:$0xff]  }
   0x5   :  { %v216_v11 = vld [vmem:[%s337_s2] ss:$0 sm:$0xff] }
   0x7   :  { %249 = vmatpush3.bf16.msra.mxu0 %v267_v1 }
   0x8   :  { %250 = vmatprep.subr.bf16.mxu0 %v268_v2 }
   0xb   :  { %251 = vmatpush3.bf16.msra.mxu0 %v268_v2 }
   0xc   :  { %252 = vmatprep.subr.bf16.mxu0 %v269_v3 }
   0xf   :  { %253 = vmatpush3.bf16.msra.mxu0 %v269_v3 }
  0x10   :  { %254 = vmatprep.subr.bf16.mxu0 %v270_v5 }
  0x13   :  { %255 = vmatpush3.bf16.msra.mxu0 %v270_v5 }
  0x14   :  { %256 = vmatprep.subr.bf16.mxu0 %v271_v6 }
  0x17   :  { %257 = vmatpush3.bf16.msra.mxu0 %v271_v6 }
  0x18   :  { %258 = vmatprep.subr.bf16.mxu0 %v272_v7 }
  0x1b   :  { %259 = vmatpush3.bf16.msra.mxu0 %v272_v7 }
  0x1c   :  { %260 = vmatprep.subr.bf16.mxu0 %v273_v8 }
  0x1f   :  { %261 = vmatpush3.bf16.msra.mxu0 %v273_v8 }
  0x22   :  { %263 = vmatmul.mubr.bf16.vlgmr.msra.gmra.mxu0 %v275_v9 }
  0xe2   :  { %v264_v10 = vpop.f32.mrf.mxu0 }
  0xe3   :  { %v180_v14 = vadd.f32 %v264_v10, %v216_v11 }
  0xe4   :  { %v141_v12 = vpop.f32.mrf.mxu0 }
  0xe5   :  { %v178_v17 = vadd.f32 %v216_v11, %v141_v12 }
  0xe6   :  { %v265_v13 = vpop.f32.mrf.mxu0 }
  0xe7   :  { %v181_v15 = vadd.f32 %v265_v13, %v216_v11 }
  0xe8   :  { %v144_v16 = vpop.f32.mrf.mxu0 }
  0xe9   :  { %v233_v18 = vpack.c.bf16 %v181_v15, %v180_v14  ;;  %v179_v19 = vadd.f32 %v216_v11, %v144_v16 }
  0xeb   :  { %235 = vst [vmem:[%s338_s3 + $0x8] sm:$0xff] %v233_v18   ;;  %v228_v20 = vpack.c.bf16 %v179_v19, %v178_v17 }
  0xed   :  { %229 = vst [vmem:[%s338_s3] sm:$0xff] %v228_v20  }

// kernel: _lambda_.23
= control target key start
LH: loop header
LB: loop body
LE: loop exit
PB: predicated region body
PF: predicated region fallthrough
CT: control target
= control target key end

     0   :  { %s874_s1 = inlined_call_operand.vmem [shape: bf16[128,128], index: 1, kind: input, shape index: {}]   ;;  %s875_s0 = inlined_call_operand.vmem [shape: bf16[128,128], index: 0, kind: input, shape index: {}]   ;;  %s876_s2 = inlined_call_operand.vmem [shape: f32[1,128], index: 2, kind: input, shape index: {}]   ;;  %s877_s3 = inlined_call_operand.vmem [shape: bf16[128,128], index: 3, kind: input, shape index: {}, may-alias: {3,4}]   ;;  %s878_s4 = inlined_call_operand.vmem [shape: bf16[128,128], index: 4, kind: output, shape index: {}, may-alias: {3,4}]  }
   0x1   :  { %v700_v0 = vld [vmem:[%s874_s1 + $0x38] sm:$0xff]   ;;  %v701_v1 = vld [vmem:[%s874_s1 + $0x30] sm:$0xff]   ;;  %v702_v2 = vld [vmem:[%s874_s1 + $0x28] sm:$0xff]  }
   0x2   :  { %652 = vmatprep.subr.bf16.mxu0 %v700_v0  ;;  %684 = vmatprep.subr.bf16.mxu1 %v700_v0  ;;  %v703_v3 = vld [vmem:[%s874_s1 + $0x20] sm:$0xff]   ;;  %v704_v6 = vld [vmem:[%s874_s1 + $0x18] sm:$0xff]   ;;  %v705_v7 = vld [vmem:[%s874_s1 + $0x10] sm:$0xff]  }
   0x3   :  { %653 = vmatpush3.bf16.msra.mxu0 %v700_v0  ;;  %692 = vmatpush3.bf16.msra.mxu1 %v700_v0  ;;  %v708_v4 = vld [vmem:[%s875_s0] sm:$0xff]   ;;  %v706_v8 = vld [vmem:[%s874_s1 + $0x8] sm:$0xff]   ;;  %v712_v12 = vld [vmem:[%s875_s0 + $0x10] sm:$0xff]  }
   0x4   :  { %654 = vmatprep.subr.bf16.mxu0 %v701_v1  ;;  %685 = vmatprep.subr.bf16.mxu1 %v701_v1  ;;  %v709_v5 = vld [vmem:[%s875_s0 + $0x20] sm:$0xff]   ;;  %v710_v10 = vld [vmem:[%s875_s0 + $0x8] sm:$0xff]   ;;  %v713_v13 = vld [vmem:[%s875_s0 + $0x30] sm:$0xff]  }
   0x5   :  { %668 = vmatprep.mubr.bf16.mxu0 %v708_v4  ;;  %676 = vmatprep.mubr.bf16.mxu1 %v709_v5  ;;  %v707_v9 = vld [vmem:[%s874_s1] sm:$0xff]   ;;  %v711_v11 = vld [vmem:[%s875_s0 + $0x28] sm:$0xff]   ;;  %v714_v14 = vld [vmem:[%s875_s0 + $0x18] sm:$0xff]  }
   0x6   :  { %v715_v15 = vld [vmem:[%s875_s0 + $0x38] sm:$0xff]   ;;  %v792_v16 = vld [vmem:[%s876_s2] ss:$0 sm:$0xff]  ;;  %v622_v17 = vld [vmem:[%s877_s3 + $0x8] sm:$0xff]  }
   0x7   :  { %655 = vmatpush3.bf16.msra.mxu0 %v701_v1  ;;  %693 = vmatpush3.bf16.msra.mxu1 %v701_v1  ;;  %v626_v18 = vld [vmem:[%s877_s3 + $0x28] sm:$0xff]   ;;  %v551_v21 = vld [vmem:[%s877_s3] sm:$0xff]   ;;  %v556_v24 = vunpack.c.l.bf16 %v622_v17  ;;  %v811_v29 = vld [vmem:[%s877_s3 + $0x18] sm:$0xff]   ;;  %v557_v38 = vunpack.c.h.bf16 %v622_v17 }
   0x8   :  { %656 = vmatprep.subr.bf16.mxu0 %v702_v2  ;;  %686 = vmatprep.subr.bf16.mxu1 %v702_v2  ;;  %v625_v22 = vld [vmem:[%s877_s3 + $0x20] sm:$0xff]   ;;  %v572_v26 = vunpack.c.l.bf16 %v626_v18  ;;  %v816_v30 = vld [vmem:[%s877_s3 + $0x38] sm:$0xff]   ;;  %v552_v32 = vunpack.c.l.bf16 %v551_v21  ;;  %v823_v35 = vld [vmem:[%s877_s3 + $0x10] sm:$0xff]   ;;  %v573_v40 = vunpack.c.h.bf16 %v626_v18  ;;  %v553_v41 = vunpack.c.h.bf16 %v551_v21 }
   0x9   :  { %v568_v34 = vunpack.c.l.bf16 %v625_v22  ;;  %v828_v36 = vld [vmem:[%s877_s3 + $0x30] sm:$0xff]   ;;  %v569_v42 = vunpack.c.h.bf16 %v625_v22  ;;  %v564_v45 = vunpack.c.l.bf16 %v811_v29  ;;  %v580_v46 = vunpack.c.l.bf16 %v816_v30 }
   0xa   :  { %v560_v51 = vunpack.c.l.bf16 %v823_v35  ;;  %v576_v52 = vunpack.c.l.bf16 %v828_v36  ;;  %v565_v61 = vunpack.c.h.bf16 %v811_v29  ;;  %v581_v62 = vunpack.c.h.bf16 %v816_v30 }
   0xb   :  { %657 = vmatpush3.bf16.msra.mxu0 %v702_v2  ;;  %694 = vmatpush3.bf16.msra.mxu1 %v702_v2  ;;  %v561_v22 = vunpack.c.h.bf16 %v823_v35 }
   0xc   :  { %658 = vmatprep.subr.bf16.mxu0 %v703_v3  ;;  %687 = vmatprep.subr.bf16.mxu1 %v703_v3 }
   0xf   :  { %659 = vmatpush3.bf16.msra.mxu0 %v703_v3  ;;  %695 = vmatpush3.bf16.msra.mxu1 %v703_v3 }
  0x10   :  { %660 = vmatprep.subr.bf16.mxu0 %v704_v6  ;;  %688 = vmatprep.subr.bf16.mxu1 %v704_v6 }
  0x13   :  { %661 = vmatpush3.bf16.msra.mxu0 %v704_v6  ;;  %696 = vmatpush3.bf16.msra.mxu1 %v704_v6 }
  0x14   :  { %662 = vmatprep.subr.bf16.mxu0 %v705_v7  ;;  %689 = vmatprep.subr.bf16.mxu1 %v705_v7 }
  0x17   :  { %663 = vmatpush3.bf16.msra.mxu0 %v705_v7  ;;  %697 = vmatpush3.bf16.msra.mxu1 %v705_v7 }
  0x18   :  { %664 = vmatprep.subr.bf16.mxu0 %v706_v8  ;;  %690 = vmatprep.subr.bf16.mxu1 %v706_v8 }
  0x1b   :  { %665 = vmatpush3.bf16.msra.mxu0 %v706_v8  ;;  %698 = vmatpush3.bf16.msra.mxu1 %v706_v8 }
  0x1c   :  { %666 = vmatprep.subr.bf16.mxu0 %v707_v9  ;;  %691 = vmatprep.subr.bf16.mxu1 %v707_v9 }
  0x1f   :  { %667 = vmatpush3.bf16.msra.mxu0 %v707_v9  ;;  %699 = vmatpush3.bf16.msra.mxu1 %v707_v9 }
  0x22   :  { %669 = vmatmul.mubr.bf16.vlgmr.msra.gmra.mxu0 %v710_v10  ;;  %677 = vmatmul.mubr.bf16.vlgmr.msra.gmra.mxu1 %v711_v11 }
  0x23   :  { %672 = vmatprep.mubr.bf16.mxu0 %v712_v12  ;;  %680 = vmatprep.mubr.bf16.mxu1 %v713_v13 }
  0x2a   :  { %673 = vmatmul.mubr.bf16.gmra.mxu0 %v714_v14  ;;  %681 = vmatmul.mubr.bf16.gmra.mxu1 %v715_v15 }
  0xe2   :  { %v670_v19 = vpop.f32.mrf.mxu0  ;;  %v678_v20 = vpop.f32.mrf.mxu1 }
  0xe3   :  { %v339_v23 = vadd.f32 %v670_v19, %v792_v16  ;;  %v347_v25 = vadd.f32 %v678_v20, %v792_v16 }
  0xe4   :  { %v216_v27 = vpop.f32.mrf.mxu0  ;;  %v248_v28 = vpop.f32.mrf.mxu1 }
  0xe5   :  { %v337_v31 = vadd.f32 %v792_v16, %v216_v27  ;;  %v345_v33 = vadd.f32 %v792_v16, %v248_v28  ;;  %v387_v43 = vadd.f32 %v556_v24, %v339_v23  ;;  %v395_v44 = vadd.f32 %v572_v26, %v347_v25 }
  0xe6   :  { %v671_v37 = vpop.f32.mrf.mxu0  ;;  %v679_v39 = vpop.f32.mrf.mxu1  ;;  %v577_v23 = vunpack.c.h.bf16 %v828_v36 }
  0xe7   :  { %v340_v47 = vadd.f32 %v671_v37, %v792_v16  ;;  %v348_v48 = vadd.f32 %v679_v39, %v792_v16  ;;  %v385_v53 = vadd.f32 %v552_v32, %v337_v31  ;;  %v393_v54 = vadd.f32 %v568_v34, %v345_v33 }
  0xe8   :  { %v219_v49 = vpop.f32.mrf.mxu0  ;;  %v251_v50 = vpop.f32.mrf.mxu1  ;;  %v403_v63 = vmax.f32 %v387_v43, 0.0  ;;  %v411_v0 = vmax.f32 %v395_v44, 0.0 }
  0xe9   :  { %v338_v55 = vadd.f32 %v792_v16, %v219_v49  ;;  %v346_v56 = vadd.f32 %v792_v16, %v251_v50  ;;  %v388_v57 = vadd.f32 %v557_v38, %v340_v47  ;;  %v396_v58 = vadd.f32 %v573_v40, %v348_v48 }
  0xea   :  { %v674_v59 = vpop.f32.mrf.mxu0  ;;  %v682_v60 = vpop.f32.mrf.mxu1  ;;  %v401_v9 = vmax.f32 %v385_v53, 0.0  ;;  %v409_v10 = vmax.f32 %v393_v54, 0.0 }
  0xeb   :  { %v386_v1 = vadd.f32 %v553_v41, %v338_v55  ;;  %v394_v2 = vadd.f32 %v569_v42, %v346_v56  ;;  %v404_v3 = vmax.f32 %v388_v57, 0.0  ;;  %v412_v4 = vmax.f32 %v396_v58, 0.0 }
  0xec   :  { %v343_v5 = vadd.f32 %v674_v59, %v792_v16  ;;  %v351_v6 = vadd.f32 %v682_v60, %v792_v16  ;;  %v232_v7 = vpop.f32.mrf.mxu0  ;;  %v264_v8 = vpop.f32.mrf.mxu1 }
  0xed   :  { %v402_v11 = vmax.f32 %v386_v1, 0.0  ;;  %v410_v12 = vmax.f32 %v394_v2, 0.0  ;;  %v590_v13 = vpack.c.bf16 %v404_v3, %v403_v63  ;;  %v610_v14 = vpack.c.bf16 %v412_v4, %v411_v0 }
  0xee   :  { %v341_v15 = vadd.f32 %v792_v16, %v232_v7  ;;  %v349_v17 = vadd.f32 %v792_v16, %v264_v8  ;;  %v675_v18 = vpop.f32.mrf.mxu0  ;;  %v683_v19 = vpop.f32.mrf.mxu1  ;;  %v391_v24 = vadd.f32 %v564_v45, %v343_v5  ;;  %v399_v25 = vadd.f32 %v580_v46, %v351_v6 }
  0xef   :  { %v585_v20 = vpack.c.bf16 %v402_v11, %v401_v9  ;;  %v605_v21 = vpack.c.bf16 %v410_v12, %v409_v10  ;;  %629 = vst [vmem:[%s878_s4 + $0x8] sm:$0xff] %v590_v13   ;;  %633 = vst [vmem:[%s878_s4 + $0x28] sm:$0xff] %v610_v14   ;;  %v344_v26 = vadd.f32 %v675_v18, %v792_v16 }
  0xf0   :  { %v352_v27 = vadd.f32 %v683_v19, %v792_v16  ;;  %v235_v28 = vpop.f32.mrf.mxu0  ;;  %v267_v29 = vpop.f32.mrf.mxu1  ;;  %v389_v30 = vadd.f32 %v560_v51, %v341_v15  ;;  %v397_v31 = vadd.f32 %v576_v52, %v349_v17  ;;  %v407_v38 = vmax.f32 %v391_v24, 0.0 }
  0xf1   :  { %586 = vst [vmem:[%s878_s4] sm:$0xff] %v585_v20   ;;  %632 = vst [vmem:[%s878_s4 + $0x20] sm:$0xff] %v605_v21   ;;  %v342_v32 = vadd.f32 %v792_v16, %v235_v28  ;;  %v350_v33 = vadd.f32 %v792_v16, %v267_v29  ;;  %v392_v34 = vadd.f32 %v565_v61, %v344_v26  ;;  %v415_v39 = vmax.f32 %v399_v25, 0.0 }
  0xf2   :  { %v400_v35 = vadd.f32 %v581_v62, %v352_v27  ;;  %v405_v42 = vmax.f32 %v389_v30, 0.0  ;;  %v413_v43 = vmax.f32 %v397_v31, 0.0 }
  0xf3   :  { %v390_v36 = vadd.f32 %v561_v22, %v342_v32  ;;  %v398_v37 = vadd.f32 %v577_v23, %v350_v33  ;;  %v408_v40 = vmax.f32 %v392_v34, 0.0 }
  0xf4   :  { %v416_v41 = vmax.f32 %v400_v35, 0.0 }
  0xf5   :  { %v406_v44 = vmax.f32 %v390_v36, 0.0  ;;  %v414_v45 = vmax.f32 %v398_v37, 0.0  ;;  %v600_v46 = vpack.c.bf16 %v408_v40, %v407_v38 }
  0xf6   :  { %v620_v47 = vpack.c.bf16 %v416_v41, %v415_v39 }
  0xf7   :  { %v595_v48 = vpack.c.bf16 %v406_v44, %v405_v42  ;;  %v615_v49 = vpack.c.bf16 %v414_v45, %v413_v43  ;;  %631 = vst [vmem:[%s878_s4 + $0x18] sm:$0xff] %v600_v46  }
  0xf8   :  { %635 = vst [vmem:[%s878_s4 + $0x38] sm:$0xff] %v620_v47  }
  0xf9   :  { %630 = vst [vmem:[%s878_s4 + $0x10] sm:$0xff] %v595_v48   ;;  %634 = vst [vmem:[%s878_s4 + $0x30] sm:$0xff] %v615_v49  }

// kernel: _lambda_.15
= control target key start
LH: loop header
LB: loop body
LE: loop exit
PB: predicated region body
PF: predicated region fallthrough
CT: control target
= control target key end

     0   :  { %s7459_s12 = smov 0   ;;  %s7461_s13 = smov 0   ;;  %s8598_s0 = inlined_call_operand.vmem [shape: bf16[2,326,128], index: 0, kind: input, shape index: {}]   ;;  %s8599_s1 = inlined_call_operand.vmem [shape: bf16[9,128,128], index: 1, kind: input, shape index: {}]   ;;  %s8600_s2 = inlined_call_operand.vmem [shape: f32[1,128], index: 2, kind: input, shape index: {}]   ;;  %s8601_s3 = inlined_call_operand.vmem [shape: bf16[2,288,128], index: 3, kind: output, shape index: {}]  }
   0x1   :  { %s7463_s14 = smov 0  }
   0x2 LB: > { %s32_s15 = sadd.s32 1, %s7433_s13  ;;  %p5874_p0 = scmp.ge.s32.totalorder %s7437_s14, 1  ;;  %s7437_s14 = sphi %s7463_s14, %s13_s14   ;;  %s7433_s13 = sphi %s7461_s13, %s8625_s13   ;;  %s7429_s12 = sphi %s7459_s12, %s8624_s12  }
   0x3   : > { %p34_p1 = scmp.ge.s32.totalorder %s32_s15, 2  ;;  %p187_p2 = scmp.lt.s32.totalorder %s7437_s14, 3 }
   0x5   : > { %s8627_s15 = smov (%p34_p1, %s32_s15), 0  ;;  %p188_p3 = pnand %p5874_p0, %p187_p2 }
   0x7   : > { %191 = sbr.rel (%p188_p3) target bundleno = 575 (0x23f), region = 32 }
   0xc   : > { %v7173_v0 = vld [vmem:[%s8599_s1 + $0x38] sm:$0xff]   ;;  %p228_p4 = scmp.lt.s32.totalorder %s7429_s12, 1  ;;  %v7174_v1 = vld [vmem:[%s8599_s1 + $0x30] sm:$0xff]   ;;  %v7175_v2 = vld [vmem:[%s8599_s1 + $0x28] sm:$0xff]   ;;  %vm1620_vm0 = vcmask 1046528   ;;  %vm3360_vm3 = vcmask 1045504  }
   0xd   : > { %7131 = vmatprep.subr.bf16.mxu1 %v7173_v0  ;;  %6663 = vmatprep.subr.bf16.mxu0 %v7173_v0  ;;  %v7176_v3 = vld [vmem:[%s8599_s1 + $0x20] sm:$0xff]   ;;  %v7177_v6 = vld [vmem:[%s8599_s1 + $0x18] sm:$0xff]   ;;  %v7178_v7 = vld [vmem:[%s8599_s1 + $0x10] sm:$0xff]   ;;  %vm973_vm1 = vsmask.f32 7424  ;;  %vm5100_vm4 = vcmask 1044480  }
   0xe   : > { %s8629_s12 = smov (!%p228_p4, %s7429_s12), 1  ;;  %7139 = vmatpush3.bf16.msra.mxu1 %v7173_v0  ;;  %6664 = vmatpush3.bf16.msra.mxu0 %v7173_v0  ;;  %v7179_v8 = vld [vmem:[%s8599_s1 + $0x8] sm:$0xff]   ;;  %v7180_v9 = vld [vmem:[%s8599_s1] sm:$0xff]   ;;  %v7183_v10 = vld [vmem:[%s8599_s1 + $0x78] sm:$0xff]   ;;  %vm2691_vm2 = vsmask.f32 6400 }
   0xf   : > { %7132 = vmatprep.subr.bf16.mxu1 %v7174_v1  ;;  %6665 = vmatprep.subr.bf16.mxu0 %v7174_v1  ;;  %s7147_s22 = smul.u32 164, %s8629_s12  ;;  %v7187_v12 = vld [vmem:[%s8599_s1 + $0xb8] sm:$0xff]   ;;  %v7186_v14 = vld [vmem:[%s8599_s1 + $0x70] sm:$0xff]   ;;  %v7191_v18 = vld [vmem:[%s8599_s1 + $0x68] sm:$0xff]   ;;  %vm4431_vm5 = vsmask.f32 5376 }
  0x10   : > { %v7190_v16 = vld [vmem:[%s8599_s1 + $0xb0] sm:$0xff]   ;;  %v7194_v20 = vld [vmem:[%s8599_s1 + $0xa8] sm:$0xff]   ;;  %v7196_v23 = vld [vmem:[%s8599_s1 + $0x60] sm:$0xff]   ;;  %s7148_s6 = smul.u32 144, %s8629_s12 }
  0x11   : > { %s7492_s25 = scalar_lea.vmem %s8598_s0, %s7147_s22  ;;  %v7198_v24 = vld [vmem:[%s8599_s1 + $0xa0] sm:$0xff]   ;;  %v7200_v26 = vld [vmem:[%s8599_s1 + $0x58] sm:$0xff]   ;;  %v7205_v31 = vld [vmem:[%s8599_s1 + $0x50] sm:$0xff]  }
  0x12   : > { %7140 = vmatpush3.bf16.msra.mxu1 %v7174_v1  ;;  %6666 = vmatpush3.bf16.msra.mxu0 %v7174_v1  ;;  %v7181_v4 = vld [vmem:[%s7492_s25 + $0x40] sm:$0xff]   ;;  %v7182_v11 = vld [vmem:[%s7492_s25 + $0x48] sm:$0xff]   ;;  %v7188_v15 = vld [vmem:[%s7492_s25 + $0x50] sm:$0xff]   ;;  %s8507_s12 = scalar_lea.vmem %s8601_s3, %s7148_s6 }
  0x13   : > { %7133 = vmatprep.subr.bf16.mxu1 %v7175_v2  ;;  %6667 = vmatprep.subr.bf16.mxu0 %v7175_v2  ;;  %v7184_v5 = vld [vmem:[%s7492_s25] sm:$0xff]   ;;  %v7185_v13 = vld [vmem:[%s7492_s25 + $0x8] sm:$0xff]   ;;  %v7192_v17 = vld [vmem:[%s7492_s25 + $0x10] sm:$0xff]  }
  0x14   : > { %6695 = vmatprep.mubr.bf16.mxu1 %v7181_v4  ;;  %6679 = vmatprep.mubr.bf16.mxu0 %v7184_v5  ;;  %v7189_v19 = vld [vmem:[%s7492_s25 + $0x58] sm:$0xff]   ;;  %v7195_v22 = vld [vmem:[%s7492_s25 + $0x60] sm:$0xff]   ;;  %v7197_v27 = vld [vmem:[%s7492_s25 + $0x68] sm:$0xff]  }
  0x15   : > { %v7193_v21 = vld [vmem:[%s7492_s25 + $0x18] sm:$0xff]   ;;  %v7199_v25 = vld [vmem:[%s7492_s25 + $0x20] sm:$0xff]   ;;  %v7201_v29 = vld [vmem:[%s7492_s25 + $0x28] sm:$0xff]  }
  0x16   : > { %7141 = vmatpush3.bf16.msra.mxu1 %v7175_v2  ;;  %6668 = vmatpush3.bf16.msra.mxu0 %v7175_v2  ;;  %v7202_v28 = vld [vmem:[%s8599_s1 + $0x98] sm:$0xff]   ;;  %v7203_v30 = vld [vmem:[%s7492_s25 + $0x70] sm:$0xff]   ;;  %v7218_v33 = vld [vmem:[%s7492_s25] sm:$0xff]  }
  0x17   : > { %7134 = vmatprep.subr.bf16.mxu1 %v7176_v3  ;;  %6669 = vmatprep.subr.bf16.mxu0 %v7176_v3  ;;  %v7206_v32 = vld [vmem:[%s8599_s1 + $0x90] sm:$0xff]   ;;  %v7215_v35 = vld [vmem:[%s7492_s25] sm:$0xfe]   ;;  %v7209_v36 = vld [vmem:[%s8599_s1 + $0x88] sm:$0xff]   ;;  %v977_v42 = vshll.u32 %v7218_v33, 16  ;;  %v975_v49 = vshrl.u32 %v7218_v33, 16 }
  0x18   : > { %v7207_v34 = vld [vmem:[%s7492_s25 + $0x30] sm:$0xff]   ;;  %v7216_v37 = vld [vmem:[%s7492_s25 + $0x8] sm:$0xff]   ;;  %v7204_v39 = vld [vmem:[%s7492_s25 + $0x78] sm:$0xff]   ;;  %v1621_v45 = vrot.slane %v7215_v35, 1 }
  0x19   : > { %v7210_v38 = vld [vmem:[%s8599_s1 + $0x48] sm:$0xff]   ;;  %v7208_v40 = vld [vmem:[%s7492_s25 + $0x38] sm:$0xff]   ;;  %v7211_v43 = vld [vmem:[%s7492_s25 + $0x80] sm:$0xff]   ;;  %v1622_v46 = vrot.slane %v7216_v37, 1  ;;  %v979_v50 = vrot.slane %v977_v42, 1 }
  0x1a   : > { %7142 = vmatpush3.bf16.msra.mxu1 %v7176_v3  ;;  %6670 = vmatpush3.bf16.msra.mxu0 %v7176_v3  ;;  %v7219_v41 = vld [vmem:[%s7492_s25 + $0x8] sm:$0xff]   ;;  %v7213_v44 = vld [vmem:[%s8599_s1 + $0x80] sm:$0xff]   ;;  %v7217_v48 = vld [vmem:[%s7492_s25 + $0x10] sm:$0xff]  }
  0x1b   : > { %7135 = vmatprep.subr.bf16.mxu1 %v7177_v6  ;;  %6671 = vmatprep.subr.bf16.mxu0 %v7177_v6  ;;  %v7214_v47 = vld [vmem:[%s8599_s1 + $0x40] sm:$0xff]   ;;  %v982_v51 = vshll.u32 %v7219_v41, 16  ;;  %v7223_v52 = vld [vmem:[%s7492_s25 + $0x18] sm:$0xff]   ;;  %v1623_v53 = vsel %vm1620_vm0, %v1621_v45, %v1622_v46  ;;  %v7220_v54 = vld [vmem:[%s7492_s25 + $0x10] sm:$0xff]   ;;  %v1624_v55 = vrot.slane %v7217_v48, 1  ;;  %v980_v57 = vor.u32 %v979_v50, %v975_v49 }
  0x1c   : > { %v7221_v56 = vld [vmem:[%s8599_s1 + $0xf8] sm:$0xff]   ;;  %v1626_v60 = vrot.slane %v7223_v52, 1  ;;  %v7212_v62 = vld [vmem:[%s7492_s25 + $0x88] sm:$0xff]   ;;  %v990_v63 = vshll.u32 %v7220_v54, 16  ;;  %v986_v1 = vshrl.u32 %v7219_v41, 16  ;;  %v7224_v2 = vld [vmem:[%s7492_s25 + $0x20] sm:$0xff]  }
  0x1d   : > { %v984_v58 = vrot.slane %v982_v51, 1  ;;  %v7222_v59 = vld [vmem:[%s8599_s1 + $0x138] sm:$0xff]   ;;  %v1625_v0 = vsel %vm1620_vm0, %v1622_v46, %v1624_v55  ;;  %v994_v3 = vshrl.u32 %v7220_v54, 16  ;;  %v7226_v4 = vld [vmem:[%s7492_s25 + $0x20] sm:$0xff]   ;;  %v7233_v37 = vld [vmem:[%s8599_s1 + $0xe8] sm:$0xff]  }
  0x1e   : > { %7143 = vmatpush3.bf16.msra.mxu1 %v7177_v6  ;;  %6672 = vmatpush3.bf16.msra.mxu0 %v7177_v6  ;;  %v7225_v61 = vld [vmem:[%s7492_s25 + $0x18] sm:$0xff]   ;;  %v7236_v41 = vld [vmem:[%s7492_s25 + $0x40] sm:$0xff]   ;;  %v7240_v48 = vld [vmem:[%s7492_s25 + $0x48] sm:$0xff]  }
  0x1f   : > { %7136 = vmatprep.subr.bf16.mxu1 %v7178_v7  ;;  %6673 = vmatprep.subr.bf16.mxu0 %v7178_v7  ;;  %v985_v5 = vsel %vm973_vm1, %v980_v57, %v984_v58  ;;  %v998_v6 = vshll.u32 %v7225_v61, 16  ;;  %v7239_v45 = vld [vmem:[%s8599_s1 + $0xe0] sm:$0xff]   ;;  %v7248_v51 = vld [vmem:[%s8599_s1 + $0x118] sm:$0xff]   ;;  %v1636_v52 = vrot.slane %v7236_v41, 1 }
  0x22   : > { %7144 = vmatpush3.bf16.msra.mxu1 %v7178_v7  ;;  %6674 = vmatpush3.bf16.msra.mxu0 %v7178_v7  ;;  %v7228_v7 = vld [vmem:[%s8599_s1 + $0x130] sm:$0xff]  }
  0x23   : > { %7137 = vmatprep.subr.bf16.mxu1 %v7179_v8  ;;  %6675 = vmatprep.subr.bf16.mxu0 %v7179_v8 }
  0x26   : > { %7145 = vmatpush3.bf16.msra.mxu1 %v7179_v8  ;;  %6676 = vmatpush3.bf16.msra.mxu0 %v7179_v8  ;;  %v1627_v8 = vsel %vm1620_vm0, %v1624_v55, %v1626_v60 }
  0x27   : > { %7138 = vmatprep.subr.bf16.mxu1 %v7180_v9  ;;  %6677 = vmatprep.subr.bf16.mxu0 %v7180_v9 }
  0x2a   : > { %7146 = vmatpush3.bf16.msra.mxu1 %v7180_v9  ;;  %6678 = vmatpush3.bf16.msra.mxu0 %v7180_v9  ;;  %v7229_v9 = vld [vmem:[%s7492_s25 + $0x28] sm:$0xff]  }
  0x2b   : > { %6715 = vmatprep.subr.bf16.mxu1 %v7183_v10  ;;  %6767 = vmatprep.subr.bf16.mxu0 %v7187_v12 }
  0x2d   : > { %6696 = vmatmul.mubr.bf16.vlgmr.msra.gmra.mxu1 %v7182_v11  ;;  %6680 = vmatmul.mubr.bf16.vlgmr.msra.gmra.mxu0 %v7185_v13  ;;  %v988_v11 = vor.u32 %v986_v1, %v984_v58  ;;  %v7231_v13 = vld [vmem:[%s7492_s25 + $0x28] sm:$0xff]   ;;  %v1638_v58 = vrot.slane %v7240_v48, 1  ;;  %v7241_v1 = vld [vmem:[%s7492_s25 + $0x50] sm:$0xff]  }
  0x2e   : > { %6716 = vmatpush3.bf16.msra.mxu1 %v7183_v10  ;;  %6768 = vmatpush3.bf16.msra.mxu0 %v7187_v12  ;;  %v992_v10 = vrot.slane %v990_v63, 1  ;;  %v1628_v12 = vrot.slane %v7224_v2, 1  ;;  %v7256_v48 = vld [vmem:[%s7492_s25 + $0x70] sm:$0xff]  }
  0x2f   : > { %6717 = vmatprep.subr.bf16.mxu1 %v7186_v14  ;;  %6699 = vmatprep.mubr.bf16.mxu1 %v7188_v15  ;;  %v1000_v15 = vrot.slane %v998_v6, 1  ;;  %v1639_v6 = vsel %vm1620_vm0, %v1636_v52, %v1638_v58 }
  0x30   : > { %6769 = vmatprep.subr.bf16.mxu0 %v7190_v16  ;;  %6683 = vmatprep.mubr.bf16.mxu0 %v7192_v17  ;;  %v1006_v17 = vshll.u32 %v7226_v4, 16 }
  0x32   : > { %6718 = vmatpush3.bf16.msra.mxu1 %v7186_v14  ;;  %6770 = vmatpush3.bf16.msra.mxu0 %v7190_v16  ;;  %v996_v14 = vor.u32 %v994_v3, %v992_v10  ;;  %v7235_v16 = vld [vmem:[%s8599_s1 + $0x128] sm:$0xff]  }
  0x33   : > { %6719 = vmatprep.subr.bf16.mxu1 %v7191_v18  ;;  %6771 = vmatprep.subr.bf16.mxu0 %v7194_v20 }
  0x35   : > { %6700 = vmatmul.mubr.bf16.gmra.mxu1 %v7189_v19  ;;  %6684 = vmatmul.mubr.bf16.gmra.mxu0 %v7193_v21  ;;  %v1002_v19 = vshrl.u32 %v7225_v61, 16  ;;  %v993_v21 = vsel %vm973_vm1, %v988_v11, %v992_v10  ;;  %v1640_v11 = vrot.slane %v7241_v1, 1 }
  0x36   : > { %6720 = vmatpush3.bf16.msra.mxu1 %v7191_v18  ;;  %6772 = vmatpush3.bf16.msra.mxu0 %v7194_v20  ;;  %v1630_v18 = vrot.slane %v7229_v9, 1  ;;  %v7227_v20 = vld [vmem:[%s8599_s1 + $0xf0] sm:$0xff]  }
  0x37   : > { %6703 = vmatprep.mubr.bf16.mxu1 %v7195_v22  ;;  %6721 = vmatprep.subr.bf16.mxu1 %v7196_v23  ;;  %v1629_v22 = vsel %vm1620_vm0, %v1626_v60, %v1628_v12  ;;  %v7244_v9 = vld [vmem:[%s7492_s25 + $0x50] sm:$0xff]  }
  0x38   : > { %6773 = vmatprep.subr.bf16.mxu0 %v7198_v24  ;;  %6687 = vmatprep.mubr.bf16.mxu0 %v7199_v25  ;;  %v1001_v25 = vsel %vm973_vm1, %v996_v14, %v1000_v15 }
  0x3a   : > { %6722 = vmatpush3.bf16.msra.mxu1 %v7196_v23  ;;  %6774 = vmatpush3.bf16.msra.mxu0 %v7198_v24  ;;  %v7230_v23 = vld [vmem:[%s7492_s25 + $0x30] sm:$0xff]   ;;  %v1010_v24 = vshrl.u32 %v7226_v4, 16  ;;  %v7245_v4 = vld [vmem:[%s7492_s25 + $0x58] sm:$0xff]  }
  0x3b   : > { %6723 = vmatprep.subr.bf16.mxu1 %v7200_v26  ;;  %6775 = vmatprep.subr.bf16.mxu0 %v7202_v28  ;;  %v1632_v33 = vrot.slane %v7230_v23, 1  ;;  %v1642_v14 = vrot.slane %v7245_v4, 1 }
  0x3d   : > { %6704 = vmatmul.mubr.bf16.gmra.mxu1 %v7197_v27  ;;  %6688 = vmatmul.mubr.bf16.gmra.mxu0 %v7201_v29  ;;  %v7232_v27 = vld [vmem:[%s7492_s25 + $0x30] sm:$0xff]   ;;  %v1631_v29 = vsel %vm1620_vm0, %v1628_v12, %v1630_v18 }
  0x3e   : > { %6724 = vmatpush3.bf16.msra.mxu1 %v7200_v26  ;;  %6776 = vmatpush3.bf16.msra.mxu0 %v7202_v28  ;;  %v1014_v26 = vshll.u32 %v7231_v13, 16  ;;  %v1008_v28 = vrot.slane %v1006_v17, 1  ;;  %v7262_v17 = vld [vmem:[%s8599_s1 + $0x108] sm:$0xff]  }
  0x3f   : > { %6707 = vmatprep.mubr.bf16.mxu1 %v7203_v30  ;;  %6725 = vmatprep.subr.bf16.mxu1 %v7205_v31  ;;  %v7234_v30 = vld [vmem:[%s7492_s25 + $0x38] sm:$0xff]  }
  0x40   : > { %6777 = vmatprep.subr.bf16.mxu0 %v7206_v32  ;;  %6691 = vmatprep.mubr.bf16.mxu0 %v7207_v34  ;;  %v7237_v34 = vld [vmem:[%s7492_s25 + $0x38] sm:$0xff]   ;;  %v1012_v35 = vor.u32 %v1010_v24, %v1008_v28  ;;  %v1643_v24 = vsel %vm1620_vm0, %v1640_v11, %v1642_v14 }
  0x41   : > { %v1034_v60 = vshrl.u32 %v7237_v34, 16 }
  0x42   : > { %6726 = vmatpush3.bf16.msra.mxu1 %v7205_v31  ;;  %6778 = vmatpush3.bf16.msra.mxu0 %v7206_v32  ;;  %v7242_v31 = vld [vmem:[%s8599_s1 + $0x120] sm:$0xff]   ;;  %v1004_v32 = vor.u32 %v1002_v19, %v1000_v15  ;;  %v7249_v15 = vld [vmem:[%s7492_s25 + $0x58] sm:$0xff]  }
  0x43   : > { %6779 = vmatprep.subr.bf16.mxu0 %v7209_v36  ;;  %6727 = vmatprep.subr.bf16.mxu1 %v7210_v38 }
  0x44   : > { %v1009_v42 = vsel %vm973_vm1, %v1004_v32, %v1008_v28  ;;  %v7266_v28 = vld [vmem:[%s8599_s1 + $0xc0] sm:$0xff]  }
  0x45   : > { %6708 = vmatmul.mubr.bf16.gmra.mxu1 %v7204_v39  ;;  %6692 = vmatmul.mubr.bf16.gmra.mxu0 %v7208_v40  ;;  %v1634_v39 = vrot.slane %v7234_v30, 1  ;;  %v1018_v40 = vshrl.u32 %v7231_v13, 16  ;;  %v7250_v30 = vld [vmem:[%s7492_s25 + $0x60] sm:$0xff]  }
  0x46   : > { %6780 = vmatpush3.bf16.msra.mxu0 %v7209_v36  ;;  %6711 = vmatprep.mubr.bf16.mxu1 %v7211_v43  ;;  %v1016_v36 = vrot.slane %v1014_v26, 1  ;;  %v1633_v43 = vsel %vm1620_vm0, %v1630_v18, %v1632_v33  ;;  %v1054_v18 = vshll.u32 %v7244_v9, 16  ;;  %v1062_v26 = vshll.u32 %v7249_v15, 16 }
  0x47   : > { %6728 = vmatpush3.bf16.msra.mxu1 %v7210_v38  ;;  %6781 = vmatprep.subr.bf16.mxu0 %v7213_v44  ;;  %v1022_v38 = vshll.u32 %v7232_v27, 16  ;;  %v1635_v50 = vsel %vm1620_vm0, %v1632_v33, %v1634_v39 }
  0x48   : > { %6729 = vmatprep.subr.bf16.mxu1 %v7214_v47  ;;  %6783 = vmatprep.mubr.bf16.mxu0 %v1623_v53  ;;  %v1017_v46 = vsel %vm973_vm1, %v1012_v35, %v1016_v36  ;;  %v7238_v53 = vld [vmem:[%s7492_s25 + $0x40] sm:$0xff]   ;;  %v1020_v54 = vor.u32 %v1018_v40, %v1016_v36  ;;  %v1064_v36 = vrot.slane %v1062_v26, 1 }
  0x49   : > { %v1024_v49 = vrot.slane %v1022_v38, 1  ;;  %v1038_v61 = vshll.u32 %v7238_v53, 16  ;;  %v1042_v2 = vshrl.u32 %v7238_v53, 16  ;;  %v1070_v38 = vshll.u32 %v7250_v30, 16 }
  0x4a   : > { %6782 = vmatpush3.bf16.msra.mxu0 %v7213_v44  ;;  %v1030_v44 = vshll.u32 %v7237_v34, 16  ;;  %v7254_v34 = vld [vmem:[%s7492_s25 + $0x68] sm:$0xff]  }
  0x4b   : > { %6730 = vmatpush3.bf16.msra.mxu1 %v7214_v47  ;;  %6871 = vmatprep.subr.bf16.mxu0 %v7222_v59  ;;  %v1026_v47 = vshrl.u32 %v7232_v27, 16  ;;  %v1025_v63 = vsel %vm973_vm1, %v1020_v54, %v1024_v49  ;;  %v7251_v27 = vld [vmem:[%s7492_s25 + $0x68] sm:$0xff]   ;;  %v7260_v54 = vld [vmem:[%s7492_s25 + $0x78] sm:$0xff]  }
  0x4c   : > { %6819 = vmatprep.subr.bf16.mxu1 %v7221_v56  ;;  %v1032_v55 = vrot.slane %v1030_v44, 1  ;;  %v1094_v1 = vshll.u32 %v7260_v54, 16 }
  0x4d   : > { %6712 = vmatmul.mubr.bf16.gmra.mxu1 %v7212_v62  ;;  %6784 = vmatmul.mubr.bf16.vlgmr.msra.gmra.mxu0 %v1625_v0  ;;  %v1028_v57 = vor.u32 %v1026_v47, %v1024_v49  ;;  %v7255_v62 = vld [vmem:[%s8599_s1 + $0x110] sm:$0xff]   ;;  %v1637_v0 = vsel %vm1620_vm0, %v1634_v39, %v1636_v52  ;;  %v7257_v47 = vld [vmem:[%s7492_s25 + $0x78] sm:$0xff]   ;;  %v1072_v49 = vrot.slane %v1070_v38, 1 }
  0x4e   : > { %6731 = vmatprep.mubr.bf16.mxu1 %v985_v5  ;;  %6872 = vmatpush3.bf16.msra.mxu0 %v7222_v59  ;;  %v7246_v59 = vld [vmem:[%s8599_s1 + $0xd8] sm:$0xff]   ;;  %v1036_v10 = vor.u32 %v1034_v60, %v1032_v55  ;;  %v7252_v39 = vld [vmem:[%s7492_s25 + $0x70] sm:$0xff]  }
  0x4f   : > { %6787 = vmatprep.mubr.bf16.mxu0 %v1627_v8  ;;  %6873 = vmatprep.subr.bf16.mxu0 %v7228_v7  ;;  %v1033_v5 = vsel %vm973_vm1, %v1028_v57, %v1032_v55  ;;  %v1040_v8 = vrot.slane %v1038_v61, 1  ;;  %v7258_v57 = vld [vmem:[%s7492_s25 + $0x80] sm:$0xff]   ;;  %v7686_v60 = vld [vmem:[%s8599_s1 + $0x178] sm:$0xff]   ;;  %v1090_v61 = vshrl.u32 %v7256_v48, 16 }
  0x51   : > { %v1044_v13 = vor.u32 %v1042_v2, %v1040_v8  ;;  %v1041_v19 = vsel %vm973_vm1, %v1036_v10, %v1040_v8  ;;  %v7270_v2 = vld [vmem:[%s7492_s25 + $0x10] sm:$0xff]   ;;  %v7703_v10 = vld [vmem:[%s7492_s25 + $0x88] sm:$0xff]  }
  0x52   : > { %6874 = vmatpush3.bf16.msra.mxu0 %v7228_v7  ;;  %v7253_v7 = vld [vmem:[%s8599_s1 + $0xd0] sm:$0xff]  }
  0x53   : > { %6875 = vmatprep.subr.bf16.mxu0 %v7235_v16 }
  0x55   : > { %6732 = vmatmul.mubr.bf16.vlgmr.msra.gmra.mxu1 %v993_v21  ;;  %6788 = vmatmul.mubr.bf16.gmra.mxu0 %v1629_v22  ;;  %v7247_v22 = vld [vmem:[%s7492_s25 + $0x60] sm:$0xff]  }
  0x56   : > { %6820 = vmatpush3.bf16.msra.mxu1 %v7221_v56  ;;  %6735 = vmatprep.mubr.bf16.mxu1 %v1001_v25  ;;  %v7243_v56 = vld [vmem:[%s7492_s25 + $0x48] sm:$0xff]   ;;  %v1058_v25 = vshrl.u32 %v7244_v9, 16  ;;  %v1644_v33 = vrot.slane %v7247_v22, 1  ;;  %v1652_v9 = vrot.slane %v7258_v57, 1  ;;  %v1110_v22 = vshll.u32 %v7703_v10, 16 }
  0x57   : > { %6821 = vmatprep.subr.bf16.mxu1 %v7227_v20  ;;  %6791 = vmatprep.mubr.bf16.mxu0 %v1631_v29  ;;  %v1046_v3 = vshll.u32 %v7243_v56, 16  ;;  %v1050_v21 = vshrl.u32 %v7243_v56, 16  ;;  %v1056_v29 = vrot.slane %v1054_v18, 1  ;;  %v1650_v56 = vrot.slane %v7257_v47, 1  ;;  %v7278_v47 = vld [vmem:[%s7492_s25 + $0x28] sm:$0xff]  }
  0x58   : > { %6876 = vmatpush3.bf16.msra.mxu0 %v7235_v16  ;;  %v7259_v16 = vld [vmem:[%s8599_s1 + $0xc8] sm:$0xff]   ;;  %v1645_v41 = vsel %vm1620_vm0, %v1642_v14, %v1644_v33  ;;  %v2701_v18 = vshrl.u32 %v7270_v2, 16 }
  0x59   : > { %6877 = vmatprep.subr.bf16.mxu0 %v7242_v31  ;;  %v1048_v12 = vrot.slane %v1046_v3, 1  ;;  %v1060_v35 = vor.u32 %v1058_v25, %v1056_v29 }
  0x5a   : > { %6822 = vmatpush3.bf16.msra.mxu1 %v7227_v20  ;;  %v1641_v20 = vsel %vm1620_vm0, %v1638_v58, %v1640_v11  ;;  %v1086_v58 = vshll.u32 %v7256_v48, 16  ;;  %v7273_v48 = vld [vmem:[%s7492_s25 + $0x10] sm:$0xff]  }
  0x5b   : > { %6823 = vmatprep.subr.bf16.mxu1 %v7233_v37  ;;  %v1049_v23 = vsel %vm973_vm1, %v1044_v13, %v1048_v12  ;;  %v1052_v32 = vor.u32 %v1050_v21, %v1048_v12  ;;  %v1065_v44 = vsel %vm973_vm1, %v1060_v35, %v1064_v36  ;;  %v1096_v12 = vrot.slane %v1094_v1, 1 }
  0x5c   : > { %6878 = vmatpush3.bf16.msra.mxu0 %v7242_v31  ;;  %v7268_v31 = vld [vmem:[%s8599_s1 + $0x100] sm:$0xff]   ;;  %v1098_v13 = vshrl.u32 %v7260_v54, 16 }
  0x5d   : > { %6736 = vmatmul.mubr.bf16.gmra.mxu1 %v1009_v42  ;;  %6792 = vmatmul.mubr.bf16.gmra.mxu0 %v1633_v43  ;;  %v1057_v40 = vsel %vm973_vm1, %v1052_v32, %v1056_v29  ;;  %v1066_v42 = vshrl.u32 %v7249_v15, 16  ;;  %v1078_v43 = vshll.u32 %v7254_v34, 16  ;;  %v7264_v15 = vld [vmem:[%s7492_s25 + $0x90] ss:$0 sps:$4 sm:$0x11]  }
  0x5e   : > { %6739 = vmatprep.mubr.bf16.mxu1 %v1017_v46  ;;  %6824 = vmatpush3.bf16.msra.mxu1 %v7233_v37  ;;  %v1646_v37 = vrot.slane %v7251_v27, 1  ;;  %v1074_v46 = vshrl.u32 %v7250_v30, 16  ;;  %v7267_v27 = vld [vmem:[%s7492_s25 + $0x90] ss:$0 sps:$4 sm:$0x11]   ;;  %v1656_v35 = vrot.slane %v7264_v15, 1  ;;  %v1100_v38 = vor.u32 %v1098_v13, %v1096_v12 }
  0x5f   : > { %6795 = vmatprep.mubr.bf16.mxu0 %v1635_v50  ;;  %6825 = vmatprep.subr.bf16.mxu1 %v7239_v45  ;;  %v1648_v50 = vrot.slane %v7252_v39, 1  ;;  %v1068_v52 = vor.u32 %v1066_v42, %v1064_v36  ;;  %v1080_v53 = vrot.slane %v1078_v43, 1  ;;  %v1112_v36 = vrot.slane %v1110_v22, 1  ;;  %v7284_v13 = vld [vmem:[%s7492_s25 + $0x38] sm:$0xff]   ;;  %v7282_v15 = vld [vmem:[%s8599_s1 + $0x1b0] sm:$0xff]  }
  0x60   : > { %6879 = vmatprep.subr.bf16.mxu0 %v7248_v51  ;;  %v1076_v55 = vor.u32 %v1074_v46, %v1072_v49  ;;  %v2746_v22 = vshrl.u32 %v7284_v13, 16 }
  0x61   : > { %6880 = vmatpush3.bf16.msra.mxu0 %v7248_v51  ;;  %v1082_v51 = vshrl.u32 %v7254_v34, 16  ;;  %v1651_v4 = vsel %vm1620_vm0, %v1648_v50, %v1650_v56 }
  0x62   : > { %6826 = vmatpush3.bf16.msra.mxu1 %v7239_v45  ;;  %6881 = vmatprep.subr.bf16.mxu0 %v7255_v62  ;;  %v1647_v45 = vsel %vm1620_vm0, %v1644_v33, %v1646_v37  ;;  %v1081_v3 = vsel %vm973_vm1, %v1076_v55, %v1080_v53  ;;  %v7277_v33 = vld [vmem:[%s7492_s25 + $0x20] sm:$0xff]  }
  0x63   : > { %6827 = vmatprep.subr.bf16.mxu1 %v7246_v59  ;;  %v1084_v8 = vor.u32 %v1082_v51, %v1080_v53  ;;  %v2722_v46 = vshll.u32 %v7277_v33, 16  ;;  %v7272_v53 = vld [vmem:[%s7492_s25 + $0x8] sm:$0xfe]  }
  0x65   : > { %6740 = vmatmul.mubr.bf16.gmra.mxu1 %v1025_v63  ;;  %6796 = vmatmul.mubr.bf16.gmra.mxu0 %v1637_v0  ;;  %v1073_v63 = vsel %vm973_vm1, %v1068_v52, %v1072_v49  ;;  %v1649_v0 = vsel %vm1620_vm0, %v1646_v37, %v1648_v50  ;;  %v1114_v37 = vshrl.u32 %v7703_v10, 16 }
  0x66   : > { %6743 = vmatprep.mubr.bf16.mxu1 %v1033_v5  ;;  %6799 = vmatprep.mubr.bf16.mxu0 %v1639_v6  ;;  %v7269_v5 = vld [vmem:[%s7492_s25 + $0x8] sm:$0xfe]   ;;  %v1088_v6 = vrot.slane %v1086_v58, 1  ;;  %v2724_v58 = vrot.slane %v2722_v46, 2  ;;  %v7286_v46 = vld [vmem:[%s7492_s25 + $0x38] sm:$0xff]  }
  0x67   : > { %6828 = vmatpush3.bf16.msra.mxu1 %v7246_v59  ;;  %6882 = vmatpush3.bf16.msra.mxu0 %v7255_v62  ;;  %v7681_v59 = vld [vmem:[%s7492_s25 + $0x88] sm:$0xff]   ;;  %v7691_v62 = vld [vmem:[%s8599_s1 + $0x1b8] sm:$0xff]  }
  0x68   : > { %6829 = vmatprep.subr.bf16.mxu1 %v7253_v7  ;;  %6883 = vmatprep.subr.bf16.mxu0 %v7262_v17  ;;  %v1092_v11 = vor.u32 %v1090_v61, %v1088_v6  ;;  %v1654_v14 = vrot.slane %v7681_v59, 1  ;;  %v2728_v61 = vshrl.u32 %v7278_v47, 16 }
  0x6a   : > { %v1655_v25 = vsel %vm1620_vm0, %v1652_v9, %v1654_v14  ;;  %v1657_v50 = vsel %vm1620_vm0, %v1654_v14, %v1656_v35  ;;  %v7294_v35 = vld [vmem:[%s7492_s25 + $0x50] sm:$0xff]  }
  0x6b   : > { %6830 = vmatpush3.bf16.msra.mxu1 %v7253_v7  ;;  %6884 = vmatpush3.bf16.msra.mxu0 %v7262_v17  ;;  %v7261_v7 = vld [vmem:[%s7492_s25 + $0x80] sm:$0xff]   ;;  %v2696_v17 = vshll.u32 %v7269_v5, 16 }
  0x6c   : > { %6831 = vmatprep.subr.bf16.mxu1 %v7259_v16  ;;  %6885 = vmatprep.subr.bf16.mxu0 %v7268_v31  ;;  %v1102_v21 = vshll.u32 %v7261_v7, 16  ;;  %v1106_v26 = vshrl.u32 %v7261_v7, 16  ;;  %v7274_v7 = vld [vmem:[%s7492_s25 + $0x18] sm:$0xff]  }
  0x6d   : > { %6744 = vmatmul.mubr.bf16.gmra.mxu1 %v1041_v19  ;;  %6800 = vmatmul.mubr.bf16.gmra.mxu0 %v1641_v20  ;;  %v2704_v19 = vshll.u32 %v7270_v2, 16  ;;  %v1089_v20 = vsel %vm973_vm1, %v1084_v8, %v1088_v6  ;;  %v2698_v30 = vrot.slane %v2696_v17, 2  ;;  %v2156_v2 = vrot.slane %v7272_v53, 1 }
  0x6e   : > { %6747 = vmatprep.mubr.bf16.mxu1 %v1049_v23  ;;  %6803 = vmatprep.mubr.bf16.mxu0 %v1643_v24  ;;  %v1653_v23 = vsel %vm1620_vm0, %v1650_v56, %v1652_v9  ;;  %v1097_v24 = vsel %vm973_vm1, %v1092_v11, %v1096_v12  ;;  %v1104_v34 = vrot.slane %v1102_v21, 1  ;;  %v7283_v56 = vld [vmem:[%s7492_s25 + $0x30] sm:$0xff]   ;;  %v2730_v8 = vrot.slane %v2728_v61, 1  ;;  %v7726_v9 = vld [vmem:[%s7492_s25 + $0x20] sm:$0xff]  }
  0x6f   : > { %6832 = vmatpush3.bf16.msra.mxu1 %v7259_v16  ;;  %6886 = vmatpush3.bf16.msra.mxu0 %v7268_v31  ;;  %v2693_v16 = vshrl.u32 %v7269_v5, 16  ;;  %v2703_v31 = vrot.slane %v2701_v18, 1  ;;  %v2706_v32 = vrot.slane %v2704_v19, 2  ;;  %v2740_v5 = vshll.u32 %v7283_v56, 16  ;;  %v7288_v18 = vld [vmem:[%s7492_s25 + $0x40] sm:$0xff]  }
  0x70   : > { %6833 = vmatprep.subr.bf16.mxu1 %v7266_v28  ;;  %6975 = vmatprep.subr.bf16.mxu0 %v7691_v62  ;;  %v1105_v49 = vsel %vm973_vm1, %v1100_v38, %v1104_v34  ;;  %v7753_v38 = vld [vmem:[%s7492_s25 + $0x30] sm:$0xff]   ;;  %v7299_v61 = vld [vmem:[%s7492_s25 + $0x60] sm:$0xff]  }
  0x71   : > { %v2695_v29 = vrot.slane %v2693_v16, 1  ;;  %v2707_v43 = vor.u32 %v2706_v32, %v2703_v31  ;;  %v2742_v17 = vrot.slane %v2740_v5, 2  ;;  %v7281_v32 = vld [vmem:[%s8599_s1 + $0x170] sm:$0xff]  }
  0x73   : > { %6834 = vmatpush3.bf16.msra.mxu1 %v7266_v28  ;;  %v7271_v28 = vld [vmem:[%s7492_s25 + $0x18] sm:$0xff]   ;;  %v2699_v42 = vor.u32 %v2698_v30, %v2695_v29  ;;  %v7290_v29 = vld [vmem:[%s7492_s25 + $0x48] sm:$0xff]  }
  0x74   : > { %6923 = vmatprep.subr.bf16.mxu1 %v7686_v60  ;;  %v2710_v39 = vshrl.u32 %v7271_v28, 16  ;;  %v7280_v30 = vld [vmem:[%s7492_s25 + $0x28] sm:$0xff]  }
  0x75   : > { %6748 = vmatmul.mubr.bf16.gmra.mxu1 %v1057_v40  ;;  %6804 = vmatmul.mubr.bf16.gmra.mxu0 %v1645_v41  ;;  %v2713_v40 = vshll.u32 %v7271_v28, 16  ;;  %v1108_v41 = vor.u32 %v1106_v26, %v1104_v34  ;;  %v2708_v55 = vsel %vm2691_vm2, %v2699_v42, %v2707_v43  ;;  %v2755_v26 = vshrl.u32 %v7288_v18, 16 }
  0x76   : > { %6751 = vmatprep.mubr.bf16.mxu1 %v1065_v44  ;;  %6807 = vmatprep.mubr.bf16.mxu0 %v1647_v45  ;;  %v1118_v44 = vshll.u32 %v7267_v27, 16  ;;  %v2719_v45 = vshrl.u32 %v7277_v33, 16  ;;  %v2712_v51 = vrot.slane %v2710_v39, 1  ;;  %v7289_v27 = vld [vmem:[%s8599_s1 + $0x1a8] sm:$0xff]   ;;  %v2758_v28 = vshll.u32 %v7288_v18, 16 }
  0x77   : > { %v2715_v52 = vrot.slane %v2713_v40, 2  ;;  %v1113_v54 = vsel %vm973_vm1, %v1108_v41, %v1112_v36  ;;  %v2748_v33 = vrot.slane %v2746_v22, 1  ;;  %v2757_v39 = vrot.slane %v2755_v26, 1  ;;  %v7307_v26 = vld [vmem:[%s8599_s1 + $0x150] sm:$0xff]  }
  0x78   : > { %v2721_v57 = vrot.slane %v2719_v45, 1  ;;  %v1120_v59 = vrot.slane %v1118_v44, 1  ;;  %v2760_v40 = vrot.slane %v2758_v28, 2  ;;  %v2764_v41 = vshrl.u32 %v7290_v29, 16  ;;  %v7296_v44 = vld [vmem:[%s8599_s1 + $0x1a0] sm:$0xff]  }
  0x79   : > { %v2716_v1 = vor.u32 %v2715_v52, %v2712_v51  ;;  %v2767_v42 = vshll.u32 %v7290_v29, 16  ;;  %v7765_v51 = vld [vmem:[%s7492_s25 + $0x40] sm:$0xff]  }
  0x7a   : > { %v2725_v6 = vor.u32 %v2724_v58, %v2721_v57  ;;  %v2761_v52 = vor.u32 %v2760_v40, %v2757_v39  ;;  %v2766_v53 = vrot.slane %v2764_v41, 1  ;;  %v7306_v39 = vld [vmem:[%s7492_s25 + $0x78] sm:$0xff]  }
  0x7b   : > { %v2717_v11 = vsel %vm2691_vm2, %v2707_v43, %v2716_v1  ;;  %v2163_v43 = vrot.slane %v7280_v30, 1 }
  0x7c   : > { %v2726_v19 = vsel %vm2691_vm2, %v2716_v1, %v2725_v6 }
  0x7d   : > { %6752 = vmatmul.mubr.bf16.gmra.mxu1 %v1073_v63  ;;  %6808 = vmatmul.mubr.bf16.gmra.mxu0 %v1649_v0  ;;  %v2731_v63 = vshll.u32 %v7278_v47, 16  ;;  %v1116_v0 = vor.u32 %v1114_v37, %v1112_v36  ;;  %v7287_v47 = vld [vmem:[%s8599_s1 + $0x168] sm:$0xff]  }
  0x7e   : > { %6755 = vmatprep.mubr.bf16.mxu1 %v1081_v3  ;;  %6811 = vmatprep.mubr.bf16.mxu0 %v1651_v4  ;;  %v2157_v3 = vrot.slane %v7273_v48, 1  ;;  %v2737_v4 = vshrl.u32 %v7283_v56, 16  ;;  %v2773_v48 = vshrl.u32 %v7294_v35, 16 }
  0x7f   : > { %v1121_v10 = vsel %vm973_vm1, %v1116_v0, %v1120_v59  ;;  %v2733_v12 = vrot.slane %v2731_v63, 2  ;;  %v7295_v59 = vld [vmem:[%s7492_s25 + $0x58] sm:$0xff]   ;;  %v2167_v0 = vrot.slane %v7286_v46, 1 }
  0x80   : > { %v2158_v14 = vsel %vm1620_vm0, %v2156_v2, %v2157_v3  ;;  %v2739_v16 = vrot.slane %v2737_v4, 1  ;;  %v2775_v57 = vrot.slane %v2773_v48, 1  ;;  %v7302_v2 = vld [vmem:[%s8599_s1 + $0x198] sm:$0xff]   ;;  %v7292_v4 = vld [vmem:[%s7492_s25 + $0x48] sm:$0xff]  }
  0x81   : > { %v2734_v21 = vor.u32 %v2733_v12, %v2730_v8  ;;  %v7300_v8 = vld [vmem:[%s8599_s1 + $0x158] sm:$0xff]   ;;  %v2794_v12 = vshll.u32 %v7299_v61, 16 }
  0x83   : > { %v2735_v31 = vsel %vm2691_vm2, %v2725_v6, %v2734_v21  ;;  %v2782_v6 = vshrl.u32 %v7295_v59, 16 }
  0x85   : > { %6756 = vmatmul.mubr.bf16.gmra.mxu1 %v1089_v20  ;;  %6812 = vmatmul.mubr.bf16.gmra.mxu0 %v1653_v23  ;;  %v2159_v20 = vrot.slane %v7274_v7, 1  ;;  %v2749_v23 = vshll.u32 %v7284_v13, 16  ;;  %v2785_v7 = vshll.u32 %v7295_v59, 16  ;;  %v2171_v13 = vrot.slane %v7292_v4, 1 }
  0x86   : > { %6759 = vmatprep.mubr.bf16.mxu1 %v1097_v24  ;;  %6815 = vmatprep.mubr.bf16.mxu0 %v1655_v25  ;;  %v2161_v24 = vrot.slane %v7726_v9, 1  ;;  %v2743_v25 = vor.u32 %v2742_v17, %v2739_v16  ;;  %v7309_v9 = vld [vmem:[%s8599_s1 + $0x190] sm:$0xff]  }
  0x87   : > { %v2751_v34 = vrot.slane %v2749_v23, 2  ;;  %v7305_v16 = vld [vmem:[%s7492_s25 + $0x70] sm:$0xff]  }
  0x88   : > { %v2162_v36 = vsel %vm1620_vm0, %v2159_v20, %v2161_v24  ;;  %v2744_v37 = vsel %vm2691_vm2, %v2734_v21, %v2743_v25  ;;  %v7795_v21 = vld [vmem:[%s7492_s25 + $0x58] sm:$0xff]  }
  0x89   : > { %v2752_v45 = vor.u32 %v2751_v34, %v2748_v33  ;;  %v2812_v34 = vshll.u32 %v7305_v16, 16 }
  0x8b   : > { %v2753_v56 = vsel %vm2691_vm2, %v2743_v25, %v2752_v45  ;;  %v2762_v1 = vsel %vm2691_vm2, %v2752_v45, %v2761_v52  ;;  %v2796_v25 = vrot.slane %v2794_v12, 2 }
  0x8d   : > { %6760 = vmatmul.mubr.bf16.gmra.mxu1 %v1105_v49  ;;  %6816 = vmatmul.mubr.bf16.gmra.mxu0 %v1657_v50  ;;  %v2776_v49 = vshll.u32 %v7294_v35, 16  ;;  %v2165_v50 = vrot.slane %v7753_v38, 1  ;;  %v7313_v35 = vld [vmem:[%s8599_s1 + $0x148] sm:$0xff]  }
  0x8e   : > { %6763 = vmatprep.mubr.bf16.mxu1 %v1113_v54  ;;  %6887 = vmatprep.mubr.bf16.mxu0 %v2708_v55  ;;  %v7293_v54 = vld [vmem:[%s8599_s1 + $0x160] sm:$0xff]   ;;  %v2164_v55 = vsel %vm1620_vm0, %v2161_v24, %v2163_v43 }
  0x8f   : > { %v2778_v58 = vrot.slane %v2776_v49, 2  ;;  %v2166_v63 = vsel %vm1620_vm0, %v2163_v43, %v2165_v50  ;;  %v2168_v17 = vsel %vm1620_vm0, %v2165_v50, %v2167_v0  ;;  %v7311_v43 = vld [vmem:[%s7492_s25 + $0x80] sm:$0xff]   ;;  %v2818_v50 = vshrl.u32 %v7306_v39, 16 }
  0x90   : > { %v7320_v49 = vld [vmem:[%s8599_s1 + $0x140] sm:$0xff]  }
  0x91   : > { %v2820_v59 = vrot.slane %v2818_v50, 1  ;;  %v7327_v50 = vld [vmem:[%s7492_s25 + $0x10] sm:$0xff]  }
  0x95   : > { %6764 = vmatmul.mubr.bf16.gmra.mxu1 %v1121_v10  ;;  %6888 = vmatmul.mubr.bf16.vlgmr.msra.gmra.mxu0 %v2717_v11  ;;  %v2779_v10 = vor.u32 %v2778_v58, %v2775_v57  ;;  %v2791_v11 = vshrl.u32 %v7299_v61, 16  ;;  %v2830_v57 = vshll.u32 %v7311_v43, 16  ;;  %v7836_v58 = vld [vmem:[%s8599_s1 + $0x1f8] sm:$0xff]  }
  0x96   : > { %6835 = vmatprep.mubr.bf16.mxu1 %v2158_v14  ;;  %6976 = vmatpush3.bf16.msra.mxu0 %v7691_v62  ;;  %v2160_v62 = vsel %vm1620_vm0, %v2157_v3, %v2159_v20  ;;  %v2169_v3 = vrot.slane %v7765_v51, 1  ;;  %v7788_v14 = vld [vmem:[%s7492_s25 + $0x50] sm:$0xff]   ;;  %v2787_v20 = vrot.slane %v2785_v7, 2  ;;  %v2821_v51 = vshll.u32 %v7306_v39, 16 }
  0x97   : > { %6891 = vmatprep.mubr.bf16.mxu0 %v2726_v19  ;;  %6977 = vmatprep.subr.bf16.mxu0 %v7282_v15  ;;  %v2784_v19 = vrot.slane %v2782_v6, 1  ;;  %v2793_v24 = vrot.slane %v2791_v11, 1  ;;  %v2173_v28 = vrot.slane %v7788_v14, 1  ;;  %v7317_v6 = vld [vmem:[%s7492_s25 + $0x90] sm:$0xff]  }
  0x98   : > { %v2170_v22 = vsel %vm1620_vm0, %v2167_v0, %v2169_v3  ;;  %v2172_v40 = vsel %vm1620_vm0, %v2169_v3, %v2171_v13  ;;  %v2823_v61 = vrot.slane %v2821_v51, 2  ;;  %v2848_v14 = vshll.u32 %v7317_v6, 16 }
  0x99   : > { %v2797_v33 = vor.u32 %v2796_v25, %v2793_v24 }
  0x9a   : > { %6978 = vmatpush3.bf16.msra.mxu0 %v7282_v15  ;;  %v7301_v15 = vld [vmem:[%s7492_s25 + $0x68] sm:$0xff]   ;;  %v2850_v25 = vrot.slane %v2848_v14, 2  ;;  %v7335_v14 = vld [vmem:[%s8599_s1 + $0x1f0] sm:$0xff]  }
  0x9b   : > { %6979 = vmatprep.subr.bf16.mxu0 %v7289_v27  ;;  %v2800_v29 = vshrl.u32 %v7301_v15, 16  ;;  %v2803_v30 = vshll.u32 %v7301_v15, 16  ;;  %v7318_v15 = vld [vmem:[%s7492_s25 + $0x98] ss:$0 sps:$4 sm:$0x33]  }
  0x9d   : > { %6836 = vmatmul.mubr.bf16.vlgmr.msra.gmra.mxu1 %v2160_v62  ;;  %6892 = vmatmul.mubr.bf16.gmra.mxu0 %v2735_v31  ;;  %v2809_v62 = vshrl.u32 %v7305_v16, 16  ;;  %v2788_v31 = vor.u32 %v2787_v20, %v2784_v19  ;;  %v2802_v38 = vrot.slane %v2800_v29, 1  ;;  %v7310_v16 = vld [vmem:[%s7492_s25 + $0x78] sm:$0xff]   ;;  %v2857_v29 = vshll.u32 %v7318_v15, 16 }
  0x9e   : > { %6924 = vmatpush3.bf16.msra.mxu1 %v7686_v60  ;;  %6839 = vmatprep.mubr.bf16.mxu1 %v2162_v36  ;;  %v2769_v60 = vrot.slane %v2767_v42, 2  ;;  %v2175_v36 = vrot.slane %v7795_v21, 1  ;;  %v2805_v42 = vrot.slane %v2803_v30, 2 }
  0x9f   : > { %6925 = vmatprep.subr.bf16.mxu1 %v7281_v32  ;;  %6895 = vmatprep.mubr.bf16.mxu0 %v2744_v37  ;;  %v7322_v37 = vld [vmem:[%s8599_s1 + $0x180] sm:$0xff]   ;;  %v2789_v41 = vsel %vm2691_vm2, %v2779_v10, %v2788_v31  ;;  %v2798_v45 = vsel %vm2691_vm2, %v2788_v31, %v2797_v33  ;;  %v2811_v46 = vrot.slane %v2809_v62, 1  ;;  %v7315_v31 = vld [vmem:[%s7492_s25 + $0x88] sm:$0xff]  }
  0xa0   : > { %6980 = vmatpush3.bf16.msra.mxu0 %v7289_v27  ;;  %v2770_v5 = vor.u32 %v2769_v60, %v2766_v53  ;;  %v7316_v27 = vld [vmem:[%s8599_s1 + $0x188] sm:$0xff]   ;;  %v2827_v53 = vshrl.u32 %v7311_v43, 16  ;;  %v7829_v60 = vld [vmem:[%s8599_s1 + $0x238] sm:$0xff]  }
  0xa1   : > { %6981 = vmatprep.subr.bf16.mxu0 %v7296_v44 }
  0xa2   : > { %6926 = vmatpush3.bf16.msra.mxu1 %v7281_v32  ;;  %v2771_v18 = vsel %vm2691_vm2, %v2761_v52, %v2770_v5  ;;  %v2780_v23 = vsel %vm2691_vm2, %v2770_v5, %v2779_v10  ;;  %v7807_v32 = vld [vmem:[%s7492_s25 + $0x60] sm:$0xff]   ;;  %v2806_v52 = vor.u32 %v2805_v42, %v2802_v38  ;;  %v2832_v5 = vrot.slane %v2830_v57, 2 }
  0xa3   : > { %6927 = vmatprep.subr.bf16.mxu1 %v7287_v47  ;;  %v2177_v48 = vrot.slane %v7807_v32, 1 }
  0xa4   : > { %6982 = vmatpush3.bf16.msra.mxu0 %v7296_v44  ;;  %v2174_v44 = vsel %vm1620_vm0, %v2171_v13, %v2173_v28  ;;  %v2807_v0 = vsel %vm2691_vm2, %v2797_v33, %v2806_v52  ;;  %v2845_v13 = vshrl.u32 %v7317_v6, 16  ;;  %v7319_v33 = vld [vmem:[%s7492_s25 + $0x90] sm:$0xff]  }
  0xa5   : > { %6840 = vmatmul.mubr.bf16.gmra.mxu1 %v2164_v55  ;;  %6896 = vmatmul.mubr.bf16.gmra.mxu0 %v2753_v56  ;;  %v7308_v56 = vld [vmem:[%s7492_s25 + $0x70] sm:$0xff]   ;;  %v2178_v3 = vsel %vm1620_vm0, %v2175_v36, %v2177_v48  ;;  %v2189_v43 = vrot.slane %v7319_v33, 1 }
  0xa6   : > { %6843 = vmatprep.mubr.bf16.mxu1 %v2166_v63  ;;  %6928 = vmatpush3.bf16.msra.mxu1 %v7287_v47  ;;  %v2814_v47 = vrot.slane %v2812_v34, 2  ;;  %v2176_v63 = vsel %vm1620_vm0, %v2173_v28, %v2175_v36  ;;  %v2847_v24 = vrot.slane %v2845_v13, 1  ;;  %v2859_v36 = vrot.slane %v2857_v29, 2 }
  0xa7   : > { %6899 = vmatprep.mubr.bf16.mxu0 %v2762_v1  ;;  %6929 = vmatprep.subr.bf16.mxu1 %v7293_v54  ;;  %v2829_v1 = vrot.slane %v2827_v53, 1  ;;  %v7326_v53 = vld [vmem:[%s7492_s25 + $0x8] sm:$0xfc]  }
  0xa8   : > { %6983 = vmatprep.subr.bf16.mxu0 %v7302_v2  ;;  %v2815_v55 = vor.u32 %v2814_v47, %v2811_v46  ;;  %v2851_v62 = vor.u32 %v2850_v25, %v2847_v24  ;;  %v7321_v46 = vld [vmem:[%s7492_s25 + $0x98] ss:$0 sps:$4 sm:$0x11]   ;;  %v7325_v47 = vld [vmem:[%s7492_s25 + $0x20] sm:$0xff]   ;;  %v3361_v57 = vrot.slane %v7326_v53, 2  ;;  %v7341_v25 = vld [vmem:[%s8599_s1 + $0x1e8] sm:$0xff]  }
  0xa9   : > { %6984 = vmatpush3.bf16.msra.mxu0 %v7302_v2  ;;  %v7312_v2 = vld [vmem:[%s7492_s25 + $0x88] sm:$0xff]   ;;  %v2833_v12 = vor.u32 %v2832_v5, %v2829_v1  ;;  %v7336_v5 = vld [vmem:[%s8599_s1 + $0x230] sm:$0xff]  }
  0xaa   : > { %6930 = vmatpush3.bf16.msra.mxu1 %v7293_v54  ;;  %6985 = vmatprep.subr.bf16.mxu0 %v7309_v9  ;;  %v7304_v54 = vld [vmem:[%s7492_s25 + $0x68] sm:$0xff]   ;;  %v2816_v4 = vsel %vm2691_vm2, %v2806_v52, %v2815_v55  ;;  %v2836_v10 = vshrl.u32 %v7312_v2, 16  ;;  %v2839_v11 = vshll.u32 %v7312_v2, 16 }
  0xab   : > { %6931 = vmatprep.subr.bf16.mxu1 %v7300_v8  ;;  %v2179_v7 = vrot.slane %v7304_v54, 1  ;;  %v7331_v54 = vld [vmem:[%s7492_s25 + $0x28] sm:$0xff]  }
  0xac   : > { %v2838_v20 = vrot.slane %v2836_v10, 1  ;;  %v2841_v21 = vrot.slane %v2839_v11, 2  ;;  %v7343_v11 = vld [vmem:[%s8599_s1 + $0x228] sm:$0xff]  }
  0xad   : > { %6844 = vmatmul.mubr.bf16.gmra.mxu1 %v2168_v17  ;;  %6900 = vmatmul.mubr.bf16.gmra.mxu0 %v2771_v18  ;;  %v7314_v17 = vld [vmem:[%s7492_s25 + $0x80] sm:$0xff]   ;;  %v2180_v18 = vsel %vm1620_vm0, %v2177_v48, %v2179_v7 }
  0xae   : > { %6847 = vmatprep.mubr.bf16.mxu1 %v2170_v22  ;;  %6903 = vmatprep.mubr.bf16.mxu0 %v2780_v23  ;;  %v2842_v28 = vor.u32 %v2841_v21, %v2838_v20  ;;  %v2185_v30 = vrot.slane %v7314_v17, 1  ;;  %v7350_v21 = vld [vmem:[%s8599_s1 + $0x220] sm:$0xff]  }
  0xaf   : > { %6932 = vmatpush3.bf16.msra.mxu1 %v7300_v8  ;;  %6986 = vmatpush3.bf16.msra.mxu0 %v7309_v9  ;;  %v2181_v8 = vrot.slane %v7308_v56, 1  ;;  %v2824_v9 = vor.u32 %v2823_v61, %v2820_v59  ;;  %v3899_v56 = vrot.slane %v7325_v47, 2  ;;  %v3362_v59 = vrot.slane %v7327_v50, 2  ;;  %v7328_v61 = vld [vmem:[%s7492_s25 + $0x18] sm:$0xff]   ;;  %v7346_v47 = vld [vmem:[%s7492_s25 + $0x48] sm:$0xff]   ;;  %v7349_v50 = vld [vmem:[%s7492_s25 + $0x60] sm:$0xff]  }
  0xb0   : > { %6933 = vmatprep.subr.bf16.mxu1 %v7307_v26  ;;  %6987 = vmatprep.subr.bf16.mxu0 %v7316_v27  ;;  %v2852_v39 = vsel %vm2691_vm2, %v2842_v28, %v2851_v62 }
  0xb1   : > { %v2825_v19 = vsel %vm2691_vm2, %v2815_v55, %v2824_v9  ;;  %v2182_v22 = vsel %vm1620_vm0, %v2179_v7, %v2181_v8  ;;  %v2834_v23 = vsel %vm2691_vm2, %v2824_v9, %v2833_v12  ;;  %v2191_v55 = vrot.slane %v7321_v46, 1  ;;  %v7337_v7 = vld [vmem:[%s7492_s25 + $0x38] sm:$0xff]  }
  0xb2   : > { %v3905_v13 = vrot.slane %v7337_v7, 2  ;;  %v7367_v7 = vld [vmem:[%s8599_s1 + $0x1c8] sm:$0xff]  }
  0xb3   : > { %6934 = vmatpush3.bf16.msra.mxu1 %v7307_v26  ;;  %6988 = vmatpush3.bf16.msra.mxu0 %v7316_v27  ;;  %v2854_v26 = vshrl.u32 %v7318_v15, 16  ;;  %v2183_v27 = vrot.slane %v7310_v16, 1  ;;  %v2192_v1 = vsel %vm1620_vm0, %v2189_v43, %v2191_v55  ;;  %v7351_v55 = vld [vmem:[%s7492_s25 + $0x50] sm:$0xff]  }
  0xb4   : > { %6935 = vmatprep.subr.bf16.mxu1 %v7313_v35  ;;  %6989 = vmatprep.subr.bf16.mxu0 %v7322_v37 }
  0xb5   : > { %6848 = vmatmul.mubr.bf16.gmra.mxu1 %v2172_v40  ;;  %6904 = vmatmul.mubr.bf16.gmra.mxu0 %v2789_v41  ;;  %v2856_v32 = vrot.slane %v2854_v26, 1  ;;  %v2184_v34 = vsel %vm1620_vm0, %v2181_v8, %v2183_v27  ;;  %v2186_v38 = vsel %vm1620_vm0, %v2183_v27, %v2185_v30  ;;  %v7323_v40 = vld [vmem:[%s7492_s25 + $0x10] sm:$0xfc]   ;;  %v2187_v41 = vrot.slane %v7315_v31, 1  ;;  %v7340_v27 = vld [vmem:[%s7492_s25 + $0x38] sm:$0xff]   ;;  %v7347_v31 = vld [vmem:[%s8599_s1 + $0x1e0] sm:$0xff]  }
  0xb6   : > { %6851 = vmatprep.mubr.bf16.mxu1 %v2174_v44  ;;  %6907 = vmatprep.mubr.bf16.mxu0 %v2798_v45  ;;  %v3896_v44 = vrot.slane %v7323_v40, 2  ;;  %v3364_v8 = vrot.slane %v7328_v61, 2  ;;  %v7363_v40 = vld [vmem:[%s8599_s1 + $0x210] sm:$0xff]  }
  0xb7   : > { %6936 = vmatpush3.bf16.msra.mxu1 %v7313_v35  ;;  %6990 = vmatpush3.bf16.msra.mxu0 %v7322_v37  ;;  %v2843_v35 = vsel %vm2691_vm2, %v2833_v12, %v2842_v28  ;;  %v7324_v37 = vld [vmem:[%s7492_s25 + $0x18] sm:$0xff]   ;;  %v2860_v42 = vor.u32 %v2859_v36, %v2856_v32  ;;  %v2188_v48 = vsel %vm1620_vm0, %v2185_v30, %v2187_v41  ;;  %v7334_v12 = vld [vmem:[%s7492_s25 + $0x28] sm:$0xff]   ;;  %v7344_v28 = vld [vmem:[%s7492_s25 + $0x50] sm:$0xff]  }
  0xb8   : > { %6937 = vmatprep.subr.bf16.mxu1 %v7320_v49  ;;  %7079 = vmatprep.subr.bf16.mxu0 %v7829_v60  ;;  %v3897_v45 = vrot.slane %v7324_v37, 2  ;;  %v2190_v51 = vsel %vm1620_vm0, %v2187_v41, %v2189_v43  ;;  %v3365_v15 = vsel %vm3360_vm3, %v3362_v59, %v3364_v8  ;;  %v7908_v30 = vld [vmem:[%s7492_s25 + $0x40] sm:$0xff]   ;;  %v7915_v32 = vld [vmem:[%s7492_s25 + $0x58] sm:$0xff]   ;;  %v3372_v37 = vrot.slane %v7340_v27, 2 }
  0xb9   : > { %v3913_v43 = vrot.slane %v7915_v32, 2 }
  0xba   : > { %v3898_v52 = vsel %vm3360_vm3, %v3896_v44, %v3897_v45  ;;  %v3900_v2 = vsel %vm3360_vm3, %v3897_v45, %v3899_v56  ;;  %v7354_v44 = vld [vmem:[%s8599_s1 + $0x1d8] sm:$0xff]  }
  0xbb   : > { %6938 = vmatpush3.bf16.msra.mxu1 %v7320_v49  ;;  %v2861_v49 = vsel %vm2691_vm2, %v2851_v62, %v2860_v42 }
  0xbc   : > { %7027 = vmatprep.subr.bf16.mxu1 %v7836_v58 }
  0xbd   : > { %6852 = vmatmul.mubr.bf16.gmra.mxu1 %v2176_v63  ;;  %6908 = vmatmul.mubr.bf16.gmra.mxu0 %v2807_v0  ;;  %v3901_v63 = vrot.slane %v7331_v54, 2  ;;  %v7332_v0 = vld [vmem:[%s7492_s25 + $0x30] sm:$0xff]  }
  0xbe   : > { %6855 = vmatprep.mubr.bf16.mxu1 %v2178_v3  ;;  %6911 = vmatprep.mubr.bf16.mxu0 %v2816_v4  ;;  %v7333_v3 = vld [vmem:[%s7492_s25 + $0x20] sm:$0xff]   ;;  %v3363_v4 = vsel %vm3360_vm3, %v3361_v57, %v3362_v59  ;;  %v3903_v9 = vrot.slane %v7332_v0, 2  ;;  %v7361_v57 = vld [vmem:[%s8599_s1 + $0x1d0] sm:$0xff]   ;;  %v7370_v59 = vld [vmem:[%s8599_s1 + $0x208] sm:$0xff]   ;;  %v3376_v0 = vrot.slane %v7346_v47, 2 }
  0xbf   : > { %v3902_v6 = vsel %vm3360_vm3, %v3899_v56, %v3901_v63  ;;  %v3366_v10 = vrot.slane %v7333_v3, 2  ;;  %v7353_v56 = vld [vmem:[%s7492_s25 + $0x68] sm:$0xff]  }
  0xc0   : > { %v3904_v16 = vsel %vm3360_vm3, %v3901_v63, %v3903_v9  ;;  %v3906_v20 = vsel %vm3360_vm3, %v3903_v9, %v3905_v13 }
  0xc1   : > { %v3367_v17 = vsel %vm3360_vm3, %v3364_v8, %v3366_v10  ;;  %v7376_v8 = vld [vmem:[%s8599_s1 + $0x200] sm:$0xff]  }
  0xc5   : > { %6856 = vmatmul.mubr.bf16.gmra.mxu1 %v2180_v18  ;;  %6912 = vmatmul.mubr.bf16.gmra.mxu0 %v2825_v19  ;;  %v7339_v18 = vld [vmem:[%s7492_s25 + $0x30] sm:$0xff]   ;;  %v7342_v19 = vld [vmem:[%s7492_s25 + $0x48] sm:$0xff]  }
  0xc6   : > { %6859 = vmatprep.mubr.bf16.mxu1 %v2182_v22  ;;  %6915 = vmatprep.mubr.bf16.mxu0 %v2834_v23  ;;  %v3368_v22 = vrot.slane %v7334_v12, 2  ;;  %v3370_v24 = vrot.slane %v7339_v18, 2  ;;  %v3909_v26 = vrot.slane %v7342_v19, 2  ;;  %v7357_v12 = vld [vmem:[%s7492_s25 + $0x60] sm:$0xff]  }
  0xc7   : > { %v7374_v19 = vld [vmem:[%s8599_s1 + $0x1c0] sm:$0xff]  }
  0xc8   : > { %v3369_v29 = vsel %vm3360_vm3, %v3366_v10, %v3368_v22  ;;  %v3371_v62 = vsel %vm3360_vm3, %v3368_v22, %v3370_v24 }
  0xcd   : > { %6860 = vmatmul.mubr.bf16.gmra.mxu1 %v2184_v34  ;;  %6916 = vmatmul.mubr.bf16.gmra.mxu0 %v2843_v35  ;;  %v7356_v34 = vld [vmem:[%s8599_s1 + $0x218] sm:$0xff]  }
  0xce   : > { %6863 = vmatprep.mubr.bf16.mxu1 %v2186_v38  ;;  %6919 = vmatprep.mubr.bf16.mxu0 %v2852_v39  ;;  %v3911_v38 = vrot.slane %v7344_v28, 2  ;;  %v3374_v39 = vrot.slane %v7908_v30, 2 }
  0xd0   : > { %v3375_v53 = vsel %vm3360_vm3, %v3372_v37, %v3374_v39  ;;  %v3914_v54 = vsel %vm3360_vm3, %v3911_v38, %v3913_v43 }
  0xd5   : > { %6864 = vmatmul.mubr.bf16.gmra.mxu1 %v2188_v48  ;;  %6920 = vmatmul.mubr.bf16.gmra.mxu0 %v2861_v49  ;;  %v3373_v48 = vsel %vm3360_vm3, %v3370_v24, %v3372_v37  ;;  %v3912_v49 = vsel %vm3360_vm3, %v3909_v26, %v3911_v38  ;;  %v3382_v24 = vrot.slane %v7357_v12, 2  ;;  %v7362_v38 = vld [vmem:[%s7492_s25 + $0x70] sm:$0xff]  }
  0xd6   : > { %6867 = vmatprep.mubr.bf16.mxu1 %v2190_v51  ;;  %6991 = vmatprep.mubr.bf16.mxu0 %v3898_v52 }
  0xdd   : > { %6868 = vmatmul.mubr.bf16.gmra.mxu1 %v2192_v1  ;;  %6992 = vmatmul.mubr.bf16.vlgmr.msra.gmra.mxu0 %v3900_v2  ;;  %v3915_v1 = vrot.slane %v7349_v50, 2  ;;  %v3386_v50 = vrot.slane %v7362_v38, 2 }
  0xde   : > { %6939 = vmatprep.mubr.bf16.mxu1 %v3363_v4  ;;  %7080 = vmatpush3.bf16.msra.mxu0 %v7829_v60  ;;  %v7338_v60 = vld [vmem:[%s7492_s25 + $0x40] sm:$0xff]   ;;  %v3378_v4 = vrot.slane %v7351_v55, 2  ;;  %v7366_v55 = vld [vmem:[%s7492_s25 + $0x90] sm:$0xff]  }
  0xdf   : > { %6995 = vmatprep.mubr.bf16.mxu0 %v3902_v6  ;;  %7081 = vmatprep.subr.bf16.mxu0 %v7336_v5  ;;  %v3907_v23 = vrot.slane %v7338_v60, 2  ;;  %v7352_v6 = vld [vmem:[%s7492_s25 + $0x58] sm:$0xff]  }
  0xe0   : > { %v3380_v22 = vrot.slane %v7352_v6, 2 }
  0xe1   : > { %v3910_v33 = vsel %vm3360_vm3, %v3907_v23, %v3909_v26 }
  0xe2   : > { %7082 = vmatpush3.bf16.msra.mxu0 %v7336_v5  ;;  %v3917_v5 = vrot.slane %v7353_v56, 2  ;;  %v3381_v30 = vsel %vm3360_vm3, %v3378_v4, %v3380_v22 }
  0xe3   : > { %7083 = vmatprep.subr.bf16.mxu0 %v7343_v11 }
  0xe4   : > { %v3918_v18 = vsel %vm3360_vm3, %v3915_v1, %v3917_v5 }
  0xe5   : > { %6940 = vmatmul.mubr.bf16.vlgmr.msra.gmra.mxu1 %v3365_v15  ;;  %6996 = vmatmul.mubr.bf16.gmra.mxu0 %v3904_v16  ;;  %v7359_v15 = vld [vmem:[%s7492_s25 + $0x78] sm:$0xff]  }
  0xe6   : > { %7028 = vmatpush3.bf16.msra.mxu1 %v7836_v58  ;;  %6943 = vmatprep.mubr.bf16.mxu1 %v3367_v17  ;;  %v3908_v58 = vsel %vm3360_vm3, %v3905_v13, %v3907_v23  ;;  %v3377_v13 = vsel %vm3360_vm3, %v3374_v39, %v3376_v0  ;;  %v3379_v17 = vsel %vm3360_vm3, %v3376_v0, %v3378_v4  ;;  %v7365_v39 = vld [vmem:[%s7492_s25 + $0x88] sm:$0xff]  }
  0xe7   : > { %7029 = vmatprep.subr.bf16.mxu1 %v7335_v14  ;;  %6999 = vmatprep.mubr.bf16.mxu0 %v3906_v20 }
  0xe8   : > { %7084 = vmatpush3.bf16.msra.mxu0 %v7343_v11  ;;  %v7355_v11 = vld [vmem:[%s7492_s25 + $0x70] sm:$0xff]  }
  0xe9   : > { %7085 = vmatprep.subr.bf16.mxu0 %v7350_v21  ;;  %v3919_v23 = vrot.slane %v7355_v11, 2 }
  0xea   : > { %7030 = vmatpush3.bf16.msra.mxu1 %v7335_v14  ;;  %v3916_v14 = vsel %vm3360_vm3, %v3913_v43, %v3915_v1 }
  0xeb   : > { %7031 = vmatprep.subr.bf16.mxu1 %v7341_v25 }
  0xec   : > { %7086 = vmatpush3.bf16.msra.mxu0 %v7350_v21 }
  0xed   : > { %v7921_v35 = vpop.f32.mrf.mxu1  ;;  %6944 = vmatmul.mubr.bf16.gmra.mxu1 %v3369_v29  ;;  %v7923_v36 = vpop.f32.mrf.mxu0  ;;  %7000 = vmatmul.mubr.bf16.gmra.mxu0 %v3908_v58  ;;  %v7358_v58 = vld [vmem:[%s7492_s25 + $0x68] sm:$0xff]  }
  0xee   : > { %6947 = vmatprep.mubr.bf16.mxu1 %v3371_v62  ;;  %7032 = vmatpush3.bf16.msra.mxu1 %v7341_v25  ;;  %v3921_v25 = vrot.slane %v7359_v15, 2  ;;  %v3920_v62 = vsel %vm3360_vm3, %v3917_v5, %v3919_v23 }
  0xef   : > { %v7929_v41 = vpop.f32.mrf.mxu1  ;;  %v7931_v42 = vpop.f32.mrf.mxu0  ;;  %7003 = vmatprep.mubr.bf16.mxu0 %v3910_v33  ;;  %7033 = vmatprep.subr.bf16.mxu1 %v7347_v31 }
  0xf0   : > { %7087 = vmatprep.subr.bf16.mxu0 %v7356_v34  ;;  %v3922_v37 = vsel %vm3360_vm3, %v3919_v23, %v3921_v25 }
  0xf1   : > { %v7937_v45 = vpop.f32.mrf.mxu1  ;;  %v7939_v46 = vpop.f32.mrf.mxu0  ;;  %7088 = vmatpush3.bf16.msra.mxu0 %v7356_v34  ;;  %v3383_v34 = vsel %vm3360_vm3, %v3380_v22, %v3382_v24  ;;  %v7372_v22 = vld [vmem:[%s7492_s25 + $0xa0] ss:$0 sps:$4 sm:$0x33]  }
  0xf2   : > { %7034 = vmatpush3.bf16.msra.mxu1 %v7347_v31  ;;  %7089 = vmatprep.subr.bf16.mxu0 %v7363_v40  ;;  %v7360_v31 = vld [vmem:[%s7492_s25 + $0x80] sm:$0xff]  }
  0xf3   : > { %v7945_v51 = vpop.f32.mrf.mxu1  ;;  %v7947_v52 = vpop.f32.mrf.mxu0  ;;  %7035 = vmatprep.subr.bf16.mxu1 %v7354_v44  ;;  %v3923_v47 = vrot.slane %v7360_v31, 2  ;;  %v7377_v31 = vld [vmem:[%s7492_s25 + $0x10] sm:$0xf8]  }
  0xf5   : > { %v7959_v61 = vpop.f32.mrf.mxu1  ;;  %6948 = vmatmul.mubr.bf16.gmra.mxu1 %v3373_v48  ;;  %v7961_v63 = vpop.f32.mrf.mxu0  ;;  %7004 = vmatmul.mubr.bf16.gmra.mxu0 %v3912_v49  ;;  %v3924_v0 = vsel %vm3360_vm3, %v3921_v25, %v3923_v47  ;;  %v7369_v25 = vld [vmem:[%s7492_s25 + $0x88] sm:$0xff]  }
  0xf6   : > { %6951 = vmatprep.mubr.bf16.mxu1 %v3375_v53  ;;  %7007 = vmatprep.mubr.bf16.mxu0 %v3914_v54  ;;  %v3925_v53 = vrot.slane %v7365_v39, 2  ;;  %v7364_v54 = vld [vmem:[%s7492_s25 + $0x78] sm:$0xff]  }
  0xf7   : > { %v7963_v2 = vpop.f32.mrf.mxu1  ;;  %v7965_v3 = vpop.f32.mrf.mxu0  ;;  %7036 = vmatpush3.bf16.msra.mxu1 %v7354_v44  ;;  %7090 = vmatpush3.bf16.msra.mxu0 %v7363_v40  ;;  %v3384_v44 = vrot.slane %v7358_v58, 2 }
  0xf8   : > { %7037 = vmatprep.subr.bf16.mxu1 %v7361_v57  ;;  %7091 = vmatprep.subr.bf16.mxu0 %v7370_v59  ;;  %v3926_v6 = vsel %vm3360_vm3, %v3923_v47, %v3925_v53  ;;  %v7380_v47 = vld [vmem:[%s7492_s25 + $0x10] sm:$0xfc]  }
  0xf9   : > { %v7974_v9 = vpop.f32.mrf.mxu1  ;;  %v7976_v10 = vpop.f32.mrf.mxu0  ;;  %v3387_v5 = vsel %vm3360_vm3, %v3384_v44, %v3386_v50 }
  0xfb   : > { %v7983_v16 = vpop.f32.mrf.mxu1  ;;  %v7985_v60 = vpop.f32.mrf.mxu0  ;;  %7038 = vmatpush3.bf16.msra.mxu1 %v7361_v57  ;;  %7092 = vmatpush3.bf16.msra.mxu0 %v7370_v59  ;;  %v3385_v59 = vsel %vm3360_vm3, %v3382_v24, %v3384_v44 }
  0xfc   : > { %7039 = vmatprep.subr.bf16.mxu1 %v7367_v7  ;;  %7093 = vmatprep.subr.bf16.mxu0 %v7376_v8 }
  0xfd   : > { %v7992_v20 = vpop.f32.mrf.mxu1  ;;  %6952 = vmatmul.mubr.bf16.gmra.mxu1 %v3377_v13  ;;  %v7994_v21 = vpop.f32.mrf.mxu0  ;;  %7008 = vmatmul.mubr.bf16.gmra.mxu0 %v3916_v14  ;;  %v3388_v13 = vrot.slane %v7364_v54, 2  ;;  %v3927_v14 = vrot.slane %v7366_v55, 2  ;;  %v7381_v54 = vld [vmem:[%s7492_s25 + $0x18] sm:$0xff]  }
  0xfe   : > { %6955 = vmatprep.mubr.bf16.mxu1 %v3379_v17  ;;  %7011 = vmatprep.mubr.bf16.mxu0 %v3918_v18 }
  0xff   : > { %v7996_v26 = vpop.f32.mrf.mxu1  ;;  %v7998_v27 = vpop.f32.mrf.mxu0  ;;  %7040 = vmatpush3.bf16.msra.mxu1 %v7367_v7  ;;  %7094 = vmatpush3.bf16.msra.mxu0 %v7376_v8  ;;  %v7368_v7 = vld [vmem:[%s7492_s25 + $0x80] sm:$0xff]   ;;  %v7371_v8 = vld [vmem:[%s7492_s25 + $0x98] sm:$0xff]   ;;  %v3389_v58 = vsel %vm3360_vm3, %v3386_v50, %v3388_v13  ;;  %v3392_v50 = vrot.slane %v7369_v25, 2  ;;  %v4441_v25 = vshrl.u32 %v7381_v54, 16 }
 0x100   : > { %7041 = vmatprep.subr.bf16.mxu1 %v7374_v19  ;;  %v3390_v18 = vrot.slane %v7368_v7, 2 }
 0x101   : > { %v8000_v28 = vpop.f32.mrf.mxu1  ;;  %v8002_v29 = vpop.f32.mrf.mxu0 }
 0x102   : > { %v3391_v39 = vsel %vm3360_vm3, %v3388_v13, %v3390_v18 }
 0x103   : > { %v8008_v32 = vpop.f32.mrf.mxu1  ;;  %v8010_v33 = vpop.f32.mrf.mxu0  ;;  %7042 = vmatpush3.bf16.msra.mxu1 %v7374_v19  ;;  %v3929_v19 = vrot.slane %v7371_v8, 2 }
 0x105   : > { %v8016_v40 = vpop.f32.mrf.mxu1  ;;  %6956 = vmatmul.mubr.bf16.gmra.mxu1 %v3381_v30  ;;  %v8018_v43 = vpop.f32.mrf.mxu0  ;;  %7012 = vmatmul.mubr.bf16.gmra.mxu0 %v3920_v62  ;;  %v3928_v30 = vsel %vm3360_vm3, %v3925_v53, %v3927_v14  ;;  %v8051_v62 = vld [vmem:[%s7492_s25 + $0x90] sm:$0xff]   ;;  %v3930_v44 = vsel %vm3360_vm3, %v3927_v14, %v3929_v19  ;;  %v3931_v53 = vrot.slane %v7372_v22, 2  ;;  %v4433_v14 = vshrl.u32 %v7380_v47, 16 }
 0x106   : > { %6959 = vmatprep.mubr.bf16.mxu1 %v3383_v34  ;;  %7015 = vmatprep.mubr.bf16.mxu0 %v3922_v37  ;;  %v8055_v34 = vld [vmem:[%s7492_s25 + $0x18] sm:$0xff]   ;;  %v4444_v22 = vshll.u32 %v7381_v54, 16 }
 0x107   : > { %v8020_v48 = vpop.f32.mrf.mxu1  ;;  %v8022_v49 = vpop.f32.mrf.mxu0  ;;  %v5102_v7 = vrot.slane %v8055_v34, 3  ;;  %v7379_v34 = vld [vmem:[%s7492_s25 + $0x20] sm:$0xff]  }
 0x109   : > { %v8026_v56 = vpop.f32.mrf.mxu1  ;;  %v8028_v57 = vpop.f32.mrf.mxu0 }
 0x10a   : > { %8602 = vst [vmem:[#allocation3_spill] sm:$0xff] %v8026_v56 }
 0x10b   : > { %v8032_v1 = vpop.f32.mrf.mxu1  ;;  %v8034_v4 = vpop.f32.mrf.mxu0 }
 0x10c   : > { %8603 = vst [vmem:[#allocation4_spill] sm:$0xff] %v8032_v1 }
 0x10d   : > { %v8040_v11 = vpop.f32.mrf.mxu1  ;;  %6960 = vmatmul.mubr.bf16.gmra.mxu1 %v3385_v59  ;;  %v6785_v12 = vpop.f32.mrf.mxu0  ;;  %7016 = vmatmul.mubr.bf16.gmra.mxu0 %v3924_v0 }
 0x10e   : > { %8604 = vst [vmem:[#allocation5_spill] sm:$0xff] %v8040_v11  ;;  %6963 = vmatprep.mubr.bf16.mxu1 %v3387_v5  ;;  %7019 = vmatprep.mubr.bf16.mxu0 %v3926_v6  ;;  %v3394_v5 = vrot.slane %v8051_v62, 2  ;;  %v5101_v6 = vrot.slane %v7377_v31, 3  ;;  %v3932_v31 = vsel %vm3360_vm3, %v3929_v19, %v3931_v53  ;;  %v4446_v11 = vrot.slane %v4444_v22, 3  ;;  %v7385_v19 = vld [vmem:[%s7492_s25 + $0x28] sm:$0xff]  }
 0x10f   : > { %v8042_v15 = vpop.f32.mrf.mxu1  ;;  %v1758_v17 = vpop.f32.mrf.mxu0 }
 0x110   : > { %8605 = vst [vmem:[#allocation6_spill] sm:$0xff] %v8042_v15  ;;  %v5103_v54 = vsel %vm5100_vm4, %v5101_v6, %v5102_v7  ;;  %v8078_v15 = vld [vmem:[%s7492_s25 + $0x28] sm:$0xff]  }
 0x111   : > { %v8045_v23 = vpop.f32.mrf.mxu1  ;;  %v6786_v24 = vpop.f32.mrf.mxu0 }
 0x112   : > { %8606 = vst [vmem:[#allocation7_spill] sm:$0xff] %v8045_v23 }
 0x113   : > { %v8057_v37 = vpop.f32.mrf.mxu1  ;;  %v1761_v38 = vpop.f32.mrf.mxu0 }
 0x114   : > { %8607 = vst [vmem:[#allocation8_spill] sm:$0xff] %v8057_v37  ;;  %v7382_v37 = vld [vmem:[%s7492_s25 + $0x20] sm:$0xff]  }
 0x115   : > { %v6733_v55 = vpop.f32.mrf.mxu1  ;;  %6964 = vmatmul.mubr.bf16.gmra.mxu1 %v3389_v58  ;;  %v6789_v59 = vpop.f32.mrf.mxu0  ;;  %7020 = vmatmul.mubr.bf16.gmra.mxu0 %v3928_v30  ;;  %v4436_v58 = vshll.u32 %v7380_v47, 16  ;;  %v3395_v47 = vsel %vm3360_vm3, %v3392_v50, %v3394_v5  ;;  %v4450_v56 = vshrl.u32 %v7382_v37, 16 }
 0x116   : > { %v1367_v0 = vadd.f32 %v6733_v55, %v7923_v36  ;;  %6967 = vmatprep.mubr.bf16.mxu1 %v3391_v39  ;;  %7023 = vmatprep.mubr.bf16.mxu0 %v3930_v44  ;;  %v3393_v44 = vsel %vm3360_vm3, %v3390_v18, %v3392_v50  ;;  %v7375_v55 = vld [vmem:[%s7492_s25 + $0x98] ss:$0 sps:$4 sm:$0x33]   ;;  %v4435_v18 = vrot.slane %v4433_v14, 2  ;;  %v4453_v14 = vshll.u32 %v7382_v37, 16 }
 0x117   : > { %v1222_v8 = vpop.f32.mrf.mxu1  ;;  %v1774_v13 = vpop.f32.mrf.mxu0  ;;  %v3396_v6 = vrot.slane %v7375_v55, 2 }
 0x118   : > { %v1365_v30 = vadd.f32 %v1222_v8, %v7931_v42  ;;  %v8067_v36 = vadd.f32 %v6785_v12, %v1367_v0  ;;  %v4438_v8 = vrot.slane %v4436_v58, 3  ;;  %v5106_v58 = vrot.slane %v8078_v15, 3 }
 0x119   : > { %v6734_v39 = vpop.f32.mrf.mxu1  ;;  %v6790_v62 = vpop.f32.mrf.mxu0  ;;  %v3397_v37 = vsel %vm3360_vm3, %v3394_v5, %v3396_v6 }
 0x11a   : > { %8608 = vst [vmem:[#allocation9_spill] sm:$0xff] %v8067_v36  ;;  %v1368_v23 = vadd.f32 %v6734_v39, %v7939_v46  ;;  %v8080_v42 = vadd.f32 %v1758_v17, %v1365_v30  ;;  %v4443_v36 = vrot.slane %v4441_v25, 2  ;;  %v5104_v39 = vrot.slane %v7379_v34, 3  ;;  %v7386_v34 = vld [vmem:[%s7492_s25 + $0x30] sm:$0xff]  }
 0x11b   : > { %v1225_v12 = vpop.f32.mrf.mxu1  ;;  %v1777_v0 = vpop.f32.mrf.mxu0  ;;  %v4459_v30 = vshrl.u32 %v7385_v19, 16 }
 0x11c   : > { %v1366_v53 = vadd.f32 %v1225_v12, %v7947_v52  ;;  %v8084_v1 = vadd.f32 %v6786_v24, %v1368_v23  ;;  %v4439_v24 = vor.u32 %v4438_v8, %v4435_v18  ;;  %v4447_v22 = vor.u32 %v4446_v11, %v4443_v36  ;;  %v7384_v36 = vld [vmem:[%s7492_s25 + $0x30] sm:$0xff]  }
 0x11d   : > { %v6737_v46 = vpop.f32.mrf.mxu1  ;;  %6968 = vmatmul.mubr.bf16.gmra.mxu1 %v3393_v44  ;;  %v6793_v50 = vpop.f32.mrf.mxu0  ;;  %7024 = vmatmul.mubr.bf16.gmra.mxu0 %v3932_v31  ;;  %v4462_v44 = vshll.u32 %v7385_v19, 16  ;;  %v4455_v11 = vrot.slane %v4453_v14, 3  ;;  %v5107_v8 = vsel %vm5100_vm4, %v5104_v39, %v5106_v58  ;;  %v4461_v19 = vrot.slane %v4459_v30, 2 }
 0x11e   : > { %v1371_v17 = vadd.f32 %v6737_v46, %v7961_v63  ;;  %6971 = vmatprep.mubr.bf16.mxu1 %v3395_v47  ;;  %7095 = vmatprep.mubr.bf16.mxu0 %v5103_v54  ;;  %v8088_v25 = vadd.f32 %v1761_v38, %v1366_v53  ;;  %v5105_v38 = vsel %vm5100_vm4, %v5102_v7, %v5104_v39  ;;  %v4452_v54 = vrot.slane %v4450_v56, 2  ;;  %v8103_v53 = vld [vmem:[%s7492_s25 + $0x38] sm:$0xff]  }
 0x11f   : > { %v1238_v52 = vpop.f32.mrf.mxu1  ;;  %v1790_v23 = vpop.f32.mrf.mxu0  ;;  %v4464_v5 = vrot.slane %v4462_v44, 3  ;;  %v7389_v46 = vld [vmem:[%s7492_s25 + $0x38] sm:$0xff]   ;;  %v5108_v39 = vrot.slane %v7384_v36, 3  ;;  %v5110_v44 = vrot.slane %v8103_v53, 3 }
 0x120   : > { %v1369_v31 = vadd.f32 %v1238_v52, %v7965_v3  ;;  %v8091_v55 = vadd.f32 %v6789_v59, %v1371_v17  ;;  %v4448_v59 = vsel %vm4431_vm5, %v4439_v24, %v4447_v22  ;;  %v4471_v17 = vshll.u32 %v7386_v34, 16 }
 0x121   : > { %v6738_v63 = vpop.f32.mrf.mxu1  ;;  %v6794_v15 = vpop.f32.mrf.mxu0  ;;  %v4456_v52 = vor.u32 %v4455_v11, %v4452_v54 }
 0x122   : > { %v1372_v47 = vadd.f32 %v6738_v63, %v7976_v10  ;;  %v8098_v12 = vadd.f32 %v1774_v13, %v1369_v31  ;;  %v4468_v13 = vshrl.u32 %v7386_v34, 16  ;;  %v4477_v31 = vshrl.u32 %v7389_v46, 16 }
 0x123   : > { %v1241_v3 = vpop.f32.mrf.mxu1  ;;  %v1793_v18 = vpop.f32.mrf.mxu0  ;;  %v4480_v63 = vshll.u32 %v7389_v46, 16  ;;  %v4473_v54 = vrot.slane %v4471_v17, 3  ;;  %v4457_v36 = vsel %vm4431_vm5, %v4447_v22, %v4456_v52 }
 0x124   : > { %v1370_v7 = vadd.f32 %v1241_v3, %v7985_v60  ;;  %v8107_v6 = vadd.f32 %v6790_v62, %v1372_v47  ;;  %v4465_v62 = vor.u32 %v4464_v5, %v4461_v19  ;;  %v4470_v47 = vrot.slane %v4468_v13, 2 }
 0x125   : > { %v6741_v10 = vpop.f32.mrf.mxu1  ;;  %6972 = vmatmul.mubr.bf16.gmra.mxu1 %v3397_v37  ;;  %v6797_v56 = vpop.f32.mrf.mxu0  ;;  %7096 = vmatmul.mubr.bf16.vlgmr.msra.gmra.mxu0 %v5105_v38  ;;  %v5109_v3 = vsel %vm5100_vm4, %v5106_v58, %v5108_v39  ;;  %v5111_v5 = vsel %vm5100_vm4, %v5108_v39, %v5110_v44  ;;  %v4479_v53 = vrot.slane %v4477_v31, 2  ;;  %v4482_v46 = vrot.slane %v4480_v63, 3 }
 0x126   : > { %v1375_v14 = vadd.f32 %v6741_v10, %v7994_v21  ;;  %7043 = vmatprep.mubr.bf16.mxu1 %v4448_v59  ;;  %7099 = vmatprep.mubr.bf16.mxu0 %v5107_v8  ;;  %v8110_v24 = vadd.f32 %v1777_v0, %v1370_v7  ;;  %v7388_v0 = vld [vmem:[%s7492_s25 + $0x40] sm:$0xff]   ;;  %v8126_v7 = vld [vmem:[%s7492_s25 + $0x48] sm:$0xff]  }
 0x127   : > { %v1254_v30 = vpop.f32.mrf.mxu1  ;;  %v1806_v60 = vpop.f32.mrf.mxu0  ;;  %v7390_v59 = vld [vmem:[%s7492_s25 + $0x40] sm:$0xff]   ;;  %v7393_v10 = vld [vmem:[%s7492_s25 + $0x48] sm:$0xff]   ;;  %v5112_v17 = vrot.slane %v7388_v0, 3  ;;  %v5114_v63 = vrot.slane %v8126_v7, 3 }
 0x128   : > { %v1373_v37 = vadd.f32 %v1254_v30, %v7998_v27  ;;  %v8114_v38 = vadd.f32 %v6793_v50, %v1375_v14  ;;  %v4466_v50 = vsel %vm4431_vm5, %v4456_v52, %v4465_v62  ;;  %v4486_v52 = vshrl.u32 %v7390_v59, 16 }
 0x129   : > { %v6742_v21 = vpop.f32.mrf.mxu1  ;;  %v6798_v34 = vpop.f32.mrf.mxu0  ;;  %v4489_v39 = vshll.u32 %v7390_v59, 16 }
 0x12a   : > { %v1376_v11 = vadd.f32 %v6742_v21, %v8002_v29  ;;  %v8121_v8 = vadd.f32 %v1790_v23, %v1373_v37  ;;  %v4474_v23 = vor.u32 %v4473_v54, %v4470_v47  ;;  %v4495_v37 = vshrl.u32 %v7393_v10, 16 }
 0x12b   : > { %v1257_v19 = vpop.f32.mrf.mxu1  ;;  %v1809_v27 = vpop.f32.mrf.mxu0  ;;  %v4498_v21 = vshll.u32 %v7393_v10, 16  ;;  %v4488_v59 = vrot.slane %v4486_v52, 2  ;;  %v8149_v10 = vld [vmem:[%s7492_s25 + $0x58] sm:$0xff]  }
 0x12c   : > { %v1374_v29 = vadd.f32 %v1257_v19, %v8010_v33  ;;  %v8130_v13 = vadd.f32 %v6794_v15, %v1376_v11  ;;  %v4483_v15 = vor.u32 %v4482_v46, %v4479_v53  ;;  %v4475_v0 = vsel %vm4431_vm5, %v4465_v62, %v4474_v23 }
 0x12d   : > { %v6745_v22 = vpop.f32.mrf.mxu1  ;;  %7044 = vmatmul.mubr.bf16.vlgmr.msra.gmra.mxu1 %v4457_v36  ;;  %v6801_v58 = vpop.f32.mrf.mxu0  ;;  %7100 = vmatmul.mubr.bf16.gmra.mxu0 %v5109_v3  ;;  %v7394_v36 = vld [vmem:[%s7492_s25 + $0x50] sm:$0xff]   ;;  %v4491_v19 = vrot.slane %v4489_v39, 3  ;;  %v5115_v46 = vsel %vm5100_vm4, %v5112_v17, %v5114_v63  ;;  %v4497_v7 = vrot.slane %v4495_v37, 2  ;;  %v4500_v62 = vrot.slane %v4498_v21, 3 }
 0x12e   : > { %v1379_v14 = vadd.f32 %v6745_v22, %v8018_v43  ;;  %7047 = vmatprep.mubr.bf16.mxu1 %v4466_v50  ;;  %7103 = vmatprep.mubr.bf16.mxu0 %v5111_v5  ;;  %v8133_v30 = vadd.f32 %v1793_v18, %v1374_v29  ;;  %v5113_v18 = vsel %vm5100_vm4, %v5110_v44, %v5112_v17  ;;  %v7392_v50 = vld [vmem:[%s7492_s25 + $0x50] sm:$0xff]   ;;  %v7397_v29 = vld [vmem:[%s7492_s25 + $0x58] sm:$0xff]   ;;  %v4507_v52 = vshll.u32 %v7394_v36, 16 }
 0x12f   : > { %v1270_v31 = vpop.f32.mrf.mxu1  ;;  %v1822_v33 = vpop.f32.mrf.mxu0  ;;  %v5116_v17 = vrot.slane %v7392_v50, 3  ;;  %v5118_v21 = vrot.slane %v8149_v10, 3 }
 0x130   : > { %v1377_v47 = vadd.f32 %v1270_v31, %v8022_v49  ;;  %v8137_v54 = vadd.f32 %v6797_v56, %v1379_v14  ;;  %v4484_v56 = vsel %vm4431_vm5, %v4474_v23, %v4483_v15  ;;  %v4492_v23 = vor.u32 %v4491_v19, %v4488_v59 }
 0x131   : > { %v6746_v43 = vpop.f32.mrf.mxu1  ;;  %v6802_v11 = vpop.f32.mrf.mxu0  ;;  %v4509_v59 = vrot.slane %v4507_v52, 3 }
 0x132   : > { %v1380_v3 = vadd.f32 %v6746_v43, %v8028_v57  ;;  %v8144_v5 = vadd.f32 %v1806_v60, %v1377_v47  ;;  %v4504_v60 = vshrl.u32 %v7394_v36, 16  ;;  %v4513_v47 = vshrl.u32 %v7397_v29, 16 }
 0x133   : > { %v1273_v53 = vpop.f32.mrf.mxu1  ;;  %v1825_v49 = vpop.f32.mrf.mxu0  ;;  %v4516_v43 = vshll.u32 %v7397_v29, 16  ;;  %v4493_v50 = vsel %vm4431_vm5, %v4483_v15, %v4492_v23 }
 0x134   : > { %v1378_v44 = vadd.f32 %v1273_v53, %v8034_v4  ;;  %v8153_v22 = vadd.f32 %v6798_v34, %v1380_v3  ;;  %v4501_v34 = vor.u32 %v4500_v62, %v4497_v7  ;;  %v4506_v3 = vrot.slane %v4504_v60, 2 }
 0x135   : > { %v6749_v57 = vpop.f32.mrf.mxu1  ;;  %7048 = vmatmul.mubr.bf16.gmra.mxu1 %v4475_v0  ;;  %v6805_v14 = vpop.f32.mrf.mxu0  ;;  %7104 = vmatmul.mubr.bf16.gmra.mxu0 %v5113_v18  ;;  %v5117_v53 = vsel %vm5100_vm4, %v5114_v63, %v5116_v17  ;;  %v5119_v62 = vsel %vm5100_vm4, %v5116_v17, %v5118_v21  ;;  %v4515_v10 = vrot.slane %v4513_v47, 2  ;;  %v4518_v29 = vrot.slane %v4516_v43, 3 }
 0x136   : > { %v1383_v39 = vadd.f32 %v6749_v57, %v7921_v35  ;;  %7051 = vmatprep.mubr.bf16.mxu1 %v4484_v56  ;;  %7107 = vmatprep.mubr.bf16.mxu0 %v5115_v46  ;;  %v8156_v31 = vadd.f32 %v1809_v27, %v1378_v44  ;;  %v7396_v27 = vld [vmem:[%s7492_s25 + $0x60] sm:$0xff]   ;;  %v8172_v44 = vld [vmem:[%s7492_s25 + $0x68] sm:$0xff]  }
 0x137   : > { %v1286_v37 = vpop.f32.mrf.mxu1  ;;  %v1838_v4 = vpop.f32.mrf.mxu0  ;;  %v7398_v56 = vld [vmem:[%s7492_s25 + $0x60] sm:$0xff]   ;;  %v7401_v57 = vld [vmem:[%s7492_s25 + $0x68] sm:$0xff]   ;;  %v5120_v52 = vrot.slane %v7396_v27, 3  ;;  %v5122_v43 = vrot.slane %v8172_v44, 3 }
 0x138   : > { %v1381_v0 = vadd.f32 %v1286_v37, %v7929_v41  ;;  %v8160_v18 = vadd.f32 %v6801_v58, %v1383_v39  ;;  %v4502_v58 = vsel %vm4431_vm5, %v4492_v23, %v4501_v34  ;;  %v4522_v23 = vshrl.u32 %v7398_v56, 16 }
 0x139   : > { %v6750_v35 = vpop.f32.mrf.mxu1  ;;  %v6806_v36 = vpop.f32.mrf.mxu0  ;;  %v4525_v17 = vshll.u32 %v7398_v56, 16 }
 0x13a   : > { %v1384_v19 = vadd.f32 %v6750_v35, %v7937_v45  ;;  %v8167_v46 = vadd.f32 %v1822_v33, %v1381_v0  ;;  %v4510_v33 = vor.u32 %v4509_v59, %v4506_v3  ;;  %v4531_v0 = vshrl.u32 %v7401_v57, 16 }
 0x13b   : > { %v1289_v7 = vpop.f32.mrf.mxu1  ;;  %v1841_v41 = vpop.f32.mrf.mxu0  ;;  %v4534_v35 = vshll.u32 %v7401_v57, 16  ;;  %v4524_v56 = vrot.slane %v4522_v23, 2  ;;  %v8195_v57 = vld [vmem:[%s7492_s25 + $0x78] sm:$0xff]  }
 0x13c   : > { %v1382_v45 = vadd.f32 %v1289_v7, %v7945_v51  ;;  %v8176_v60 = vadd.f32 %v6802_v11, %v1384_v19  ;;  %v4519_v11 = vor.u32 %v4518_v29, %v4515_v10  ;;  %v4511_v27 = vsel %vm4431_vm5, %v4501_v34, %v4510_v33 }
 0x13d   : > { %v6753_v15 = vpop.f32.mrf.mxu1  ;;  %7052 = vmatmul.mubr.bf16.gmra.mxu1 %v4493_v50  ;;  %v6809_v63 = vpop.f32.mrf.mxu0  ;;  %7108 = vmatmul.mubr.bf16.gmra.mxu0 %v5117_v53  ;;  %v7402_v50 = vld [vmem:[%s7492_s25 + $0x70] sm:$0xff]   ;;  %v4527_v7 = vrot.slane %v4525_v17, 3  ;;  %v5123_v29 = vsel %vm5100_vm4, %v5120_v52, %v5122_v43  ;;  %v4533_v44 = vrot.slane %v4531_v0, 2  ;;  %v4536_v34 = vrot.slane %v4534_v35, 3 }
 0x13e   : > { %v1387_v39 = vadd.f32 %v6753_v15, %v7959_v61  ;;  %7055 = vmatprep.mubr.bf16.mxu1 %v4502_v58  ;;  %7111 = vmatprep.mubr.bf16.mxu0 %v5119_v62  ;;  %v8179_v37 = vadd.f32 %v1825_v49, %v1382_v45  ;;  %v5121_v49 = vsel %vm5100_vm4, %v5118_v21, %v5120_v52  ;;  %v7400_v58 = vld [vmem:[%s7492_s25 + $0x70] sm:$0xff]   ;;  %v7405_v45 = vld [vmem:[%s7492_s25 + $0x78] sm:$0xff]   ;;  %v4543_v23 = vshll.u32 %v7402_v50, 16 }
 0x13f   : > { %v1302_v47 = vpop.f32.mrf.mxu1  ;;  %v1854_v51 = vpop.f32.mrf.mxu0  ;;  %v5124_v52 = vrot.slane %v7400_v58, 3  ;;  %v5126_v35 = vrot.slane %v8195_v57, 3 }
 0x140   : > { %v1385_v3 = vadd.f32 %v1302_v47, %v7963_v2  ;;  %v8183_v59 = vadd.f32 %v6805_v14, %v1387_v39  ;;  %v4520_v14 = vsel %vm4431_vm5, %v4510_v33, %v4519_v11  ;;  %v4528_v33 = vor.u32 %v4527_v7, %v4524_v56 }
 0x141   : > { %v6754_v61 = vpop.f32.mrf.mxu1  ;;  %v6810_v19 = vpop.f32.mrf.mxu0  ;;  %v4545_v56 = vrot.slane %v4543_v23, 3 }
 0x142   : > { %v1388_v53 = vadd.f32 %v6754_v61, %v7974_v9  ;;  %v8190_v62 = vadd.f32 %v1838_v4, %v1385_v3  ;;  %v4540_v4 = vshrl.u32 %v7402_v50, 16  ;;  %v4549_v3 = vshrl.u32 %v7405_v45, 16 }
 0x143   : > { %v1305_v10 = vpop.f32.mrf.mxu1  ;;  %v1857_v2 = vpop.f32.mrf.mxu0  ;;  %v4552_v61 = vshll.u32 %v7405_v45, 16  ;;  %v4529_v58 = vsel %vm4431_vm5, %v4519_v11, %v4528_v33 }
 0x144   : > { %v1386_v21 = vadd.f32 %v1305_v10, %v7983_v16  ;;  %v8199_v15 = vadd.f32 %v6806_v36, %v1388_v53  ;;  %v4537_v36 = vor.u32 %v4536_v34, %v4533_v44  ;;  %v4542_v53 = vrot.slane %v4540_v4, 2 }
 0x145   : > { %v6757_v9 = vpop.f32.mrf.mxu1  ;;  %7056 = vmatmul.mubr.bf16.gmra.mxu1 %v4511_v27  ;;  %v6813_v39 = vpop.f32.mrf.mxu0  ;;  %7112 = vmatmul.mubr.bf16.gmra.mxu0 %v5121_v49  ;;  %v5125_v10 = vsel %vm5100_vm4, %v5122_v43, %v5124_v52  ;;  %v5127_v34 = vsel %vm5100_vm4, %v5124_v52, %v5126_v35  ;;  %v4551_v57 = vrot.slane %v4549_v3, 2  ;;  %v4554_v45 = vrot.slane %v4552_v61, 3 }
 0x146   : > { %v1391_v17 = vadd.f32 %v6757_v9, %v7992_v20  ;;  %7059 = vmatprep.mubr.bf16.mxu1 %v4520_v14  ;;  %7115 = vmatprep.mubr.bf16.mxu0 %v5123_v29  ;;  %v8202_v47 = vadd.f32 %v1841_v41, %v1386_v21  ;;  %v7404_v41 = vld [vmem:[%s7492_s25 + $0x80] sm:$0xff]   ;;  %v8218_v21 = vld [vmem:[%s7492_s25 + $0x88] sm:$0xff]  }
 0x147   : > { %v1318_v0 = vpop.f32.mrf.mxu1  ;;  %v1870_v16 = vpop.f32.mrf.mxu0  ;;  %v7406_v14 = vld [vmem:[%s7492_s25 + $0x80] sm:$0xff]   ;;  %v7409_v9 = vld [vmem:[%s7492_s25 + $0x88] sm:$0xff]   ;;  %v5128_v23 = vrot.slane %v7404_v41, 3  ;;  %v5130_v61 = vrot.slane %v8218_v21, 3 }
 0x148   : > { %v1389_v27 = vadd.f32 %v1318_v0, %v7996_v26  ;;  %v8206_v49 = vadd.f32 %v6809_v63, %v1391_v17  ;;  %v4538_v63 = vsel %vm4431_vm5, %v4528_v33, %v4537_v36  ;;  %v4558_v33 = vshrl.u32 %v7406_v14, 16 }
 0x149   : > { %v6758_v20 = vpop.f32.mrf.mxu1  ;;  %v6814_v50 = vpop.f32.mrf.mxu0  ;;  %v4561_v52 = vshll.u32 %v7406_v14, 16  ;;  %v5131_v21 = vsel %vm5100_vm4, %v5128_v23, %v5130_v61 }
 0x14a   : > { %v1392_v7 = vadd.f32 %v6758_v20, %v8000_v28  ;;  %v8213_v29 = vadd.f32 %v1854_v51, %v1389_v27  ;;  %v4546_v51 = vor.u32 %v4545_v56, %v4542_v53  ;;  %v4567_v27 = vshrl.u32 %v7409_v9, 16 }
 0x14b   : > { %v1321_v44 = vpop.f32.mrf.mxu1  ;;  %v1873_v26 = vpop.f32.mrf.mxu0  ;;  %v4570_v20 = vshll.u32 %v7409_v9, 16 }
 0x14c   : > { %v1390_v28 = vadd.f32 %v1321_v44, %v8008_v32  ;;  %v8222_v4 = vadd.f32 %v6810_v19, %v1392_v7  ;;  %v4555_v19 = vor.u32 %v4554_v45, %v4551_v57  ;;  %v4547_v41 = vsel %vm4431_vm5, %v4537_v36, %v4546_v51 }
 0x14d   : > { %v6761_v11 = vpop.f32.mrf.mxu1  ;;  %7060 = vmatmul.mubr.bf16.gmra.mxu1 %v4529_v58  ;;  %v6817_v43 = vpop.f32.mrf.mxu0  ;;  %7116 = vmatmul.mubr.bf16.gmra.mxu0 %v5125_v10  ;;  %v7410_v58 = vld [vmem:[%s7492_s25 + $0x90] sm:$0xff]   ;;  %v8609_v10 = vld [vmem:[#allocation3_spill] sm:$0xff]  ;;  %v4560_v44 = vrot.slane %v4558_v33, 2  ;;  %v4569_v9 = vrot.slane %v4567_v27, 2  ;;  %v4572_v36 = vrot.slane %v4570_v20, 3 }
 0x14e   : > { %v1395_v17 = vadd.f32 %v6761_v11, %v8016_v40  ;;  %7063 = vmatprep.mubr.bf16.mxu1 %v4538_v63  ;;  %7119 = vmatprep.mubr.bf16.mxu0 %v5127_v34  ;;  %v8225_v0 = vadd.f32 %v1857_v2, %v1390_v28  ;;  %v5129_v2 = vsel %vm5100_vm4, %v5126_v35, %v5128_v23  ;;  %v4563_v63 = vrot.slane %v4561_v52, 3  ;;  %v7408_v34 = vld [vmem:[%s7492_s25 + $0x90] sm:$0xff]   ;;  %v8241_v28 = vld [vmem:[%s7492_s25 + $0x98] sm:$0xff]   ;;  %v8610_v35 = vld [vmem:[#allocation4_spill] sm:$0xff] }
 0x14f   : > { %v1334_v3 = vpop.f32.mrf.mxu1  ;;  %v1886_v32 = vpop.f32.mrf.mxu0  ;;  %v7413_v11 = vld [vmem:[%s7492_s25 + $0x98] sm:$0xff]   ;;  %v5132_v23 = vrot.slane %v7408_v34, 3  ;;  %v8616_v34 = vld [vmem:[#allocation7_spill] sm:$0xff] }
 0x150   : > { %v1393_v53 = vadd.f32 %v1334_v3, %v8020_v48  ;;  %v8229_v56 = vadd.f32 %v6813_v39, %v1395_v17  ;;  %v4556_v39 = vsel %vm4431_vm5, %v4546_v51, %v4555_v19  ;;  %v4564_v51 = vor.u32 %v4563_v63, %v4560_v44 }
 0x151   : > { %v6762_v40 = vpop.f32.mrf.mxu1  ;;  %v6818_v7 = vpop.f32.mrf.mxu0 }
 0x152   : > { %v1396_v14 = vadd.f32 %v6762_v40, %v8609_v10  ;;  %v8236_v57 = vadd.f32 %v1870_v16, %v1393_v53  ;;  %v4576_v16 = vshrl.u32 %v7410_v58, 16  ;;  %v4579_v53 = vshll.u32 %v7410_v58, 16  ;;  %v8612_v40 = vld [vmem:[#allocation5_spill] sm:$0xff] }
 0x153   : > { %v1337_v45 = vpop.f32.mrf.mxu1  ;;  %v1889_v48 = vpop.f32.mrf.mxu0 }
 0x154   : > { %v1394_v17 = vadd.f32 %v1337_v45, %v8610_v35  ;;  %v8245_v3 = vadd.f32 %v6814_v50, %v1396_v14  ;;  %v4573_v50 = vor.u32 %v4572_v36, %v4569_v9  ;;  %v5134_v14 = vrot.slane %v8241_v28, 3  ;;  %v7414_v9 = vld [vmem:[%s7492_s25 + $0xa0] ss:$0 sps:$4 sm:$0x77]  }
 0x155   : > { %v6765_v33 = vpop.f32.mrf.mxu1  ;;  %7064 = vmatmul.mubr.bf16.gmra.mxu1 %v4547_v41  ;;  %v6889_v52 = vpop.f32.mrf.mxu0  ;;  %7120 = vmatmul.mubr.bf16.gmra.mxu0 %v5129_v2  ;;  %v4585_v41 = vshrl.u32 %v7413_v11, 16  ;;  %v4588_v35 = vshll.u32 %v7413_v11, 16  ;;  %v8614_v2 = vld [vmem:[#allocation6_spill] sm:$0xff]  ;;  %v4578_v44 = vrot.slane %v4576_v16, 2  ;;  %v4581_v63 = vrot.slane %v4579_v53, 3  ;;  %v8618_v16 = vld [vmem:[#allocation8_spill] sm:$0xff] }
 0x156   : > { %8611 = vst [vmem:[#allocation3_spill] sm:$0xff] %v8245_v3  ;;  %v1399_v10 = vadd.f32 %v6765_v33, %v8612_v40  ;;  %7067 = vmatprep.mubr.bf16.mxu1 %v4556_v39  ;;  %7123 = vmatprep.mubr.bf16.mxu0 %v5131_v21  ;;  %v8248_v27 = vadd.f32 %v1873_v26, %v1394_v17  ;;  %v7412_v21 = vld [vmem:[%s7492_s25 + $0xa0] ss:$0 sps:$4 sm:$0x77]  }
 0x157   : > { %v1350_v20 = vpop.f32.mrf.mxu1  ;;  %v2962_v45 = vpop.f32.mrf.mxu0  ;;  %v4565_v17 = vsel %vm4431_vm5, %v4555_v19, %v4564_v51  ;;  %v5133_v40 = vsel %vm5100_vm4, %v5130_v61, %v5132_v23  ;;  %v4582_v61 = vor.u32 %v4581_v63, %v4578_v44 }
 0x158   : > { %8613 = vst [vmem:[#allocation4_spill] sm:$0xff] %v8248_v27  ;;  %v1397_v3 = vadd.f32 %v1350_v20, %v8614_v2  ;;  %v8252_v58 = vadd.f32 %v6817_v43, %v1399_v10  ;;  %v4574_v20 = vsel %vm4431_vm5, %v4564_v51, %v4573_v50  ;;  %v5135_v43 = vsel %vm5100_vm4, %v5132_v23, %v5134_v14 }
 0x159   : > { %v6766_v33 = vpop.f32.mrf.mxu1  ;;  %v6890_v39 = vpop.f32.mrf.mxu0  ;;  %v4587_v10 = vrot.slane %v4585_v41, 2  ;;  %v4590_v2 = vrot.slane %v4588_v35, 3  ;;  %v4597_v51 = vshll.u32 %v7414_v9, 16 }
 0x15a   : > { %8615 = vst [vmem:[#allocation5_spill] sm:$0xff] %v8252_v58  ;;  %v1400_v26 = vadd.f32 %v6766_v33, %v8616_v34  ;;  %v8259_v36 = vadd.f32 %v1886_v32, %v1397_v3  ;;  %v5136_v34 = vrot.slane %v7412_v21, 3  ;;  %v8619_v32 = vld [vmem:[#allocation9_spill] sm:$0xff] }
 0x15b   : > { %v1353_v28 = vpop.f32.mrf.mxu1  ;;  %v2965_v11 = vpop.f32.mrf.mxu0  ;;  %v4591_v35 = vor.u32 %v4590_v2, %v4587_v10 }
 0x15c   : > { %8617 = vst [vmem:[#allocation6_spill] sm:$0xff] %v8259_v36  ;;  %v1398_v53 = vadd.f32 %v1353_v28, %v8618_v16  ;;  %v8264_v58 = vadd.f32 %v6818_v7, %v1400_v26  ;;  %v4594_v36 = vshrl.u32 %v7414_v9, 16  ;;  %v5137_v63 = vsel %vm5100_vm4, %v5134_v14, %v5136_v34 }
 0x15d   : > { %v6837_v33 = vpop.f32.mrf.mxu1  ;;  %7068 = vmatmul.mubr.bf16.gmra.mxu1 %v4565_v17  ;;  %v6893_v19 = vpop.f32.mrf.mxu0  ;;  %7124 = vmatmul.mubr.bf16.gmra.mxu0 %v5133_v40  ;;  %v4583_v40 = vsel %vm4431_vm5, %v4573_v50, %v4582_v61  ;;  %v4592_v10 = vsel %vm4431_vm5, %v4582_v61, %v4591_v35 }
 0x15e   : > { %v2438_v3 = vadd.f32 %v6837_v33, %v8619_v32  ;;  %7071 = vmatprep.mubr.bf16.mxu1 %v4574_v20  ;;  %7127 = vmatprep.mubr.bf16.mxu0 %v5135_v43  ;;  %v8267_v27 = vadd.f32 %v1889_v48, %v1398_v53  ;;  %v4596_v28 = vrot.slane %v4594_v36, 2  ;;  %v4599_v20 = vrot.slane %v4597_v51, 3 }
 0x15f   : > { %v2293_v23 = vpop.f32.mrf.mxu1  ;;  %v2978_v41 = vpop.f32.mrf.mxu0 }
 0x160   : > { %v2436_v7 = vadd.f32 %v2293_v23, %v8080_v42  ;;  %v8270_v26 = vadd.f32 %v6889_v52, %v2438_v3 }
 0x161   : > { %v6838_v17 = vpop.f32.mrf.mxu1  ;;  %v6894_v44 = vpop.f32.mrf.mxu0 }
 0x162   : > { %v2439_v21 = vadd.f32 %v6838_v17, %v8084_v1  ;;  %v8275_v9 = vadd.f32 %v2962_v45, %v2436_v7  ;;  %v4600_v1 = vor.u32 %v4599_v20, %v4596_v28 }
 0x163   : > { %v2296_v48 = vpop.f32.mrf.mxu1  ;;  %v2981_v43 = vpop.f32.mrf.mxu0 }
 0x164   : > { %v2437_v42 = vadd.f32 %v2296_v48, %v8088_v25  ;;  %v8279_v52 = vadd.f32 %v6890_v39, %v2439_v21  ;;  %v4601_v34 = vsel %vm4431_vm5, %v4591_v35, %v4600_v1 }
 0x165   : > { %v6841_v2 = vpop.f32.mrf.mxu1  ;;  %7072 = vmatmul.mubr.bf16.gmra.mxu1 %v4583_v40  ;;  %v6897_v50 = vpop.f32.mrf.mxu0  ;;  %7128 = vmatmul.mubr.bf16.gmra.mxu0 %v5137_v63 }
 0x166   : > { %v2442_v14 = vadd.f32 %v6841_v2, %v8091_v55  ;;  %7075 = vmatprep.mubr.bf16.mxu1 %v4592_v10  ;;  %v8282_v36 = vadd.f32 %v2965_v11, %v2437_v42 }
 0x167   : > { %v2309_v45 = vpop.f32.mrf.mxu1  ;;  %v2994_v16 = vpop.f32.mrf.mxu0 }
 0x168   : > { %v2440_v53 = vadd.f32 %v2309_v45, %v8098_v12  ;;  %v8285_v33 = vadd.f32 %v6893_v19, %v2442_v14 }
 0x169   : > { %v6842_v61 = vpop.f32.mrf.mxu1  ;;  %v6898_v25 = vpop.f32.mrf.mxu0 }
 0x16a   : > { %v2443_v39 = vadd.f32 %v6842_v61, %v8107_v6  ;;  %v8289_v32 = vadd.f32 %v2978_v41, %v2440_v53 }
 0x16b   : > { %v2312_v3 = vpop.f32.mrf.mxu1  ;;  %v2997_v55 = vpop.f32.mrf.mxu0 }
 0x16c   : > { %v2441_v51 = vadd.f32 %v2312_v3, %v8110_v24  ;;  %v8292_v11 = vadd.f32 %v6894_v44, %v2443_v39 }
 0x16d   : > { %v6845_v23 = vpop.f32.mrf.mxu1  ;;  %7076 = vmatmul.mubr.bf16.gmra.mxu1 %v4601_v34  ;;  %v6901_v7 = vpop.f32.mrf.mxu0 }
 0x16e   : > { %v2446_v12 = vadd.f32 %v6845_v23, %v8114_v38  ;;  %v8295_v19 = vadd.f32 %v2981_v43, %v2441_v51 }
 0x16f   : > { %v2325_v17 = vpop.f32.mrf.mxu1  ;;  %v3010_v40 = vpop.f32.mrf.mxu0 }
 0x170   : > { %v2444_v6 = vadd.f32 %v2325_v17, %v8121_v8  ;;  %v8298_v35 = vadd.f32 %v6897_v50, %v2446_v12 }
 0x171   : > { %v6846_v41 = vpop.f32.mrf.mxu1  ;;  %v6902_v63 = vpop.f32.mrf.mxu0 }
 0x172   : > { %v2447_v21 = vadd.f32 %v6846_v41, %v8130_v13  ;;  %v8301_v24 = vadd.f32 %v2994_v16, %v2444_v6 }
 0x173   : > { %v2328_v44 = vpop.f32.mrf.mxu1  ;;  %v3013_v28 = vpop.f32.mrf.mxu0 }
 0x174   : > { %v2445_v20 = vadd.f32 %v2328_v44, %v8133_v30  ;;  %v8304_v48 = vadd.f32 %v6898_v25, %v2447_v21 }
 0x175   : > { %v6849_v38 = vpop.f32.mrf.mxu1  ;;  %v6905_v43 = vpop.f32.mrf.mxu0 }
 0x176   : > { %v2450_v10 = vadd.f32 %v6849_v38, %v8137_v54  ;;  %v8307_v42 = vadd.f32 %v2997_v55, %v2445_v20 }
 0x177   : > { %v2341_v8 = vpop.f32.mrf.mxu1  ;;  %v3026_v2 = vpop.f32.mrf.mxu0 }
 0x178   : > { %v2448_v50 = vadd.f32 %v2341_v8, %v8144_v5  ;;  %v8310_v14 = vadd.f32 %v6901_v7, %v2450_v10 }
 0x179   : > { %v6850_v13 = vpop.f32.mrf.mxu1  ;;  %v6906_v1 = vpop.f32.mrf.mxu0 }
 0x17a   : > { %v2451_v45 = vadd.f32 %v6850_v13, %v8153_v22  ;;  %v8313_v16 = vadd.f32 %v3010_v40, %v2448_v50 }
 0x17b   : > { %v2344_v30 = vpop.f32.mrf.mxu1  ;;  %v3029_v53 = vpop.f32.mrf.mxu0 }
 0x17c   : > { %v2449_v61 = vadd.f32 %v2344_v30, %v8156_v31  ;;  %v8316_v25 = vadd.f32 %v6902_v63, %v2451_v45 }
 0x17d   : > { %v6853_v54 = vpop.f32.mrf.mxu1  ;;  %v6909_v39 = vpop.f32.mrf.mxu0 }
 0x17e   : > { %v2454_v34 = vadd.f32 %v6853_v54, %v8160_v18  ;;  %v8319_v3 = vadd.f32 %v3013_v28, %v2449_v61 }
 0x17f   : > { %v2357_v5 = vpop.f32.mrf.mxu1  ;;  %v3042_v55 = vpop.f32.mrf.mxu0 }
 0x180   : > { %v2452_v51 = vadd.f32 %v2357_v5, %v8167_v46  ;;  %v8322_v23 = vadd.f32 %v6905_v43, %v2454_v34 }
 0x181   : > { %v6854_v22 = vpop.f32.mrf.mxu1  ;;  %v6910_v7 = vpop.f32.mrf.mxu0 }
 0x182   : > { %v2455_v12 = vadd.f32 %v6854_v22, %v8176_v60  ;;  %v8325_v17 = vadd.f32 %v3026_v2, %v2452_v51 }
 0x183   : > { %v2360_v31 = vpop.f32.mrf.mxu1  ;;  %v3045_v40 = vpop.f32.mrf.mxu0 }
 0x184   : > { %v2453_v6 = vadd.f32 %v2360_v31, %v8179_v37  ;;  %v8328_v41 = vadd.f32 %v6906_v1, %v2455_v12 }
 0x185   : > { %v6857_v18 = vpop.f32.mrf.mxu1  ;;  %v6913_v63 = vpop.f32.mrf.mxu0 }
 0x186   : > { %v2458_v21 = vadd.f32 %v6857_v18, %v8183_v59  ;;  %v8331_v44 = vadd.f32 %v3029_v53, %v2453_v6 }
 0x187   : > { %v2373_v46 = vpop.f32.mrf.mxu1  ;;  %v3058_v28 = vpop.f32.mrf.mxu0 }
 0x188   : > { %v2456_v20 = vadd.f32 %v2373_v46, %v8190_v62  ;;  %v8334_v38 = vadd.f32 %v6909_v39, %v2458_v21  ;;  %v8620_v21 = vld [vmem:[#allocation3_spill] sm:$0xff] }
 0x189   : > { %v6858_v60 = vpop.f32.mrf.mxu1  ;;  %v6914_v43 = vpop.f32.mrf.mxu0 }
 0x18a   : > { %v2459_v10 = vadd.f32 %v6858_v60, %v8199_v15  ;;  %v8337_v8 = vadd.f32 %v3042_v55, %v2456_v20  ;;  %v8621_v60 = vld [vmem:[#allocation4_spill] sm:$0xff] }
 0x18b   : > { %v2376_v37 = vpop.f32.mrf.mxu1  ;;  %v3061_v2 = vpop.f32.mrf.mxu0 }
 0x18c   : > { %v2457_v50 = vadd.f32 %v2376_v37, %v8202_v47  ;;  %v8340_v13 = vadd.f32 %v6910_v7, %v2459_v10 }
 0x18d   : > { %v6861_v59 = vpop.f32.mrf.mxu1  ;;  %v6917_v1 = vpop.f32.mrf.mxu0 }
 0x18e   : > { %v2462_v45 = vadd.f32 %v6861_v59, %v8206_v49  ;;  %v8343_v30 = vadd.f32 %v3045_v40, %v2457_v50 }
 0x18f   : > { %v2389_v62 = vpop.f32.mrf.mxu1  ;;  %v3074_v53 = vpop.f32.mrf.mxu0 }
 0x190   : > { %v2460_v61 = vadd.f32 %v2389_v62, %v8213_v29  ;;  %v8346_v54 = vadd.f32 %v6913_v63, %v2462_v45  ;;  %v8623_v45 = vld [vmem:[#allocation6_spill] sm:$0xff] }
 0x191   : > { %v6862_v15 = vpop.f32.mrf.mxu1  ;;  %v6918_v39 = vpop.f32.mrf.mxu0 }
 0x192   : > { %v2463_v34 = vadd.f32 %v6862_v15, %v8222_v4  ;;  %v8349_v5 = vadd.f32 %v3058_v28, %v2460_v61 }
 0x193   : > { %v2392_v47 = vpop.f32.mrf.mxu1  ;;  %v3077_v55 = vpop.f32.mrf.mxu0 }
 0x194   : > { %v2461_v51 = vadd.f32 %v2392_v47, %v8225_v0  ;;  %v8352_v22 = vadd.f32 %v6914_v43, %v2463_v34 }
 0x195   : > { %v6865_v49 = vpop.f32.mrf.mxu1  ;;  %v6921_v7 = vpop.f32.mrf.mxu0 }
 0x196   : > { %v2466_v12 = vadd.f32 %v6865_v49, %v8229_v56  ;;  %v8355_v31 = vadd.f32 %v3061_v2, %v2461_v51  ;;  %v8622_v2 = vld [vmem:[#allocation5_spill] sm:$0xff] }
 0x197   : > { %v2405_v29 = vpop.f32.mrf.mxu1  ;;  %v3090_v40 = vpop.f32.mrf.mxu0 }
 0x198   : > { %v2464_v6 = vadd.f32 %v2405_v29, %v8236_v57  ;;  %v8358_v18 = vadd.f32 %v6917_v1, %v2466_v12 }
 0x199   : > { %v6866_v4 = vpop.f32.mrf.mxu1  ;;  %v6922_v63 = vpop.f32.mrf.mxu0 }
 0x19a   : > { %v2467_v46 = vadd.f32 %v6866_v4, %v8620_v21  ;;  %v8361_v28 = vadd.f32 %v3074_v53, %v2464_v6 }
 0x19b   : > { %v2408_v0 = vpop.f32.mrf.mxu1  ;;  %v3093_v20 = vpop.f32.mrf.mxu0 }
 0x19c   : > { %v2465_v43 = vadd.f32 %v2408_v0, %v8621_v60  ;;  %v8364_v10 = vadd.f32 %v6918_v39, %v2467_v46 }
 0x19d   : > { %v6869_v56 = vpop.f32.mrf.mxu1  ;;  %v6993_v37 = vpop.f32.mrf.mxu0 }
 0x19e   : > { %v2470_v50 = vadd.f32 %v6869_v56, %v8622_v2  ;;  %v8367_v59 = vadd.f32 %v3077_v55, %v2465_v43 }
 0x19f   : > { %v2421_v57 = vpop.f32.mrf.mxu1  ;;  %v4033_v1 = vpop.f32.mrf.mxu0 }
 0x1a0   : > { %v2468_v62 = vadd.f32 %v2421_v57, %v8623_v45  ;;  %v8370_v61 = vadd.f32 %v6921_v7, %v2470_v50 }
 0x1a1   : > { %v6870_v53 = vpop.f32.mrf.mxu1  ;;  %v6994_v15 = vpop.f32.mrf.mxu0 }
 0x1a2   : > { %v2471_v34 = vadd.f32 %v6870_v53, %v8264_v58  ;;  %v8373_v47 = vadd.f32 %v3090_v40, %v2468_v62 }
 0x1a3   : > { %v2424_v39 = vpop.f32.mrf.mxu1  ;;  %v4036_v51 = vpop.f32.mrf.mxu0 }
 0x1a4   : > { %v2469_v49 = vadd.f32 %v2424_v39, %v8267_v27  ;;  %v8376_v12 = vadd.f32 %v6922_v63, %v2471_v34 }
 0x1a5   : > { %v6941_v55 = vpop.f32.mrf.mxu1  ;;  %v6997_v29 = vpop.f32.mrf.mxu0 }
 0x1a6   : > { %v3643_v6 = vadd.f32 %v6941_v55, %v8270_v26  ;;  %v8379_v4 = vadd.f32 %v3093_v20, %v2469_v49 }
 0x1a7   : > { %v3498_v7 = vpop.f32.mrf.mxu1  ;;  %v4049_v21 = vpop.f32.mrf.mxu0 }
 0x1a8   : > { %v3641_v46 = vadd.f32 %v3498_v7, %v8275_v9  ;;  %v8382_v0 = vadd.f32 %v6993_v37, %v3643_v6 }
 0x1a9   : > { %v6942_v58 = vpop.f32.mrf.mxu1  ;;  %v6998_v40 = vpop.f32.mrf.mxu0 }
 0x1aa   : > { %v3644_v60 = vadd.f32 %v6942_v58, %v8279_v52  ;;  %v8385_v43 = vadd.f32 %v4033_v1, %v3641_v46 }
 0x1ab   : > { %v3501_v27 = vpop.f32.mrf.mxu1  ;;  %v4052_v63 = vpop.f32.mrf.mxu0 }
 0x1ac   : > { %v3642_v56 = vadd.f32 %v3501_v27, %v8282_v36  ;;  %v8388_v2 = vadd.f32 %v6994_v15, %v3644_v60 }
 0x1ad   : > { %v6945_v26 = vpop.f32.mrf.mxu1  ;;  %v7001_v20 = vpop.f32.mrf.mxu0 }
 0x1ae   : > { %v3647_v50 = vadd.f32 %v6945_v26, %v8285_v33  ;;  %v8391_v57 = vadd.f32 %v4036_v51, %v3642_v56 }
 0x1af   : > { %v3514_v9 = vpop.f32.mrf.mxu1  ;;  %v4065_v37 = vpop.f32.mrf.mxu0 }
 0x1b0   : > { %v3645_v45 = vadd.f32 %v3514_v9, %v8289_v32  ;;  %v8394_v62 = vadd.f32 %v6997_v29, %v3647_v50 }
 0x1b1   : > { %v6946_v52 = vpop.f32.mrf.mxu1  ;;  %v7002_v1 = vpop.f32.mrf.mxu0 }
 0x1b2   : > { %v3648_v53 = vadd.f32 %v6946_v52, %v8292_v11  ;;  %v8397_v34 = vadd.f32 %v4049_v21, %v3645_v45 }
 0x1b3   : > { %v3517_v36 = vpop.f32.mrf.mxu1  ;;  %v4068_v15 = vpop.f32.mrf.mxu0 }
 0x1b4   : > { %v3646_v39 = vadd.f32 %v3517_v36, %v8295_v19  ;;  %v8400_v49 = vadd.f32 %v6998_v40, %v3648_v53 }
 0x1b5   : > { %v6949_v33 = vpop.f32.mrf.mxu1  ;;  %v7005_v51 = vpop.f32.mrf.mxu0 }
 0x1b6   : > { %v3651_v55 = vadd.f32 %v6949_v33, %v8298_v35  ;;  %v8403_v6 = vadd.f32 %v4052_v63, %v3646_v39 }
 0x1b7   : > { %v3530_v32 = vpop.f32.mrf.mxu1  ;;  %v4081_v29 = vpop.f32.mrf.mxu0 }
 0x1b8   : > { %v3649_v7 = vadd.f32 %v3530_v32, %v8301_v24  ;;  %v8406_v46 = vadd.f32 %v7001_v20, %v3651_v55 }
 0x1b9   : > { %v6950_v11 = vpop.f32.mrf.mxu1  ;;  %v7006_v21 = vpop.f32.mrf.mxu0 }
 0x1ba   : > { %v3652_v58 = vadd.f32 %v6950_v11, %v8304_v48  ;;  %v8409_v60 = vadd.f32 %v4065_v37, %v3649_v7 }
 0x1bb   : > { %v3533_v19 = vpop.f32.mrf.mxu1  ;;  %v4084_v40 = vpop.f32.mrf.mxu0 }
 0x1bc   : > { %v3650_v27 = vadd.f32 %v3533_v19, %v8307_v42  ;;  %v8412_v56 = vadd.f32 %v7002_v1, %v3652_v58 }
 0x1bd   : > { %v6953_v35 = vpop.f32.mrf.mxu1  ;;  %v7009_v63 = vpop.f32.mrf.mxu0 }
 0x1be   : > { %v3655_v26 = vadd.f32 %v6953_v35, %v8310_v14  ;;  %v8415_v50 = vadd.f32 %v4068_v15, %v3650_v27 }
 0x1bf   : > { %v3546_v24 = vpop.f32.mrf.mxu1  ;;  %v4097_v20 = vpop.f32.mrf.mxu0 }
 0x1c0   : > { %v3653_v9 = vadd.f32 %v3546_v24, %v8313_v16  ;;  %v8418_v45 = vadd.f32 %v7005_v51, %v3655_v26 }
 0x1c1   : > { %v6954_v48 = vpop.f32.mrf.mxu1  ;;  %v7010_v37 = vpop.f32.mrf.mxu0 }
 0x1c2   : > { %v3656_v52 = vadd.f32 %v6954_v48, %v8316_v25  ;;  %v8421_v53 = vadd.f32 %v4081_v29, %v3653_v9 }
 0x1c3   : > { %v3549_v42 = vpop.f32.mrf.mxu1  ;;  %v4100_v1 = vpop.f32.mrf.mxu0 }
 0x1c4   : > { %v3654_v36 = vadd.f32 %v3549_v42, %v8319_v3  ;;  %v8424_v39 = vadd.f32 %v7006_v21, %v3656_v52 }
 0x1c5   : > { %v6957_v14 = vpop.f32.mrf.mxu1  ;;  %v7013_v15 = vpop.f32.mrf.mxu0 }
 0x1c6   : > { %v3659_v33 = vadd.f32 %v6957_v14, %v8322_v23  ;;  %v8427_v55 = vadd.f32 %v4084_v40, %v3654_v36 }
 0x1c7   : > { %v3562_v16 = vpop.f32.mrf.mxu1  ;;  %v4113_v51 = vpop.f32.mrf.mxu0 }
 0x1c8   : > { %v3657_v32 = vadd.f32 %v3562_v16, %v8325_v17  ;;  %v8430_v7 = vadd.f32 %v7009_v63, %v3659_v33 }
 0x1c9   : > { %v6958_v25 = vpop.f32.mrf.mxu1  ;;  %v7014_v29 = vpop.f32.mrf.mxu0 }
 0x1ca   : > { %v3660_v11 = vadd.f32 %v6958_v25, %v8328_v41  ;;  %v8433_v58 = vadd.f32 %v4097_v20, %v3657_v32 }
 0x1cb   : > { %v3565_v3 = vpop.f32.mrf.mxu1  ;;  %v4116_v21 = vpop.f32.mrf.mxu0 }
 0x1cc   : > { %v3658_v19 = vadd.f32 %v3565_v3, %v8331_v44  ;;  %v8436_v27 = vadd.f32 %v7010_v37, %v3660_v11 }
 0x1cd   : > { %v6961_v23 = vpop.f32.mrf.mxu1  ;;  %v7017_v40 = vpop.f32.mrf.mxu0 }
 0x1ce   : > { %v3663_v35 = vadd.f32 %v6961_v23, %v8334_v38  ;;  %v8439_v26 = vadd.f32 %v4100_v1, %v3658_v19 }
 0x1cf   : > { %v3578_v17 = vpop.f32.mrf.mxu1  ;;  %v4129_v63 = vpop.f32.mrf.mxu0 }
 0x1d0   : > { %v3661_v24 = vadd.f32 %v3578_v17, %v8337_v8  ;;  %v8442_v9 = vadd.f32 %v7013_v15, %v3663_v35 }
 0x1d1   : > { %v6962_v41 = vpop.f32.mrf.mxu1  ;;  %v7018_v20 = vpop.f32.mrf.mxu0 }
 0x1d2   : > { %v3664_v48 = vadd.f32 %v6962_v41, %v8340_v13  ;;  %v8445_v52 = vadd.f32 %v4113_v51, %v3661_v24 }
 0x1d3   : > { %v3581_v44 = vpop.f32.mrf.mxu1  ;;  %v4132_v37 = vpop.f32.mrf.mxu0 }
 0x1d4   : > { %v3662_v42 = vadd.f32 %v3581_v44, %v8343_v30  ;;  %v8448_v36 = vadd.f32 %v7014_v29, %v3664_v48 }
 0x1d5   : > { %v6965_v38 = vpop.f32.mrf.mxu1  ;;  %v7021_v1 = vpop.f32.mrf.mxu0 }
 0x1d6   : > { %v3667_v14 = vadd.f32 %v6965_v38, %v8346_v54  ;;  %v8451_v33 = vadd.f32 %v4116_v21, %v3662_v42 }
 0x1d7   : > { %v3594_v8 = vpop.f32.mrf.mxu1  ;;  %v4145_v15 = vpop.f32.mrf.mxu0 }
 0x1d8   : > { %v3665_v16 = vadd.f32 %v3594_v8, %v8349_v5  ;;  %v8454_v32 = vadd.f32 %v7017_v40, %v3667_v14 }
 0x1d9   : > { %v6966_v13 = vpop.f32.mrf.mxu1  ;;  %v7022_v51 = vpop.f32.mrf.mxu0 }
 0x1da   : > { %v3668_v25 = vadd.f32 %v6966_v13, %v8352_v22  ;;  %v8457_v11 = vadd.f32 %v4129_v63, %v3665_v16 }
 0x1db   : > { %v3597_v30 = vpop.f32.mrf.mxu1  ;;  %v4148_v29 = vpop.f32.mrf.mxu0 }
 0x1dc   : > { %v3666_v3 = vadd.f32 %v3597_v30, %v8355_v31  ;;  %v8460_v19 = vadd.f32 %v7018_v20, %v3668_v25 }
 0x1dd   : > { %v6969_v54 = vpop.f32.mrf.mxu1  ;;  %v7025_v21 = vpop.f32.mrf.mxu0 }
 0x1de   : > { %v3671_v23 = vadd.f32 %v6969_v54, %v8358_v18  ;;  %v8463_v35 = vadd.f32 %v4132_v37, %v3666_v3 }
 0x1df   : > { %v3610_v5 = vpop.f32.mrf.mxu1  ;;  %v4161_v40 = vpop.f32.mrf.mxu0 }
 0x1e0   : > { %v3669_v17 = vadd.f32 %v3610_v5, %v8361_v28  ;;  %v8466_v24 = vadd.f32 %v7021_v1, %v3671_v23 }
 0x1e1   : > { %v6970_v22 = vpop.f32.mrf.mxu1  ;;  %v7026_v63 = vpop.f32.mrf.mxu0 }
 0x1e2   : > { %v3672_v41 = vadd.f32 %v6970_v22, %v8364_v10  ;;  %v8469_v48 = vadd.f32 %v4145_v15, %v3669_v17 }
 0x1e3   : > { %v3613_v31 = vpop.f32.mrf.mxu1  ;;  %v4164_v20 = vpop.f32.mrf.mxu0 }
 0x1e4   : > { %v3670_v44 = vadd.f32 %v3613_v31, %v8367_v59  ;;  %v8472_v42 = vadd.f32 %v7022_v51, %v3672_v41 }
 0x1e5   : > { %v6973_v18 = vpop.f32.mrf.mxu1  ;;  %v7097_v37 = vpop.f32.mrf.mxu0 }
 0x1e6   : > { %v3675_v38 = vadd.f32 %v6973_v18, %v8370_v61  ;;  %v8475_v14 = vadd.f32 %v4148_v29, %v3670_v44 }
 0x1e7   : > { %v3626_v28 = vpop.f32.mrf.mxu1  ;;  %v5238_v1 = vpop.f32.mrf.mxu0 }
 0x1e8   : > { %v3673_v8 = vadd.f32 %v3626_v28, %v8373_v47  ;;  %v8478_v16 = vadd.f32 %v7025_v21, %v3675_v38 }
 0x1e9   : > { %v6974_v10 = vpop.f32.mrf.mxu1  ;;  %v7098_v15 = vpop.f32.mrf.mxu0 }
 0x1ea   : > { %v3676_v13 = vadd.f32 %v6974_v10, %v8376_v12  ;;  %v8481_v25 = vadd.f32 %v4161_v40, %v3673_v8  ;;  %v8493_v40 = vld [vmem:[%s8600_s2] ss:$0 sm:$0xff] }
 0x1eb   : > { %v3629_v59 = vpop.f32.mrf.mxu1  ;;  %v5241_v51 = vpop.f32.mrf.mxu0 }
 0x1ec   : > { %v3674_v30 = vadd.f32 %v3629_v59, %v8379_v4  ;;  %v8484_v3 = vadd.f32 %v7026_v63, %v3676_v13 }
 0x1ed   : > { %v7045_v61 = vpop.f32.mrf.mxu1  ;;  %v7101_v29 = vpop.f32.mrf.mxu0 }
 0x1ee   : > { %v4847_v54 = vadd.f32 %v7045_v61, %v8382_v0  ;;  %v8487_v47 = vadd.f32 %v4164_v20, %v3674_v30 }
 0x1ef   : > { %v4702_v21 = vpop.f32.mrf.mxu1  ;;  %v5254_v23 = vpop.f32.mrf.mxu0 }
 0x1f0   : > { %v5383_v5 = vadd.f32 %v7097_v37, %v4847_v54  ;;  %v4845_v12 = vadd.f32 %v4702_v21, %v8385_v43 }
 0x1f1   : > { %v7046_v4 = vpop.f32.mrf.mxu1  ;;  %v7102_v17 = vpop.f32.mrf.mxu0 }
 0x1f2   : > { %v5381_v22 = vadd.f32 %v5238_v1, %v4845_v12  ;;  %v4848_v63 = vadd.f32 %v7046_v4, %v8388_v2  ;;  %v5501_v31 = vadd.f32 %v8493_v40, %v5383_v5 }
 0x1f3   : > { %v4705_v41 = vpop.f32.mrf.mxu1  ;;  %v5257_v0 = vpop.f32.mrf.mxu0 }
 0x1f4   : > { %v5384_v20 = vadd.f32 %v7098_v15, %v4848_v63  ;;  %v4846_v44 = vadd.f32 %v4705_v41, %v8391_v57  ;;  %v5499_v37 = vadd.f32 %v8493_v40, %v5381_v22  ;;  %v5537_v2 = vmax.f32 %v5501_v31, 0.0 }
 0x1f5   : > { %v7049_v18 = vpop.f32.mrf.mxu1  ;;  %v7105_v43 = vpop.f32.mrf.mxu0 }
 0x1f6   : > { %v5502_v38 = vadd.f32 %v8493_v40, %v5384_v20  ;;  %v5382_v28 = vadd.f32 %v5241_v51, %v4846_v44  ;;  %v4851_v8 = vadd.f32 %v7049_v18, %v8394_v62  ;;  %v5535_v61 = vmax.f32 %v5499_v37, 0.0 }
 0x1f7   : > { %v4718_v1 = vpop.f32.mrf.mxu1  ;;  %v5270_v10 = vpop.f32.mrf.mxu0 }
 0x1f8   : > { %v5538_v13 = vmax.f32 %v5502_v38, 0.0  ;;  %v5500_v59 = vadd.f32 %v8493_v40, %v5382_v28  ;;  %v4849_v15 = vadd.f32 %v4718_v1, %v8397_v34  ;;  %v5387_v57 = vadd.f32 %v7101_v29, %v4851_v8 }
 0x1f9   : > { %v7050_v30 = vpop.f32.mrf.mxu1  ;;  %v7106_v51 = vpop.f32.mrf.mxu0 }
 0x1fa   : > { %v6330_v62 = vpack.c.bf16 %v5538_v13, %v5537_v2  ;;  %v5536_v54 = vmax.f32 %v5500_v59, 0.0  ;;  %v5385_v21 = vadd.f32 %v5254_v23, %v4849_v15  ;;  %v4852_v5 = vadd.f32 %v7050_v30, %v8400_v49 }
 0x1fb   : > { %v4721_v12 = vpop.f32.mrf.mxu1  ;;  %v5273_v4 = vpop.f32.mrf.mxu0  ;;  %v5505_v63 = vadd.f32 %v8493_v40, %v5387_v57 }
 0x1fc   : > { %6412 = vst [vmem:[%s8507_s12 + $0x8] sm:$0xff] %v6330_v62   ;;  %v6325_v34 = vpack.c.bf16 %v5536_v54, %v5535_v61  ;;  %v4850_v22 = vadd.f32 %v4721_v12, %v8403_v6  ;;  %v5388_v41 = vadd.f32 %v7102_v17, %v4852_v5  ;;  %v5503_v20 = vadd.f32 %v8493_v40, %v5385_v21 }
 0x1fd   : > { %v7053_v31 = vpop.f32.mrf.mxu1  ;;  %v7109_v29 = vpop.f32.mrf.mxu0  ;;  %v5541_v8 = vmax.f32 %v5505_v63, 0.0 }
 0x1fe   : > { %6326 = vst [vmem:[%s8507_s12] sm:$0xff] %v6325_v34   ;;  %v5386_v44 = vadd.f32 %v5257_v0, %v4850_v22  ;;  %v4855_v18 = vadd.f32 %v7053_v31, %v8406_v46  ;;  %v5506_v23 = vadd.f32 %v8493_v40, %v5388_v41  ;;  %v5539_v13 = vmax.f32 %v5503_v20, 0.0 }
 0x1ff   : > { %v4734_v49 = vpop.f32.mrf.mxu1  ;;  %v5286_v37 = vpop.f32.mrf.mxu0 }
 0x200   : > { %v5504_v38 = vadd.f32 %v8493_v40, %v5386_v44  ;;  %v5391_v28 = vadd.f32 %v7105_v43, %v4855_v18  ;;  %v4853_v6 = vadd.f32 %v4734_v49, %v8409_v60  ;;  %v5542_v17 = vmax.f32 %v5506_v23, 0.0 }
 0x201   : > { %v7054_v1 = vpop.f32.mrf.mxu1  ;;  %v7110_v2 = vpop.f32.mrf.mxu0 }
 0x202   : > { %v5540_v59 = vmax.f32 %v5504_v38, 0.0  ;;  %v4856_v0 = vadd.f32 %v7054_v1, %v8412_v56  ;;  %v6340_v46 = vpack.c.bf16 %v5542_v17, %v5541_v8  ;;  %v5389_v15 = vadd.f32 %v5270_v10, %v4853_v6 }
 0x203   : > { %v4737_v57 = vpop.f32.mrf.mxu1  ;;  %v5289_v30 = vpop.f32.mrf.mxu0  ;;  %v5509_v62 = vadd.f32 %v8493_v40, %v5391_v28 }
 0x204   : > { %v6335_v61 = vpack.c.bf16 %v5540_v59, %v5539_v13  ;;  %v5392_v43 = vadd.f32 %v7106_v51, %v4856_v0  ;;  %6414 = vst [vmem:[%s8507_s12 + $0x18] sm:$0xff] %v6340_v46   ;;  %v4854_v60 = vadd.f32 %v4737_v57, %v8415_v50  ;;  %v5507_v56 = vadd.f32 %v8493_v40, %v5389_v15 }
 0x205   : > { %v7057_v54 = vpop.f32.mrf.mxu1  ;;  %v7113_v21 = vpop.f32.mrf.mxu0  ;;  %v5545_v63 = vmax.f32 %v5509_v62, 0.0 }
 0x206   : > { %6413 = vst [vmem:[%s8507_s12 + $0x10] sm:$0xff] %v6335_v61   ;;  %v5510_v5 = vadd.f32 %v8493_v40, %v5392_v43  ;;  %v4859_v12 = vadd.f32 %v7057_v54, %v8418_v45  ;;  %v5390_v34 = vadd.f32 %v5273_v4, %v4854_v60  ;;  %v5543_v45 = vmax.f32 %v5507_v56, 0.0 }
 0x207   : > { %v4750_v10 = vpop.f32.mrf.mxu1  ;;  %v5302_v22 = vpop.f32.mrf.mxu0 }
 0x208   : > { %v5546_v41 = vmax.f32 %v5510_v5, 0.0  ;;  %v5395_v31 = vadd.f32 %v7109_v29, %v4859_v12  ;;  %v4857_v51 = vadd.f32 %v4750_v10, %v8421_v53  ;;  %v5508_v50 = vadd.f32 %v8493_v40, %v5390_v34 }
 0x209   : > { %v7058_v20 = vpop.f32.mrf.mxu1  ;;  %v7114_v44 = vpop.f32.mrf.mxu0 }
 0x20a   : > { %v6350_v18 = vpack.c.bf16 %v5546_v41, %v5545_v63  ;;  %v5393_v23 = vadd.f32 %v5286_v37, %v4857_v51  ;;  %v4860_v49 = vadd.f32 %v7058_v20, %v8424_v39  ;;  %v5544_v38 = vmax.f32 %v5508_v50, 0.0 }
 0x20b   : > { %v4753_v4 = vpop.f32.mrf.mxu1  ;;  %v5305_v28 = vpop.f32.mrf.mxu0  ;;  %v5513_v6 = vadd.f32 %v8493_v40, %v5395_v31 }
 0x20c   : > { %6416 = vst [vmem:[%s8507_s12 + $0x28] sm:$0xff] %v6350_v18   ;;  %v5396_v8 = vadd.f32 %v7110_v2, %v4860_v49  ;;  %v4858_v29 = vadd.f32 %v4753_v4, %v8427_v55  ;;  %v6345_v53 = vpack.c.bf16 %v5544_v38, %v5543_v45  ;;  %v5511_v13 = vadd.f32 %v8493_v40, %v5393_v23 }
 0x20d   : > { %v7061_v17 = vpop.f32.mrf.mxu1  ;;  %v7117_v1 = vpop.f32.mrf.mxu0  ;;  %v5549_v15 = vmax.f32 %v5513_v6, 0.0 }
 0x20e   : > { %v5514_v37 = vadd.f32 %v8493_v40, %v5396_v8  ;;  %v5394_v59 = vadd.f32 %v5289_v30, %v4858_v29  ;;  %v4863_v39 = vadd.f32 %v7061_v17, %v8430_v7  ;;  %6415 = vst [vmem:[%s8507_s12 + $0x20] sm:$0xff] %v6345_v53   ;;  %v5547_v60 = vmax.f32 %v5511_v13, 0.0 }
 0x20f   : > { %v4766_v0 = vpop.f32.mrf.mxu1  ;;  %v5318_v46 = vpop.f32.mrf.mxu0 }
 0x210   : > { %v5550_v57 = vmax.f32 %v5514_v37, 0.0  ;;  %v5512_v2 = vadd.f32 %v8493_v40, %v5394_v59  ;;  %v4861_v55 = vadd.f32 %v4766_v0, %v8433_v58  ;;  %v5399_v61 = vadd.f32 %v7113_v21, %v4863_v39 }
 0x211   : > { %v7062_v62 = vpop.f32.mrf.mxu1  ;;  %v7118_v43 = vpop.f32.mrf.mxu0 }
 0x212   : > { %v6360_v54 = vpack.c.bf16 %v5550_v57, %v5549_v15  ;;  %v5548_v5 = vmax.f32 %v5512_v2, 0.0  ;;  %v5397_v30 = vadd.f32 %v5302_v22, %v4861_v55  ;;  %v4864_v7 = vadd.f32 %v7062_v62, %v8436_v27 }
 0x213   : > { %v4769_v12 = vpop.f32.mrf.mxu1  ;;  %v5321_v56 = vpop.f32.mrf.mxu0  ;;  %v5517_v63 = vadd.f32 %v8493_v40, %v5399_v61 }
 0x214   : > { %6418 = vst [vmem:[%s8507_s12 + $0x38] sm:$0xff] %v6360_v54   ;;  %v6355_v34 = vpack.c.bf16 %v5548_v5, %v5547_v60  ;;  %v4862_v10 = vadd.f32 %v4769_v12, %v8439_v26  ;;  %v5400_v41 = vadd.f32 %v7114_v44, %v4864_v7  ;;  %v5515_v31 = vadd.f32 %v8493_v40, %v5397_v30 }
 0x215   : > { %v7065_v58 = vpop.f32.mrf.mxu1  ;;  %v7121_v21 = vpop.f32.mrf.mxu0  ;;  %v5553_v49 = vmax.f32 %v5517_v63, 0.0 }
 0x216   : > { %6417 = vst [vmem:[%s8507_s12 + $0x30] sm:$0xff] %v6355_v34   ;;  %v5398_v51 = vadd.f32 %v5305_v28, %v4862_v10  ;;  %v4867_v50 = vadd.f32 %v7065_v58, %v8442_v9  ;;  %v5518_v22 = vadd.f32 %v8493_v40, %v5400_v41  ;;  %v5551_v4 = vmax.f32 %v5515_v31, 0.0 }
 0x217   : > { %v4782_v27 = vpop.f32.mrf.mxu1  ;;  %v5334_v20 = vpop.f32.mrf.mxu0 }
 0x218   : > { %v5516_v18 = vadd.f32 %v8493_v40, %v5398_v51  ;;  %v5403_v23 = vadd.f32 %v7117_v1, %v4867_v50  ;;  %v4865_v26 = vadd.f32 %v4782_v27, %v8445_v52  ;;  %v5554_v44 = vmax.f32 %v5518_v22, 0.0 }
 0x219   : > { %v7066_v45 = vpop.f32.mrf.mxu1  ;;  %v7122_v38 = vpop.f32.mrf.mxu0 }
 0x21a   : > { %v5552_v6 = vmax.f32 %v5516_v18, 0.0  ;;  %v4868_v28 = vadd.f32 %v7066_v45, %v8448_v36  ;;  %v6370_v9 = vpack.c.bf16 %v5554_v44, %v5553_v49  ;;  %v5401_v8 = vadd.f32 %v5318_v46, %v4865_v26 }
 0x21b   : > { %v4785_v29 = vpop.f32.mrf.mxu1  ;;  %v5337_v53 = vpop.f32.mrf.mxu0  ;;  %v5521_v13 = vadd.f32 %v8493_v40, %v5403_v23 }
 0x21c   : > { %v6365_v17 = vpack.c.bf16 %v5552_v6, %v5551_v4  ;;  %v5404_v1 = vadd.f32 %v7118_v43, %v4868_v28  ;;  %6420 = vst [vmem:[%s8507_s12 + $0x48] sm:$0xff] %v6370_v9   ;;  %v4866_v52 = vadd.f32 %v4785_v29, %v8451_v33  ;;  %v5519_v36 = vadd.f32 %v8493_v40, %v5401_v8 }
 0x21d   : > { %v7069_v37 = vpop.f32.mrf.mxu1  ;;  %v7125_v59 = vpop.f32.mrf.mxu0  ;;  %v5557_v2 = vmax.f32 %v5521_v13, 0.0 }
 0x21e   : > { %6419 = vst [vmem:[%s8507_s12 + $0x40] sm:$0xff] %v6365_v17   ;;  %v5522_v39 = vadd.f32 %v8493_v40, %v5404_v1  ;;  %v4871_v0 = vadd.f32 %v7069_v37, %v8454_v32  ;;  %v5402_v15 = vadd.f32 %v5321_v56, %v4866_v52  ;;  %v5555_v30 = vmax.f32 %v5519_v36, 0.0 }
 0x21f   : > { %v4798_v46 = vpop.f32.mrf.mxu1  ;;  %v5350_v57 = vpop.f32.mrf.mxu0 }
 0x220   : > { %v5558_v55 = vmax.f32 %v5522_v39, 0.0  ;;  %v5407_v61 = vadd.f32 %v7121_v21, %v4871_v0  ;;  %v4869_v62 = vadd.f32 %v4798_v46, %v8457_v11  ;;  %v5520_v33 = vadd.f32 %v8493_v40, %v5402_v15 }
 0x221   : > { %v7070_v43 = vpop.f32.mrf.mxu1  ;;  %v7126_v32 = vpop.f32.mrf.mxu0 }
 0x222   : > { %v6380_v60 = vpack.c.bf16 %v5558_v55, %v5557_v2  ;;  %v5405_v54 = vadd.f32 %v5334_v20, %v4869_v62  ;;  %v4872_v5 = vadd.f32 %v7070_v43, %v8460_v19  ;;  %v5556_v7 = vmax.f32 %v5520_v33, 0.0 }
 0x223   : > { %v4801_v12 = vpop.f32.mrf.mxu1  ;;  %v5525_v56 = vadd.f32 %v8493_v40, %v5407_v61  ;;  %v5353_v31 = vpop.f32.mrf.mxu0 }
 0x224   : > { %6422 = vst [vmem:[%s8507_s12 + $0x58] sm:$0xff] %v6380_v60   ;;  %v5408_v34 = vadd.f32 %v7122_v38, %v4872_v5  ;;  %v4870_v10 = vadd.f32 %v4801_v12, %v8463_v35  ;;  %v6375_v63 = vpack.c.bf16 %v5556_v7, %v5555_v30  ;;  %v5523_v41 = vadd.f32 %v8493_v40, %v5405_v54 }
 0x225   : > { %v7073_v11 = vpop.f32.mrf.mxu1  ;;  %v5561_v50 = vmax.f32 %v5525_v56, 0.0  ;;  %v7129_v45 = vpop.f32.mrf.mxu0 }
 0x226   : > { %v5526_v58 = vadd.f32 %v8493_v40, %v5408_v34  ;;  %v5406_v21 = vadd.f32 %v5337_v53, %v4870_v10  ;;  %v4875_v19 = vadd.f32 %v7073_v11, %v8466_v24  ;;  %6421 = vst [vmem:[%s8507_s12 + $0x50] sm:$0xff] %v6375_v63   ;;  %v5559_v23 = vmax.f32 %v5523_v41, 0.0 }
 0x227   : > { %v4814_v51 = vpop.f32.mrf.mxu1  ;;  %v5366_v53 = vpop.f32.mrf.mxu0 }
 0x228   : > { %v5562_v22 = vmax.f32 %v5526_v58, 0.0  ;;  %v5524_v27 = vadd.f32 %v8493_v40, %v5406_v21  ;;  %v4873_v20 = vadd.f32 %v4814_v51, %v8469_v48  ;;  %v5411_v35 = vadd.f32 %v7125_v59, %v4875_v19 }
 0x229   : > { %v7074_v18 = vpop.f32.mrf.mxu1  ;;  %v7130_v15 = vpop.f32.mrf.mxu0 }
 0x22a   : > { %v6390_v26 = vpack.c.bf16 %v5562_v22, %v5561_v50  ;;  %v5560_v49 = vmax.f32 %v5524_v27, 0.0  ;;  %v5409_v44 = vadd.f32 %v5350_v57, %v4873_v20  ;;  %v4876_v24 = vadd.f32 %v7074_v18, %v8472_v42 }
 0x22b   : > { %v4817_v38 = vpop.f32.mrf.mxu1  ;;  %v5529_v28 = vadd.f32 %v8493_v40, %v5411_v35  ;;  %v5369_v33 = vpop.f32.mrf.mxu0 }
 0x22c   : > { %6424 = vst [vmem:[%s8507_s12 + $0x68] sm:$0xff] %v6390_v26   ;;  %v6385_v4 = vpack.c.bf16 %v5560_v49, %v5559_v23  ;;  %v4874_v6 = vadd.f32 %v4817_v38, %v8475_v14  ;;  %v5412_v9 = vadd.f32 %v7126_v32, %v4876_v24  ;;  %v5527_v48 = vadd.f32 %v8493_v40, %v5409_v44 }
 0x22d   : > { %v7077_v8 = vpop.f32.mrf.mxu1  ;;  %v5565_v37 = vmax.f32 %v5529_v28, 0.0 }
 0x22e   : > { %6423 = vst [vmem:[%s8507_s12 + $0x60] sm:$0xff] %v6385_v4   ;;  %v5410_v29 = vadd.f32 %v5353_v31, %v4874_v6  ;;  %v4879_v17 = vadd.f32 %v7077_v8, %v8478_v16  ;;  %v5530_v13 = vadd.f32 %v8493_v40, %v5412_v9  ;;  %v5563_v0 = vmax.f32 %v5527_v48, 0.0 }
 0x22f   : > { %v4830_v1 = vpop.f32.mrf.mxu1 }
 0x230   : > { %v5528_v42 = vadd.f32 %v8493_v40, %v5410_v29  ;;  %v5415_v52 = vadd.f32 %v7129_v45, %v4879_v17  ;;  %v4877_v14 = vadd.f32 %v4830_v1, %v8481_v25  ;;  %v5566_v59 = vmax.f32 %v5530_v13, 0.0 }
 0x231   : > { %v7078_v39 = vpop.f32.mrf.mxu1 }
 0x232   : > { %v5564_v36 = vmax.f32 %v5528_v42, 0.0  ;;  %v4880_v46 = vadd.f32 %v7078_v39, %v8484_v3  ;;  %v6400_v57 = vpack.c.bf16 %v5566_v59, %v5565_v37  ;;  %v5413_v16 = vadd.f32 %v5366_v53, %v4877_v14 }
 0x233   : > { %v4833_v2 = vpop.f32.mrf.mxu1  ;;  %v5533_v61 = vadd.f32 %v8493_v40, %v5415_v52 }
 0x234   : > { %v6395_v55 = vpack.c.bf16 %v5564_v36, %v5563_v0  ;;  %v5416_v62 = vadd.f32 %v7130_v15, %v4880_v46  ;;  %6426 = vst [vmem:[%s8507_s12 + $0x78] sm:$0xff] %v6400_v57   ;;  %v4878_v25 = vadd.f32 %v4833_v2, %v8487_v47  ;;  %v5531_v60 = vadd.f32 %v8493_v40, %v5413_v16 }
 0x235   : > { %v5569_v3 = vmax.f32 %v5533_v61, 0.0 }
 0x236   : > { %6425 = vst [vmem:[%s8507_s12 + $0x70] sm:$0xff] %v6395_v55   ;;  %v5534_v43 = vadd.f32 %v8493_v40, %v5416_v62  ;;  %v5414_v54 = vadd.f32 %v5369_v33, %v4878_v25  ;;  %v5567_v7 = vmax.f32 %v5531_v60, 0.0 }
 0x238   : > { %v5570_v5 = vmax.f32 %v5534_v43, 0.0  ;;  %v5532_v32 = vadd.f32 %v8493_v40, %v5414_v54 }
 0x23a   : > { %v6410_v30 = vpack.c.bf16 %v5570_v5, %v5569_v3  ;;  %v5568_v12 = vmax.f32 %v5532_v32, 0.0 }
 0x23c   : > { %6428 = vst [vmem:[%s8507_s12 + $0x88] sm:$0xff] %v6410_v30   ;;  %v6405_v56 = vpack.c.bf16 %v5568_v12, %v5567_v7 }
 0x23e   : > { %6427 = vst [vmem:[%s8507_s12 + $0x80] sm:$0xff] %v6405_v56  }
 0x23f PF: > { %s13_s14 = sadd.s32 1, %s7437_s14   ;;  %s8624_s12 = smov %s7433_s13 }
 0x240   : > { %p10_p5 = scmp.ge.s32.totalorder %s13_s14, 4   ;;  %s8625_s13 = smov %s8627_s15 }
 0x242   :  { %12 = sbr.rel (!%p10_p5) target bundleno = 2 (0x2), region = 84 }

// kernel: _lambda_.24
= control target key start
LH: loop header
LB: loop body
LE: loop exit
PB: predicated region body
PF: predicated region fallthrough
CT: control target
= control target key end

     0   :  { %s339_s1 = inlined_call_operand.vmem [shape: bf16[128,128], index: 1, kind: input, shape index: {}]   ;;  %s340_s0 = inlined_call_operand.vmem [shape: bf16[32,128], index: 0, kind: input, shape index: {}]   ;;  %s341_s2 = inlined_call_operand.vmem [shape: f32[1,128], index: 2, kind: input, shape index: {}]   ;;  %s342_s3 = inlined_call_operand.vmem [shape: bf16[32,128], index: 3, kind: output, shape index: {}]  }
   0x1   :  { %v270_v0 = vld [vmem:[%s339_s1 + $0x38] sm:$0xff]   ;;  %v271_v1 = vld [vmem:[%s339_s1 + $0x30] sm:$0xff]   ;;  %v272_v2 = vld [vmem:[%s339_s1 + $0x28] sm:$0xff]  }
   0x2   :  { %250 = vmatprep.subr.bf16.mxu0 %v270_v0  ;;  %v273_v3 = vld [vmem:[%s339_s1 + $0x20] sm:$0xff]   ;;  %v274_v5 = vld [vmem:[%s339_s1 + $0x18] sm:$0xff]   ;;  %v275_v6 = vld [vmem:[%s339_s1 + $0x10] sm:$0xff]  }
   0x3   :  { %251 = vmatpush3.bf16.msra.mxu0 %v270_v0  ;;  %v278_v4 = vld [vmem:[%s340_s0] sm:$0xff]   ;;  %v276_v7 = vld [vmem:[%s339_s1 + $0x8] sm:$0xff]  }
   0x4   :  { %252 = vmatprep.subr.bf16.mxu0 %v271_v1  ;;  %266 = vmatprep.mubr.bf16.mxu0 %v278_v4  ;;  %v277_v8 = vld [vmem:[%s339_s1] sm:$0xff]   ;;  %v279_v9 = vld [vmem:[%s340_s0 + $0x8] sm:$0xff]  }
   0x5   :  { %v220_v11 = vld [vmem:[%s341_s2] ss:$0 sm:$0xff] }
   0x7   :  { %253 = vmatpush3.bf16.msra.mxu0 %v271_v1 }
   0x8   :  { %254 = vmatprep.subr.bf16.mxu0 %v272_v2 }
   0xb   :  { %255 = vmatpush3.bf16.msra.mxu0 %v272_v2 }
   0xc   :  { %256 = vmatprep.subr.bf16.mxu0 %v273_v3 }
   0xf   :  { %257 = vmatpush3.bf16.msra.mxu0 %v273_v3 }
  0x10   :  { %258 = vmatprep.subr.bf16.mxu0 %v274_v5 }
  0x13   :  { %259 = vmatpush3.bf16.msra.mxu0 %v274_v5 }
  0x14   :  { %260 = vmatprep.subr.bf16.mxu0 %v275_v6 }
  0x17   :  { %261 = vmatpush3.bf16.msra.mxu0 %v275_v6 }
  0x18   :  { %262 = vmatprep.subr.bf16.mxu0 %v276_v7 }
  0x1b   :  { %263 = vmatpush3.bf16.msra.mxu0 %v276_v7 }
  0x1c   :  { %264 = vmatprep.subr.bf16.mxu0 %v277_v8 }
  0x1f   :  { %265 = vmatpush3.bf16.msra.mxu0 %v277_v8 }
  0x22   :  { %267 = vmatmul.mubr.bf16.vlgmr.msra.gmra.mxu0 %v279_v9 }
  0xe2   :  { %v268_v10 = vpop.f32.mrf.mxu0 }
  0xe3   :  { %v180_v13 = vadd.f32 %v268_v10, %v220_v11 }
  0xe4   :  { %v141_v12 = vpop.f32.mrf.mxu0 }
  0xe5   :  { %v178_v15 = vadd.f32 %v220_v11, %v141_v12  ;;  %v184_v18 = vmax.f32 %v180_v13, 0.0 }
  0xe6   :  { %v269_v14 = vpop.f32.mrf.mxu0 }
  0xe7   :  { %v181_v16 = vadd.f32 %v269_v14, %v220_v11  ;;  %v182_v21 = vmax.f32 %v178_v15, 0.0 }
  0xe8   :  { %v144_v17 = vpop.f32.mrf.mxu0 }
  0xe9   :  { %v185_v19 = vmax.f32 %v181_v16, 0.0  ;;  %v179_v20 = vadd.f32 %v220_v11, %v144_v17 }
  0xeb   :  { %v237_v22 = vpack.c.bf16 %v185_v19, %v184_v18  ;;  %v183_v23 = vmax.f32 %v179_v20, 0.0 }
  0xed   :  { %239 = vst [vmem:[%s342_s3 + $0x8] sm:$0xff] %v237_v22   ;;  %v232_v24 = vpack.c.bf16 %v183_v23, %v182_v21 }
  0xef   :  { %233 = vst [vmem:[%s342_s3] sm:$0xff] %v232_v24  }

// kernel: _lambda_.21
= control target key start
LH: loop header
LB: loop body
LE: loop exit
PB: predicated region body
PF: predicated region fallthrough
CT: control target
= control target key end

     0   :  { %s3562_s12 = smov 0   ;;  %s3564_s13 = smov 0   ;;  %s4157_s0 = inlined_call_operand.vmem [shape: bf16[2,102,128], index: 0, kind: input, shape index: {}]   ;;  %s4158_s1 = inlined_call_operand.vmem [shape: bf16[9,128,128], index: 1, kind: input, shape index: {}]   ;;  %s4159_s2 = inlined_call_operand.vmem [shape: f32[1,128], index: 2, kind: input, shape index: {}]   ;;  %s4160_s3 = inlined_call_operand.vmem [shape: bf16[2,80,128], index: 3, kind: output, shape index: {}]  }
   0x1   :  { %s3566_s14 = smov 0  }
   0x2 LB: > { %s32_s15 = sadd.s32 1, %s3534_s13  ;;  %p2598_p0 = scmp.ge.s32.totalorder %s3538_s14, 1  ;;  %s3538_s14 = sphi %s3566_s14, %s13_s14   ;;  %s3534_s13 = sphi %s3564_s13, %s4162_s13   ;;  %s3530_s12 = sphi %s3562_s12, %s4161_s12  }
   0x3   : > { %p34_p1 = scmp.ge.s32.totalorder %s32_s15, 2  ;;  %p187_p2 = scmp.lt.s32.totalorder %s3538_s14, 3 }
   0x5   : > { %s4164_s15 = smov (%p34_p1, %s32_s15), 0  ;;  %p188_p3 = pnand %p2598_p0, %p187_p2 }
   0x6   : > { %p228_p4 = scmp.lt.s32.totalorder (!%p188_p3), %s3530_s12, 1 }
   0x7   : > { %191 = sbr.rel (%p188_p3) target bundleno = 427 (0x1ab), region = 32 }
   0xc   : > { %v3391_v0 = vld [vmem:[%s4158_s1 + $0x38] sm:$0xff]   ;;  %v3540_v1 = vmov 0.0   ;;  %v3393_v3 = vld [vmem:[%s4158_s1 + $0x30] sm:$0xff]   ;;  %vm3541_vm0 = vmmov 0   ;;  %v3395_v5 = vld [vmem:[%s4158_s1 + $0x28] sm:$0xff]   ;;  %s4166_s12 = smov (!%p228_p4, %s3530_s12), 1 }
   0xd   : > { %3023 = vmatprep.subr.bf16.mxu0 %v3540_v1  ;;  %3059 = vmatprep.subr.bf16.mxu1 %v3540_v1  ;;  %v3392_v2 = vld [vmem:[%s4158_s1 + $0x78] sm:$0xff]   ;;  %v3394_v4 = vld [vmem:[%s4158_s1 + $0x70] sm:$0xff]   ;;  %v3396_v6 = vld [vmem:[%s4158_s1 + $0x68] sm:$0xff]   ;;  %s3363_s5 = smul.u32 52, %s4166_s12  ;;  %vm544_vm1 = vsmask.f32 7424 }
   0xe   : > { %3024 = vmatpush3.bf16.msra.mxu0 %v3391_v0  ;;  %3039 = vmatprep.mubr.msk.bf16.mxu0 %vm3541_vm0, %v3540_v1  ;;  %v3397_v7 = vld [vmem:[%s4158_s1 + $0x20] sm:$0xff]   ;;  %v3399_v9 = vld [vmem:[%s4158_s1 + $0x18] sm:$0xff]   ;;  %v3401_v11 = vld [vmem:[%s4158_s1 + $0x10] sm:$0xff]   ;;  %vm801_vm2 = vcmask 1046528   ;;  %vm1248_vm3 = vsmask.f32 6400 }
   0xf   : > { %3060 = vmatpush3.bf16.msra.mxu1 %v3392_v2  ;;  %3025 = vmatprep.subr.bf16.mxu0 %v3540_v1  ;;  %v3398_v8 = vld [vmem:[%s4158_s1 + $0x60] sm:$0xff]   ;;  %v3400_v10 = vld [vmem:[%s4158_s1 + $0x58] sm:$0xff]   ;;  %s3633_s16 = scalar_lea.vmem %s4157_s0, %s3363_s5  ;;  %v3402_v12 = vld [vmem:[%s4158_s1 + $0x50] sm:$0xff]   ;;  %vm1514_vm4 = vcmask 1045504   ;;  %vm1961_vm5 = vsmask.f32 5376 }
  0x10   : > { %3061 = vmatprep.subr.bf16.mxu1 %v3540_v1  ;;  %3075 = vmatprep.mubr.msk.bf16.mxu1 %vm3541_vm0, %v3540_v1  ;;  %v3408_v13 = vld [vmem:[%s3633_s16] sm:$0xff]   ;;  %v3409_v14 = vld [vmem:[%s3633_s16 + $0x8] sm:$0xff]   ;;  %v3413_v25 = vld [vmem:[%s3633_s16 + $0x10] sm:$0xff]   ;;  %vm2227_vm6 = vcmask 1044480   ;;  %s3364_s5 = smul.u32 40, %s4166_s12 }
  0x11   : > { %v548_v15 = vshll.u32 %v3408_v13, 16  ;;  %v3403_v16 = vld [vmem:[%s4158_s1 + $0x8] sm:$0xff]   ;;  %v546_v18 = vshrl.u32 %v3408_v13, 16  ;;  %v553_v20 = vshll.u32 %v3409_v14, 16  ;;  %v3405_v21 = vld [vmem:[%s4158_s1] sm:$0xff]   ;;  %v3410_v27 = vld [vmem:[%s4158_s1 + $0xb8] sm:$0xff]  }
  0x12   : > { %3026 = vmatpush3.bf16.msra.mxu0 %v3393_v3  ;;  %v3404_v17 = vld [vmem:[%s4158_s1 + $0x48] sm:$0xff]   ;;  %v3406_v22 = vld [vmem:[%s4158_s1 + $0x40] sm:$0xff]   ;;  %v557_v29 = vshrl.u32 %v3409_v14, 16  ;;  %v561_v30 = vshll.u32 %v3413_v25, 16  ;;  %v3414_v31 = vld [vmem:[%s4158_s1 + $0xf8] sm:$0xff]   ;;  %v565_v40 = vshrl.u32 %v3413_v25, 16  ;;  %s4128_s7 = scalar_lea.vmem %s4160_s3, %s3364_s5 }
  0x13   : > { %3062 = vmatpush3.bf16.msra.mxu1 %v3394_v4  ;;  %3027 = vmatprep.subr.bf16.mxu0 %v3540_v1  ;;  %v550_v19 = vrot.slane %v548_v15, 1  ;;  %v555_v24 = vrot.slane %v553_v20, 1  ;;  %v3407_v26 = vld [vmem:[%s3633_s16] sm:$0xff]   ;;  %v3411_v32 = vld [vmem:[%s4158_s1 + $0xb0] sm:$0xff]   ;;  %v3418_v35 = vld [vmem:[%s3633_s16 + $0x18] sm:$0xff]  }
  0x14   : > { %3063 = vmatprep.subr.bf16.mxu1 %v3540_v1  ;;  %v563_v34 = vrot.slane %v561_v30, 1  ;;  %v3416_v36 = vld [vmem:[%s4158_s1 + $0xf0] sm:$0xff]   ;;  %v3412_v37 = vld [vmem:[%s3633_s16 + $0x8] sm:$0xff]   ;;  %v569_v41 = vshll.u32 %v3418_v35, 16  ;;  %v3419_v43 = vld [vmem:[%s4158_s1 + $0xa0] sm:$0xff]   ;;  %v573_v51 = vshrl.u32 %v3418_v35, 16 }
  0x15   : > { %v551_v23 = vor.u32 %v550_v19, %v546_v18  ;;  %v559_v33 = vor.u32 %v557_v29, %v555_v24  ;;  %v3415_v38 = vld [vmem:[%s4158_s1 + $0xa8] sm:$0xff]   ;;  %v3424_v46 = vld [vmem:[%s3633_s16 + $0x20] sm:$0xff]   ;;  %v3417_v48 = vld [vmem:[%s3633_s16 + $0x10] sm:$0xff]  }
  0x16   : > { %3028 = vmatpush3.bf16.msra.mxu0 %v3395_v5  ;;  %v3420_v42 = vld [vmem:[%s4158_s1 + $0xe8] sm:$0xff]   ;;  %v567_v44 = vor.u32 %v565_v40, %v563_v34  ;;  %v571_v45 = vrot.slane %v569_v41, 1  ;;  %v3422_v47 = vld [vmem:[%s4158_s1 + $0xe0] sm:$0xff]   ;;  %v3421_v49 = vld [vmem:[%s4158_s1 + $0x98] sm:$0xff]   ;;  %v577_v52 = vshll.u32 %v3424_v46, 16  ;;  %v581_v60 = vshrl.u32 %v3424_v46, 16 }
  0x17   : > { %3064 = vmatpush3.bf16.msra.mxu1 %v3396_v6  ;;  %3029 = vmatprep.subr.bf16.mxu0 %v3540_v1  ;;  %v556_v28 = vsel %vm544_vm1, %v551_v23, %v555_v24  ;;  %v564_v39 = vsel %vm544_vm1, %v559_v33, %v563_v34  ;;  %v3425_v53 = vld [vmem:[%s4158_s1 + $0xd8] sm:$0xff]   ;;  %v3430_v54 = vld [vmem:[%s3633_s16 + $0x28] ss:$0 sps:$4 sm:$0x11]   ;;  %v3426_v55 = vld [vmem:[%s4158_s1 + $0x90] sm:$0xff]  }
  0x18   : > { %3065 = vmatprep.subr.bf16.mxu1 %v3540_v1  ;;  %v572_v50 = vsel %vm544_vm1, %v567_v44, %v571_v45  ;;  %v575_v56 = vor.u32 %v573_v51, %v571_v45  ;;  %v579_v57 = vrot.slane %v577_v52, 1  ;;  %v3427_v58 = vld [vmem:[%s4158_s1 + $0xd0] sm:$0xff]   ;;  %v3423_v59 = vld [vmem:[%s3633_s16 + $0x18] sm:$0xff]   ;;  %v3428_v62 = vld [vmem:[%s4158_s1 + $0x88] sm:$0xff]   ;;  %v585_v63 = vshll.u32 %v3430_v54, 16 }
  0x19   : > { %v3431_v0 = vld [vmem:[%s4158_s1 + $0xc8] sm:$0xff]   ;;  %v3432_v2 = vld [vmem:[%s4158_s1 + $0x80] sm:$0xff]   ;;  %v3441_v18 = vld [vmem:[%s3633_s16 + $0x14] sm:$0xff]  }
  0x1a   : > { %3030 = vmatpush3.bf16.msra.mxu0 %v3397_v7  ;;  %v580_v61 = vsel %vm544_vm1, %v575_v56, %v579_v57  ;;  %v3429_v3 = vld [vmem:[%s3633_s16 + $0x20] sm:$0xff]   ;;  %v583_v4 = vor.u32 %v581_v60, %v579_v57  ;;  %v587_v5 = vrot.slane %v585_v63, 1  ;;  %v3435_v7 = vld [vmem:[%s3633_s16 + $0x8] sm:$0xff]   ;;  %v1028_v24 = vrot.slane %v3441_v18, 1  ;;  %v3453_v41 = vld [vmem:[%s4158_s1 + $0x158] sm:$0xff]  }
  0x1b   : > { %3066 = vmatpush3.bf16.msra.mxu1 %v3398_v8  ;;  %3031 = vmatprep.subr.bf16.mxu0 %v3540_v1  ;;  %v3433_v6 = vld [vmem:[%s4158_s1 + $0xc0] sm:$0xff]   ;;  %v803_v13 = vrot.slane %v3435_v7, 1  ;;  %v3443_v25 = vld [vmem:[%s4158_s1 + $0x128] sm:$0xff]   ;;  %v3455_v45 = vld [vmem:[%s4158_s1 + $0x150] sm:$0xff]  }
  0x1c   : > { %3067 = vmatprep.subr.bf16.mxu1 %v3540_v1  ;;  %v3434_v8 = vld [vmem:[%s3633_s16] sm:$0xfe]   ;;  %v3457_v46 = vld [vmem:[%s3633_s16 + $0x28] ss:$0 sps:$4 sm:$0x11]   ;;  %v3468_v63 = vld [vmem:[%s3633_s16 + $0x14] sm:$0xff]  }
  0x1d   : > { %v3446_v29 = vld [vmem:[%s3633_s16 + $0x1c] sm:$0xff]   ;;  %v3452_v40 = vld [vmem:[%s3633_s16 + $0x24] sm:$0xff]  }
  0x1e   : > { %3032 = vmatpush3.bf16.msra.mxu0 %v3399_v9  ;;  %v3437_v9 = vld [vmem:[%s3633_s16 + $0xc] sm:$0xff]   ;;  %v1030_v33 = vrot.slane %v3446_v29, 1  ;;  %v3447_v34 = vld [vmem:[%s4158_s1 + $0x120] sm:$0xff]   ;;  %v1032_v44 = vrot.slane %v3452_v40, 1 }
  0x1f   : > { %3068 = vmatpush3.bf16.msra.mxu1 %v3400_v10  ;;  %3033 = vmatprep.subr.bf16.mxu0 %v3540_v1  ;;  %v588_v10 = vsel %vm544_vm1, %v583_v4, %v587_v5  ;;  %v1026_v15 = vrot.slane %v3437_v9, 1  ;;  %v3450_v35 = vld [vmem:[%s4158_s1 + $0x160] sm:$0xff]   ;;  %v3456_v52 = vld [vmem:[%s4158_s1 + $0x108] sm:$0xff]   ;;  %v1270_v9 = vshll.u32 %v3468_v63, 16 }
  0x20   : > { %3069 = vmatprep.subr.bf16.mxu1 %v3540_v1  ;;  %v1033_v51 = vsel %vm801_vm2, %v1030_v33, %v1032_v44  ;;  %v3460_v56 = vld [vmem:[%s4158_s1 + $0x100] sm:$0xff]  }
  0x21   : > { %v1029_v30 = vsel %vm801_vm2, %v1026_v15, %v1028_v24 }
  0x22   : > { %3034 = vmatpush3.bf16.msra.mxu0 %v3401_v11  ;;  %v3436_v11 = vld [vmem:[%s3633_s16 + $0x4] sm:$0xfe]  }
  0x23   : > { %3070 = vmatpush3.bf16.msra.mxu1 %v3402_v12  ;;  %3035 = vmatprep.subr.bf16.mxu0 %v3540_v1  ;;  %v802_v12 = vrot.slane %v3434_v8, 1  ;;  %v1025_v14 = vrot.slane %v3436_v11, 1  ;;  %v1267_v8 = vshrl.u32 %v3468_v63, 16  ;;  %v3493_v63 = vld [vmem:[%s3633_s16 + $0x10] sm:$0xff]  }
  0x24   : > { %3071 = vmatprep.subr.bf16.mxu1 %v3540_v1 }
  0x25   : > { %v804_v19 = vsel %vm801_vm2, %v802_v12, %v803_v13  ;;  %v1027_v20 = vsel %vm801_vm2, %v1025_v14, %v1026_v15  ;;  %v3466_v14 = vld [vmem:[%s4158_s1 + $0x1b8] sm:$0xff]   ;;  %v1269_v15 = vrot.slane %v1267_v8, 1  ;;  %v1974_v8 = vshll.u32 %v3493_v63, 16 }
  0x26   : > { %3036 = vmatpush3.bf16.msra.mxu0 %v3403_v16  ;;  %v3438_v16 = vld [vmem:[%s4158_s1 + $0x138] sm:$0xff]  }
  0x27   : > { %3072 = vmatpush3.bf16.msra.mxu1 %v3404_v17  ;;  %3037 = vmatprep.subr.bf16.mxu0 %v3540_v1  ;;  %v3440_v17 = vld [vmem:[%s3633_s16 + $0x10] sm:$0xff]  }
  0x28   : > { %3073 = vmatprep.subr.bf16.mxu1 %v3540_v1  ;;  %v805_v23 = vrot.slane %v3440_v17, 1  ;;  %v3473_v17 = vld [vmem:[%s3633_s16 + $0x1c] sm:$0xff]  }
  0x2a   : > { %3038 = vmatpush3.bf16.msra.mxu0 %v3405_v21  ;;  %v3442_v21 = vld [vmem:[%s4158_s1 + $0x178] sm:$0xff]  }
  0x2b   : > { %3074 = vmatpush3.bf16.msra.mxu1 %v3406_v22  ;;  %3095 = vmatprep.subr.bf16.mxu0 %v3540_v1  ;;  %v3439_v22 = vld [vmem:[%s4158_s1 + $0x130] sm:$0xff]  }
  0x2c   : > { %3131 = vmatprep.subr.bf16.mxu1 %v3540_v1 }
  0x2d   : > { %3040 = vmatmul.mubr.bf16.vlgmr.msra.gmra.mxu0 %v3407_v26  ;;  %v3444_v26 = vld [vmem:[%s4158_s1 + $0x170] sm:$0xff]  }
  0x2e   : > { %3076 = vmatmul.mubr.bf16.vlgmr.msra.gmra.mxu1 %v556_v28  ;;  %3096 = vmatpush3.bf16.msra.mxu0 %v3410_v27  ;;  %v3445_v27 = vld [vmem:[%s3633_s16 + $0x18] sm:$0xff]   ;;  %v806_v28 = vsel %vm801_vm2, %v803_v13, %v805_v23 }
  0x2f   : > { %3097 = vmatprep.subr.bf16.mxu0 %v3540_v1  ;;  %3043 = vmatprep.mubr.msk.bf16.mxu0 %vm3541_vm0, %v3540_v1 }
  0x30   : > { %3079 = vmatprep.mubr.msk.bf16.mxu1 %vm3541_vm0, %v3540_v1  ;;  %3132 = vmatpush3.bf16.msra.mxu1 %v3414_v31  ;;  %v3448_v31 = vld [vmem:[%s4158_s1 + $0x168] sm:$0xff]  }
  0x31   : > { %3133 = vmatprep.subr.bf16.mxu1 %v3540_v1 }
  0x32   : > { %3098 = vmatpush3.bf16.msra.mxu0 %v3411_v32  ;;  %v807_v32 = vrot.slane %v3445_v27, 1  ;;  %v3472_v27 = vld [vmem:[%s4158_s1 + $0x1f0] sm:$0xff]  }
  0x33   : > { %3099 = vmatprep.subr.bf16.mxu0 %v3540_v1 }
  0x34   : > { %3134 = vmatpush3.bf16.msra.mxu1 %v3416_v36  ;;  %v808_v36 = vsel %vm801_vm2, %v805_v23, %v807_v32  ;;  %v3467_v23 = vld [vmem:[%s4158_s1 + $0x1b0] sm:$0xff]  }
  0x35   : > { %3044 = vmatmul.mubr.bf16.gmra.mxu0 %v3412_v37  ;;  %3135 = vmatprep.subr.bf16.mxu1 %v3540_v1  ;;  %v3449_v37 = vld [vmem:[%s4158_s1 + $0x118] sm:$0xff]  }
  0x36   : > { %3080 = vmatmul.mubr.bf16.gmra.mxu1 %v564_v39  ;;  %3100 = vmatpush3.bf16.msra.mxu0 %v3415_v38  ;;  %v3451_v38 = vld [vmem:[%s3633_s16 + $0x20] sm:$0xff]   ;;  %v1031_v39 = vsel %vm801_vm2, %v1028_v24, %v1030_v33 }
  0x37   : > { %3047 = vmatprep.mubr.msk.bf16.mxu0 %vm3541_vm0, %v3540_v1  ;;  %3083 = vmatprep.mubr.msk.bf16.mxu1 %vm3541_vm0, %v3540_v1 }
  0x38   : > { %3101 = vmatprep.subr.bf16.mxu0 %v3540_v1  ;;  %3136 = vmatpush3.bf16.msra.mxu1 %v3420_v42  ;;  %v809_v42 = vrot.slane %v3451_v38, 1 }
  0x39   : > { %3137 = vmatprep.subr.bf16.mxu1 %v3540_v1 }
  0x3a   : > { %3102 = vmatpush3.bf16.msra.mxu0 %v3419_v43  ;;  %v3454_v43 = vld [vmem:[%s4158_s1 + $0x110] sm:$0xff]  }
  0x3b   : > { %3103 = vmatprep.subr.bf16.mxu0 %v3540_v1 }
  0x3c   : > { %3138 = vmatpush3.bf16.msra.mxu1 %v3422_v47  ;;  %v3463_v47 = vld [vmem:[%s3633_s16 + $0xc] sm:$0xff]  }
  0x3d   : > { %3048 = vmatmul.mubr.bf16.gmra.mxu0 %v3417_v48  ;;  %3139 = vmatprep.subr.bf16.mxu1 %v3540_v1  ;;  %v3458_v48 = vld [vmem:[%s3633_s16 + $0x2c] ss:$0 sps:$4 sm:$0x11]   ;;  %v1258_v54 = vshrl.u32 %v3463_v47, 16  ;;  %v1261_v57 = vshll.u32 %v3463_v47, 16 }
  0x3e   : > { %3084 = vmatmul.mubr.bf16.gmra.mxu1 %v572_v50  ;;  %3104 = vmatpush3.bf16.msra.mxu0 %v3421_v49  ;;  %v810_v49 = vsel %vm801_vm2, %v807_v32, %v809_v42  ;;  %v3462_v50 = vld [vmem:[%s3633_s16 + $0x4] sm:$0xfe]   ;;  %v1034_v60 = vrot.slane %v3458_v48, 1 }
  0x3f   : > { %3051 = vmatprep.mubr.msk.bf16.mxu0 %vm3541_vm0, %v3540_v1  ;;  %3087 = vmatprep.mubr.msk.bf16.mxu1 %vm3541_vm0, %v3540_v1  ;;  %v1263_v5 = vrot.slane %v1261_v57, 2  ;;  %v3479_v32 = vld [vmem:[%s3633_s16 + $0x24] sm:$0xff]  }
  0x40   : > { %3105 = vmatprep.subr.bf16.mxu0 %v3540_v1  ;;  %3140 = vmatpush3.bf16.msra.mxu1 %v3425_v53  ;;  %v3459_v53 = vld [vmem:[%s4158_s1 + $0x148] sm:$0xff]   ;;  %v1035_v7 = vsel %vm801_vm2, %v1032_v44, %v1034_v60  ;;  %v1285_v38 = vshrl.u32 %v3479_v32, 16 }
  0x41   : > { %3141 = vmatprep.subr.bf16.mxu1 %v3540_v1  ;;  %v3480_v48 = vld [vmem:[%s3633_s16 + $0x24] sm:$0xff]  }
  0x42   : > { %3106 = vmatpush3.bf16.msra.mxu0 %v3426_v55  ;;  %v811_v55 = vrot.slane %v3457_v46, 1 }
  0x43   : > { %3107 = vmatprep.subr.bf16.mxu0 %v3540_v1 }
  0x44   : > { %3142 = vmatpush3.bf16.msra.mxu1 %v3427_v58  ;;  %v1250_v58 = vshrl.u32 %v3462_v50, 16 }
  0x45   : > { %3052 = vmatmul.mubr.bf16.gmra.mxu0 %v3423_v59  ;;  %3143 = vmatprep.subr.bf16.mxu1 %v3540_v1  ;;  %v1253_v59 = vshll.u32 %v3462_v50, 16 }
  0x46   : > { %3088 = vmatmul.mubr.bf16.gmra.mxu1 %v580_v61  ;;  %3055 = vmatprep.mubr.msk.bf16.mxu0 %vm3541_vm0, %v3540_v1  ;;  %v3461_v61 = vld [vmem:[%s4158_s1 + $0x140] sm:$0xff]  }
  0x47   : > { %3091 = vmatprep.mubr.msk.bf16.mxu1 %vm3541_vm0, %v3540_v1  ;;  %3108 = vmatpush3.bf16.msra.mxu0 %v3428_v62  ;;  %v1260_v62 = vrot.slane %v1258_v54, 1  ;;  %v1255_v4 = vrot.slane %v1253_v59, 2  ;;  %v1522_v54 = vrot.slane %v3480_v48, 2  ;;  %v3486_v59 = vld [vmem:[%s3633_s16 + $0x2c] ss:$0 sps:$4 sm:$0x33]  }
  0x48   : > { %3144 = vmatpush3.bf16.msra.mxu1 %v3431_v0  ;;  %3109 = vmatprep.subr.bf16.mxu0 %v3540_v1  ;;  %v3464_v0 = vld [vmem:[%s3633_s16 + $0x4] sm:$0xfc]  }
  0x49   : > { %3145 = vmatprep.subr.bf16.mxu1 %v3540_v1  ;;  %v1264_v11 = vor.u32 %v1263_v5, %v1260_v62  ;;  %v1515_v12 = vrot.slane %v3464_v0, 2  ;;  %v3492_v62 = vld [vmem:[%s3633_s16 + $0x8] sm:$0xfc]  }
  0x4a   : > { %v3487_v0 = vld [vmem:[%s4158_s1 + $0x1c8] sm:$0xff]   ;;  %v1963_v5 = vshrl.u32 %v3492_v62, 16 }
  0x4b   : > { %3110 = vmatpush3.bf16.msra.mxu0 %v3432_v2  ;;  %v812_v2 = vsel %vm801_vm2, %v809_v42, %v811_v55  ;;  %v3477_v42 = vld [vmem:[%s4158_s1 + $0x198] sm:$0xff]   ;;  %v3483_v55 = vld [vmem:[%s4158_s1 + $0x1d0] sm:$0xff]  }
  0x4c   : > { %3146 = vmatpush3.bf16.msra.mxu1 %v3433_v6  ;;  %3167 = vmatprep.subr.bf16.mxu0 %v3540_v1  ;;  %v3465_v6 = vld [vmem:[%s3633_s16 + $0xc] sm:$0xff]  }
  0x4d   : > { %3056 = vmatmul.mubr.bf16.gmra.mxu0 %v3429_v3  ;;  %3203 = vmatprep.subr.bf16.mxu1 %v3540_v1  ;;  %v1252_v3 = vrot.slane %v1250_v58, 1  ;;  %v1516_v13 = vrot.slane %v3465_v6, 2  ;;  %v1966_v6 = vshll.u32 %v3492_v62, 16  ;;  %v3507_v62 = vld [vmem:[%s3633_s16 + $0x30] ss:$0 sps:$4 sm:$0x33]  }
  0x4e   : > { %3092 = vmatmul.mubr.bf16.gmra.mxu1 %v588_v10  ;;  %3111 = vmatprep.mubr.msk.bf16.mxu0 %vm3541_vm0, %v3540_v1 }
  0x4f   : > { %3147 = vmatprep.mubr.msk.bf16.mxu1 %vm3541_vm0, %v3540_v1  ;;  %v1256_v10 = vor.u32 %v1255_v4, %v1252_v3  ;;  %v1524_v3 = vrot.slane %v3486_v59, 2  ;;  %v3488_v4 = vld [vmem:[%s4158_s1 + $0x180] sm:$0xff]  }
  0x51   : > { %v1265_v18 = vsel %vm1248_vm3, %v1256_v10, %v1264_v11 }
  0x55   : > { %3112 = vmatmul.mubr.bf16.vlgmr.msra.gmra.mxu0 %v804_v19  ;;  %v1517_v19 = vsel %vm1514_vm4, %v1515_v12, %v1516_v13  ;;  %v3490_v12 = vld [vmem:[%s3633_s16 + $0x8] sm:$0xfc]  }
  0x56   : > { %3148 = vmatmul.mubr.bf16.vlgmr.msra.gmra.mxu1 %v1027_v20  ;;  %3168 = vmatpush3.bf16.msra.mxu0 %v3438_v16  ;;  %v1272_v16 = vrot.slane %v1270_v9, 2  ;;  %v3469_v20 = vld [vmem:[%s3633_s16 + $0x14] sm:$0xff]   ;;  %v3489_v9 = vld [vmem:[%s4158_s1 + $0x1c0] sm:$0xff]  }
  0x57   : > { %3169 = vmatprep.subr.bf16.mxu0 %v3540_v1  ;;  %3115 = vmatprep.mubr.msk.bf16.mxu0 %vm3541_vm0, %v3540_v1 }
  0x58   : > { %3151 = vmatprep.mubr.msk.bf16.mxu1 %vm3541_vm0, %v3540_v1  ;;  %3204 = vmatpush3.bf16.msra.mxu1 %v3442_v21  ;;  %v3470_v21 = vld [vmem:[%s4158_s1 + $0x1f8] sm:$0xff]   ;;  %v1273_v24 = vor.u32 %v1272_v16, %v1269_v15  ;;  %v1968_v15 = vrot.slane %v1966_v6, 3  ;;  %v3509_v6 = vld [vmem:[%s4158_s1 + $0x200] sm:$0xff]  }
  0x59   : > { %3205 = vmatprep.subr.bf16.mxu1 %v3540_v1 }
  0x5a   : > { %3170 = vmatpush3.bf16.msra.mxu0 %v3439_v22  ;;  %v1276_v22 = vshrl.u32 %v3473_v17, 16 }
  0x5b   : > { %3171 = vmatprep.subr.bf16.mxu0 %v3540_v1 }
  0x5c   : > { %3206 = vmatpush3.bf16.msra.mxu1 %v3444_v26  ;;  %v1518_v26 = vrot.slane %v3469_v20, 2  ;;  %v1278_v29 = vrot.slane %v1276_v22, 1 }
  0x5d   : > { %3116 = vmatmul.mubr.bf16.gmra.mxu0 %v806_v28  ;;  %3207 = vmatprep.subr.bf16.mxu1 %v3540_v1  ;;  %v3471_v28 = vld [vmem:[%s4158_s1 + $0x1a8] sm:$0xff]  }
  0x5e   : > { %3152 = vmatmul.mubr.bf16.gmra.mxu1 %v1029_v30  ;;  %3172 = vmatpush3.bf16.msra.mxu0 %v3443_v25  ;;  %v1279_v25 = vshll.u32 %v3473_v17, 16  ;;  %v1274_v30 = vsel %vm1248_vm3, %v1264_v11, %v1273_v24  ;;  %v1519_v33 = vsel %vm1514_vm4, %v1516_v13, %v1518_v26  ;;  %v1525_v11 = vsel %vm1514_vm4, %v1522_v54, %v1524_v3  ;;  %v3491_v13 = vld [vmem:[%s3633_s16 + $0x10] sm:$0xff]  }
  0x5f   : > { %3119 = vmatprep.mubr.msk.bf16.mxu0 %vm3541_vm0, %v3540_v1  ;;  %3155 = vmatprep.mubr.msk.bf16.mxu1 %vm3541_vm0, %v3540_v1  ;;  %v1976_v17 = vrot.slane %v1974_v8, 3  ;;  %v1739_v20 = vrot.slane %v3491_v13, 2  ;;  %v3510_v8 = vld [vmem:[%s3633_s16 + $0x8] sm:$0xf8]  }
  0x60   : > { %3173 = vmatprep.subr.bf16.mxu0 %v3540_v1  ;;  %3208 = vmatpush3.bf16.msra.mxu1 %v3448_v31  ;;  %v1281_v31 = vrot.slane %v1279_v25, 2  ;;  %v2228_v13 = vrot.slane %v3510_v8, 3 }
  0x61   : > { %3209 = vmatprep.subr.bf16.mxu1 %v3540_v1 }
  0x62   : > { %3174 = vmatpush3.bf16.msra.mxu0 %v3447_v34  ;;  %v3474_v34 = vld [vmem:[%s3633_s16 + $0x1c] sm:$0xff]  }
  0x63   : > { %3175 = vmatprep.subr.bf16.mxu0 %v3540_v1  ;;  %v1520_v40 = vrot.slane %v3474_v34, 2 }
  0x64   : > { %3210 = vmatpush3.bf16.msra.mxu1 %v3450_v35  ;;  %v3476_v35 = vld [vmem:[%s4158_s1 + $0x1e8] sm:$0xff]  }
  0x65   : > { %3120 = vmatmul.mubr.bf16.gmra.mxu0 %v808_v36  ;;  %3211 = vmatprep.subr.bf16.mxu1 %v3540_v1  ;;  %v1282_v36 = vor.u32 %v1281_v31, %v1278_v29  ;;  %v1521_v47 = vsel %vm1514_vm4, %v1518_v26, %v1520_v40  ;;  %v1523_v60 = vsel %vm1514_vm4, %v1520_v40, %v1522_v54  ;;  %v3494_v26 = vld [vmem:[%s4158_s1 + $0x238] sm:$0xff]   ;;  %v3500_v31 = vld [vmem:[%s3633_s16 + $0x20] sm:$0xff]  }
  0x66   : > { %3156 = vmatmul.mubr.bf16.gmra.mxu1 %v1031_v39  ;;  %3176 = vmatpush3.bf16.msra.mxu0 %v3449_v37  ;;  %v3475_v37 = vld [vmem:[%s4158_s1 + $0x1a0] sm:$0xff]   ;;  %v1288_v39 = vshll.u32 %v3479_v32, 16  ;;  %v3495_v32 = vld [vmem:[%s4158_s1 + $0x230] sm:$0xff]  }
  0x67   : > { %3123 = vmatprep.mubr.msk.bf16.mxu0 %vm3541_vm0, %v3540_v1  ;;  %3159 = vmatprep.mubr.msk.bf16.mxu1 %vm3541_vm0, %v3540_v1  ;;  %v1283_v44 = vsel %vm1248_vm3, %v1273_v24, %v1282_v36 }
  0x68   : > { %3177 = vmatprep.subr.bf16.mxu0 %v3540_v1  ;;  %3212 = vmatpush3.bf16.msra.mxu1 %v3453_v41  ;;  %v3478_v41 = vld [vmem:[%s4158_s1 + $0x1e0] sm:$0xff]   ;;  %v1290_v46 = vrot.slane %v1288_v39, 2 }
  0x69   : > { %3213 = vmatprep.subr.bf16.mxu1 %v3540_v1  ;;  %v3499_v39 = vld [vmem:[%s3633_s16 + $0x20] sm:$0xff]  }
  0x6a   : > { %3178 = vmatpush3.bf16.msra.mxu0 %v3454_v43  ;;  %v3485_v43 = vld [vmem:[%s3633_s16 + $0x2c] ss:$0 sps:$4 sm:$0x33]  }
  0x6b   : > { %3179 = vmatprep.subr.bf16.mxu0 %v3540_v1 }
  0x6c   : > { %3214 = vmatpush3.bf16.msra.mxu1 %v3455_v45  ;;  %v1287_v45 = vrot.slane %v1285_v38, 1  ;;  %v3498_v38 = vld [vmem:[%s4158_s1 + $0x228] sm:$0xff]  }
  0x6d   : > { %3124 = vmatmul.mubr.bf16.gmra.mxu0 %v810_v49  ;;  %3215 = vmatprep.subr.bf16.mxu1 %v3540_v1  ;;  %v3481_v49 = vld [vmem:[%s4158_s1 + $0x1d8] sm:$0xff]  }
  0x6e   : > { %3160 = vmatmul.mubr.bf16.gmra.mxu1 %v1033_v51  ;;  %3127 = vmatprep.mubr.msk.bf16.mxu0 %vm3541_vm0, %v3540_v1  ;;  %v1291_v50 = vor.u32 %v1290_v46, %v1287_v45  ;;  %v3482_v51 = vld [vmem:[%s4158_s1 + $0x190] sm:$0xff]   ;;  %v3501_v45 = vld [vmem:[%s4158_s1 + $0x220] sm:$0xff]  }
  0x6f   : > { %3163 = vmatprep.mubr.msk.bf16.mxu1 %vm3541_vm0, %v3540_v1  ;;  %3180 = vmatpush3.bf16.msra.mxu0 %v3456_v52  ;;  %v1294_v52 = vshrl.u32 %v3485_v43, 16 }
  0x70   : > { %3216 = vmatpush3.bf16.msra.mxu1 %v3459_v53  ;;  %3181 = vmatprep.subr.bf16.mxu0 %v3540_v1  ;;  %v1297_v53 = vshll.u32 %v3485_v43, 16  ;;  %v3504_v43 = vld [vmem:[%s3633_s16 + $0x28] sm:$0xff]  }
  0x71   : > { %3217 = vmatprep.subr.bf16.mxu1 %v3540_v1  ;;  %v1296_v57 = vrot.slane %v1294_v52, 1  ;;  %v2001_v48 = vshll.u32 %v3504_v43, 16 }
  0x72   : > { %v1299_v58 = vrot.slane %v1297_v53, 2 }
  0x73   : > { %3182 = vmatpush3.bf16.msra.mxu0 %v3460_v56  ;;  %v1292_v56 = vsel %vm1248_vm3, %v1282_v36, %v1291_v50  ;;  %v1992_v36 = vshll.u32 %v3500_v31, 16  ;;  %v2003_v54 = vrot.slane %v2001_v48, 3 }
  0x74   : > { %3218 = vmatpush3.bf16.msra.mxu1 %v3461_v61  ;;  %3239 = vmatprep.subr.bf16.mxu0 %v3540_v1  ;;  %v3484_v61 = vld [vmem:[%s4158_s1 + $0x188] sm:$0xff]  }
  0x75   : > { %3128 = vmatmul.mubr.bf16.gmra.mxu0 %v812_v2  ;;  %3275 = vmatprep.subr.bf16.mxu1 %v3540_v1  ;;  %v1300_v2 = vor.u32 %v1299_v58, %v1296_v57  ;;  %v3505_v57 = vld [vmem:[%s4158_s1 + $0x210] sm:$0xff]  }
  0x76   : > { %3164 = vmatmul.mubr.bf16.gmra.mxu1 %v1035_v7  ;;  %3183 = vmatprep.mubr.msk.bf16.mxu0 %vm3541_vm0, %v3540_v1  ;;  %v1971_v7 = vshrl.u32 %v3493_v63, 16 }
  0x77   : > { %3219 = vmatprep.mubr.msk.bf16.mxu1 %vm3541_vm0, %v3540_v1  ;;  %v1301_v10 = vsel %vm1248_vm3, %v1291_v50, %v1300_v2  ;;  %v3502_v50 = vld [vmem:[%s4158_s1 + $0x218] sm:$0xff]  }
  0x78   : > { %v1973_v16 = vrot.slane %v1971_v7, 2 }
  0x7a   : > { %v1977_v22 = vor.u32 %v1976_v17, %v1973_v16 }
  0x7d   : > { %3184 = vmatmul.mubr.bf16.vlgmr.msra.gmra.mxu0 %v1265_v18  ;;  %v3497_v18 = vld [vmem:[%s3633_s16 + $0x18] sm:$0xff]  }
  0x7e   : > { %3220 = vmatmul.mubr.bf16.vlgmr.msra.gmra.mxu1 %v1517_v19  ;;  %3240 = vmatpush3.bf16.msra.mxu0 %v3466_v14  ;;  %v1965_v14 = vrot.slane %v1963_v5, 2  ;;  %v1738_v19 = vrot.slane %v3490_v12, 2  ;;  %v1983_v24 = vshll.u32 %v3497_v18, 16  ;;  %v3513_v12 = vld [vmem:[%s3633_s16 + $0x28] sm:$0xff]  }
  0x7f   : > { %3241 = vmatprep.subr.bf16.mxu0 %v3540_v1  ;;  %3187 = vmatprep.mubr.msk.bf16.mxu0 %vm3541_vm0, %v3540_v1  ;;  %v2235_v16 = vrot.slane %v3513_v12, 3 }
  0x80   : > { %3223 = vmatprep.mubr.msk.bf16.mxu1 %vm3541_vm0, %v3540_v1  ;;  %3276 = vmatpush3.bf16.msra.mxu1 %v3470_v21  ;;  %v1969_v21 = vor.u32 %v1968_v15, %v1965_v14  ;;  %v1740_v25 = vsel %vm1514_vm4, %v1738_v19, %v1739_v20 }
  0x81   : > { %3277 = vmatprep.subr.bf16.mxu1 %v3540_v1 }
  0x82   : > { %3242 = vmatpush3.bf16.msra.mxu0 %v3467_v23  ;;  %v1980_v23 = vshrl.u32 %v3497_v18, 16  ;;  %v3514_v18 = vld [vmem:[%s3633_s16 + $0x18] sm:$0xff]  }
  0x83   : > { %3243 = vmatprep.subr.bf16.mxu0 %v3540_v1 }
  0x84   : > { %3278 = vmatpush3.bf16.msra.mxu1 %v3472_v27  ;;  %v3496_v27 = vld [vmem:[%s3633_s16 + $0x18] sm:$0xff]   ;;  %v1982_v29 = vrot.slane %v1980_v23, 2 }
  0x85   : > { %3188 = vmatmul.mubr.bf16.gmra.mxu0 %v1274_v30  ;;  %3279 = vmatprep.subr.bf16.mxu1 %v3540_v1  ;;  %v1985_v30 = vrot.slane %v1983_v24, 3 }
  0x86   : > { %3224 = vmatmul.mubr.bf16.gmra.mxu1 %v1519_v33  ;;  %3244 = vmatpush3.bf16.msra.mxu0 %v3471_v28  ;;  %v1978_v28 = vsel %vm1961_vm5, %v1969_v21, %v1977_v22  ;;  %v1741_v33 = vrot.slane %v3496_v27, 2  ;;  %v2231_v21 = vrot.slane %v3514_v18, 3 }
  0x87   : > { %3191 = vmatprep.mubr.msk.bf16.mxu0 %vm3541_vm0, %v3540_v1  ;;  %3227 = vmatprep.mubr.msk.bf16.mxu1 %vm3541_vm0, %v3540_v1  ;;  %v1986_v34 = vor.u32 %v1985_v30, %v1982_v29 }
  0x88   : > { %3245 = vmatprep.subr.bf16.mxu0 %v3540_v1  ;;  %3280 = vmatpush3.bf16.msra.mxu1 %v3476_v35  ;;  %v1989_v35 = vshrl.u32 %v3500_v31, 16 }
  0x89   : > { %3281 = vmatprep.subr.bf16.mxu1 %v3540_v1  ;;  %v1987_v40 = vsel %vm1961_vm5, %v1977_v22, %v1986_v34 }
  0x8a   : > { %3246 = vmatpush3.bf16.msra.mxu0 %v3475_v37  ;;  %v1742_v37 = vsel %vm1514_vm4, %v1739_v20, %v1741_v33  ;;  %v3515_v20 = vld [vmem:[%s3633_s16 + $0x30] ss:$0 sps:$4 sm:$0x77]  }
  0x8b   : > { %3247 = vmatprep.subr.bf16.mxu0 %v3540_v1  ;;  %v2237_v22 = vrot.slane %v3515_v20, 3 }
  0x8c   : > { %3282 = vmatpush3.bf16.msra.mxu1 %v3478_v41  ;;  %v1991_v41 = vrot.slane %v1989_v35, 2 }
  0x8d   : > { %3192 = vmatmul.mubr.bf16.gmra.mxu0 %v1283_v44  ;;  %3283 = vmatprep.subr.bf16.mxu1 %v3540_v1  ;;  %v1743_v44 = vrot.slane %v3499_v39, 2  ;;  %v2238_v24 = vsel %vm2227_vm6, %v2235_v16, %v2237_v22 }
  0x8e   : > { %3228 = vmatmul.mubr.bf16.gmra.mxu1 %v1521_v47  ;;  %3248 = vmatpush3.bf16.msra.mxu0 %v3477_v42  ;;  %v1994_v42 = vrot.slane %v1992_v36, 3  ;;  %v1998_v47 = vshrl.u32 %v3504_v43, 16 }
  0x8f   : > { %3195 = vmatprep.mubr.msk.bf16.mxu0 %vm3541_vm0, %v3540_v1  ;;  %3231 = vmatprep.mubr.msk.bf16.mxu1 %vm3541_vm0, %v3540_v1 }
  0x90   : > { %3249 = vmatprep.subr.bf16.mxu0 %v3540_v1  ;;  %3284 = vmatpush3.bf16.msra.mxu1 %v3481_v49  ;;  %v1995_v46 = vor.u32 %v1994_v42, %v1991_v41  ;;  %v1744_v49 = vsel %vm1514_vm4, %v1741_v33, %v1743_v44  ;;  %v2000_v53 = vrot.slane %v1998_v47, 2 }
  0x91   : > { %3285 = vmatprep.subr.bf16.mxu1 %v3540_v1 }
  0x92   : > { %3250 = vmatpush3.bf16.msra.mxu0 %v3482_v51  ;;  %v3503_v51 = vld [vmem:[%s3633_s16 + $0x28] sm:$0xff]   ;;  %v1996_v52 = vsel %vm1961_vm5, %v1986_v34, %v1995_v46  ;;  %v2004_v58 = vor.u32 %v2003_v54, %v2000_v53 }
  0x93   : > { %3251 = vmatprep.subr.bf16.mxu0 %v3540_v1 }
  0x94   : > { %3286 = vmatpush3.bf16.msra.mxu1 %v3483_v55  ;;  %v3508_v55 = vld [vmem:[%s3633_s16 + $0x30] ss:$0 sps:$4 sm:$0x77]   ;;  %v2005_v63 = vsel %vm1961_vm5, %v1995_v46, %v2004_v58 }
  0x95   : > { %3196 = vmatmul.mubr.bf16.gmra.mxu0 %v1292_v56  ;;  %3287 = vmatprep.subr.bf16.mxu1 %v3540_v1  ;;  %v1745_v56 = vrot.slane %v3503_v51, 2  ;;  %v2007_v59 = vshrl.u32 %v3508_v55, 16 }
  0x96   : > { %3232 = vmatmul.mubr.bf16.gmra.mxu1 %v1523_v60  ;;  %3199 = vmatprep.mubr.msk.bf16.mxu0 %vm3541_vm0, %v3540_v1  ;;  %v2010_v60 = vshll.u32 %v3508_v55, 16 }
  0x97   : > { %3235 = vmatprep.mubr.msk.bf16.mxu1 %vm3541_vm0, %v3540_v1  ;;  %3252 = vmatpush3.bf16.msra.mxu0 %v3484_v61  ;;  %v1746_v61 = vsel %vm1514_vm4, %v1743_v44, %v1745_v56  ;;  %v2009_v2 = vrot.slane %v2007_v59, 2 }
  0x98   : > { %3288 = vmatpush3.bf16.msra.mxu1 %v3487_v0  ;;  %3253 = vmatprep.subr.bf16.mxu0 %v3540_v1  ;;  %v3506_v0 = vld [vmem:[%s4158_s1 + $0x208] sm:$0xff]   ;;  %v2012_v3 = vrot.slane %v2010_v60, 3 }
  0x99   : > { %3289 = vmatprep.subr.bf16.mxu1 %v3540_v1 }
  0x9a   : > { %v2013_v5 = vor.u32 %v2012_v3, %v2009_v2 }
  0x9b   : > { %3254 = vmatpush3.bf16.msra.mxu0 %v3488_v4  ;;  %v1747_v4 = vrot.slane %v3507_v62, 2 }
  0x9c   : > { %3290 = vmatpush3.bf16.msra.mxu1 %v3489_v9  ;;  %3311 = vmatprep.subr.bf16.mxu0 %v3540_v1  ;;  %v3511_v9 = vld [vmem:[%s3633_s16 + $0x10] sm:$0xff]  }
  0x9d   : > { %3200 = vmatmul.mubr.bf16.gmra.mxu0 %v1301_v10  ;;  %3347 = vmatprep.subr.bf16.mxu1 %v3540_v1  ;;  %v1748_v7 = vsel %vm1514_vm4, %v1745_v56, %v1747_v4  ;;  %v2014_v10 = vsel %vm1961_vm5, %v2004_v58, %v2013_v5  ;;  %v2229_v14 = vrot.slane %v3511_v9, 3 }
  0x9e   : > { %3236 = vmatmul.mubr.bf16.gmra.mxu1 %v1525_v11  ;;  %3255 = vmatprep.mubr.msk.bf16.mxu0 %vm3541_vm0, %v3540_v1  ;;  %v3512_v11 = vld [vmem:[%s3633_s16 + $0x20] sm:$0xff]  }
  0x9f   : > { %3291 = vmatprep.mubr.msk.bf16.mxu1 %vm3541_vm0, %v3540_v1  ;;  %v2233_v15 = vrot.slane %v3512_v11, 3  ;;  %v2230_v17 = vsel %vm2227_vm6, %v2228_v13, %v2229_v14  ;;  %v2232_v23 = vsel %vm2227_vm6, %v2229_v14, %v2231_v21 }
  0xa1   : > { %v2236_v19 = vsel %vm2227_vm6, %v2233_v15, %v2235_v16 }
  0xa5   : > { %3256 = vmatmul.mubr.bf16.vlgmr.msra.gmra.mxu0 %v1740_v25  ;;  %v2234_v25 = vsel %vm2227_vm6, %v2231_v21, %v2233_v15 }
  0xa6   : > { %3292 = vmatmul.mubr.bf16.vlgmr.msra.gmra.mxu1 %v1978_v28  ;;  %3312 = vmatpush3.bf16.msra.mxu0 %v3494_v26 }
  0xa7   : > { %3313 = vmatprep.subr.bf16.mxu0 %v3540_v1  ;;  %3259 = vmatprep.mubr.msk.bf16.mxu0 %vm3541_vm0, %v3540_v1 }
  0xa8   : > { %3295 = vmatprep.mubr.msk.bf16.mxu1 %vm3541_vm0, %v3540_v1  ;;  %3355 = vmatpush3.bf16.msra.mxu1 %v3494_v26 }
  0xa9   : > { %3348 = vmatprep.subr.bf16.mxu1 %v3540_v1 }
  0xaa   : > { %3314 = vmatpush3.bf16.msra.mxu0 %v3495_v32 }
  0xab   : > { %3315 = vmatprep.subr.bf16.mxu0 %v3540_v1 }
  0xac   : > { %3356 = vmatpush3.bf16.msra.mxu1 %v3495_v32 }
  0xad   : > { %3260 = vmatmul.mubr.bf16.gmra.mxu0 %v1742_v37  ;;  %3349 = vmatprep.subr.bf16.mxu1 %v3540_v1 }
  0xae   : > { %3296 = vmatmul.mubr.bf16.gmra.mxu1 %v1987_v40  ;;  %3316 = vmatpush3.bf16.msra.mxu0 %v3498_v38 }
  0xaf   : > { %3263 = vmatprep.mubr.msk.bf16.mxu0 %vm3541_vm0, %v3540_v1  ;;  %3299 = vmatprep.mubr.msk.bf16.mxu1 %vm3541_vm0, %v3540_v1 }
  0xb0   : > { %3317 = vmatprep.subr.bf16.mxu0 %v3540_v1  ;;  %3357 = vmatpush3.bf16.msra.mxu1 %v3498_v38 }
  0xb1   : > { %3350 = vmatprep.subr.bf16.mxu1 %v3540_v1 }
  0xb2   : > { %3318 = vmatpush3.bf16.msra.mxu0 %v3501_v45 }
  0xb3   : > { %3319 = vmatprep.subr.bf16.mxu0 %v3540_v1 }
  0xb4   : > { %3358 = vmatpush3.bf16.msra.mxu1 %v3501_v45 }
  0xb5   : > { %3264 = vmatmul.mubr.bf16.gmra.mxu0 %v1744_v49  ;;  %3351 = vmatprep.subr.bf16.mxu1 %v3540_v1 }
  0xb6   : > { %3300 = vmatmul.mubr.bf16.gmra.mxu1 %v1996_v52  ;;  %3320 = vmatpush3.bf16.msra.mxu0 %v3502_v50 }
  0xb7   : > { %3267 = vmatprep.mubr.msk.bf16.mxu0 %vm3541_vm0, %v3540_v1  ;;  %3303 = vmatprep.mubr.msk.bf16.mxu1 %vm3541_vm0, %v3540_v1 }
  0xb8   : > { %3359 = vmatpush3.bf16.msra.mxu1 %v3502_v50  ;;  %3321 = vmatprep.subr.bf16.mxu0 %v3540_v1 }
  0xb9   : > { %3352 = vmatprep.subr.bf16.mxu1 %v3540_v1 }
  0xba   : > { %3322 = vmatpush3.bf16.msra.mxu0 %v3505_v57 }
  0xbb   : > { %3323 = vmatprep.subr.bf16.mxu0 %v3540_v1 }
  0xbc   : > { %3360 = vmatpush3.bf16.msra.mxu1 %v3505_v57 }
  0xbd   : > { %3268 = vmatmul.mubr.bf16.gmra.mxu0 %v1746_v61  ;;  %3353 = vmatprep.subr.bf16.mxu1 %v3540_v1 }
  0xbe   : > { %3304 = vmatmul.mubr.bf16.gmra.mxu1 %v2005_v63  ;;  %3271 = vmatprep.mubr.msk.bf16.mxu0 %vm3541_vm0, %v3540_v1 }
  0xbf   : > { %3307 = vmatprep.mubr.msk.bf16.mxu1 %vm3541_vm0, %v3540_v1  ;;  %3324 = vmatpush3.bf16.msra.mxu0 %v3506_v0 }
  0xc0   : > { %3361 = vmatpush3.bf16.msra.mxu1 %v3506_v0  ;;  %3325 = vmatprep.subr.bf16.mxu0 %v3540_v1 }
  0xc1   : > { %3354 = vmatprep.subr.bf16.mxu1 %v3540_v1 }
  0xc3   : > { %3326 = vmatpush3.bf16.msra.mxu0 %v3509_v6 }
  0xc4   : > { %3362 = vmatpush3.bf16.msra.mxu1 %v3509_v6 }
  0xc5   : > { %3272 = vmatmul.mubr.bf16.gmra.mxu0 %v1748_v7 }
  0xc6   : > { %3308 = vmatmul.mubr.bf16.gmra.mxu1 %v2014_v10  ;;  %3327 = vmatprep.mubr.msk.bf16.mxu0 %vm3541_vm0, %v3540_v1 }
  0xc7   : > { %3339 = vmatprep.mubr.msk.bf16.mxu1 %vm3541_vm0, %v3540_v1 }
  0xcd   : > { %3328 = vmatmul.mubr.bf16.vlgmr.msra.gmra.mxu0 %v2230_v17 }
  0xce   : > { %3340 = vmatmul.mubr.bf16.vlgmr.msra.gmra.mxu1 %v2236_v19  ;;  %3331 = vmatprep.mubr.msk.bf16.mxu0 %vm3541_vm0, %v3540_v1 }
  0xcf   : > { %3343 = vmatprep.mubr.msk.bf16.mxu1 %vm3541_vm0, %v3540_v1 }
  0xd5   : > { %3332 = vmatmul.mubr.bf16.gmra.mxu0 %v2232_v23 }
  0xd6   : > { %3344 = vmatmul.mubr.bf16.gmra.mxu1 %v2238_v24  ;;  %3335 = vmatprep.mubr.msk.bf16.mxu0 %vm3541_vm0, %v3540_v1 }
  0xdd   : > { %3336 = vmatmul.mubr.bf16.gmra.mxu0 %v2234_v25 }
  0xed   : > { %v419_v26 = vpop.f32.mrf.mxu0 }
  0xee   : > { %v676_v27 = vpop.f32.mrf.mxu1 }
  0xef   : > { %v715_v28 = vadd.f32 %v676_v27, %v419_v26  ;;  %v3041_v29 = vpop.f32.mrf.mxu0 }
  0xf0   : > { %v3077_v30 = vpop.f32.mrf.mxu1 }
  0xf1   : > { %v422_v31 = vpop.f32.mrf.mxu0 }
  0xf2   : > { %v679_v32 = vpop.f32.mrf.mxu1 }
  0xf3   : > { %v716_v33 = vadd.f32 %v679_v32, %v422_v31  ;;  %v3042_v34 = vpop.f32.mrf.mxu0 }
  0xf4   : > { %v3078_v35 = vpop.f32.mrf.mxu1 }
  0xf5   : > { %v427_v36 = vpop.f32.mrf.mxu0 }
  0xf6   : > { %v684_v37 = vpop.f32.mrf.mxu1 }
  0xf7   : > { %v717_v38 = vadd.f32 %v684_v37, %v427_v36  ;;  %v3045_v39 = vpop.f32.mrf.mxu0 }
  0xf8   : > { %v3081_v40 = vpop.f32.mrf.mxu1 }
  0xf9   : > { %v430_v41 = vpop.f32.mrf.mxu0 }
  0xfa   : > { %v687_v1 = vpop.f32.mrf.mxu1 }
  0xfb   : > { %v718_v42 = vadd.f32 %v687_v1, %v430_v41  ;;  %v3046_v43 = vpop.f32.mrf.mxu0 }
  0xfc   : > { %v3082_v44 = vpop.f32.mrf.mxu1 }
  0xfd   : > { %v435_v45 = vpop.f32.mrf.mxu0 }
  0xfe   : > { %v692_v46 = vpop.f32.mrf.mxu1 }
  0xff   : > { %v719_v47 = vadd.f32 %v692_v46, %v435_v45  ;;  %v3049_v48 = vpop.f32.mrf.mxu0 }
 0x100   : > { %v3085_v49 = vpop.f32.mrf.mxu1 }
 0x101   : > { %v438_v50 = vpop.f32.mrf.mxu0 }
 0x102   : > { %v695_v51 = vpop.f32.mrf.mxu1 }
 0x103   : > { %v720_v52 = vadd.f32 %v695_v51, %v438_v50  ;;  %v3050_v53 = vpop.f32.mrf.mxu0 }
 0x104   : > { %v3086_v54 = vpop.f32.mrf.mxu1 }
 0x105   : > { %v443_v55 = vpop.f32.mrf.mxu0 }
 0x106   : > { %v700_v56 = vpop.f32.mrf.mxu1 }
 0x107   : > { %v721_v57 = vadd.f32 %v700_v56, %v443_v55  ;;  %v3053_v58 = vpop.f32.mrf.mxu0 }
 0x108   : > { %v3089_v59 = vpop.f32.mrf.mxu1 }
 0x109   : > { %v446_v60 = vpop.f32.mrf.mxu0 }
 0x10a   : > { %v703_v61 = vpop.f32.mrf.mxu1 }
 0x10b   : > { %v722_v62 = vadd.f32 %v703_v61, %v446_v60  ;;  %v3054_v63 = vpop.f32.mrf.mxu0 }
 0x10c   : > { %v3090_v0 = vpop.f32.mrf.mxu1 }
 0x10d   : > { %v451_v2 = vpop.f32.mrf.mxu0 }
 0x10e   : > { %v708_v3 = vpop.f32.mrf.mxu1 }
 0x10f   : > { %v723_v4 = vadd.f32 %v708_v3, %v451_v2  ;;  %v3057_v5 = vpop.f32.mrf.mxu0 }
 0x110   : > { %v3093_v6 = vpop.f32.mrf.mxu1 }
 0x111   : > { %v454_v7 = vpop.f32.mrf.mxu0 }
 0x112   : > { %v711_v8 = vpop.f32.mrf.mxu1 }
 0x113   : > { %v724_v9 = vadd.f32 %v711_v8, %v454_v7  ;;  %v3058_v10 = vpop.f32.mrf.mxu0 }
 0x114   : > { %v3094_v11 = vpop.f32.mrf.mxu1 }
 0x115   : > { %v900_v12 = vpop.f32.mrf.mxu0 }
 0x116   : > { %v939_v13 = vadd.f32 %v900_v12, %v715_v28  ;;  %v1123_v14 = vpop.f32.mrf.mxu1 }
 0x117   : > { %v3113_v15 = vpop.f32.mrf.mxu0 }
 0x118   : > { %v1162_v16 = vadd.f32 %v1123_v14, %v939_v13  ;;  %v3149_v17 = vpop.f32.mrf.mxu1 }
 0x119   : > { %v903_v18 = vpop.f32.mrf.mxu0 }
 0x11a   : > { %v940_v19 = vadd.f32 %v903_v18, %v716_v33  ;;  %v1126_v20 = vpop.f32.mrf.mxu1 }
 0x11b   : > { %v3114_v21 = vpop.f32.mrf.mxu0 }
 0x11c   : > { %v1163_v22 = vadd.f32 %v1126_v20, %v940_v19  ;;  %v3150_v23 = vpop.f32.mrf.mxu1 }
 0x11d   : > { %v908_v24 = vpop.f32.mrf.mxu0 }
 0x11e   : > { %v941_v25 = vadd.f32 %v908_v24, %v717_v38  ;;  %v1131_v26 = vpop.f32.mrf.mxu1 }
 0x11f   : > { %v3117_v27 = vpop.f32.mrf.mxu0 }
 0x120   : > { %v1164_v29 = vadd.f32 %v1131_v26, %v941_v25  ;;  %v3153_v30 = vpop.f32.mrf.mxu1 }
 0x121   : > { %v911_v31 = vpop.f32.mrf.mxu0 }
 0x122   : > { %v942_v32 = vadd.f32 %v911_v31, %v718_v42  ;;  %v1134_v34 = vpop.f32.mrf.mxu1 }
 0x123   : > { %v3118_v28 = vpop.f32.mrf.mxu0 }
 0x124   : > { %v1165_v35 = vadd.f32 %v1134_v34, %v942_v32  ;;  %v3154_v36 = vpop.f32.mrf.mxu1 }
 0x125   : > { %v916_v37 = vpop.f32.mrf.mxu0 }
 0x126   : > { %v943_v39 = vadd.f32 %v916_v37, %v719_v47  ;;  %v1139_v40 = vpop.f32.mrf.mxu1 }
 0x127   : > { %v3121_v33 = vpop.f32.mrf.mxu0 }
 0x128   : > { %v1166_v41 = vadd.f32 %v1139_v40, %v943_v39  ;;  %v3157_v1 = vpop.f32.mrf.mxu1 }
 0x129   : > { %v919_v43 = vpop.f32.mrf.mxu0 }
 0x12a   : > { %v944_v44 = vadd.f32 %v919_v43, %v720_v52  ;;  %v1142_v45 = vpop.f32.mrf.mxu1 }
 0x12b   : > { %v3122_v38 = vpop.f32.mrf.mxu0 }
 0x12c   : > { %v1167_v46 = vadd.f32 %v1142_v45, %v944_v44  ;;  %v3158_v48 = vpop.f32.mrf.mxu1 }
 0x12d   : > { %v924_v49 = vpop.f32.mrf.mxu0 }
 0x12e   : > { %v945_v50 = vadd.f32 %v924_v49, %v721_v57  ;;  %v1147_v51 = vpop.f32.mrf.mxu1 }
 0x12f   : > { %v3125_v42 = vpop.f32.mrf.mxu0 }
 0x130   : > { %v4071_v53 = vadd.f32 %v1147_v51, %v945_v50  ;;  %v3161_v54 = vpop.f32.mrf.mxu1 }
 0x131   : > { %v927_v55 = vpop.f32.mrf.mxu0 }
 0x132   : > { %v946_v56 = vadd.f32 %v927_v55, %v722_v62  ;;  %v1150_v47 = vpop.f32.mrf.mxu1 }
 0x133   : > { %v3126_v58 = vpop.f32.mrf.mxu0 }
 0x134   : > { %v4073_v59 = vadd.f32 %v1150_v47, %v946_v56  ;;  %v3162_v60 = vpop.f32.mrf.mxu1 }
 0x135   : > { %v932_v61 = vpop.f32.mrf.mxu0 }
 0x136   : > { %v947_v52 = vadd.f32 %v932_v61, %v723_v4  ;;  %v1155_v63 = vpop.f32.mrf.mxu1 }
 0x137   : > { %v3129_v0 = vpop.f32.mrf.mxu0 }
 0x138   : > { %v4075_v2 = vadd.f32 %v1155_v63, %v947_v52  ;;  %v3165_v3 = vpop.f32.mrf.mxu1 }
 0x139   : > { %v935_v57 = vpop.f32.mrf.mxu0 }
 0x13a   : > { %v948_v5 = vadd.f32 %v935_v57, %v724_v9  ;;  %v1158_v6 = vpop.f32.mrf.mxu1 }
 0x13b   : > { %v3130_v7 = vpop.f32.mrf.mxu0 }
 0x13c   : > { %v4077_v8 = vadd.f32 %v1158_v6, %v948_v5  ;;  %v3166_v10 = vpop.f32.mrf.mxu1 }
 0x13d   : > { %v1389_v62 = vpop.f32.mrf.mxu0 }
 0x13e   : > { %v1428_v11 = vadd.f32 %v1389_v62, %v1162_v16  ;;  %v1613_v12 = vpop.f32.mrf.mxu1 }
 0x13f   : > { %v3185_v13 = vpop.f32.mrf.mxu0 }
 0x140   : > { %v4079_v14 = vadd.f32 %v1613_v12, %v1428_v11  ;;  %v3221_v15 = vpop.f32.mrf.mxu1 }
 0x141   : > { %v1392_v4 = vpop.f32.mrf.mxu0 }
 0x142   : > { %v1429_v17 = vadd.f32 %v1392_v4, %v1163_v22  ;;  %v1616_v18 = vpop.f32.mrf.mxu1 }
 0x143   : > { %v3186_v19 = vpop.f32.mrf.mxu0 }
 0x144   : > { %v4081_v20 = vadd.f32 %v1616_v18, %v1429_v17  ;;  %v3222_v21 = vpop.f32.mrf.mxu1 }
 0x145   : > { %v1397_v9 = vpop.f32.mrf.mxu0 }
 0x146   : > { %v1430_v23 = vadd.f32 %v1397_v9, %v1164_v29  ;;  %v1621_v24 = vpop.f32.mrf.mxu1 }
 0x147   : > { %v3189_v25 = vpop.f32.mrf.mxu0 }
 0x148   : > { %v4083_v26 = vadd.f32 %v1621_v24, %v1430_v23  ;;  %v3225_v27 = vpop.f32.mrf.mxu1 }
 0x149   : > { %v1400_v16 = vpop.f32.mrf.mxu0 }
 0x14a   : > { %v1431_v30 = vadd.f32 %v1400_v16, %v1165_v35  ;;  %v1624_v31 = vpop.f32.mrf.mxu1 }
 0x14b   : > { %v3190_v32 = vpop.f32.mrf.mxu0 }
 0x14c   : > { %v4085_v34 = vadd.f32 %v1624_v31, %v1431_v30  ;;  %v3226_v28 = vpop.f32.mrf.mxu1 }
 0x14d   : > { %v1405_v22 = vpop.f32.mrf.mxu0 }
 0x14e   : > { %v1432_v36 = vadd.f32 %v1405_v22, %v1166_v41  ;;  %v1629_v37 = vpop.f32.mrf.mxu1 }
 0x14f   : > { %v3193_v39 = vpop.f32.mrf.mxu0 }
 0x150   : > { %v4087_v40 = vadd.f32 %v1629_v37, %v1432_v36  ;;  %v3229_v33 = vpop.f32.mrf.mxu1 }
 0x151   : > { %v1408_v29 = vpop.f32.mrf.mxu0 }
 0x152   : > { %v1433_v1 = vadd.f32 %v1408_v29, %v1167_v46  ;;  %v1632_v43 = vpop.f32.mrf.mxu1 }
 0x153   : > { %v3194_v44 = vpop.f32.mrf.mxu0 }
 0x154   : > { %v4089_v45 = vadd.f32 %v1632_v43, %v1433_v1  ;;  %v3230_v38 = vpop.f32.mrf.mxu1 }
 0x155   : > { %v1413_v35 = vpop.f32.mrf.mxu0 }
 0x156   : > { %v1637_v48 = vpop.f32.mrf.mxu1  ;;  %v1434_v37 = vadd.f32 %v1413_v35, %v4071_v53 }
 0x157   : > { %v3197_v49 = vpop.f32.mrf.mxu0 }
 0x158   : > { %v3233_v50 = vpop.f32.mrf.mxu1  ;;  %v1658_v43 = vadd.f32 %v1637_v48, %v1434_v37 }
 0x159   : > { %v1416_v51 = vpop.f32.mrf.mxu0 }
 0x15a   : > { %v1640_v42 = vpop.f32.mrf.mxu1  ;;  %v1435_v44 = vadd.f32 %v1416_v51, %v4073_v59 }
 0x15b   : > { %v3198_v54 = vpop.f32.mrf.mxu0 }
 0x15c   : > { %v3234_v41 = vpop.f32.mrf.mxu1 }
 0x15d   : > { %v1421_v55 = vpop.f32.mrf.mxu0 }
 0x15e   : > { %v1645_v56 = vpop.f32.mrf.mxu1 }
 0x15f   : > { %v3201_v47 = vpop.f32.mrf.mxu0 }
 0x160   : > { %v3237_v58 = vpop.f32.mrf.mxu1 }
 0x161   : > { %v1424_v60 = vpop.f32.mrf.mxu0  ;;  %v1659_v58 = vadd.f32 %v1640_v42, %v1435_v44  ;;  %v4114_v42 = vld [vmem:[%s4159_s2] ss:$0 sm:$0xff] }
 0x162   : > { %v4091_v61 = vpop.f32.mrf.mxu1 }
 0x163   : > { %v3202_v46 = vpop.f32.mrf.mxu0 }
 0x164   : > { %v3238_v52 = vpop.f32.mrf.mxu1  ;;  %v1436_v46 = vadd.f32 %v1421_v55, %v4075_v2 }
 0x165   : > { %v1836_v63 = vpop.f32.mrf.mxu0 }
 0x166   : > { %v2102_v0 = vpop.f32.mrf.mxu1  ;;  %v1875_v49 = vadd.f32 %v1836_v63, %v4079_v14  ;;  %v1660_v51 = vadd.f32 %v1645_v56, %v1436_v46  ;;  %v1437_v14 = vadd.f32 %v1424_v60, %v4077_v8 }
 0x167   : > { %v3257_v3 = vpop.f32.mrf.mxu0 }
 0x168   : > { %v3293_v57 = vpop.f32.mrf.mxu1  ;;  %v2141_v3 = vadd.f32 %v2102_v0, %v1875_v49  ;;  %v1661_v8 = vadd.f32 %v4091_v61, %v1437_v14 }
 0x169   : > { %v1839_v5 = vpop.f32.mrf.mxu0 }
 0x16a   : > { %v2105_v6 = vpop.f32.mrf.mxu1  ;;  %v1876_v53 = vadd.f32 %v1839_v5, %v4081_v20 }
 0x16b   : > { %v3258_v7 = vpop.f32.mrf.mxu0 }
 0x16c   : > { %v3294_v10 = vpop.f32.mrf.mxu1  ;;  %v2142_v63 = vadd.f32 %v2105_v6, %v1876_v53 }
 0x16d   : > { %v1844_v62 = vpop.f32.mrf.mxu0 }
 0x16e   : > { %v4093_v11 = vpop.f32.mrf.mxu1  ;;  %v1877_v20 = vadd.f32 %v1844_v62, %v4083_v26 }
 0x16f   : > { %v3261_v12 = vpop.f32.mrf.mxu0 }
 0x170   : > { %v3297_v13 = vpop.f32.mrf.mxu1 }
 0x171   : > { %v1847_v15 = vpop.f32.mrf.mxu0 }
 0x172   : > { %v4095_v4 = vpop.f32.mrf.mxu1  ;;  %v1878_v6 = vadd.f32 %v1847_v15, %v4085_v34 }
 0x173   : > { %v3262_v17 = vpop.f32.mrf.mxu0 }
 0x174   : > { %v3298_v18 = vpop.f32.mrf.mxu1 }
 0x175   : > { %v4097_v19 = vpop.f32.mrf.mxu0 }
 0x176   : > { %v4099_v21 = vpop.f32.mrf.mxu1 }
 0x177   : > { %v3265_v9 = vpop.f32.mrf.mxu0 }
 0x178   : > { %v3301_v23 = vpop.f32.mrf.mxu1 }
 0x179   : > { %v4101_v24 = vpop.f32.mrf.mxu0 }
 0x17a   : > { %v4103_v25 = vpop.f32.mrf.mxu1 }
 0x17b   : > { %v3266_v27 = vpop.f32.mrf.mxu0 }
 0x17c   : > { %v3302_v16 = vpop.f32.mrf.mxu1  ;;  %v2143_v27 = vadd.f32 %v4093_v11, %v1877_v20 }
 0x17d   : > { %v1860_v30 = vpop.f32.mrf.mxu0 }
 0x17e   : > { %v2126_v31 = vpop.f32.mrf.mxu1  ;;  %v1881_v54 = vadd.f32 %v1860_v30, %v1658_v43 }
 0x17f   : > { %v3269_v32 = vpop.f32.mrf.mxu0 }
 0x180   : > { %v3305_v28 = vpop.f32.mrf.mxu1  ;;  %v2147_v57 = vadd.f32 %v2126_v31, %v1881_v54 }
 0x181   : > { %v1863_v22 = vpop.f32.mrf.mxu0 }
 0x182   : > { %v2129_v36 = vpop.f32.mrf.mxu1  ;;  %v1882_v7 = vadd.f32 %v1863_v22, %v1659_v58 }
 0x183   : > { %v3270_v39 = vpop.f32.mrf.mxu0 }
 0x184   : > { %v3306_v33 = vpop.f32.mrf.mxu1  ;;  %v2148_v5 = vadd.f32 %v2129_v36, %v1882_v7  ;;  %v2144_v39 = vadd.f32 %v4095_v4, %v1878_v6 }
 0x185   : > { %v1868_v29 = vpop.f32.mrf.mxu0  ;;  %v1879_v33 = vadd.f32 %v4097_v19, %v4087_v40  ;;  %v1880_v40 = vadd.f32 %v4101_v24, %v4089_v45 }
 0x186   : > { %v2134_v1 = vpop.f32.mrf.mxu1  ;;  %v1883_v12 = vadd.f32 %v1868_v29, %v1660_v51 }
 0x187   : > { %v3273_v38 = vpop.f32.mrf.mxu0  ;;  %v2145_v4 = vadd.f32 %v4099_v21, %v1879_v33  ;;  %v2146_v21 = vadd.f32 %v4103_v25, %v1880_v40 }
 0x188   : > { %v3309_v50 = vpop.f32.mrf.mxu1  ;;  %v2149_v16 = vadd.f32 %v2134_v1, %v1883_v12 }
 0x189   : > { %v1871_v41 = vpop.f32.mrf.mxu0 }
 0x18a   : > { %v2137_v47 = vpop.f32.mrf.mxu1  ;;  %v1884_v30 = vadd.f32 %v1871_v41, %v1661_v8 }
 0x18b   : > { %v3274_v52 = vpop.f32.mrf.mxu0 }
 0x18c   : > { %v3310_v35 = vpop.f32.mrf.mxu1  ;;  %v2150_v43 = vadd.f32 %v2137_v47, %v1884_v30 }
 0x18d   : > { %v2326_v48 = vpop.f32.mrf.mxu0 }
 0x18e   : > { %v2365_v10 = vadd.f32 %v2326_v48, %v2141_v3  ;;  %v2350_v59 = vpop.f32.mrf.mxu1 }
 0x18f   : > { %v2371_v2 = vadd.f32 %v2350_v59, %v2147_v57  ;;  %v3329_v55 = vpop.f32.mrf.mxu0 }
 0x190   : > { %v3341_v0 = vpop.f32.mrf.mxu1  ;;  %v2405_v17 = vadd.f32 %v4114_v42, %v2365_v10 }
 0x191   : > { %v2329_v13 = vpop.f32.mrf.mxu0  ;;  %v2411_v60 = vadd.f32 %v4114_v42, %v2371_v2 }
 0x192   : > { %v2366_v56 = vadd.f32 %v2329_v13, %v2142_v63  ;;  %v2353_v18 = vpop.f32.mrf.mxu1  ;;  %v2415_v28 = vmax.f32 %v2405_v17, 0.0 }
 0x193   : > { %v2372_v9 = vadd.f32 %v2353_v18, %v2148_v5  ;;  %v3330_v23 = vpop.f32.mrf.mxu0  ;;  %v2421_v37 = vmax.f32 %v2411_v60, 0.0 }
 0x194   : > { %v2406_v26 = vadd.f32 %v4114_v42, %v2366_v56  ;;  %v3342_v62 = vpop.f32.mrf.mxu1 }
 0x195   : > { %v2412_v31 = vadd.f32 %v4114_v42, %v2372_v9  ;;  %v2334_v32 = vpop.f32.mrf.mxu0 }
 0x196   : > { %v2416_v22 = vmax.f32 %v2406_v26, 0.0  ;;  %v2367_v61 = vadd.f32 %v2334_v32, %v2143_v27  ;;  %v2358_v36 = vpop.f32.mrf.mxu1 }
 0x197   : > { %v2422_v34 = vmax.f32 %v2412_v31, 0.0  ;;  %v2373_v11 = vadd.f32 %v2358_v36, %v2149_v16  ;;  %v3333_v15 = vpop.f32.mrf.mxu0 }
 0x198   : > { %v2880_v29 = vpack.c.bf16 %v2416_v22, %v2415_v28  ;;  %v3345_v1 = vpop.f32.mrf.mxu1  ;;  %v2407_v49 = vadd.f32 %v4114_v42, %v2367_v61 }
 0x199   : > { %v2895_v44 = vpack.c.bf16 %v2422_v34, %v2421_v37  ;;  %v2337_v38 = vpop.f32.mrf.mxu0  ;;  %v2413_v41 = vadd.f32 %v4114_v42, %v2373_v11 }
 0x19a   : > { %2881 = vst [vmem:[%s4128_s7] sm:$0xff] %v2880_v29   ;;  %v2368_v50 = vadd.f32 %v2337_v38, %v2144_v39  ;;  %v2361_v54 = vpop.f32.mrf.mxu1  ;;  %v2417_v53 = vmax.f32 %v2407_v49, 0.0 }
 0x19b   : > { %2904 = vst [vmem:[%s4128_s7 + $0x18] sm:$0xff] %v2895_v44   ;;  %v2374_v58 = vadd.f32 %v2361_v54, %v2150_v43  ;;  %v3334_v46 = vpop.f32.mrf.mxu0  ;;  %v2423_v7 = vmax.f32 %v2413_v41, 0.0 }
 0x19c   : > { %v2408_v19 = vadd.f32 %v4114_v42, %v2368_v50  ;;  %v3346_v47 = vpop.f32.mrf.mxu1 }
 0x19d   : > { %v2414_v52 = vadd.f32 %v4114_v42, %v2374_v58  ;;  %v2342_v3 = vpop.f32.mrf.mxu0 }
 0x19e   : > { %v2418_v35 = vmax.f32 %v2408_v19, 0.0  ;;  %v2369_v57 = vadd.f32 %v2342_v3, %v2145_v4 }
 0x19f   : > { %v2424_v48 = vmax.f32 %v2414_v52, 0.0  ;;  %v3337_v10 = vpop.f32.mrf.mxu0 }
 0x1a0   : > { %v2885_v59 = vpack.c.bf16 %v2418_v35, %v2417_v53  ;;  %v2409_v45 = vadd.f32 %v4114_v42, %v2369_v57 }
 0x1a1   : > { %v2900_v51 = vpack.c.bf16 %v2424_v48, %v2423_v7  ;;  %v2345_v14 = vpop.f32.mrf.mxu0 }
 0x1a2   : > { %2902 = vst [vmem:[%s4128_s7 + $0x8] sm:$0xff] %v2885_v59   ;;  %v2370_v24 = vadd.f32 %v2345_v14, %v2146_v21  ;;  %v2419_v63 = vmax.f32 %v2409_v45, 0.0 }
 0x1a3   : > { %2905 = vst [vmem:[%s4128_s7 + $0x20] sm:$0xff] %v2900_v51   ;;  %v3338_v2 = vpop.f32.mrf.mxu0 }
 0x1a4   : > { %v2410_v55 = vadd.f32 %v4114_v42, %v2370_v24 }
 0x1a6   : > { %v2420_v20 = vmax.f32 %v2410_v55, 0.0 }
 0x1a8   : > { %v2890_v0 = vpack.c.bf16 %v2420_v20, %v2419_v63 }
 0x1aa   : > { %2903 = vst [vmem:[%s4128_s7 + $0x10] sm:$0xff] %v2890_v0  }
 0x1ab PF: > { %s13_s14 = sadd.s32 1, %s3538_s14   ;;  %s4161_s12 = smov %s3534_s13 }
 0x1ac   : > { %p10_p5 = scmp.ge.s32.totalorder %s13_s14, 4   ;;  %s4162_s13 = smov %s4164_s15 }
 0x1ae   :  { %12 = sbr.rel (!%p10_p5) target bundleno = 2 (0x2), region = 84 }

// kernel: _lambda_.27
= control target key start
LH: loop header
LB: loop body
LE: loop exit
PB: predicated region body
PF: predicated region fallthrough
CT: control target
= control target key end

     0   :  { %s374_s1 = inlined_call_operand.vmem [shape: bf16[128,128], index: 1, kind: input, shape index: {}]   ;;  %s375_s0 = inlined_call_operand.vmem [shape: bf16[32,128], index: 0, kind: input, shape index: {}]   ;;  %s376_s2 = inlined_call_operand.vmem [shape: f32[1,128], index: 2, kind: input, shape index: {}]   ;;  %s377_s3 = inlined_call_operand.vmem [shape: bf16[32,128], index: 3, kind: input, shape index: {}, may-alias: {3,4}]   ;;  %s378_s4 = inlined_call_operand.vmem [shape: bf16[32,128], index: 4, kind: output, shape index: {}, may-alias: {3,4}]  }
   0x1   :  { %v294_v0 = vld [vmem:[%s374_s1 + $0x38] sm:$0xff]   ;;  %v295_v1 = vld [vmem:[%s374_s1 + $0x30] sm:$0xff]   ;;  %v296_v2 = vld [vmem:[%s374_s1 + $0x28] sm:$0xff]  }
   0x2   :  { %274 = vmatprep.subr.bf16.mxu0 %v294_v0  ;;  %v297_v3 = vld [vmem:[%s374_s1 + $0x20] sm:$0xff]   ;;  %v298_v5 = vld [vmem:[%s374_s1 + $0x18] sm:$0xff]   ;;  %v299_v6 = vld [vmem:[%s374_s1 + $0x10] sm:$0xff]  }
   0x3   :  { %275 = vmatpush3.bf16.msra.mxu0 %v294_v0  ;;  %v302_v4 = vld [vmem:[%s375_s0] sm:$0xff]   ;;  %v300_v7 = vld [vmem:[%s374_s1 + $0x8] sm:$0xff]  }
   0x4   :  { %276 = vmatprep.subr.bf16.mxu0 %v295_v1  ;;  %290 = vmatprep.mubr.bf16.mxu0 %v302_v4  ;;  %v301_v8 = vld [vmem:[%s374_s1] sm:$0xff]   ;;  %v303_v9 = vld [vmem:[%s375_s0 + $0x8] sm:$0xff]  }
   0x5   :  { %v235_v10 = vld [vmem:[%s376_s2] ss:$0 sm:$0xff]  ;;  %v262_v11 = vld [vmem:[%s377_s3 + $0x8] sm:$0xff]  }
   0x6   :  { %v245_v13 = vld [vmem:[%s377_s3] sm:$0xff]   ;;  %v250_v15 = vunpack.c.l.bf16 %v262_v11  ;;  %v251_v19 = vunpack.c.h.bf16 %v262_v11 }
   0x7   :  { %277 = vmatpush3.bf16.msra.mxu0 %v295_v1  ;;  %v246_v18 = vunpack.c.l.bf16 %v245_v13  ;;  %v247_v23 = vunpack.c.h.bf16 %v245_v13 }
   0x8   :  { %278 = vmatprep.subr.bf16.mxu0 %v296_v2 }
   0xb   :  { %279 = vmatpush3.bf16.msra.mxu0 %v296_v2 }
   0xc   :  { %280 = vmatprep.subr.bf16.mxu0 %v297_v3 }
   0xf   :  { %281 = vmatpush3.bf16.msra.mxu0 %v297_v3 }
  0x10   :  { %282 = vmatprep.subr.bf16.mxu0 %v298_v5 }
  0x13   :  { %283 = vmatpush3.bf16.msra.mxu0 %v298_v5 }
  0x14   :  { %284 = vmatprep.subr.bf16.mxu0 %v299_v6 }
  0x17   :  { %285 = vmatpush3.bf16.msra.mxu0 %v299_v6 }
  0x18   :  { %286 = vmatprep.subr.bf16.mxu0 %v300_v7 }
  0x1b   :  { %287 = vmatpush3.bf16.msra.mxu0 %v300_v7 }
  0x1c   :  { %288 = vmatprep.subr.bf16.mxu0 %v301_v8 }
  0x1f   :  { %289 = vmatpush3.bf16.msra.mxu0 %v301_v8 }
  0x22   :  { %291 = vmatmul.mubr.bf16.vlgmr.msra.gmra.mxu0 %v303_v9 }
  0xe2   :  { %v292_v12 = vpop.f32.mrf.mxu0 }
  0xe3   :  { %v183_v14 = vadd.f32 %v292_v12, %v235_v10 }
  0xe4   :  { %v144_v16 = vpop.f32.mrf.mxu0 }
  0xe5   :  { %v181_v17 = vadd.f32 %v235_v10, %v144_v16  ;;  %v195_v21 = vadd.f32 %v250_v15, %v183_v14 }
  0xe6   :  { %v293_v20 = vpop.f32.mrf.mxu0 }
  0xe7   :  { %v184_v22 = vadd.f32 %v293_v20, %v235_v10  ;;  %v193_v25 = vadd.f32 %v246_v18, %v181_v17  ;;  %v199_v28 = vmax.f32 %v195_v21, 0.0 }
  0xe8   :  { %v147_v24 = vpop.f32.mrf.mxu0 }
  0xe9   :  { %v196_v26 = vadd.f32 %v251_v19, %v184_v22  ;;  %v182_v27 = vadd.f32 %v235_v10, %v147_v24  ;;  %v197_v31 = vmax.f32 %v193_v25, 0.0 }
  0xeb   :  { %v200_v29 = vmax.f32 %v196_v26, 0.0  ;;  %v194_v30 = vadd.f32 %v247_v23, %v182_v27 }
  0xed   :  { %v260_v32 = vpack.c.bf16 %v200_v29, %v199_v28  ;;  %v198_v33 = vmax.f32 %v194_v30, 0.0 }
  0xef   :  { %263 = vst [vmem:[%s378_s4 + $0x8] sm:$0xff] %v260_v32   ;;  %v255_v34 = vpack.c.bf16 %v198_v33, %v197_v31 }
  0xf1   :  { %256 = vst [vmem:[%s378_s4] sm:$0xff] %v255_v34  }

// kernel: _lambda_.28
= control target key start
LH: loop header
LB: loop body
LE: loop exit
PB: predicated region body
PF: predicated region fallthrough
CT: control target
= control target key end

     0   :  { %v40_v12 = vlaneseq  ;;  %v131_v15 = vmov 1966171168   ;;  %v132_v19 = vmov 1935823168   ;;  %vm96_vm0 = vcmask 1041409   ;;  %s152_s0 = inlined_call_operand.vmem [shape: bf16[2,16,128], index: 0, kind: input, shape index: {}]   ;;  %s153_s1 = inlined_call_operand.vmem [shape: bf16[2,128], index: 1, kind: output, shape index: {}]  }
   0x1   :  { %v121_v0 = vld [vmem:[%s152_s0] sm:$0xff]   ;;  %v128_v1 = vld [vmem:[%s152_s0 + $0x8] sm:$0xff]   ;;  %v38_v16 = vunpack.c.l.s4 %v131_v15  ;;  %v66_v20 = vunpack.c.l.s4 %v132_v19 }
   0x2   :  { %v122_v2 = vunpack.c.l.bf16 %v121_v0  ;;  %v123_v3 = vunpack.c.h.bf16 %v121_v0  ;;  %v126_v4 = vunpack.c.l.bf16 %v128_v1  ;;  %v127_v5 = vunpack.c.h.bf16 %v128_v1 }
   0x3   :  { %v39_v23 = vunpack.c.0.s8 %v38_v16  ;;  %v41_v24 = vshrl.u32 %v40_v12, 7  ;;  %v67_v30 = vunpack.c.0.s8 %v66_v20 }
   0x4   :  { %v16_v6 = vadd.f32 %v123_v3, %v122_v2  ;;  %v23_v7 = vadd.f32 %v127_v5, %v126_v4 }
   0x5   :  { %v42_v29 = vsub.s32 %v39_v23, %v41_v24  ;;  %v70_v35 = vsub.s32 %v67_v30, %v41_v24 }
   0x6   :  { %v17_v8 = vrot.slane %v16_v6, 4  ;;  %v24_v9 = vrot.slane %v23_v7, 4 }
   0x8   :  { %v18_v10 = vadd.f32 %v17_v8, %v16_v6  ;;  %v25_v11 = vadd.f32 %v24_v9, %v23_v7 }
   0xa   :  { %v19_v13 = vrot.slane %v18_v10, 2  ;;  %v26_v14 = vrot.slane %v25_v11, 2 }
   0xc   :  { %v20_v17 = vadd.f32 %v19_v13, %v18_v10  ;;  %v27_v18 = vadd.f32 %v26_v14, %v25_v11 }
   0xe   :  { %v21_v21 = vrot.slane %v20_v17, 1  ;;  %v28_v22 = vrot.slane %v27_v18, 1 }
  0x10   :  { %v22_v25 = vadd.f32 %v21_v21, %v20_v17  ;;  %v29_v26 = vadd.f32 %v28_v22, %v27_v18 }
  0x12   :  { %v31_v27 = vmul.f32 0.0625, %v22_v25  ;;  %v32_v28 = vmul.f32 0.0625, %v29_v26 }
  0x14   :  { %v33_v31 = vpack.c.bf16 %v31_v27, %v31_v27  ;;  %v34_v32 = vpack.c.bf16 %v32_v28, %v32_v28 }
  0x16   :  { %v43_v33 = vrot.slane %v33_v31, %v42_v29  ;;  %v57_v34 = vrot.slane %v34_v32, %v42_v29 }
  0x18   :  { %v50_v36 = vrot.slane %v43_v33, %v42_v29  ;;  %v64_v37 = vrot.slane %v57_v34, %v42_v29 }
  0x1a   :  { %v71_v38 = vrot.slane %v50_v36, %v70_v35  ;;  %v85_v39 = vrot.slane %v64_v37, %v70_v35 }
  0x1c   :  { %v78_v40 = vrot.slane %v71_v38, %v70_v35  ;;  %v92_v41 = vrot.slane %v85_v39, %v70_v35 }
  0x1e   :  { %v93_v42 = vunpack.c.l.b16 %v78_v40  ;;  %v94_v43 = vunpack.c.l.b16 %v92_v41 }
  0x20   :  { %v95_v44 = vrot.slane %v94_v43, 7 }
  0x22   :  { %v97_v45 = vsel %vm96_vm0, %v95_v44, %v93_v42 }
  0x23   :  { %v98_v46 = vpack.c.b16 %v97_v45, %v97_v45 }
  0x25   :  { %v105_v47 = vrot.slane %v98_v46, %v42_v29 }
  0x27   :  { %119 = vst.sshfl [vmem:[%s153_s1] sm:$0x1 pattern:$0x73625140] %v105_v47 }

// kernel: _lambda_.25
= control target key start
LH: loop header
LB: loop body
LE: loop exit
PB: predicated region body
PF: predicated region fallthrough
CT: control target
= control target key end

     0   :  { %s2389_s12 = smov 0   ;;  %s2391_s13 = smov 0   ;;  %s2685_s0 = inlined_call_operand.vmem [shape: bf16[2,38,128], index: 0, kind: input, shape index: {}]   ;;  %s2686_s1 = inlined_call_operand.vmem [shape: bf16[9,128,128], index: 1, kind: input, shape index: {}]   ;;  %s2687_s2 = inlined_call_operand.vmem [shape: f32[1,128], index: 2, kind: input, shape index: {}]   ;;  %s2688_s3 = inlined_call_operand.vmem [shape: bf16[2,24,128], index: 3, kind: output, shape index: {}]  }
   0x1   :  { %s2393_s14 = smov 0  }
   0x2 LB: > { %s32_s15 = sadd.s32 1, %s2363_s13  ;;  %p1724_p0 = scmp.ge.s32.totalorder %s2367_s14, 1  ;;  %s2367_s14 = sphi %s2393_s14, %s13_s14   ;;  %s2363_s13 = sphi %s2391_s13, %s2690_s13   ;;  %s2359_s12 = sphi %s2389_s12, %s2689_s12  }
   0x3   : > { %p34_p1 = scmp.ge.s32.totalorder %s32_s15, 2  ;;  %p187_p2 = scmp.lt.s32.totalorder %s2367_s14, 3 }
   0x5   : > { %s2692_s15 = smov (%p34_p1, %s32_s15), 0  ;;  %p188_p3 = pnand %p1724_p0, %p187_p2 }
   0x6   : > { %p228_p4 = scmp.lt.s32.totalorder (!%p188_p3), %s2359_s12, 1 }
   0x7   : > { %191 = sbr.rel (%p188_p3) target bundleno = 381 (0x17d), region = 32 }
   0xc   : > { %v2255_v0 = vld [vmem:[%s2686_s1 + $0x38] sm:$0xff]   ;;  %v2257_v2 = vld [vmem:[%s2686_s1 + $0x30] sm:$0xff]   ;;  %v2259_v4 = vld [vmem:[%s2686_s1 + $0x28] sm:$0xff]   ;;  %s2694_s12 = smov (!%p228_p4, %s2359_s12), 1  ;;  %vm432_vm0 = vsmask.f32 7424 }
   0xd   : > { %v2256_v1 = vld [vmem:[%s2686_s1 + $0x78] sm:$0xff]   ;;  %2049 = vmatprep.subr.bf16.mxu0 %v2255_v0  ;;  %v2258_v3 = vld [vmem:[%s2686_s1 + $0x70] sm:$0xff]   ;;  %v2260_v5 = vld [vmem:[%s2686_s1 + $0x68] sm:$0xff]   ;;  %s2229_s5 = smul.u32 20, %s2694_s12  ;;  %vm586_vm1 = vcmask 1046528   ;;  %vm728_vm2 = vcmask 1044480  }
   0xe   : > { %2069 = vmatprep.subr.bf16.mxu1 %v2256_v1  ;;  %2050 = vmatpush3.bf16.msra.mxu0 %v2255_v0  ;;  %v2261_v6 = vld [vmem:[%s2686_s1 + $0x20] sm:$0xff]   ;;  %v2263_v8 = vld [vmem:[%s2686_s1 + $0x18] sm:$0xff]   ;;  %v2265_v10 = vld [vmem:[%s2686_s1 + $0x10] sm:$0xff]   ;;  %vm870_vm3 = vsmask.f32 4352  ;;  %vm1161_vm4 = vcmask 1045504  }
   0xf   : > { %2070 = vmatpush3.bf16.msra.mxu1 %v2256_v1  ;;  %2051 = vmatprep.subr.bf16.mxu0 %v2257_v2  ;;  %v2262_v7 = vld [vmem:[%s2686_s1 + $0x60] sm:$0xff]   ;;  %v2264_v9 = vld [vmem:[%s2686_s1 + $0x58] sm:$0xff]   ;;  %v2266_v11 = vld [vmem:[%s2686_s1 + $0x50] sm:$0xff]   ;;  %s2449_s20 = scalar_lea.vmem %s2685_s0, %s2229_s5  ;;  %vm1303_vm5 = vsmask.f32 5376  ;;  %s2230_s5 = smul.u32 12, %s2694_s12 }
  0x10   : > { %2071 = vmatprep.subr.bf16.mxu1 %v2258_v3  ;;  %v2271_v12 = vld [vmem:[%s2449_s20] sm:$0xff]   ;;  %v2273_v14 = vld [vmem:[%s2449_s20 + $0x8] sm:$0x1f]   ;;  %v2275_v27 = vld [vmem:[%s2686_s1 + $0xb8] sm:$0xff]  }
  0x11   : > { %2065 = vmatprep.mubr.bf16.mxu0 %v2271_v12  ;;  %v2272_v13 = vld [vmem:[%s2449_s20] sm:$0xff]   ;;  %v2267_v15 = vld [vmem:[%s2686_s1 + $0x8] sm:$0xff]   ;;  %v441_v18 = vshll.u32 %v2273_v14, 16  ;;  %v445_v26 = vshrl.u32 %v2273_v14, 16  ;;  %v2276_v28 = vld [vmem:[%s2686_s1 + $0xf8] sm:$0xff]   ;;  %s255_s8 = scalar_lea.vmem %s2688_s3, %s2230_s5 }
  0x12   : > { %2052 = vmatpush3.bf16.msra.mxu0 %v2257_v2  ;;  %v434_v16 = vshrl.u32 %v2272_v13, 16  ;;  %v436_v17 = vshll.u32 %v2272_v13, 16  ;;  %v2268_v19 = vld [vmem:[%s2686_s1 + $0x48] sm:$0xff]   ;;  %v2269_v22 = vld [vmem:[%s2686_s1] sm:$0xff]   ;;  %v2277_v31 = vld [vmem:[%s2686_s1 + $0xb0] sm:$0xff]  }
  0x13   : > { %2072 = vmatpush3.bf16.msra.mxu1 %v2258_v3  ;;  %2053 = vmatprep.subr.bf16.mxu0 %v2259_v4  ;;  %v443_v21 = vrot.slane %v441_v18, 1  ;;  %v2270_v24 = vld [vmem:[%s2686_s1 + $0x40] sm:$0xff]   ;;  %v2274_v29 = vld [vmem:[%s2449_s20 + $0x8] ss:$0 sps:$4 sm:$0xff]   ;;  %v2278_v32 = vld [vmem:[%s2686_s1 + $0xf0] sm:$0xff]  }
  0x14   : > { %2073 = vmatprep.subr.bf16.mxu1 %v2260_v5  ;;  %v438_v20 = vrot.slane %v436_v17, 1  ;;  %v2279_v33 = vld [vmem:[%s2686_s1 + $0xa8] sm:$0xff]   ;;  %v2281_v35 = vld [vmem:[%s2686_s1 + $0xa0] sm:$0xff]   ;;  %v2283_v46 = vld [vmem:[%s2686_s1 + $0x98] sm:$0xff]  }
  0x15   : > { %v447_v30 = vor.u32 %v445_v26, %v443_v21  ;;  %v2280_v34 = vld [vmem:[%s2686_s1 + $0xe8] sm:$0xff]   ;;  %v2291_v36 = vld [vmem:[%s2449_s20] sm:$0xfe]   ;;  %v2284_v47 = vld [vmem:[%s2686_s1 + $0xd8] sm:$0xff]  }
  0x16   : > { %2054 = vmatpush3.bf16.msra.mxu0 %v2259_v4  ;;  %v439_v23 = vor.u32 %v438_v20, %v434_v16  ;;  %v2490_v37 = vld [vmem:[%s2449_s20 + $0x8] sm:$0x1f]   ;;  %v2282_v38 = vld [vmem:[%s2686_s1 + $0xe0] sm:$0xff]   ;;  %v587_v39 = vrot.slane %v2291_v36, 1  ;;  %v2285_v49 = vld [vmem:[%s2686_s1 + $0x90] sm:$0xff]  }
  0x17   : > { %2074 = vmatpush3.bf16.msra.mxu1 %v2260_v5  ;;  %2055 = vmatprep.subr.bf16.mxu0 %v2261_v6  ;;  %v588_v40 = vrot.slane %v2490_v37, 1  ;;  %v2294_v41 = vld [vmem:[%s2449_s20] sm:$0xf8]   ;;  %v2295_v42 = vld [vmem:[%s2449_s20 + $0x8] sm:$0x7f]   ;;  %v2286_v50 = vld [vmem:[%s2686_s1 + $0xd0] sm:$0xff]  }
  0x18   : > { %2075 = vmatprep.subr.bf16.mxu1 %v2262_v7  ;;  %v444_v25 = vsel %vm432_vm0, %v439_v23, %v443_v21  ;;  %v729_v44 = vrot.slane %v2294_v41, 3  ;;  %v730_v45 = vrot.slane %v2295_v42, 3  ;;  %v2287_v51 = vld [vmem:[%s2686_s1 + $0x88] sm:$0xff]   ;;  %v2289_v53 = vld [vmem:[%s2686_s1 + $0x80] sm:$0xff]   ;;  %v2293_v56 = vld [vmem:[%s2686_s1 + $0x138] sm:$0xff]  }
  0x19   : > { %2085 = vmatprep.mubr.bf16.mxu1 %v444_v25  ;;  %v589_v43 = vsel %vm586_vm1, %v587_v39, %v588_v40  ;;  %v2288_v52 = vld [vmem:[%s2686_s1 + $0xc8] sm:$0xff]   ;;  %v2290_v54 = vld [vmem:[%s2686_s1 + $0xc0] sm:$0xff]   ;;  %v2296_v60 = vld [vmem:[%s2686_s1 + $0x178] sm:$0xff]  }
  0x1a   : > { %2056 = vmatpush3.bf16.msra.mxu0 %v2261_v6  ;;  %v731_v48 = vsel %vm728_vm2, %v729_v44, %v730_v45  ;;  %v2311_v55 = vld [vmem:[%s2449_s20] sm:$0xf8]   ;;  %v2312_v57 = vld [vmem:[%s2449_s20 + $0x8] sm:$0xff]   ;;  %v2297_v63 = vld [vmem:[%s2686_s1 + $0x130] sm:$0xff]  }
  0x1b   : > { %2076 = vmatpush3.bf16.msra.mxu1 %v2262_v7  ;;  %2057 = vmatprep.subr.bf16.mxu0 %v2263_v8  ;;  %v872_v58 = vshrl.u32 %v2311_v55, 16  ;;  %v875_v59 = vshll.u32 %v2311_v55, 16  ;;  %v880_v61 = vshrl.u32 %v2312_v57, 16  ;;  %v883_v62 = vshll.u32 %v2312_v57, 16  ;;  %v2298_v5 = vld [vmem:[%s2686_s1 + $0x170] sm:$0xff]   ;;  %v2314_v7 = vld [vmem:[%s2449_s20 + $0x4] sm:$0xff]  }
  0x1c   : > { %2077 = vmatprep.subr.bf16.mxu1 %v2264_v9  ;;  %v2302_v12 = vld [vmem:[%s2686_s1 + $0x160] sm:$0xff]   ;;  %v2303_v13 = vld [vmem:[%s2686_s1 + $0x118] sm:$0xff]   ;;  %v2306_v16 = vld [vmem:[%s2686_s1 + $0x150] sm:$0xff]  }
  0x1d   : > { %v874_v0 = vrot.slane %v872_v58, 3  ;;  %v877_v1 = vrot.slane %v875_v59, 4  ;;  %v882_v2 = vrot.slane %v880_v61, 3  ;;  %v885_v3 = vrot.slane %v883_v62, 4  ;;  %v2304_v14 = vld [vmem:[%s2686_s1 + $0x158] sm:$0xff]   ;;  %v2308_v20 = vld [vmem:[%s2686_s1 + $0x148] sm:$0xff]  }
  0x1e   : > { %2058 = vmatpush3.bf16.msra.mxu0 %v2263_v8  ;;  %v2334_v17 = vld [vmem:[%s2449_s20 + $0x4] sm:$0xfc]   ;;  %v2335_v18 = vld [vmem:[%s2449_s20 + $0xc] sm:$0x7f]   ;;  %v2333_v58 = vld [vmem:[%s2686_s1 + $0x238] sm:$0xff]  }
  0x1f   : > { %2078 = vmatpush3.bf16.msra.mxu1 %v2264_v9  ;;  %2059 = vmatprep.subr.bf16.mxu0 %v2265_v10  ;;  %v878_v4 = vor.u32 %v877_v1, %v874_v0  ;;  %v2537_v6 = vor.u32 %v885_v3, %v882_v2  ;;  %v2299_v9 = vld [vmem:[%s2686_s1 + $0x128] sm:$0xff]   ;;  %v1305_v21 = vshrl.u32 %v2334_v17, 16  ;;  %v2309_v23 = vld [vmem:[%s2686_s1 + $0x100] sm:$0xff]   ;;  %v1313_v25 = vshrl.u32 %v2335_v18, 16  ;;  %v2318_v41 = vld [vmem:[%s2686_s1 + $0x1f0] sm:$0xff]  }
  0x20   : > { %2079 = vmatprep.subr.bf16.mxu1 %v2266_v11  ;;  %v1316_v26 = vshll.u32 %v2335_v18, 16  ;;  %v2315_v37 = vld [vmem:[%s2449_s20 + $0xc] ss:$0 sps:$4 sm:$0xff]   ;;  %v2330_v55 = vld [vmem:[%s2686_s1 + $0x1c0] sm:$0xff]   ;;  %v2336_v61 = vld [vmem:[%s2686_s1 + $0x230] sm:$0xff]  }
  0x21   : > { %v887_v8 = vsel %vm870_vm3, %v878_v4, %v2537_v6  ;;  %v2319_v44 = vld [vmem:[%s2686_s1 + $0x1a8] sm:$0xff]   ;;  %v2338_v0 = vld [vmem:[%s2686_s1 + $0x220] sm:$0xff]   ;;  %v2339_v1 = vld [vmem:[%s2686_s1 + $0x218] sm:$0xff]  }
  0x22   : > { %2060 = vmatpush3.bf16.msra.mxu0 %v2265_v10  ;;  %v2300_v10 = vld [vmem:[%s2686_s1 + $0x168] sm:$0xff]   ;;  %v2340_v2 = vld [vmem:[%s2686_s1 + $0x210] sm:$0xff]   ;;  %v2342_v4 = vld [vmem:[%s2686_s1 + $0x200] sm:$0xff]  }
  0x23   : > { %2080 = vmatpush3.bf16.msra.mxu1 %v2266_v11  ;;  %2061 = vmatprep.subr.bf16.mxu0 %v2267_v15  ;;  %v2301_v11 = vld [vmem:[%s2686_s1 + $0x120] sm:$0xff]   ;;  %v2344_v57 = vld [vmem:[%s2449_s20 + $0xc] sm:$0x7f]  }
  0x24   : > { %2081 = vmatprep.subr.bf16.mxu1 %v2268_v19  ;;  %v2341_v3 = vld [vmem:[%s2686_s1 + $0x208] sm:$0xff]  }
  0x26   : > { %2062 = vmatpush3.bf16.msra.mxu0 %v2267_v15  ;;  %v2305_v15 = vld [vmem:[%s2686_s1 + $0x110] sm:$0xff]  }
  0x27   : > { %2082 = vmatpush3.bf16.msra.mxu1 %v2268_v19  ;;  %2063 = vmatprep.subr.bf16.mxu0 %v2269_v22  ;;  %v2307_v19 = vld [vmem:[%s2686_s1 + $0x108] sm:$0xff]  }
  0x28   : > { %2083 = vmatprep.subr.bf16.mxu1 %v2270_v24 }
  0x2a   : > { %2064 = vmatpush3.bf16.msra.mxu0 %v2269_v22  ;;  %v1308_v22 = vshll.u32 %v2334_v17, 16 }
  0x2b   : > { %2084 = vmatpush3.bf16.msra.mxu1 %v2270_v24  ;;  %2089 = vmatprep.subr.bf16.mxu0 %v2275_v27  ;;  %v2310_v24 = vld [vmem:[%s2686_s1 + $0x140] sm:$0xff]  }
  0x2c   : > { %2109 = vmatprep.subr.bf16.mxu1 %v2276_v28 }
  0x2d   : > { %2066 = vmatmul.mubr.bf16.vlgmr.msra.gmra.mxu0 %v2274_v29  ;;  %v1307_v29 = vrot.slane %v1305_v21, 2 }
  0x2e   : > { %2086 = vmatmul.mubr.bf16.vlgmr.msra.gmra.mxu1 %v447_v30  ;;  %2090 = vmatpush3.bf16.msra.mxu0 %v2275_v27  ;;  %v2331_v27 = vld [vmem:[%s2449_s20 + $0x4] sm:$0xfc]   ;;  %v1310_v30 = vrot.slane %v1308_v22, 3 }
  0x2f   : > { %2110 = vmatpush3.bf16.msra.mxu1 %v2276_v28  ;;  %2091 = vmatprep.subr.bf16.mxu0 %v2277_v31  ;;  %v2581_v28 = vld [vmem:[%s2449_s20 + $0xc] sm:$0x3f]  }
  0x30   : > { %2111 = vmatprep.subr.bf16.mxu1 %v2278_v32  ;;  %2105 = vmatprep.mubr.bf16.mxu0 %v589_v43  ;;  %v1163_v36 = vrot.slane %v2581_v28, 2 }
  0x31   : > { %2125 = vmatprep.mubr.bf16.mxu1 %v731_v48  ;;  %v2323_v48 = vld [vmem:[%s2686_s1 + $0x198] sm:$0xff]  }
  0x32   : > { %2092 = vmatpush3.bf16.msra.mxu0 %v2277_v31  ;;  %v1315_v31 = vrot.slane %v1313_v25, 2 }
  0x33   : > { %2112 = vmatpush3.bf16.msra.mxu1 %v2278_v32  ;;  %2093 = vmatprep.subr.bf16.mxu0 %v2279_v33  ;;  %v1318_v32 = vrot.slane %v1316_v26, 3 }
  0x34   : > { %2113 = vmatprep.subr.bf16.mxu1 %v2280_v34 }
  0x35   : > { %v2591_v39 = vor.u32 %v1318_v32, %v1315_v31 }
  0x36   : > { %2094 = vmatpush3.bf16.msra.mxu0 %v2279_v33  ;;  %v2313_v33 = vld [vmem:[%s2686_s1 + $0x1b8] sm:$0xff]  }
  0x37   : > { %2114 = vmatpush3.bf16.msra.mxu1 %v2280_v34  ;;  %2095 = vmatprep.subr.bf16.mxu0 %v2281_v35  ;;  %v2316_v34 = vld [vmem:[%s2686_s1 + $0x1f8] sm:$0xff]  }
  0x38   : > { %2115 = vmatprep.subr.bf16.mxu1 %v2282_v38 }
  0x3a   : > { %2096 = vmatpush3.bf16.msra.mxu0 %v2281_v35  ;;  %v1162_v35 = vrot.slane %v2331_v27, 2 }
  0x3b   : > { %2116 = vmatpush3.bf16.msra.mxu1 %v2282_v38  ;;  %2097 = vmatprep.subr.bf16.mxu0 %v2283_v46  ;;  %v1311_v38 = vor.u32 %v1310_v30, %v1307_v29 }
  0x3c   : > { %2117 = vmatprep.subr.bf16.mxu1 %v2284_v47  ;;  %v1164_v42 = vsel %vm1161_vm4, %v1162_v35, %v1163_v36 }
  0x3d   : > { %v1320_v43 = vsel %vm1303_vm5, %v1311_v38, %v2591_v39 }
  0x3e   : > { %2098 = vmatpush3.bf16.msra.mxu0 %v2283_v46  ;;  %v2321_v46 = vld [vmem:[%s2686_s1 + $0x1a0] sm:$0xff]  }
  0x3f   : > { %2118 = vmatpush3.bf16.msra.mxu1 %v2284_v47  ;;  %2099 = vmatprep.subr.bf16.mxu0 %v2285_v49  ;;  %v2322_v47 = vld [vmem:[%s2686_s1 + $0x1e0] sm:$0xff]  }
  0x40   : > { %2119 = vmatprep.subr.bf16.mxu1 %v2286_v50 }
  0x42   : > { %2100 = vmatpush3.bf16.msra.mxu0 %v2285_v49  ;;  %v2324_v49 = vld [vmem:[%s2686_s1 + $0x1d8] sm:$0xff]  }
  0x43   : > { %2120 = vmatpush3.bf16.msra.mxu1 %v2286_v50  ;;  %2101 = vmatprep.subr.bf16.mxu0 %v2287_v51  ;;  %v2325_v50 = vld [vmem:[%s2686_s1 + $0x190] sm:$0xff]  }
  0x44   : > { %2121 = vmatprep.subr.bf16.mxu1 %v2288_v52 }
  0x46   : > { %2102 = vmatpush3.bf16.msra.mxu0 %v2287_v51  ;;  %v2326_v51 = vld [vmem:[%s2686_s1 + $0x1d0] sm:$0xff]  }
  0x47   : > { %2122 = vmatpush3.bf16.msra.mxu1 %v2288_v52  ;;  %2103 = vmatprep.subr.bf16.mxu0 %v2289_v53  ;;  %v2327_v52 = vld [vmem:[%s2686_s1 + $0x188] sm:$0xff]  }
  0x48   : > { %2123 = vmatprep.subr.bf16.mxu1 %v2290_v54 }
  0x4a   : > { %2104 = vmatpush3.bf16.msra.mxu0 %v2289_v53  ;;  %v2328_v53 = vld [vmem:[%s2686_s1 + $0x1c8] sm:$0xff]  }
  0x4b   : > { %2124 = vmatpush3.bf16.msra.mxu1 %v2290_v54  ;;  %2129 = vmatprep.subr.bf16.mxu0 %v2293_v56  ;;  %v2329_v54 = vld [vmem:[%s2686_s1 + $0x180] sm:$0xff]  }
  0x4c   : > { %2149 = vmatprep.subr.bf16.mxu1 %v2296_v60 }
  0x4d   : > { %2106 = vmatmul.mubr.bf16.vlgmr.msra.gmra.mxu0 %v588_v40  ;;  %v2317_v40 = vld [vmem:[%s2686_s1 + $0x1b0] sm:$0xff]  }
  0x4e   : > { %2130 = vmatpush3.bf16.msra.mxu0 %v2293_v56  ;;  %2126 = vmatmul.mubr.bf16.vlgmr.msra.gmra.mxu1 %v730_v45  ;;  %v2320_v45 = vld [vmem:[%s2686_s1 + $0x1e8] sm:$0xff]  }
  0x4f   : > { %2150 = vmatpush3.bf16.msra.mxu1 %v2296_v60  ;;  %2131 = vmatprep.subr.bf16.mxu0 %v2297_v63  ;;  %v2343_v56 = vld [vmem:[%s2449_s20 + $0x4] sm:$0xf8]   ;;  %v1460_v60 = vrot.slane %v2344_v57, 3 }
  0x50   : > { %2151 = vmatprep.subr.bf16.mxu1 %v2298_v5  ;;  %2145 = vmatprep.mubr.bf16.mxu0 %v887_v8  ;;  %v1459_v59 = vrot.slane %v2343_v56, 3 }
  0x51   : > { %2165 = vmatprep.mubr.bf16.mxu1 %v2314_v7 }
  0x52   : > { %2132 = vmatpush3.bf16.msra.mxu0 %v2297_v63  ;;  %v1461_v62 = vsel %vm728_vm2, %v1459_v59, %v1460_v60  ;;  %v2337_v63 = vld [vmem:[%s2686_s1 + $0x228] sm:$0xff]  }
  0x53   : > { %2152 = vmatpush3.bf16.msra.mxu1 %v2298_v5  ;;  %2133 = vmatprep.subr.bf16.mxu0 %v2299_v9 }
  0x54   : > { %2153 = vmatprep.subr.bf16.mxu1 %v2300_v10 }
  0x56   : > { %2134 = vmatpush3.bf16.msra.mxu0 %v2299_v9 }
  0x57   : > { %2154 = vmatpush3.bf16.msra.mxu1 %v2300_v10  ;;  %2135 = vmatprep.subr.bf16.mxu0 %v2301_v11 }
  0x58   : > { %2155 = vmatprep.subr.bf16.mxu1 %v2302_v12 }
  0x5a   : > { %2136 = vmatpush3.bf16.msra.mxu0 %v2301_v11 }
  0x5b   : > { %2156 = vmatpush3.bf16.msra.mxu1 %v2302_v12  ;;  %2137 = vmatprep.subr.bf16.mxu0 %v2303_v13 }
  0x5c   : > { %2157 = vmatprep.subr.bf16.mxu1 %v2304_v14 }
  0x5e   : > { %2138 = vmatpush3.bf16.msra.mxu0 %v2303_v13 }
  0x5f   : > { %2158 = vmatpush3.bf16.msra.mxu1 %v2304_v14  ;;  %2139 = vmatprep.subr.bf16.mxu0 %v2305_v15 }
  0x60   : > { %2159 = vmatprep.subr.bf16.mxu1 %v2306_v16 }
  0x62   : > { %2140 = vmatpush3.bf16.msra.mxu0 %v2305_v15 }
  0x63   : > { %2160 = vmatpush3.bf16.msra.mxu1 %v2306_v16  ;;  %2141 = vmatprep.subr.bf16.mxu0 %v2307_v19 }
  0x64   : > { %2161 = vmatprep.subr.bf16.mxu1 %v2308_v20 }
  0x66   : > { %2142 = vmatpush3.bf16.msra.mxu0 %v2307_v19 }
  0x67   : > { %2162 = vmatpush3.bf16.msra.mxu1 %v2308_v20  ;;  %2143 = vmatprep.subr.bf16.mxu0 %v2309_v23 }
  0x68   : > { %2163 = vmatprep.subr.bf16.mxu1 %v2310_v24 }
  0x6a   : > { %2144 = vmatpush3.bf16.msra.mxu0 %v2309_v23 }
  0x6b   : > { %2164 = vmatpush3.bf16.msra.mxu1 %v2310_v24  ;;  %2169 = vmatprep.subr.bf16.mxu0 %v2313_v33 }
  0x6c   : > { %2189 = vmatprep.subr.bf16.mxu1 %v2316_v34 }
  0x6d   : > { %2146 = vmatmul.mubr.bf16.vlgmr.msra.gmra.mxu0 %v2537_v6 }
  0x6e   : > { %2170 = vmatpush3.bf16.msra.mxu0 %v2313_v33  ;;  %2166 = vmatmul.mubr.bf16.vlgmr.msra.gmra.mxu1 %v2315_v37 }
  0x6f   : > { %2190 = vmatpush3.bf16.msra.mxu1 %v2316_v34  ;;  %2171 = vmatprep.subr.bf16.mxu0 %v2317_v40 }
  0x70   : > { %2191 = vmatprep.subr.bf16.mxu1 %v2318_v41  ;;  %2185 = vmatprep.mubr.bf16.mxu0 %v1164_v42 }
  0x71   : > { %2205 = vmatprep.mubr.bf16.mxu1 %v1320_v43 }
  0x72   : > { %2172 = vmatpush3.bf16.msra.mxu0 %v2317_v40 }
  0x73   : > { %2192 = vmatpush3.bf16.msra.mxu1 %v2318_v41  ;;  %2173 = vmatprep.subr.bf16.mxu0 %v2319_v44 }
  0x74   : > { %2193 = vmatprep.subr.bf16.mxu1 %v2320_v45 }
  0x76   : > { %2174 = vmatpush3.bf16.msra.mxu0 %v2319_v44 }
  0x77   : > { %2194 = vmatpush3.bf16.msra.mxu1 %v2320_v45  ;;  %2175 = vmatprep.subr.bf16.mxu0 %v2321_v46 }
  0x78   : > { %2195 = vmatprep.subr.bf16.mxu1 %v2322_v47 }
  0x7a   : > { %2176 = vmatpush3.bf16.msra.mxu0 %v2321_v46 }
  0x7b   : > { %2196 = vmatpush3.bf16.msra.mxu1 %v2322_v47  ;;  %2177 = vmatprep.subr.bf16.mxu0 %v2323_v48 }
  0x7c   : > { %2197 = vmatprep.subr.bf16.mxu1 %v2324_v49 }
  0x7e   : > { %2178 = vmatpush3.bf16.msra.mxu0 %v2323_v48 }
  0x7f   : > { %2198 = vmatpush3.bf16.msra.mxu1 %v2324_v49  ;;  %2179 = vmatprep.subr.bf16.mxu0 %v2325_v50 }
  0x80   : > { %2199 = vmatprep.subr.bf16.mxu1 %v2326_v51 }
  0x82   : > { %2180 = vmatpush3.bf16.msra.mxu0 %v2325_v50 }
  0x83   : > { %2200 = vmatpush3.bf16.msra.mxu1 %v2326_v51  ;;  %2181 = vmatprep.subr.bf16.mxu0 %v2327_v52 }
  0x84   : > { %2201 = vmatprep.subr.bf16.mxu1 %v2328_v53 }
  0x86   : > { %2182 = vmatpush3.bf16.msra.mxu0 %v2327_v52 }
  0x87   : > { %2202 = vmatpush3.bf16.msra.mxu1 %v2328_v53  ;;  %2183 = vmatprep.subr.bf16.mxu0 %v2329_v54 }
  0x88   : > { %2203 = vmatprep.subr.bf16.mxu1 %v2330_v55 }
  0x8a   : > { %2184 = vmatpush3.bf16.msra.mxu0 %v2329_v54 }
  0x8b   : > { %2204 = vmatpush3.bf16.msra.mxu1 %v2330_v55  ;;  %2209 = vmatprep.subr.bf16.mxu0 %v2333_v58  ;;  %v1945_v55 = vld [vmem:[%s2687_s2] ss:$0 sm:$0xff] }
  0x8d   : > { %2186 = vmatmul.mubr.bf16.vlgmr.msra.gmra.mxu0 %v1163_v36 }
  0x8e   : > { %2210 = vmatpush3.bf16.msra.mxu0 %v2333_v58  ;;  %2206 = vmatmul.mubr.bf16.vlgmr.msra.gmra.mxu1 %v2591_v39 }
  0x8f   : > { %2211 = vmatprep.subr.bf16.mxu0 %v2336_v61  ;;  %2225 = vmatprep.mubr.bf16.mxu0 %v1461_v62 }
  0x92   : > { %2212 = vmatpush3.bf16.msra.mxu0 %v2336_v61 }
  0x93   : > { %2213 = vmatprep.subr.bf16.mxu0 %v2337_v63 }
  0x96   : > { %2214 = vmatpush3.bf16.msra.mxu0 %v2337_v63 }
  0x97   : > { %2215 = vmatprep.subr.bf16.mxu0 %v2338_v0 }
  0x9a   : > { %2216 = vmatpush3.bf16.msra.mxu0 %v2338_v0 }
  0x9b   : > { %2217 = vmatprep.subr.bf16.mxu0 %v2339_v1 }
  0x9e   : > { %2218 = vmatpush3.bf16.msra.mxu0 %v2339_v1 }
  0x9f   : > { %2219 = vmatprep.subr.bf16.mxu0 %v2340_v2 }
  0xa2   : > { %2220 = vmatpush3.bf16.msra.mxu0 %v2340_v2 }
  0xa3   : > { %2221 = vmatprep.subr.bf16.mxu0 %v2341_v3 }
  0xa6   : > { %2222 = vmatpush3.bf16.msra.mxu0 %v2341_v3 }
  0xa7   : > { %2223 = vmatprep.subr.bf16.mxu0 %v2342_v4 }
  0xaa   : > { %2224 = vmatpush3.bf16.msra.mxu0 %v2342_v4 }
  0xad   : > { %2226 = vmatmul.mubr.bf16.vlgmr.msra.gmra.mxu0 %v1460_v60 }
  0xed   : > { %v2067_v5 = vpop.f32.mrf.mxu0 }
  0xee   : > { %v2087_v6 = vpop.f32.mrf.mxu1 }
  0xef   : > { %v548_v7 = vadd.f32 %v2087_v6, %v2067_v5  ;;  %v378_v8 = vpop.f32.mrf.mxu0 }
  0xf0   : > { %v532_v9 = vpop.f32.mrf.mxu1 }
  0xf1   : > { %v546_v10 = vadd.f32 %v532_v9, %v378_v8  ;;  %v2068_v11 = vpop.f32.mrf.mxu0 }
  0xf2   : > { %v2088_v12 = vpop.f32.mrf.mxu1 }
  0xf3   : > { %v381_v13 = vpop.f32.mrf.mxu0 }
  0xf4   : > { %v535_v14 = vpop.f32.mrf.mxu1 }
  0xf5   : > { %v547_v15 = vadd.f32 %v535_v14, %v381_v13 }
 0x10d   : > { %v2107_v16 = vpop.f32.mrf.mxu0 }
 0x10e   : > { %v690_v17 = vadd.f32 %v2107_v16, %v548_v7  ;;  %v2127_v18 = vpop.f32.mrf.mxu1 }
 0x10f   : > { %v674_v19 = vpop.f32.mrf.mxu0 }
 0x110   : > { %v688_v20 = vadd.f32 %v674_v19, %v546_v10  ;;  %v832_v21 = vadd.f32 %v2127_v18, %v690_v17  ;;  %v816_v22 = vpop.f32.mrf.mxu1 }
 0x111   : > { %v2108_v23 = vpop.f32.mrf.mxu0 }
 0x112   : > { %v830_v24 = vadd.f32 %v816_v22, %v688_v20  ;;  %v2128_v25 = vpop.f32.mrf.mxu1 }
 0x113   : > { %v677_v26 = vpop.f32.mrf.mxu0 }
 0x114   : > { %v819_v27 = vpop.f32.mrf.mxu1  ;;  %v689_v42 = vadd.f32 %v677_v26, %v547_v15 }
 0x116   : > { %v831_v45 = vadd.f32 %v819_v27, %v689_v42 }
 0x12d   : > { %v2147_v28 = vpop.f32.mrf.mxu0 }
 0x12e   : > { %v2167_v29 = vpop.f32.mrf.mxu1  ;;  %v988_v43 = vadd.f32 %v2147_v28, %v832_v21 }
 0x12f   : > { %v972_v30 = vpop.f32.mrf.mxu0 }
 0x130   : > { %v1107_v31 = vpop.f32.mrf.mxu1  ;;  %v986_v44 = vadd.f32 %v972_v30, %v830_v24  ;;  %v1123_v46 = vadd.f32 %v2167_v29, %v988_v43 }
 0x131   : > { %v2148_v32 = vpop.f32.mrf.mxu0 }
 0x132   : > { %v2168_v33 = vpop.f32.mrf.mxu1  ;;  %v1121_v47 = vadd.f32 %v1107_v31, %v986_v44 }
 0x133   : > { %v975_v34 = vpop.f32.mrf.mxu0 }
 0x134   : > { %v1110_v35 = vpop.f32.mrf.mxu1  ;;  %v987_v48 = vadd.f32 %v975_v34, %v831_v45 }
 0x136   : > { %v1122_v52 = vadd.f32 %v1110_v35, %v987_v48 }
 0x14d   : > { %v2187_v36 = vpop.f32.mrf.mxu0 }
 0x14e   : > { %v2207_v37 = vpop.f32.mrf.mxu1  ;;  %v1265_v49 = vadd.f32 %v2187_v36, %v1123_v46 }
 0x14f   : > { %v1249_v38 = vpop.f32.mrf.mxu0 }
 0x150   : > { %v1405_v39 = vpop.f32.mrf.mxu1  ;;  %v1263_v50 = vadd.f32 %v1249_v38, %v1121_v47  ;;  %v1421_v53 = vadd.f32 %v2207_v37, %v1265_v49 }
 0x151   : > { %v2188_v40 = vpop.f32.mrf.mxu0 }
 0x152   : > { %v2208_v41 = vpop.f32.mrf.mxu1  ;;  %v1419_v56 = vadd.f32 %v1405_v39, %v1263_v50 }
 0x153   : > { %v1252_v51 = vpop.f32.mrf.mxu0 }
 0x154   : > { %v1264_v57 = vadd.f32 %v1252_v51, %v1122_v52  ;;  %v1408_v59 = vpop.f32.mrf.mxu1 }
 0x156   : > { %v1420_v0 = vadd.f32 %v1408_v59, %v1264_v57 }
 0x16d   : > { %v2227_v54 = vpop.f32.mrf.mxu0 }
 0x16e   : > { %v1562_v58 = vadd.f32 %v2227_v54, %v1421_v53 }
 0x16f   : > { %v1546_v60 = vpop.f32.mrf.mxu0 }
 0x170   : > { %v1581_v61 = vadd.f32 %v1945_v55, %v1562_v58  ;;  %v1560_v62 = vadd.f32 %v1546_v60, %v1419_v56 }
 0x171   : > { %v2228_v63 = vpop.f32.mrf.mxu0 }
 0x172   : > { %v1584_v1 = vmax.f32 %v1581_v61, 0.0  ;;  %v1579_v4 = vadd.f32 %v1945_v55, %v1560_v62 }
 0x173   : > { %v1549_v2 = vpop.f32.mrf.mxu0 }
 0x174   : > { %v1953_v3 = vpack.c.bf16 %v1584_v1, %v1584_v1  ;;  %v1561_v5 = vadd.f32 %v1549_v2, %v1420_v0  ;;  %v1582_v7 = vmax.f32 %v1579_v4, 0.0 }
 0x176   : > { %1600 = vst [vmem:[%s255_s8 + $0x8] sm:$0xf] %v1953_v3  ;;  %v1580_v6 = vadd.f32 %v1945_v55, %v1561_v5 }
 0x178   : > { %v1583_v8 = vmax.f32 %v1580_v6, 0.0 }
 0x17a   : > { %v1957_v9 = vpack.c.bf16 %v1583_v8, %v1582_v7 }
 0x17c   : > { %1958 = vst [vmem:[%s255_s8] sm:$0xff] %v1957_v9  }
 0x17d PF: > { %s13_s14 = sadd.s32 1, %s2367_s14   ;;  %s2689_s12 = smov %s2363_s13 }
 0x17e   : > { %p10_p5 = scmp.ge.s32.totalorder %s13_s14, 4   ;;  %s2690_s13 = smov %s2692_s15 }
 0x180   :  { %12 = sbr.rel (!%p10_p5) target bundleno = 2 (0x2), region = 84 }

// kernel: _lambda_.29
= control target key start
LH: loop header
LB: loop body
LE: loop exit
PB: predicated region body
PF: predicated region fallthrough
CT: control target
= control target key end

     0   :  { %v210_v0 = vmov 0.0   ;;  %vm211_vm0 = vmmov 0   ;;  %s268_s1 = inlined_call_operand.vmem [shape: bf16[128,128], index: 1, kind: input, shape index: {}]   ;;  %s269_s0 = inlined_call_operand.vmem [shape: bf16[16,128], index: 0, kind: input, shape index: {}]   ;;  %s270_s2 = inlined_call_operand.vmem [shape: f32[1,128], index: 2, kind: input, shape index: {}]   ;;  %s271_s3 = inlined_call_operand.vmem [shape: f32[16,128], index: 3, kind: output, shape index: {}]  }
   0x1   :  { %179 = vmatprep.subr.bf16.mxu0 %v210_v0  ;;  %v201_v1 = vld [vmem:[%s268_s1 + $0x38] sm:$0xff]   ;;  %195 = vmatprep.mubr.msk.bf16.mxu0 %vm211_vm0, %v210_v0  ;;  %v202_v2 = vld [vmem:[%s268_s1 + $0x30] sm:$0xff]   ;;  %v203_v3 = vld [vmem:[%s268_s1 + $0x28] sm:$0xff]  }
   0x2   :  { %180 = vmatpush3.bf16.msra.mxu0 %v201_v1  ;;  %v204_v4 = vld [vmem:[%s268_s1 + $0x20] sm:$0xff]   ;;  %v205_v5 = vld [vmem:[%s268_s1 + $0x18] sm:$0xff]   ;;  %v206_v6 = vld [vmem:[%s268_s1 + $0x10] sm:$0xff]  }
   0x3   :  { %181 = vmatprep.subr.bf16.mxu0 %v210_v0  ;;  %v207_v7 = vld [vmem:[%s268_s1 + $0x8] sm:$0xff]   ;;  %v208_v8 = vld [vmem:[%s268_s1] sm:$0xff]  }
   0x4   :  { %v209_v9 = vld [vmem:[%s269_s0] sm:$0xff]  }
   0x5   :  { %v169_v10 = vld [vmem:[%s270_s2] ss:$0 sm:$0xff] }
   0x6   :  { %182 = vmatpush3.bf16.msra.mxu0 %v202_v2 }
   0x7   :  { %183 = vmatprep.subr.bf16.mxu0 %v210_v0 }
   0xa   :  { %184 = vmatpush3.bf16.msra.mxu0 %v203_v3 }
   0xb   :  { %185 = vmatprep.subr.bf16.mxu0 %v210_v0 }
   0xe   :  { %186 = vmatpush3.bf16.msra.mxu0 %v204_v4 }
   0xf   :  { %187 = vmatprep.subr.bf16.mxu0 %v210_v0 }
  0x12   :  { %188 = vmatpush3.bf16.msra.mxu0 %v205_v5 }
  0x13   :  { %189 = vmatprep.subr.bf16.mxu0 %v210_v0 }
  0x16   :  { %190 = vmatpush3.bf16.msra.mxu0 %v206_v6 }
  0x17   :  { %191 = vmatprep.subr.bf16.mxu0 %v210_v0 }
  0x1a   :  { %192 = vmatpush3.bf16.msra.mxu0 %v207_v7 }
  0x1b   :  { %193 = vmatprep.subr.bf16.mxu0 %v210_v0 }
  0x1e   :  { %194 = vmatpush3.bf16.msra.mxu0 %v208_v8 }
  0x21   :  { %196 = vmatmul.mubr.bf16.vlgmr.msra.gmra.mxu0 %v209_v9 }
  0xe1   :  { %v129_v11 = vpop.f32.mrf.mxu0 }
  0xe2   :  { %v152_v12 = vadd.f32 %v169_v10, %v129_v11 }
  0xe3   :  { %v197_v13 = vpop.f32.mrf.mxu0 }
  0xe4   :  { %154 = vst [vmem:[%s271_s3] sm:$0xff] %v152_v12 }
  0xe5   :  { %v132_v14 = vpop.f32.mrf.mxu0 }
  0xe6   :  { %v153_v15 = vadd.f32 %v169_v10, %v132_v14 }
  0xe7   :  { %v198_v16 = vpop.f32.mrf.mxu0 }
  0xe8   :  { %155 = vst [vmem:[%s271_s3 + $0x8] sm:$0xff] %v153_v15 }

</bundles_post_ra>
